<compile_context>
chip_gen: v7x
topology: tpu7x:2x2x1
jax: 0.10.0
libtpu: 0.0.40
codegen_flags: <defaults>
</compile_context>

<pallas_src>
import math
from functools import partial

import jax
import jax.numpy as jnp
import numpy as np
from jax.experimental import pallas as pl
from jax.experimental.pallas import tpu as pltpu


def _project(w, b, z, mm_dtype, precision):
    """(Co, Ci) @ (Ci, N) + (Co, 1) -> (Co, N), f32 accumulation."""
    co, ci = w.shape
    if ci <= 8:
        # Tiny contraction dim: an MXU dot would be <4% occupied; use a VPU
        # broadcast-multiply-accumulate over the few input channels (f32 —
        # v5e's VPU has no bf16).
        acc = w[:, 0:1] * z[0:1, :]
        for c in range(1, ci):                      # static, <= 8 iterations
            acc = acc + w[:, c:c + 1] * z[c:c + 1, :]
        return acc + b
    return jnp.dot(w.astype(mm_dtype), z.astype(mm_dtype),
                   preferred_element_type=jnp.float32,
                   precision=precision) + b


def _attn_kernel(x_ref, ln_w_ref, ln_b_ref, w_in_ref, b_in_ref,
                 w_out_ref, b_out_ref, o_ref, kt_ref, v_ref, att_ref, *,
                 n_heads, q_tile, cache_kv, mm_dtype, eps):
    C = x_ref.shape[1]
    S = x_ref.shape[2]
    hd = C // n_heads
    qi = pl.program_id(1)
    precision = (jax.lax.Precision.HIGHEST if mm_dtype == jnp.float32
                 else jax.lax.Precision.DEFAULT)

    ln_w = ln_w_ref[...]                # (C, 1)
    ln_b = ln_b_ref[...]                # (C, 1)
    w_in = w_in_ref[...]                # (3C, C) packed q/k/v proj (q pre-scaled)
    b_in = b_in_ref[...]                # (3C, 1)

    def layernorm(z):                   # normalize over channels (sublane axis)
        mean = jnp.mean(z, axis=0, keepdims=True)
        var = jnp.mean(jnp.square(z - mean), axis=0, keepdims=True)
        return (z - mean) * jax.lax.rsqrt(var + eps) * ln_w + ln_b

    def compute_kv():
        x_kv = x_ref[0]                                   # (C, S) full sequence
        xn_kv = layernorm(x_kv)
        k = _project(w_in[C:2 * C], b_in[C:2 * C], xn_kv, mm_dtype, precision)
        v = _project(w_in[2 * C:3 * C], b_in[2 * C:3 * C], xn_kv, mm_dtype,
                     precision)
        # Transpose k once per image (hoisted out of the per-head loop).
        kt_ref[...] = k.T.astype(kt_ref.dtype)            # (S, C)
        v_ref[...] = v.astype(v_ref.dtype)                # (C, S)

    if cache_kv:
        @pl.when(qi == 0)               # K/V cached across query tiles
        def _():
            compute_kv()
    else:
        compute_kv()

    # Query tile (also the residual) sliced from the resident full block.
    if q_tile == S:
        x_q = x_ref[0]                                    # (C, S)
    else:
        start = pl.multiple_of(qi * q_tile, 128)
        x_q = x_ref[0, :, pl.ds(start, q_tile)]           # (C, TQ)

    xn_q = layernorm(x_q)
    # 1/sqrt(head_dim) already folded into w_in[0:C] / b_in[0:C] on the host.
    q = _project(w_in[0:C], b_in[0:C], xn_q, mm_dtype, precision)    # (C, TQ)

    # Per-head results go straight into att_ref so the megabyte-scale score
    # planes do not stay live across heads (no concat / relayout either).
    for h in range(n_heads):            # static, tiny head count
        rs = slice(h * hd, (h + 1) * hd)
        q_h = q[rs, :]                  # (hd, TQ)
        kt_h = kt_ref[:, rs]            # (S, hd) slice of cached k^T

        if hd <= 8:
            # Tiny head_dim: VPU outer-product accumulation beats a K=hd MXU dot.
            s_t = kt_h[:, 0:1] * q_h[0:1, :]
            for d in range(1, hd):
                s_t = s_t + kt_h[:, d:d + 1] * q_h[d:d + 1, :]
        else:
            s_t = jnp.dot(kt_h.astype(mm_dtype), q_h.astype(mm_dtype),
                          preferred_element_type=jnp.float32,
                          precision=precision)            # (S, TQ)

        # Stable softmax over keys (the sublane axis of s_t).
        s_t = s_t - jnp.max(s_t, axis=0, keepdims=True)
        p_t = jnp.exp(s_t)
        denom = jnp.sum(p_t, axis=0, keepdims=True)
        if mm_dtype == jnp.float32:
            p_t = p_t / denom                              # exact for f32 parity
        else:
            p_t = p_t * pl.reciprocal(denom, approx=True)  # EUP approx recip

        # att[d, i] = sum_j v[d, j] * p^T[j, i]: well-shaped MXU dot (K = S).
        att_ref[rs, :] = jnp.dot(v_ref[rs, :].astype(mm_dtype),
                                 p_t.astype(mm_dtype),
                                 preferred_element_type=jnp.float32,
                                 precision=precision)

    out = _project(w_out_ref[...], b_out_ref[...], att_ref[...], mm_dtype,
                   precision)                              # (C, TQ)
    o_ref[0] = (out + x_q).astype(o_ref.dtype)             # residual add


def _pick_q_tile(S, B):
    """Largest lane-dense query tile; split when B == 1 (v7x has 2 TCs)."""
    q = S
    if B == 1 and S % 256 == 0:
        q = S // 2                      # guarantee >= 2 grid steps for 1 image
    # Bound the per-step (S, q_tile) f32 score plane to ~8 MiB.
    while q % 256 == 0 and S * q * 4 > 8 * 2 ** 20:
        q //= 2
    return q


def image_self_attention(x_nchw, params, n_heads, *,
                         matmul_dtype=jnp.bfloat16, q_tile=None, eps=1e-5):
    """Pallas forward of ImageSelfAttention. x_nchw: (B, C, H, W) float32."""
    B, C, H, W = x_nchw.shape
    assert C % n_heads == 0
    hd = C // n_heads
    S = H * W
    # Channel-major (B, C, S): no HBM transpose on either side of the call.
    x_bcs = x_nchw.reshape(B, C, S)

    if q_tile is None:
        q_tile = _pick_q_tile(S, B)
    assert S % q_tile == 0 and (q_tile == S or q_tile % 128 == 0)
    n_q = S // q_tile

    # Cache K/V across query tiles (qi sequential) unless B == 1, where the qi
    # axis stays "parallel" (K/V recomputed per tile) so both v7x cores work.
    cache_kv = (n_q > 1) and (B > 1)
    qi_semantics = "arbitrary" if cache_kv else "parallel"

    # Fold the 1/sqrt(head_dim) query scale into the packed in-projection
    # weights/bias (one-time host transform of constant weights).
    scale = 1.0 / math.sqrt(hd)
    w_in = params['in_proj_w']
    b_in = params['in_proj_b']
    w_in = jnp.concatenate([w_in[:C] * scale, w_in[C:]], axis=0)          # (3C, C)
    b_in = jnp.concatenate([b_in[:C] * scale, b_in[C:]], axis=0).reshape(3 * C, 1)
    ln_w = params['ln_w'].reshape(C, 1)
    ln_b = params['ln_b'].reshape(C, 1)
    w_out = params['out_proj_w']                                           # (C, C)
    b_out = params['out_proj_b'].reshape(C, 1)

    kernel = partial(_attn_kernel, n_heads=n_heads, q_tile=q_tile,
                     cache_kv=cache_kv, mm_dtype=matmul_dtype, eps=eps)

    mm_bytes = jnp.dtype(matmul_dtype).itemsize
    # Per-step VMEM estimate (bytes): double-buffered x / out blocks, resident
    # weights, cached k^T / v, head accumulator, live xn/q temporaries, and the
    # score + prob planes (one head live at a time).
    est = 4 * (2 * C * S + 2 * C * q_tile
               + 2 * (4 * C * C + 8 * C)
               + C * q_tile
               + 4 * C * max(S, q_tile)
               + 3 * S * q_tile) + mm_bytes * 2 * C * S
    # Cap at 48 MiB: leaves headroom on v7x's 64 MiB VMEM (v5e/v6e could go
    # higher, but these image-sized tiles never need it).
    vmem_limit = int(min(48 * 2 ** 20, max(32 * 2 ** 20, 2 * est)))

    out_bcs = pl.pallas_call(
        kernel,
        out_shape=jax.ShapeDtypeStruct((B, C, S), x_bcs.dtype),
        grid_spec=pltpu.PrefetchScalarGridSpec(
            num_scalar_prefetch=0,
            grid=(B, n_q),
            in_specs=[
                pl.BlockSpec((1, C, S), lambda b, qi: (b, 0, 0)),    # full seq (Q/K/V)
                pl.BlockSpec((C, 1), lambda b, qi: (0, 0)),          # ln weight
                pl.BlockSpec((C, 1), lambda b, qi: (0, 0)),          # ln bias
                pl.BlockSpec((3 * C, C), lambda b, qi: (0, 0)),      # in_proj_w (q pre-scaled)
                pl.BlockSpec((3 * C, 1), lambda b, qi: (0, 0)),      # in_proj_b
                pl.BlockSpec((C, C), lambda b, qi: (0, 0)),          # out_proj_w
                pl.BlockSpec((C, 1), lambda b, qi: (0, 0)),          # out_proj_b
            ],
            out_specs=pl.BlockSpec((1, C, q_tile), lambda b, qi: (b, 0, qi)),
            scratch_shapes=[
                pltpu.VMEM((S, C), matmul_dtype),       # cached k^T (per image)
                pltpu.VMEM((C, S), matmul_dtype),       # cached v   (per image)
                pltpu.VMEM((C, q_tile), jnp.float32),   # per-tile head accumulator
            ],
        ),
        compiler_params=pltpu.CompilerParams(
            dimension_semantics=("parallel", qi_semantics),
            vmem_limit_bytes=vmem_limit),
    )(x_bcs, ln_w, ln_b, w_in, b_in, w_out, b_out)

    # TODO(synk): for S >= ~4096 switch the full (C, S)-resident design to a
    # flash-style key-tile loop (online softmax) to bound VMEM on v7x.
    return out_bcs.reshape(B, C, H, W)


def reference_forward(x_nchw, params, n_heads, eps=1e-5):
    """Pure-JAX reference mirroring the PyTorch module's math (f32 matmuls)."""
    prec = jax.lax.Precision.HIGHEST
    B, C, H, W = x_nchw.shape
    S = H * W
    x = jnp.transpose(x_nchw.reshape(B, C, S), (0, 2, 1))        # (B, S, C)
    mean = jnp.mean(x, -1, keepdims=True)
    var = jnp.mean((x - mean) ** 2, -1, keepdims=True)
    xn = (x - mean) / jnp.sqrt(var + eps) * params['ln_w'] + params['ln_b']
    qkv = jnp.einsum('bsc,dc->bsd', xn, params['in_proj_w'],
                     precision=prec) + params['in_proj_b']
    q, k, v = jnp.split(qkv, 3, axis=-1)
    hd = C // n_heads
    qh = q.reshape(B, S, n_heads, hd).transpose(0, 2, 1, 3)
    kh = k.reshape(B, S, n_heads, hd).transpose(0, 2, 1, 3)
    vh = v.reshape(B, S, n_heads, hd).transpose(0, 2, 1, 3)
    scores = jnp.einsum('bhqd,bhkd->bhqk', qh / math.sqrt(hd), kh,
                        precision=prec)
    p = jax.nn.softmax(scores, axis=-1)
    o = jnp.einsum('bhqk,bhkd->bhqd', p, vh, precision=prec)
    o = o.transpose(0, 2, 1, 3).reshape(B, S, C)
    o = jnp.einsum('bsc,dc->bsd', o, params['out_proj_w'],
                   precision=prec) + params['out_proj_b']
    o = o + x
    return jnp.transpose(o, (0, 2, 1)).reshape(B, C, H, W)


def _make_params(key, C):
    k1, k2, k3, k4, k5, k6 = jax.random.split(key, 6)
    return {
        'ln_w': jnp.ones((C,), jnp.float32) + 0.05 * jax.random.normal(k1, (C,), jnp.float32),
        'ln_b': 0.05 * jax.random.normal(k2, (C,), jnp.float32),
        'in_proj_w': 0.3 * jax.random.normal(k3, (3 * C, C), jnp.float32),
        'in_proj_b': 0.1 * jax.random.normal(k4, (3 * C,), jnp.float32),
        'out_proj_w': 0.3 * jax.random.normal(k5, (C, C), jnp.float32),
        'out_proj_b': 0.1 * jax.random.normal(k6, (C,), jnp.float32),
    }


if __name__ == "__main__":
    key = jax.random.PRNGKey(0)

    # Config 1: module-like tiny default (B=2, C=4, 16x16), 2 heads.
    kx1, kp1, key = jax.random.split(key, 3)
    x1 = jax.random.normal(kx1, (2, 4, 16, 16), dtype=jnp.float32)
    p1 = _make_params(kp1, 4)
    ref1 = jax.block_until_ready(reference_forward(x1, p1, 2))

    out1 = jax.block_until_ready(
        image_self_attention(x1, p1, 2, matmul_dtype=jnp.float32))
    assert out1.shape == (2, 4, 16, 16), out1.shape
    np.testing.assert_allclose(np.asarray(out1), np.asarray(ref1),
                               rtol=2e-3, atol=2e-3)

    # Default path (bf16 MXU operands, f32 accumulation) -- looser check.
    out1b = jax.block_until_ready(image_self_attention(x1, p1, 2))
    np.testing.assert_allclose(np.asarray(out1b), np.asarray(ref1),
                               rtol=5e-2, atol=5e-2)

    # Config 2: larger C (MXU projection path), B=1, S=1024 -> 2 query tiles
    # on a "parallel" qi axis (both v7x cores busy).
    kx2, kp2, key = jax.random.split(key, 3)
    x2 = jax.random.normal(kx2, (1, 16, 32, 32), dtype=jnp.float32)
    p2 = _make_params(kp2, 16)
    ref2 = jax.block_until_ready(reference_forward(x2, p2, 4))

    out2 = jax.block_until_ready(
        image_self_attention(x2, p2, 4, matmul_dtype=jnp.float32))
    np.testing.assert_allclose(np.asarray(out2), np.asarray(ref2),
                               rtol=2e-3, atol=2e-3)

    out2b = jax.block_until_ready(image_self_attention(x2, p2, 4))
    np.testing.assert_allclose(np.asarray(out2b), np.asarray(ref2),
                               rtol=1e-1, atol=1e-1)

    print("KERNEL_OK")
</pallas_src>

<mosaic_0001>
module attributes {stable_mosaic.version = 11 : i64} {
  func.func @_attn_kernel(%arg0: i32, %arg1: i32, %arg2: memref<1x4x256xf32, #tpu.memory_space<vmem>>, %arg3: memref<4x1xf32, #tpu.memory_space<vmem>>, %arg4: memref<4x1xf32, #tpu.memory_space<vmem>>, %arg5: memref<12x4xf32, #tpu.memory_space<vmem>>, %arg6: memref<12x1xf32, #tpu.memory_space<vmem>>, %arg7: memref<4x4xf32, #tpu.memory_space<vmem>>, %arg8: memref<4x1xf32, #tpu.memory_space<vmem>>, %arg9: memref<1x4x256xf32, #tpu.memory_space<vmem>>, %arg10: memref<256x4xf32, #tpu.memory_space<vmem>>, %arg11: memref<4x256xf32, #tpu.memory_space<vmem>>, %arg12: memref<4x256xf32, #tpu.memory_space<vmem>>) attributes {dimension_semantics = [#tpu.dimension_semantics<parallel>, #tpu.dimension_semantics<parallel>], iteration_bounds = array<i64: 2, 1>, scalar_prefetch = 0 : i64, scratch_operands = 3 : i64, tpu.core_type = #tpu.core_type<tc>, window_params = [{transform_indices = @transform_0, window_bounds = array<i64: 1, 4, 256>}, {pipeline_mode = #tpu.pipeline_mode<synchronous>, transform_indices = @transform_1, window_bounds = array<i64: 4, 1>}, {pipeline_mode = #tpu.pipeline_mode<synchronous>, transform_indices = @transform_2, window_bounds = array<i64: 4, 1>}, {pipeline_mode = #tpu.pipeline_mode<synchronous>, transform_indices = @transform_3, window_bounds = array<i64: 12, 4>}, {pipeline_mode = #tpu.pipeline_mode<synchronous>, transform_indices = @transform_4, window_bounds = array<i64: 12, 1>}, {pipeline_mode = #tpu.pipeline_mode<synchronous>, transform_indices = @transform_5, window_bounds = array<i64: 4, 4>}, {pipeline_mode = #tpu.pipeline_mode<synchronous>, transform_indices = @transform_6, window_bounds = array<i64: 4, 1>}, {transform_indices = @transform_7, window_bounds = array<i64: 1, 4, 256>}]} {
    %c0 = arith.constant 0 : index
    %c0_0 = arith.constant 0 : index
    %0 = vector.load %arg3[%c0, %c0_0] : memref<4x1xf32, #tpu.memory_space<vmem>>, vector<4x1xf32>
    %c0_1 = arith.constant 0 : index
    %c0_2 = arith.constant 0 : index
    %1 = vector.load %arg4[%c0_1, %c0_2] : memref<4x1xf32, #tpu.memory_space<vmem>>, vector<4x1xf32>
    %c0_3 = arith.constant 0 : index
    %c0_4 = arith.constant 0 : index
    %2 = vector.load %arg5[%c0_3, %c0_4] : memref<12x4xf32, #tpu.memory_space<vmem>>, vector<12x4xf32>
    %c0_5 = arith.constant 0 : index
    %c0_6 = arith.constant 0 : index
    %3 = vector.load %arg6[%c0_5, %c0_6] : memref<12x1xf32, #tpu.memory_space<vmem>>, vector<12x1xf32>
    %c0_7 = arith.constant 0 : index
    %c0_8 = arith.constant 0 : index
    %c0_9 = arith.constant 0 : index
    %4 = vector.load %arg2[%c0_7, %c0_8, %c0_9] : memref<1x4x256xf32, #tpu.memory_space<vmem>>, vector<1x4x256xf32>
    %5 = vector.shape_cast %4 : vector<1x4x256xf32> to vector<4x256xf32>
    %cst = arith.constant dense<0.000000e+00> : vector<256xf32>
    %6 = vector.multi_reduction <add>, %5, %cst [0] : vector<4x256xf32> to vector<256xf32>
    %7 = vector.shape_cast %6 : vector<256xf32> to vector<1x256xf32>
    %cst_10 = arith.constant 4.000000e+00 : f32
    %8 = vector.broadcast %cst_10 : f32 to vector<1x256xf32>
    %9 = arith.divf %7, %8 : vector<1x256xf32>
    %10 = vector.broadcast %9 : vector<1x256xf32> to vector<4x256xf32>
    %11 = arith.subf %5, %10 : vector<4x256xf32>
    %12 = arith.mulf %11, %11 : vector<4x256xf32>
    %cst_11 = arith.constant dense<0.000000e+00> : vector<256xf32>
    %13 = vector.multi_reduction <add>, %12, %cst_11 [0] : vector<4x256xf32> to vector<256xf32>
    %14 = vector.shape_cast %13 : vector<256xf32> to vector<1x256xf32>
    %cst_12 = arith.constant 4.000000e+00 : f32
    %15 = vector.broadcast %cst_12 : f32 to vector<1x256xf32>
    %16 = arith.divf %14, %15 : vector<1x256xf32>
    %17 = vector.broadcast %9 : vector<1x256xf32> to vector<4x256xf32>
    %18 = arith.subf %5, %17 : vector<4x256xf32>
    %cst_13 = arith.constant 9.99999974E-6 : f32
    %19 = vector.broadcast %cst_13 : f32 to vector<1x256xf32>
    %20 = arith.addf %16, %19 : vector<1x256xf32>
    %21 = math.rsqrt %20 : vector<1x256xf32>
    %22 = vector.broadcast %21 : vector<1x256xf32> to vector<4x256xf32>
    %23 = arith.mulf %18, %22 : vector<4x256xf32>
    %24 = vector.broadcast %0 : vector<4x1xf32> to vector<4x256xf32>
    %25 = arith.mulf %23, %24 : vector<4x256xf32>
    %26 = vector.broadcast %1 : vector<4x1xf32> to vector<4x256xf32>
    %27 = arith.addf %25, %26 : vector<4x256xf32>
    %28 = vector.extract_strided_slice %2 {offsets = [4, 0], sizes = [4, 4], strides = [1, 1]} : vector<12x4xf32> to vector<4x4xf32>
    %29 = vector.extract_strided_slice %3 {offsets = [4, 0], sizes = [4, 1], strides = [1, 1]} : vector<12x1xf32> to vector<4x1xf32>
    %30 = vector.extract_strided_slice %28 {offsets = [0, 0], sizes = [4, 1], strides = [1, 1]} : vector<4x4xf32> to vector<4x1xf32>
    %31 = vector.extract_strided_slice %27 {offsets = [0, 0], sizes = [1, 256], strides = [1, 1]} : vector<4x256xf32> to vector<1x256xf32>
    %32 = vector.broadcast %30 : vector<4x1xf32> to vector<4x256xf32>
    %33 = vector.broadcast %31 : vector<1x256xf32> to vector<4x256xf32>
    %34 = arith.mulf %32, %33 : vector<4x256xf32>
    %35 = vector.extract_strided_slice %28 {offsets = [0, 1], sizes = [4, 1], strides = [1, 1]} : vector<4x4xf32> to vector<4x1xf32>
    %36 = vector.extract_strided_slice %27 {offsets = [1, 0], sizes = [1, 256], strides = [1, 1]} : vector<4x256xf32> to vector<1x256xf32>
    %37 = vector.broadcast %35 : vector<4x1xf32> to vector<4x256xf32>
    %38 = vector.broadcast %36 : vector<1x256xf32> to vector<4x256xf32>
    %39 = arith.mulf %37, %38 : vector<4x256xf32>
    %40 = arith.addf %34, %39 : vector<4x256xf32>
    %41 = vector.extract_strided_slice %28 {offsets = [0, 2], sizes = [4, 1], strides = [1, 1]} : vector<4x4xf32> to vector<4x1xf32>
    %42 = vector.extract_strided_slice %27 {offsets = [2, 0], sizes = [1, 256], strides = [1, 1]} : vector<4x256xf32> to vector<1x256xf32>
    %43 = vector.broadcast %41 : vector<4x1xf32> to vector<4x256xf32>
    %44 = vector.broadcast %42 : vector<1x256xf32> to vector<4x256xf32>
    %45 = arith.mulf %43, %44 : vector<4x256xf32>
    %46 = arith.addf %40, %45 : vector<4x256xf32>
    %47 = vector.extract_strided_slice %28 {offsets = [0, 3], sizes = [4, 1], strides = [1, 1]} : vector<4x4xf32> to vector<4x1xf32>
    %48 = vector.extract_strided_slice %27 {offsets = [3, 0], sizes = [1, 256], strides = [1, 1]} : vector<4x256xf32> to vector<1x256xf32>
    %49 = vector.broadcast %47 : vector<4x1xf32> to vector<4x256xf32>
    %50 = vector.broadcast %48 : vector<1x256xf32> to vector<4x256xf32>
    %51 = arith.mulf %49, %50 : vector<4x256xf32>
    %52 = arith.addf %46, %51 : vector<4x256xf32>
    %53 = vector.broadcast %29 : vector<4x1xf32> to vector<4x256xf32>
    %54 = arith.addf %52, %53 : vector<4x256xf32>
    %55 = vector.extract_strided_slice %2 {offsets = [8, 0], sizes = [4, 4], strides = [1, 1]} : vector<12x4xf32> to vector<4x4xf32>
    %56 = vector.extract_strided_slice %3 {offsets = [8, 0], sizes = [4, 1], strides = [1, 1]} : vector<12x1xf32> to vector<4x1xf32>
    %57 = vector.extract_strided_slice %55 {offsets = [0, 0], sizes = [4, 1], strides = [1, 1]} : vector<4x4xf32> to vector<4x1xf32>
    %58 = vector.extract_strided_slice %27 {offsets = [0, 0], sizes = [1, 256], strides = [1, 1]} : vector<4x256xf32> to vector<1x256xf32>
    %59 = vector.broadcast %57 : vector<4x1xf32> to vector<4x256xf32>
    %60 = vector.broadcast %58 : vector<1x256xf32> to vector<4x256xf32>
    %61 = arith.mulf %59, %60 : vector<4x256xf32>
    %62 = vector.extract_strided_slice %55 {offsets = [0, 1], sizes = [4, 1], strides = [1, 1]} : vector<4x4xf32> to vector<4x1xf32>
    %63 = vector.extract_strided_slice %27 {offsets = [1, 0], sizes = [1, 256], strides = [1, 1]} : vector<4x256xf32> to vector<1x256xf32>
    %64 = vector.broadcast %62 : vector<4x1xf32> to vector<4x256xf32>
    %65 = vector.broadcast %63 : vector<1x256xf32> to vector<4x256xf32>
    %66 = arith.mulf %64, %65 : vector<4x256xf32>
    %67 = arith.addf %61, %66 : vector<4x256xf32>
    %68 = vector.extract_strided_slice %55 {offsets = [0, 2], sizes = [4, 1], strides = [1, 1]} : vector<4x4xf32> to vector<4x1xf32>
    %69 = vector.extract_strided_slice %27 {offsets = [2, 0], sizes = [1, 256], strides = [1, 1]} : vector<4x256xf32> to vector<1x256xf32>
    %70 = vector.broadcast %68 : vector<4x1xf32> to vector<4x256xf32>
    %71 = vector.broadcast %69 : vector<1x256xf32> to vector<4x256xf32>
    %72 = arith.mulf %70, %71 : vector<4x256xf32>
    %73 = arith.addf %67, %72 : vector<4x256xf32>
    %74 = vector.extract_strided_slice %55 {offsets = [0, 3], sizes = [4, 1], strides = [1, 1]} : vector<4x4xf32> to vector<4x1xf32>
    %75 = vector.extract_strided_slice %27 {offsets = [3, 0], sizes = [1, 256], strides = [1, 1]} : vector<4x256xf32> to vector<1x256xf32>
    %76 = vector.broadcast %74 : vector<4x1xf32> to vector<4x256xf32>
    %77 = vector.broadcast %75 : vector<1x256xf32> to vector<4x256xf32>
    %78 = arith.mulf %76, %77 : vector<4x256xf32>
    %79 = arith.addf %73, %78 : vector<4x256xf32>
    %80 = vector.broadcast %56 : vector<4x1xf32> to vector<4x256xf32>
    %81 = arith.addf %79, %80 : vector<4x256xf32>
    %82 = tpu.transpose %54, [1, 0] : vector<4x256xf32> -> vector<256x4xf32>
    %c0_14 = arith.constant 0 : index
    %c0_15 = arith.constant 0 : index
    %83 = vector.load %arg10[%c0_14, %c0_15] : memref<256x4xf32, #tpu.memory_space<vmem>>, vector<256x4xf32>
    tpu.vector_store %arg10[%c0_14, %c0_15], %82 {strides = array<i32>} : memref<256x4xf32, #tpu.memory_space<vmem>>, vector<256x4xf32>,
    %c0_16 = arith.constant 0 : index
    %c0_17 = arith.constant 0 : index
    %84 = vector.load %arg11[%c0_16, %c0_17] : memref<4x256xf32, #tpu.memory_space<vmem>>, vector<4x256xf32>
    tpu.vector_store %arg11[%c0_16, %c0_17], %81 {strides = array<i32>} : memref<4x256xf32, #tpu.memory_space<vmem>>, vector<4x256xf32>,
    %c0_18 = arith.constant 0 : index
    %c0_19 = arith.constant 0 : index
    %c0_20 = arith.constant 0 : index
    %85 = vector.load %arg2[%c0_18, %c0_19, %c0_20] : memref<1x4x256xf32, #tpu.memory_space<vmem>>, vector<1x4x256xf32>
    %86 = vector.shape_cast %85 : vector<1x4x256xf32> to vector<4x256xf32>
    %cst_21 = arith.constant dense<0.000000e+00> : vector<256xf32>
    %87 = vector.multi_reduction <add>, %86, %cst_21 [0] : vector<4x256xf32> to vector<256xf32>
    %88 = vector.shape_cast %87 : vector<256xf32> to vector<1x256xf32>
    %cst_22 = arith.constant 4.000000e+00 : f32
    %89 = vector.broadcast %cst_22 : f32 to vector<1x256xf32>
    %90 = arith.divf %88, %89 : vector<1x256xf32>
    %91 = vector.broadcast %90 : vector<1x256xf32> to vector<4x256xf32>
    %92 = arith.subf %86, %91 : vector<4x256xf32>
    %93 = arith.mulf %92, %92 : vector<4x256xf32>
    %cst_23 = arith.constant dense<0.000000e+00> : vector<256xf32>
    %94 = vector.multi_reduction <add>, %93, %cst_23 [0] : vector<4x256xf32> to vector<256xf32>
    %95 = vector.shape_cast %94 : vector<256xf32> to vector<1x256xf32>
    %cst_24 = arith.constant 4.000000e+00 : f32
    %96 = vector.broadcast %cst_24 : f32 to vector<1x256xf32>
    %97 = arith.divf %95, %96 : vector<1x256xf32>
    %98 = vector.broadcast %90 : vector<1x256xf32> to vector<4x256xf32>
    %99 = arith.subf %86, %98 : vector<4x256xf32>
    %cst_25 = arith.constant 9.99999974E-6 : f32
    %100 = vector.broadcast %cst_25 : f32 to vector<1x256xf32>
    %101 = arith.addf %97, %100 : vector<1x256xf32>
    %102 = math.rsqrt %101 : vector<1x256xf32>
    %103 = vector.broadcast %102 : vector<1x256xf32> to vector<4x256xf32>
    %104 = arith.mulf %99, %103 : vector<4x256xf32>
    %105 = vector.broadcast %0 : vector<4x1xf32> to vector<4x256xf32>
    %106 = arith.mulf %104, %105 : vector<4x256xf32>
    %107 = vector.broadcast %1 : vector<4x1xf32> to vector<4x256xf32>
    %108 = arith.addf %106, %107 : vector<4x256xf32>
    %109 = vector.extract_strided_slice %2 {offsets = [0, 0], sizes = [4, 4], strides = [1, 1]} : vector<12x4xf32> to vector<4x4xf32>
    %110 = vector.extract_strided_slice %3 {offsets = [0, 0], sizes = [4, 1], strides = [1, 1]} : vector<12x1xf32> to vector<4x1xf32>
    %111 = vector.extract_strided_slice %109 {offsets = [0, 0], sizes = [4, 1], strides = [1, 1]} : vector<4x4xf32> to vector<4x1xf32>
    %112 = vector.extract_strided_slice %108 {offsets = [0, 0], sizes = [1, 256], strides = [1, 1]} : vector<4x256xf32> to vector<1x256xf32>
    %113 = vector.broadcast %111 : vector<4x1xf32> to vector<4x256xf32>
    %114 = vector.broadcast %112 : vector<1x256xf32> to vector<4x256xf32>
    %115 = arith.mulf %113, %114 : vector<4x256xf32>
    %116 = vector.extract_strided_slice %109 {offsets = [0, 1], sizes = [4, 1], strides = [1, 1]} : vector<4x4xf32> to vector<4x1xf32>
    %117 = vector.extract_strided_slice %108 {offsets = [1, 0], sizes = [1, 256], strides = [1, 1]} : vector<4x256xf32> to vector<1x256xf32>
    %118 = vector.broadcast %116 : vector<4x1xf32> to vector<4x256xf32>
    %119 = vector.broadcast %117 : vector<1x256xf32> to vector<4x256xf32>
    %120 = arith.mulf %118, %119 : vector<4x256xf32>
    %121 = arith.addf %115, %120 : vector<4x256xf32>
    %122 = vector.extract_strided_slice %109 {offsets = [0, 2], sizes = [4, 1], strides = [1, 1]} : vector<4x4xf32> to vector<4x1xf32>
    %123 = vector.extract_strided_slice %108 {offsets = [2, 0], sizes = [1, 256], strides = [1, 1]} : vector<4x256xf32> to vector<1x256xf32>
    %124 = vector.broadcast %122 : vector<4x1xf32> to vector<4x256xf32>
    %125 = vector.broadcast %123 : vector<1x256xf32> to vector<4x256xf32>
    %126 = arith.mulf %124, %125 : vector<4x256xf32>
    %127 = arith.addf %121, %126 : vector<4x256xf32>
    %128 = vector.extract_strided_slice %109 {offsets = [0, 3], sizes = [4, 1], strides = [1, 1]} : vector<4x4xf32> to vector<4x1xf32>
    %129 = vector.extract_strided_slice %108 {offsets = [3, 0], sizes = [1, 256], strides = [1, 1]} : vector<4x256xf32> to vector<1x256xf32>
    %130 = vector.broadcast %128 : vector<4x1xf32> to vector<4x256xf32>
    %131 = vector.broadcast %129 : vector<1x256xf32> to vector<4x256xf32>
    %132 = arith.mulf %130, %131 : vector<4x256xf32>
    %133 = arith.addf %127, %132 : vector<4x256xf32>
    %134 = vector.broadcast %110 : vector<4x1xf32> to vector<4x256xf32>
    %135 = arith.addf %133, %134 : vector<4x256xf32>
    %136 = vector.extract_strided_slice %135 {offsets = [0, 0], sizes = [2, 256], strides = [1, 1]} : vector<4x256xf32> to vector<2x256xf32>
    %c0_26 = arith.constant 0 : index
    %c0_27 = arith.constant 0 : index
    %137 = vector.load %arg10[%c0_26, %c0_27] : memref<256x4xf32, #tpu.memory_space<vmem>>, vector<256x2xf32>
    %138 = vector.extract_strided_slice %137 {offsets = [0, 0], sizes = [256, 1], strides = [1, 1]} : vector<256x2xf32> to vector<256x1xf32>
    %139 = vector.extract_strided_slice %136 {offsets = [0, 0], sizes = [1, 256], strides = [1, 1]} : vector<2x256xf32> to vector<1x256xf32>
    %140 = vector.broadcast %138 : vector<256x1xf32> to vector<256x256xf32>
    %141 = vector.broadcast %139 : vector<1x256xf32> to vector<256x256xf32>
    %142 = arith.mulf %140, %141 : vector<256x256xf32>
    %143 = vector.extract_strided_slice %137 {offsets = [0, 1], sizes = [256, 1], strides = [1, 1]} : vector<256x2xf32> to vector<256x1xf32>
    %144 = vector.extract_strided_slice %136 {offsets = [1, 0], sizes = [1, 256], strides = [1, 1]} : vector<2x256xf32> to vector<1x256xf32>
    %145 = vector.broadcast %143 : vector<256x1xf32> to vector<256x256xf32>
    %146 = vector.broadcast %144 : vector<1x256xf32> to vector<256x256xf32>
    %147 = arith.mulf %145, %146 : vector<256x256xf32>
    %148 = arith.addf %142, %147 : vector<256x256xf32>
    %cst_28 = arith.constant dense<0xFF800000> : vector<256xf32>
    %149 = vector.multi_reduction <maximumf>, %148, %cst_28 [0] : vector<256x256xf32> to vector<256xf32>
    %150 = vector.shape_cast %149 : vector<256xf32> to vector<1x256xf32>
    %151 = vector.broadcast %150 : vector<1x256xf32> to vector<256x256xf32>
    %152 = arith.subf %148, %151 : vector<256x256xf32>
    %153 = math.exp %152 : vector<256x256xf32>
    %cst_29 = arith.constant dense<0.000000e+00> : vector<256xf32>
    %154 = vector.multi_reduction <add>, %153, %cst_29 [0] : vector<256x256xf32> to vector<256xf32>
    %155 = vector.shape_cast %154 : vector<256xf32> to vector<1x256xf32>
    %156 = vector.broadcast %155 : vector<1x256xf32> to vector<256x256xf32>
    %157 = arith.divf %153, %156 : vector<256x256xf32>
    %c0_30 = arith.constant 0 : index
    %c0_31 = arith.constant 0 : index
    %158 = vector.load %arg11[%c0_30, %c0_31] : memref<4x256xf32, #tpu.memory_space<vmem>>, vector<2x256xf32>
    %cst_32 = arith.constant dense<0.000000e+00> : vector<2x256xf32>
    %159 = tpu.matmul %158, %157, %cst_32 {dimension_numbers = #tpu.dot_dimension_numbers<[1], [0], [0], [1], [0, 0, 1, 1], [], []>, precision = #tpu.contract_precision<fp32>} : vector<2x256xf32>, vector<256x256xf32>, vector<2x256xf32> -> vector<2x256xf32>
    %c0_33 = arith.constant 0 : index
    %c0_34 = arith.constant 0 : index
    %160 = vector.load %arg12[%c0_33, %c0_34] : memref<4x256xf32, #tpu.memory_space<vmem>>, vector<2x256xf32>
    tpu.vector_store %arg12[%c0_33, %c0_34], %159 {strides = array<i32>} : memref<4x256xf32, #tpu.memory_space<vmem>>, vector<2x256xf32>,
    %161 = vector.extract_strided_slice %135 {offsets = [2, 0], sizes = [2, 256], strides = [1, 1]} : vector<4x256xf32> to vector<2x256xf32>
    %c0_35 = arith.constant 0 : index
    %c2 = arith.constant 2 : index
    %162 = vector.load %arg10[%c0_35, %c2] : memref<256x4xf32, #tpu.memory_space<vmem>>, vector<256x2xf32>
    %163 = vector.extract_strided_slice %162 {offsets = [0, 0], sizes = [256, 1], strides = [1, 1]} : vector<256x2xf32> to vector<256x1xf32>
    %164 = vector.extract_strided_slice %161 {offsets = [0, 0], sizes = [1, 256], strides = [1, 1]} : vector<2x256xf32> to vector<1x256xf32>
    %165 = vector.broadcast %163 : vector<256x1xf32> to vector<256x256xf32>
    %166 = vector.broadcast %164 : vector<1x256xf32> to vector<256x256xf32>
    %167 = arith.mulf %165, %166 : vector<256x256xf32>
    %168 = vector.extract_strided_slice %162 {offsets = [0, 1], sizes = [256, 1], strides = [1, 1]} : vector<256x2xf32> to vector<256x1xf32>
    %169 = vector.extract_strided_slice %161 {offsets = [1, 0], sizes = [1, 256], strides = [1, 1]} : vector<2x256xf32> to vector<1x256xf32>
    %170 = vector.broadcast %168 : vector<256x1xf32> to vector<256x256xf32>
    %171 = vector.broadcast %169 : vector<1x256xf32> to vector<256x256xf32>
    %172 = arith.mulf %170, %171 : vector<256x256xf32>
    %173 = arith.addf %167, %172 : vector<256x256xf32>
    %cst_36 = arith.constant dense<0xFF800000> : vector<256xf32>
    %174 = vector.multi_reduction <maximumf>, %173, %cst_36 [0] : vector<256x256xf32> to vector<256xf32>
    %175 = vector.shape_cast %174 : vector<256xf32> to vector<1x256xf32>
    %176 = vector.broadcast %175 : vector<1x256xf32> to vector<256x256xf32>
    %177 = arith.subf %173, %176 : vector<256x256xf32>
    %178 = math.exp %177 : vector<256x256xf32>
    %cst_37 = arith.constant dense<0.000000e+00> : vector<256xf32>
    %179 = vector.multi_reduction <add>, %178, %cst_37 [0] : vector<256x256xf32> to vector<256xf32>
    %180 = vector.shape_cast %179 : vector<256xf32> to vector<1x256xf32>
    %181 = vector.broadcast %180 : vector<1x256xf32> to vector<256x256xf32>
    %182 = arith.divf %178, %181 : vector<256x256xf32>
    %c2_38 = arith.constant 2 : index
    %c0_39 = arith.constant 0 : index
    %183 = vector.load %arg11[%c2_38, %c0_39] : memref<4x256xf32, #tpu.memory_space<vmem>>, vector<2x256xf32>
    %cst_40 = arith.constant dense<0.000000e+00> : vector<2x256xf32>
    %184 = tpu.matmul %183, %182, %cst_40 {dimension_numbers = #tpu.dot_dimension_numbers<[1], [0], [0], [1], [0, 0, 1, 1], [], []>, precision = #tpu.contract_precision<fp32>} : vector<2x256xf32>, vector<256x256xf32>, vector<2x256xf32> -> vector<2x256xf32>
    %c2_41 = arith.constant 2 : index
    %c0_42 = arith.constant 0 : index
    %185 = vector.load %arg12[%c2_41, %c0_42] : memref<4x256xf32, #tpu.memory_space<vmem>>, vector<2x256xf32>
    tpu.vector_store %arg12[%c2_41, %c0_42], %184 {strides = array<i32>} : memref<4x256xf32, #tpu.memory_space<vmem>>, vector<2x256xf32>,
    %c0_43 = arith.constant 0 : index
    %c0_44 = arith.constant 0 : index
    %186 = vector.load %arg7[%c0_43, %c0_44] : memref<4x4xf32, #tpu.memory_space<vmem>>, vector<4x4xf32>
    %c0_45 = arith.constant 0 : index
    %c0_46 = arith.constant 0 : index
    %187 = vector.load %arg8[%c0_45, %c0_46] : memref<4x1xf32, #tpu.memory_space<vmem>>, vector<4x1xf32>
    %c0_47 = arith.constant 0 : index
    %c0_48 = arith.constant 0 : index
    %188 = vector.load %arg12[%c0_47, %c0_48] : memref<4x256xf32, #tpu.memory_space<vmem>>, vector<4x256xf32>
    %189 = vector.extract_strided_slice %186 {offsets = [0, 0], sizes = [4, 1], strides = [1, 1]} : vector<4x4xf32> to vector<4x1xf32>
    %190 = vector.extract_strided_slice %188 {offsets = [0, 0], sizes = [1, 256], strides = [1, 1]} : vector<4x256xf32> to vector<1x256xf32>
    %191 = vector.broadcast %189 : vector<4x1xf32> to vector<4x256xf32>
    %192 = vector.broadcast %190 : vector<1x256xf32> to vector<4x256xf32>
    %193 = arith.mulf %191, %192 : vector<4x256xf32>
    %194 = vector.extract_strided_slice %186 {offsets = [0, 1], sizes = [4, 1], strides = [1, 1]} : vector<4x4xf32> to vector<4x1xf32>
    %195 = vector.extract_strided_slice %188 {offsets = [1, 0], sizes = [1, 256], strides = [1, 1]} : vector<4x256xf32> to vector<1x256xf32>
    %196 = vector.broadcast %194 : vector<4x1xf32> to vector<4x256xf32>
    %197 = vector.broadcast %195 : vector<1x256xf32> to vector<4x256xf32>
    %198 = arith.mulf %196, %197 : vector<4x256xf32>
    %199 = arith.addf %193, %198 : vector<4x256xf32>
    %200 = vector.extract_strided_slice %186 {offsets = [0, 2], sizes = [4, 1], strides = [1, 1]} : vector<4x4xf32> to vector<4x1xf32>
    %201 = vector.extract_strided_slice %188 {offsets = [2, 0], sizes = [1, 256], strides = [1, 1]} : vector<4x256xf32> to vector<1x256xf32>
    %202 = vector.broadcast %200 : vector<4x1xf32> to vector<4x256xf32>
    %203 = vector.broadcast %201 : vector<1x256xf32> to vector<4x256xf32>
    %204 = arith.mulf %202, %203 : vector<4x256xf32>
    %205 = arith.addf %199, %204 : vector<4x256xf32>
    %206 = vector.extract_strided_slice %186 {offsets = [0, 3], sizes = [4, 1], strides = [1, 1]} : vector<4x4xf32> to vector<4x1xf32>
    %207 = vector.extract_strided_slice %188 {offsets = [3, 0], sizes = [1, 256], strides = [1, 1]} : vector<4x256xf32> to vector<1x256xf32>
    %208 = vector.broadcast %206 : vector<4x1xf32> to vector<4x256xf32>
    %209 = vector.broadcast %207 : vector<1x256xf32> to vector<4x256xf32>
    %210 = arith.mulf %208, %209 : vector<4x256xf32>
    %211 = arith.addf %205, %210 : vector<4x256xf32>
    %212 = vector.broadcast %187 : vector<4x1xf32> to vector<4x256xf32>
    %213 = arith.addf %211, %212 : vector<4x256xf32>
    %214 = arith.addf %213, %86 : vector<4x256xf32>
    %c0_49 = arith.constant 0 : index
    %c0_50 = arith.constant 0 : index
    %c0_51 = arith.constant 0 : index
    %215 = vector.load %arg9[%c0_49, %c0_50, %c0_51] : memref<1x4x256xf32, #tpu.memory_space<vmem>>, vector<1x4x256xf32>
    %216 = vector.shape_cast %215 : vector<1x4x256xf32> to vector<4x256xf32>
    %217 = vector.shape_cast %214 : vector<4x256xf32> to vector<1x4x256xf32>
    tpu.vector_store %arg9[%c0_49, %c0_50, %c0_51], %217 {strides = array<i32>} : memref<1x4x256xf32, #tpu.memory_space<vmem>>, vector<1x4x256xf32>,
    return
  }
  func.func @transform_0(%arg0: i32, %arg1: i32) -> (i32, i32, i32) {
    %c0_i32 = arith.constant 0 : i32
    %c0_i32_0 = arith.constant 0 : i32
    %c0_i32_1 = arith.constant 0 : i32
    return %arg0, %c0_i32, %c0_i32_0 : i32, i32, i32
  }
  func.func @transform_1(%arg0: i32, %arg1: i32) -> (i32, i32) {
    %c0_i32 = arith.constant 0 : i32
    %c0_i32_0 = arith.constant 0 : i32
    %c0_i32_1 = arith.constant 0 : i32
    return %c0_i32, %c0_i32_0 : i32, i32
  }
  func.func @transform_2(%arg0: i32, %arg1: i32) -> (i32, i32) {
    %c0_i32 = arith.constant 0 : i32
    %c0_i32_0 = arith.constant 0 : i32
    %c0_i32_1 = arith.constant 0 : i32
    return %c0_i32, %c0_i32_0 : i32, i32
  }
  func.func @transform_3(%arg0: i32, %arg1: i32) -> (i32, i32) {
    %c0_i32 = arith.constant 0 : i32
    %c0_i32_0 = arith.constant 0 : i32
    %c0_i32_1 = arith.constant 0 : i32
    return %c0_i32, %c0_i32_0 : i32, i32
  }
  func.func @transform_4(%arg0: i32, %arg1: i32) -> (i32, i32) {
    %c0_i32 = arith.constant 0 : i32
    %c0_i32_0 = arith.constant 0 : i32
    %c0_i32_1 = arith.constant 0 : i32
    return %c0_i32, %c0_i32_0 : i32, i32
  }
  func.func @transform_5(%arg0: i32, %arg1: i32) -> (i32, i32) {
    %c0_i32 = arith.constant 0 : i32
    %c0_i32_0 = arith.constant 0 : i32
    %c0_i32_1 = arith.constant 0 : i32
    return %c0_i32, %c0_i32_0 : i32, i32
  }
  func.func @transform_6(%arg0: i32, %arg1: i32) -> (i32, i32) {
    %c0_i32 = arith.constant 0 : i32
    %c0_i32_0 = arith.constant 0 : i32
    %c0_i32_1 = arith.constant 0 : i32
    return %c0_i32, %c0_i32_0 : i32, i32
  }
  func.func @transform_7(%arg0: i32, %arg1: i32) -> (i32, i32, i32) {
    %c0_i32 = arith.constant 0 : i32
    %c0_i32_0 = arith.constant 0 : i32
    return %arg0, %c0_i32, %arg1 : i32, i32, i32
  }
}

</mosaic_0001>

<bundles_post_ra>
// kernel: tpu_custom_call.1
= control target key start
LH: loop header
LB: loop body
LE: loop exit
PB: predicated region body
PF: predicated region fallthrough
CT: control target
= control target key end

     0   :  { %12 = vsyncpa [#allocation6], 0  ;;  %s11612_s0 = inlined_call_operand.vmem [shape: f32[2,4,256], index: 0, kind: input, shape index: {}]   ;;  %s11613_s1 = inlined_call_operand.vmem [shape: f32[4,1], index: 1, kind: input, shape index: {}]   ;;  %s11614_s2 = inlined_call_operand.vmem [shape: f32[4,1], index: 2, kind: input, shape index: {}]   ;;  %s11615_s3 = inlined_call_operand.vmem [shape: f32[12,4], index: 3, kind: input, shape index: {}]   ;;  %s11616_s4 = inlined_call_operand.vmem [shape: f32[12,1], index: 4, kind: input, shape index: {}]   ;;  %s11617_s5 = inlined_call_operand.vmem [shape: f32[4,4], index: 5, kind: input, shape index: {}]   ;;  %s11618_s6 = inlined_call_operand.vmem [shape: f32[4,1], index: 6, kind: input, shape index: {}]   ;;  %s11619_s7 = inlined_call_operand.hbm [shape: f32[2,4,256], index: 7, kind: output, shape index: {}]  }
   0x1   :  { %14 = vsyncpa [#allocation6 + $0x1], 0  ;;  %s6799_s24 = smov 0   ;;  %s6801_s25 = smov 0  }
   0x2   :  { %s6803_s26 = smov 0   ;;  %s6805_s27 = smov 0  }
   0x3   :  { %s6807_s28 = smov 0   ;;  %s6809_s29 = smov 0  }
   0x4 LB: > { %s5448_s30 = sadd.s32 4294967295, %s6751_s29   ;;  %s5449_s8 = sadd.s32 4294967294, %s6751_s29   ;;  %s6751_s29 = sphi %s6809_s29, %s20_s29   ;;  %s6747_s28 = sphi %s6807_s28, %s13991_s28   ;;  %s6743_s27 = sphi %s6805_s27, %s13990_s27   ;;  %s6739_s26 = sphi %s6803_s26, %s13989_s26   ;;  %s6735_s25 = sphi %s6801_s25, %s13988_s25   ;;  %s6731_s24 = sphi %s6799_s24, %s13987_s24  }
   0x5   : > { %s32_s9 = sadd.s32 1, %s6747_s28  ;;  %s193_s10 = sadd.s32 1, %s6739_s26 }
   0x6   : > { %p34_p0 = scmp.ge.s32.totalorder %s32_s9, 2  ;;  %p203_p1 = scmp.ne.s32.totalorder %s6739_s26, %s6735_s25 }
   0x7   : > { %p204_p2 = scmp.eq.s32.totalorder %s5448_s30, 1  ;;  %p209_p3 = scmp.ne.s32.totalorder %s6735_s25, %s6731_s24 }
   0x8   : > { %s13993_s9 = smov (%p34_p0, %s32_s9), 0  ;;  %p210_p5 = scmp.eq.s32.totalorder %s5449_s8, 1 }
   0x9   : > { %p6839_p4 = por %p204_p2, %p203_p1  ;;  %s188_s12 = ssub.s32 %s6747_s28, %s13993_s9 }
   0xa   : > { %p5452_p6 = scmp.ge.s32.totalorder %s6751_s29, 1  ;;  %p191_p7 = scmp.eq.s32.totalorder %s188_s12, 0 }
   0xb   : > { %p6846_p8 = por %p210_p5, %p209_p3  ;;  %p254_p9 = scmp.lt.s32.totalorder %s6751_s29, 3 }
   0xc   : > { %s6852_s14 = scalar_select %p191_p7, %s6739_s26, %s193_s10  }
   0xd   : > { %p255_p10 = pnand %p5452_p6, %p254_p9 }
   0xf   : > { %258 = sbr.rel (%p255_p10) target bundleno = 1776 (0x6f0), region = 48 }
  0x16   : > { %v292_v0 = vld [vmem:[%s11613_s1] sm:$0xf]  ;;  %v11628_v2 = vmov 0   ;;  %v11626_v4 = vmov 1   ;;  %p286_p11 = scmp.lt.s32.totalorder %s6743_s27, 1  ;;  %v11624_v5 = vmov 2   ;;  %v361_v50 = vlaneseq }
  0x17   : > { %v294_v1 = vld [vmem:[%s11615_s3] sm:$0xff]  ;;  %6312 = vset.pattern.permute.xlu0 %v11628_v2  ;;  %6313 = vset.pattern.permute.xlu1 %v11628_v2  ;;  %v11631_v6 = vmov 3   ;;  %vm302_vm0 = vcmask 1043456   ;;  %v6757_v48 = vmov 839922192   ;;  %vm599_vm1 = vcmask 31744  }
  0x18   : > { %356 = vperm.xlu0 %6312, %v292_v0   ;;  %382 = vperm.xlu1 %6313, %v294_v1   ;;  %v293_v3 = vld [vmem:[%s11614_s2] sm:$0xf]  ;;  %s287_s21 = scalar_select %p286_p11, %s6743_s27, 1  ;;  %v359_v49 = vunpack.c.l.s4 %v6757_v48  ;;  %v6887_v54 = vshrl.u32 %v361_v50, 7 }
  0x19   : > { %v296_v7 = vld [vmem:[%s11616_s4] sm:$0xff]  ;;  %s283_s23 = sand.u32 1, %s6735_s25   ;;  %s5462_s8 = sshll.u32 %s6743_s27, 7 }
  0x1a   : > { %s5461_s30 = sshll.u32 %s287_s21, 3  ;;  %v360_v53 = vunpack.c.0.s8 %v359_v49  ;;  %12459 = vst [vmem:[#allocation9_spill] sm:$0xff] %v6887_v54  ;;  %v11623_v63 = vsub.s32 5, %v6887_v54  ;;  %s11565_s18 = scalar_lea.hbm %s11619_s7, %s5462_s8 }
  0x1b   : > { %s6877_s12 = scalar_lea.vmem %s11612_s0, %s5461_s30  ;;  %s5453_s30 = sshll.u32 %s283_s23, 3 }
  0x1c   : > { %369 = vperm.xlu0 %6312, %v293_v3   ;;  %6314 = vset.pattern.permute.xlu1 %v11626_v4  ;;  %v298_v8 = vld [vmem:[%s6877_s12] sm:$0xff]  ;;  %v363_v56 = vsub.s32 %v360_v53, %v6887_v54  ;;  %s285_s10 = scalar_lea.vmem [#allocation5], %s5453_s30  ;;  %s5362_s19 = scalar_lea.sflag [#allocation6], %s283_s23 }
  0x1d   : > { %407 = vperm.xlu1 %6314, %v294_v1   ;;  %v6880_v9 = vcombine.high %v298_v8, %v298_v8  ;;  %v303_v10 = vsel %vm302_vm0, %v298_v8, 0.0  ;;  %s5378_s15 = sshll.u32 %s285_s10, 4  ;;  %s11567_s15 = int_to_ptr.vmem [resolvable:$true] %s5378_s15 }
  0x1e   : > { %v304_v12 = vrot.slane %v303_v10, 4  ;;  %s6673_s27 = scalar_lea.vmem %s11567_s15, 128 }
  0x1f   : > { %12458 = vst [vmem:[#allocation8_spill] sm:$0xff] %v6880_v9  ;;  %v310_v11 = vsel %vm302_vm0, %v6880_v9, 0.0  ;;  %v12479_v9 = vmov 0   ;;  %p6674_p12 = scmp.ne.s32.totalorder %s11567_s15, %s6673_s27 }
  0x20   : > { %6315 = vset.pattern.permute.xlu0 %v11624_v5  ;;  %v311_v13 = vrot.slane %v310_v11, 4  ;;  %v305_v14 = vadd.f32 %v304_v12, %v303_v10  ;;  %v11621_v10 = vsub.s32 6, %v6887_v54  ;;  %v11620_v12 = vsub.s32 7, %v6887_v54 }
  0x21   : > { %6316 = vset.pattern.permute.xlu1 %v11631_v6  ;;  %433 = vperm.xlu0 %6315, %v294_v1   ;;  %p6675_p13 = pnand %p6674_p12, %p6839_p4 }
  0x22   : > { %459 = vperm.xlu1 %6316, %v294_v1   ;;  %v312_v15 = vadd.f32 %v311_v13, %v310_v11  ;;  %v306_v16 = vrot.slane %v305_v14, 2  ;;  %v6892_v1 = vsub.s32 1, %v6887_v54  ;;  %v11622_v11 = vsub.s32 4, %v6887_v54 }
  0x23   : > { %v6901_v13 = vsub.s32 2, %v6887_v54  ;;  %p6676_p0 = pneg %p6675_p13 }
  0x24   : > { %v313_v17 = vrot.slane %v312_v15, 2  ;;  %v307_v18 = vadd.f32 %v306_v16, %v305_v14  ;;  %12460 = vst [vmem:[#allocation10_spill] sm:$0xff] %v6892_v1  ;;  %v6904_v14 = vsub.s32 0, %v6887_v54 }
  0x25   : > { %12461 = vst [vmem:[#allocation11_spill] sm:$0xff] %v6901_v13 }
  0x26   : > { %6317 = vset.pattern.permute.xlu1 %v11628_v2  ;;  %v314_v19 = vadd.f32 %v313_v17, %v312_v15  ;;  %v308_v20 = vrot.slane %v307_v18, 1  ;;  %12462 = vst [vmem:[#allocation12_spill] sm:$0xff] %v6904_v14 }
  0x27   : > { %486 = vperm.xlu1 %6317, %v296_v7  }
  0x28   : > { %v315_v21 = vrot.slane %v314_v19, 1  ;;  %v309_v22 = vadd.f32 %v308_v20, %v307_v18  ;;  %v6913_v18 = vsub.s32 3, %v6887_v54  ;;  %v12487_v54 = vmov 1  }
  0x2a   : > { %v316_v23 = vadd.f32 %v315_v21, %v314_v19  ;;  %v318_v24 = vmul.f32 0.25, %v309_v22  ;;  %12465 = vst [vmem:[#allocation15_spill] sm:$0xff] %v6913_v18 }
  0x2c   : > { %v319_v25 = vmul.f32 0.25, %v316_v23 }
  0x2e   : > { %v322_v26 = vcombine.low %v318_v24, %v319_v25 }
  0x30   : > { %v324_v27 = vsub.f32 %v298_v8, %v322_v26 }
  0x32   : > { %v325_v28 = vmul.f32 %v324_v27, %v324_v27 }
  0x34   : > { %v327_v29 = vcombine.high %v325_v28, %v325_v28  ;;  %v329_v30 = vsel %vm302_vm0, %v325_v28, 0.0 }
  0x35   : > { %v330_v32 = vrot.slane %v329_v30, 4 }
  0x36   : > { %v336_v31 = vsel %vm302_vm0, %v327_v29, 0.0 }
  0x37   : > { %v337_v33 = vrot.slane %v336_v31, 4  ;;  %v331_v34 = vadd.f32 %v330_v32, %v329_v30 }
  0x39   : > { %v338_v35 = vadd.f32 %v337_v33, %v336_v31  ;;  %v332_v36 = vrot.slane %v331_v34, 2 }
  0x3b   : > { %v339_v37 = vrot.slane %v338_v35, 2  ;;  %v333_v38 = vadd.f32 %v332_v36, %v331_v34 }
  0x3d   : > { %v340_v39 = vadd.f32 %v339_v37, %v338_v35  ;;  %v334_v40 = vrot.slane %v333_v38, 1 }
  0x3f   : > { %v341_v41 = vrot.slane %v340_v39, 1  ;;  %v335_v42 = vadd.f32 %v334_v40, %v333_v38 }
  0x41   : > { %v342_v43 = vadd.f32 %v341_v41, %v340_v39  ;;  %v343_v44 = vmul.f32 0.25, %v335_v42 }
  0x43   : > { %v344_v45 = vmul.f32 0.25, %v342_v43  ;;  %v345_v46 = vadd.f32 1e-05, %v343_v44 }
  0x45   : > { %v346_v47 = vadd.f32 1e-05, %v344_v45  ;;  %6404 = vrsqrt.f32 %v345_v46 }
  0x47   : > { %6406 = vrsqrt.f32 %v346_v47 }
  0x4f   : > { %v6405_v51 = vpop.eup %6404 }
  0x51   : > { %v6407_v52 = vpop.eup %6406 }
  0x52   : > { %v351_v55 = vcombine.low %v6405_v51, %v6407_v52 }
  0x54   : > { %v353_v57 = vmul.f32 %v351_v55, %v324_v27 }
  0x97   : > { %v357_v58 = vpop.permute.xlu0 %356  ;;  %v383_v3 = vpop.permute.xlu1 %382 }
  0x98   : > { %v364_v59 = vrot.slane %v357_v58, %v363_v56 }
  0x9a   : > { %v691_v60 = vmul.f32 %v364_v59, %v353_v57 }
  0x9b   : > { %v370_v61 = vpop.permute.xlu0 %369 }
  0x9c   : > { %v377_v62 = vrot.slane %v370_v61, %v363_v56  ;;  %v408_v16 = vpop.permute.xlu1 %407 }
  0x9e   : > { %v379_v0 = vadd.f32 %v691_v60, %v377_v62 }
  0xa0   : > { %v417_v7 = vrot.slane %v379_v0, %v11623_v63  ;;  %v413_v8 = vrot.slane %v379_v0, %v6892_v1  ;;  %v443_v19 = vrot.slane %v379_v0, %v11621_v10  ;;  %v439_v20 = vrot.slane %v379_v0, %v6901_v13  ;;  %v434_v28 = vpop.permute.xlu0 %433 }
  0xa1   : > { %v393_v21 = vrot.slane %v379_v0, %v11622_v11  ;;  %v469_v22 = vrot.slane %v379_v0, %v11620_v12  ;;  %v389_v26 = vrot.slane %v379_v0, %v6904_v14  ;;  %v465_v29 = vrot.slane %v379_v0, %v6913_v18  ;;  %v460_v34 = vpop.permute.xlu1 %459 }
  0xa2   : > { %v6907_v15 = vrot.slane %v417_v7, %v6892_v1  ;;  %v6910_v17 = vrot.slane %v413_v8, %v6892_v1  ;;  %v6924_v24 = vrot.slane %v443_v19, %v6901_v13  ;;  %v6933_v30 = vrot.slane %v439_v20, %v6901_v13 }
  0xa3   : > { %v6927_v25 = vrot.slane %v393_v21, %v6904_v14  ;;  %v6937_v32 = vrot.slane %v469_v22, %v6913_v18  ;;  %v6940_v33 = vrot.slane %v389_v26, %v6904_v14  ;;  %v6945_v38 = vrot.slane %v465_v29, %v6913_v18 }
  0xa4   : > { %12463 = vst [vmem:[#allocation13_spill] sm:$0xff] %v6907_v15  ;;  %12464 = vst [vmem:[#allocation14_spill] sm:$0xff] %v6910_v17  ;;  %v429_v23 = vmul.f32 %v6907_v15, %v408_v16  ;;  %v428_v27 = vmul.f32 %v6910_v17, %v408_v16  ;;  %v455_v35 = vmul.f32 %v6924_v24, %v434_v28 }
  0xa5   : > { %12466 = vst [vmem:[#allocation16_spill] sm:$0xff] %v6924_v24  ;;  %12467 = vst [vmem:[#allocation17_spill] sm:$0xff] %v6927_v25  ;;  %v405_v31 = vmul.f32 %v6927_v25, %v383_v3  ;;  %v404_v37 = vmul.f32 %v6940_v33, %v383_v3  ;;  %v454_v39 = vmul.f32 %v6933_v30, %v434_v28  ;;  %v12491_v24 = vmov 2  }
  0xa6   : > { %12468 = vst [vmem:[#allocation18_spill] sm:$0xff] %v6933_v30  ;;  %12469 = vst [vmem:[#allocation19_spill] sm:$0xff] %v6937_v32  ;;  %v481_v41 = vmul.f32 %v6937_v32, %v460_v34  ;;  %v487_v43 = vpop.permute.xlu1 %486  ;;  %v480_v46 = vmul.f32 %v6945_v38, %v460_v34 }
  0xa7   : > { %12470 = vst [vmem:[#allocation20_spill] sm:$0xff] %v6940_v33  ;;  %v431_v36 = vadd.f32 %v429_v23, %v405_v31  ;;  %12471 = vst [vmem:[#allocation21_spill] sm:$0xff] %v6945_v38  ;;  %v430_v42 = vadd.f32 %v428_v27, %v404_v37 }
  0xa9   : > { %v457_v40 = vadd.f32 %v455_v35, %v431_v36  ;;  %v456_v45 = vadd.f32 %v454_v39, %v430_v42 }
  0xab   : > { %v483_v44 = vadd.f32 %v481_v41, %v457_v40  ;;  %v482_v48 = vadd.f32 %v480_v46, %v456_v45 }
  0xad   : > { %v6950_v47 = vadd.f32 %v487_v43, %v483_v44  ;;  %v6953_v50 = vadd.f32 %v487_v43, %v482_v48 }
  0xaf   : > { %v532_v49 = vrot.slane %v6950_v47, 4  ;;  %v531_v51 = vrot.slane %v6953_v50, 4 }
  0xb1   : > { %567 = vxpose.xlu1.b32.start.end [1/1] (short) %v532_v49, 128  ;;  %535 = vxpose.xlu0.b32.start.end [1/1] (short) %v531_v51, 128 }
 0x131   : > { %v583_v52 = vpop.trf.xlu1  ;;  %v551_v53 = vpop.trf.xlu0 }
 0x132   : > { %616 = vst.msk [vmem:[#allocation2 + $0x80] sm:$0xff] %vm599_vm1, %v583_v52  ;;  %600 = vst.msk [vmem:[#allocation2] sm:$0xff] %vm599_vm1, %v551_v53 }
 0x135   : > { %v584_v55 = vpop.trf.xlu1  ;;  %v552_v56 = vpop.trf.xlu0 }
 0x136   : > { %617 = vst.msk [vmem:[#allocation2 + $0x88] sm:$0xff] %vm599_vm1, %v584_v55  ;;  %601 = vst.msk [vmem:[#allocation2 + $0x8] sm:$0xff] %vm599_vm1, %v552_v56 }
 0x139   : > { %v585_v57 = vpop.trf.xlu1  ;;  %v553_v58 = vpop.trf.xlu0  ;;  %v6961_v59 = vld [vmem:[#allocation2] sm:$0xff] }
 0x13a   : > { %618 = vst.msk [vmem:[#allocation2 + $0x90] sm:$0xff] %vm599_vm1, %v585_v57  ;;  %602 = vst.msk [vmem:[#allocation2 + $0x10] sm:$0xff] %vm599_vm1, %v553_v58  ;;  %3043 = vperm.xlu0 %6315, %v6961_v59   ;;  %816 = vperm.xlu1 %6317, %v6961_v59  }
 0x13d   : > { %v586_v60 = vpop.trf.xlu1  ;;  %v554_v61 = vpop.trf.xlu0  ;;  %v6967_v62 = vld [vmem:[#allocation2 + $0x8] sm:$0xff] }
 0x13e   : > { %619 = vst.msk [vmem:[#allocation2 + $0x98] sm:$0xff] %vm599_vm1, %v586_v60  ;;  %603 = vst.msk [vmem:[#allocation2 + $0x18] sm:$0xff] %vm599_vm1, %v554_v61  ;;  %6318 = vset.pattern.permute.xlu1 %v11624_v5  ;;  %v7029_v53 = vld [vmem:[#allocation2 + $0x88] sm:$0xff] }
 0x13f   : > { %3048 = vperm.xlu1 %6318, %v6967_v62  }
 0x141   : > { %v587_v0 = vpop.trf.xlu1  ;;  %v555_v3 = vpop.trf.xlu0  ;;  %v3011_v7 = vld [vmem:[#allocation2 + $0x10] sm:$0xff] }
 0x142   : > { %620 = vst.msk [vmem:[#allocation2 + $0xa0] sm:$0xff] %vm599_vm1, %v587_v0  ;;  %604 = vst.msk [vmem:[#allocation2 + $0x20] sm:$0xff] %vm599_vm1, %v555_v3  ;;  %3053 = vperm.xlu0 %6315, %v3011_v7  }
 0x143   : > { %6319 = vset.pattern.permute.xlu1 %v11631_v6 }
 0x144   : > { %3278 = vperm.xlu1 %6319, %v6967_v62  }
 0x145   : > { %v588_v8 = vpop.trf.xlu1  ;;  %v556_v16 = vpop.trf.xlu0  ;;  %v6999_v36 = vld [vmem:[#allocation2 + $0x18] sm:$0xff] }
 0x146   : > { %621 = vst.msk [vmem:[#allocation2 + $0xa8] sm:$0xff] %vm599_vm1, %v588_v8  ;;  %605 = vst.msk [vmem:[#allocation2 + $0x28] sm:$0xff] %vm599_vm1, %v556_v16  ;;  %v7089_v8 = vrot.slane %v6950_v47, %v6901_v13 }
 0x148   : > { %6320 = vset.pattern.permute.xlu1 %v11626_v4 }
 0x149   : > { %v589_v19 = vpop.trf.xlu1  ;;  %1051 = vperm.xlu1 %6320, %v6967_v62   ;;  %v557_v20 = vpop.trf.xlu0  ;;  %v7009_v43 = vld [vmem:[#allocation2 + $0x20] sm:$0xff] }
 0x14a   : > { %622 = vst.msk [vmem:[#allocation2 + $0xb0] sm:$0xff] %vm599_vm1, %v589_v19  ;;  %606 = vst.msk [vmem:[#allocation2 + $0x30] sm:$0xff] %vm599_vm1, %v557_v20  ;;  %v7034_v55 = vld [vmem:[#allocation2 + $0xa0] sm:$0xff] }
 0x14d   : > { %v590_v21 = vpop.trf.xlu1  ;;  %6321 = vset.pattern.permute.xlu1 %v11631_v6  ;;  %v558_v22 = vpop.trf.xlu0  ;;  %v6984_v23 = vld [vmem:[#allocation2 + $0x28] sm:$0xff] }
 0x14e   : > { %623 = vst.msk [vmem:[#allocation2 + $0xb8] sm:$0xff] %vm599_vm1, %v590_v21  ;;  %607 = vst.msk [vmem:[#allocation2 + $0x38] sm:$0xff] %vm599_vm1, %v558_v22  ;;  %3282 = vperm.xlu1 %6321, %v3011_v7   ;;  %3068 = vperm.xlu0 %6315, %v6984_v23  }
 0x151   : > { %v591_v26 = vpop.trf.xlu1  ;;  %v559_v27 = vpop.trf.xlu0  ;;  %v3015_v57 = vld [vmem:[#allocation2 + $0x30] sm:$0xff] }
 0x152   : > { %624 = vst.msk [vmem:[#allocation2 + $0xc0] sm:$0xff] %vm599_vm1, %v591_v26  ;;  %608 = vst.msk [vmem:[#allocation2 + $0x40] sm:$0xff] %vm599_vm1, %v559_v27  ;;  %6322 = vset.pattern.permute.xlu1 %v11628_v2 }
 0x153   : > { %826 = vperm.xlu1 %6322, %v3011_v7  }
 0x155   : > { %v592_v28 = vpop.trf.xlu1  ;;  %v560_v29 = vpop.trf.xlu0  ;;  %v7039_v56 = vld [vmem:[#allocation2 + $0xb8] sm:$0xff] }
 0x156   : > { %625 = vst.msk [vmem:[#allocation2 + $0xc8] sm:$0xff] %vm599_vm1, %v592_v28  ;;  %609 = vst.msk [vmem:[#allocation2 + $0x48] sm:$0xff] %vm599_vm1, %v560_v29  ;;  %v7053_v61 = vld [vmem:[#allocation2 + $0x38] sm:$0xff] }
 0x157   : > { %6323 = vset.pattern.permute.xlu1 %v11626_v4 }
 0x158   : > { %1055 = vperm.xlu1 %6323, %v3011_v7   ;;  %v7085_v7 = vrot.slane %v6953_v50, %v6901_v13 }
 0x159   : > { %v593_v31 = vpop.trf.xlu1  ;;  %v561_v34 = vpop.trf.xlu0  ;;  %v6995_v35 = vld [vmem:[#allocation2 + $0x40] sm:$0xff] }
 0x15a   : > { %626 = vst.msk [vmem:[#allocation2 + $0xd0] sm:$0xff] %vm599_vm1, %v593_v31  ;;  %610 = vst.msk [vmem:[#allocation2 + $0x50] sm:$0xff] %vm599_vm1, %v561_v34  ;;  %3083 = vperm.xlu0 %6315, %v6995_v35   ;;  %v7121_v34 = vrot.slane %v6953_v50, %v6913_v18 }
 0x15c   : > { %6324 = vset.pattern.permute.xlu1 %v11624_v5 }
 0x15d   : > { %v594_v37 = vpop.trf.xlu1  ;;  %3058 = vperm.xlu1 %6324, %v6999_v36   ;;  %v562_v39 = vpop.trf.xlu0  ;;  %v3018_v0 = vld [vmem:[#allocation2 + $0x48] sm:$0xff] }
 0x15e   : > { %627 = vst.msk [vmem:[#allocation2 + $0xd8] sm:$0xff] %vm599_vm1, %v594_v37  ;;  %611 = vst.msk [vmem:[#allocation2 + $0x58] sm:$0xff] %vm599_vm1, %v562_v39  ;;  %v7128_v39 = vld [vmem:[#allocation2 + $0x90] sm:$0xff] }
 0x161   : > { %v595_v40 = vpop.trf.xlu1  ;;  %6325 = vset.pattern.permute.xlu1 %v11628_v2  ;;  %v563_v41 = vpop.trf.xlu0  ;;  %v7043_v58 = vld [vmem:[#allocation2 + $0xd0] sm:$0xff] }
 0x162   : > { %628 = vst.msk [vmem:[#allocation2 + $0xe0] sm:$0xff] %vm599_vm1, %v595_v40  ;;  %612 = vst.msk [vmem:[#allocation2 + $0x60] sm:$0xff] %vm599_vm1, %v563_v41  ;;  %831 = vperm.xlu1 %6325, %v6999_v36   ;;  %v7078_v3 = vld [vmem:[#allocation2 + $0x50] sm:$0xff] }
 0x165   : > { %v596_v42 = vpop.trf.xlu1  ;;  %v564_v44 = vpop.trf.xlu0  ;;  %v7012_v45 = vld [vmem:[#allocation2 + $0x58] sm:$0xff] }
 0x166   : > { %629 = vst.msk [vmem:[#allocation2 + $0xe8] sm:$0xff] %vm599_vm1, %v596_v42  ;;  %613 = vst.msk [vmem:[#allocation2 + $0x68] sm:$0xff] %vm599_vm1, %v564_v44  ;;  %6326 = vset.pattern.permute.xlu1 %v11624_v5  ;;  %3098 = vperm.xlu0 %6315, %v7012_v45  }
 0x167   : > { %3063 = vperm.xlu1 %6326, %v7009_v43  }
 0x169   : > { %v597_v46 = vpop.trf.xlu1  ;;  %v565_v48 = vpop.trf.xlu0  ;;  %v3021_v28 = vld [vmem:[#allocation2 + $0x60] sm:$0xff] }
 0x16a   : > { %630 = vst.msk [vmem:[#allocation2 + $0xf0] sm:$0xff] %vm599_vm1, %v597_v46  ;;  %614 = vst.msk [vmem:[#allocation2 + $0x70] sm:$0xff] %vm599_vm1, %v565_v48  ;;  %v7140_v48 = vld [vmem:[#allocation2 + $0xa8] sm:$0xff]  ;;  %v7257_v33 = vld [vmem:[#allocation2 + $0xe0] sm:$0xff] }
 0x16b   : > { %6327 = vset.pattern.permute.xlu1 %v11631_v6 }
 0x16c   : > { %3290 = vperm.xlu1 %6327, %v7009_v43  }
 0x16d   : > { %v598_v49 = vpop.trf.xlu1  ;;  %v566_v51 = vpop.trf.xlu0  ;;  %v7046_v60 = vld [vmem:[#allocation2 + $0xe8] sm:$0xff] }
 0x16e   : > { %631 = vst.msk [vmem:[#allocation2 + $0xf8] sm:$0xff] %vm599_vm1, %v598_v49  ;;  %615 = vst.msk [vmem:[#allocation2 + $0x78] sm:$0xff] %vm599_vm1, %v566_v51  ;;  %v7146_v51 = vld [vmem:[#allocation2 + $0xc0] sm:$0xff] }
 0x170   : > { %6328 = vset.pattern.permute.xlu1 %v11626_v4 }
 0x171   : > { %1063 = vperm.xlu1 %6328, %v7009_v43   ;;  %v7026_v52 = vld [vmem:[#allocation2 + $0x70] sm:$0xff] }
 0x172   : > { %3113 = vperm.xlu0 %6315, %v7026_v52  }
 0x175   : > { %6329 = vset.pattern.permute.xlu1 %v11631_v6  ;;  %v7115_v31 = vld [vmem:[#allocation2 + $0x78] sm:$0xff] }
 0x176   : > { %3294 = vperm.xlu1 %6329, %v6984_v23   ;;  %3128 = vperm.xlu0 %6315, %v7029_v53  }
 0x17a   : > { %6330 = vset.pattern.permute.xlu1 %v11628_v2  ;;  %3143 = vperm.xlu0 %6315, %v7034_v55  }
 0x17b   : > { %841 = vperm.xlu1 %6330, %v6984_v23  }
 0x17e   : > { %3158 = vperm.xlu0 %6315, %v7039_v56  }
 0x17f   : > { %6331 = vset.pattern.permute.xlu1 %v11624_v5 }
 0x180   : > { %3073 = vperm.xlu1 %6331, %v3015_v57  }
 0x182   : > { %3173 = vperm.xlu0 %6315, %v7043_v58  }
 0x184   : > { %6332 = vset.pattern.permute.xlu1 %v11628_v2 }
 0x185   : > { %846 = vperm.xlu1 %6332, %v3015_v57  }
 0x186   : > { %3188 = vperm.xlu0 %6315, %v7046_v60  }
 0x189   : > { %6333 = vset.pattern.permute.xlu1 %v11626_v4 }
 0x18a   : > { %1071 = vperm.xlu1 %6333, %v3015_v57   ;;  %6382 = vset.pattern.permute.xlu0 %v11626_v4 }
 0x18b   : > { %1047 = vperm.xlu0 %6382, %v6961_v59  }
 0x18e   : > { %6334 = vset.pattern.permute.xlu1 %v11624_v5 }
 0x18f   : > { %3078 = vperm.xlu1 %6334, %v7053_v61   ;;  %1059 = vperm.xlu0 %6382, %v6999_v36  }
 0x193   : > { %6335 = vset.pattern.permute.xlu1 %v11631_v6  ;;  %1067 = vperm.xlu0 %6382, %v6984_v23  }
 0x194   : > { %3302 = vperm.xlu1 %6335, %v7053_v61  }
 0x197   : > { %1079 = vperm.xlu0 %6382, %v6995_v35  }
 0x198   : > { %6336 = vset.pattern.permute.xlu1 %v11626_v4 }
 0x199   : > { %1075 = vperm.xlu1 %6336, %v7053_v61  }
 0x19b   : > { %1091 = vperm.xlu0 %6382, %v7012_v45  }
 0x19d   : > { %6337 = vset.pattern.permute.xlu1 %v11631_v6 }
 0x19e   : > { %3306 = vperm.xlu1 %6337, %v6995_v35  }
 0x19f   : > { %1103 = vperm.xlu0 %6382, %v7026_v52  }
 0x1a2   : > { %6338 = vset.pattern.permute.xlu1 %v11628_v2 }
 0x1a3   : > { %856 = vperm.xlu1 %6338, %v6995_v35   ;;  %1115 = vperm.xlu0 %6382, %v7029_v53   ;;  %v7125_v35 = vrot.slane %v6950_v47, %v6913_v18 }
 0x1a7   : > { %6339 = vset.pattern.permute.xlu1 %v11624_v5  ;;  %1127 = vperm.xlu0 %6382, %v7034_v55  }
 0x1a8   : > { %3088 = vperm.xlu1 %6339, %v3018_v0  }
 0x1ab   : > { %1139 = vperm.xlu0 %6382, %v7039_v56  }
 0x1ac   : > { %6340 = vset.pattern.permute.xlu1 %v11628_v2 }
 0x1ad   : > { %861 = vperm.xlu1 %6340, %v3018_v0  }
 0x1af   : > { %1151 = vperm.xlu0 %6382, %v7043_v58  }
 0x1b1   : > { %6341 = vset.pattern.permute.xlu1 %v11626_v4 }
 0x1b2   : > { %1083 = vperm.xlu1 %6341, %v3018_v0  }
 0x1b3   : > { %1163 = vperm.xlu0 %6382, %v7046_v60  }
 0x1b6   : > { %6342 = vset.pattern.permute.xlu1 %v11624_v5 }
 0x1b7   : > { %3093 = vperm.xlu1 %6342, %v7078_v3   ;;  %6386 = vset.pattern.permute.xlu0 %v11631_v6 }
 0x1b8   : > { %3274 = vperm.xlu0 %6386, %v6961_v59  }
 0x1b9   : > { %v7092_v16 = vpop.permute.xlu1 %816  ;;  %v3044_v19 = vpop.permute.xlu0 %3043 }
 0x1ba   : > { %v7095_v20 = vmul.f32 %v7085_v7, %v3044_v19  ;;  %v7098_v21 = vmul.f32 %v7089_v8, %v3044_v19  ;;  %v7152_v19 = vld [vmem:[#allocation2 + $0xd8] sm:$0xff] }
 0x1bb   : > { %6343 = vset.pattern.permute.xlu1 %v11631_v6 }
 0x1bc   : > { %3314 = vperm.xlu1 %6343, %v7078_v3   ;;  %3286 = vperm.xlu0 %6386, %v6999_v36  }
 0x1be   : > { %v7103_v22 = vpop.permute.xlu1 %3048 }
 0x1c0   : > { %6344 = vset.pattern.permute.xlu1 %v11626_v4  ;;  %3298 = vperm.xlu0 %6386, %v3015_v57  }
 0x1c1   : > { %1087 = vperm.xlu1 %6344, %v7078_v3   ;;  %v3054_v59 = vpop.permute.xlu0 %3053 }
 0x1c2   : > { %v3213_v23 = vmul.f32 %v7085_v7, %v3054_v59  ;;  %v3214_v26 = vmul.f32 %v7089_v8, %v3054_v59 }
 0x1c3   : > { %v7109_v27 = vpop.permute.xlu1 %3278 }
 0x1c4   : > { %3310 = vperm.xlu0 %6386, %v3018_v0  }
 0x1c5   : > { %6345 = vset.pattern.permute.xlu1 %v11631_v6 }
 0x1c6   : > { %3318 = vperm.xlu1 %6345, %v7012_v45  }
 0x1c8   : > { %v7113_v29 = vpop.permute.xlu1 %1051  ;;  %3322 = vperm.xlu0 %6386, %v3021_v28  }
 0x1c9   : > { %12472 = vst [vmem:[#allocation22_spill] sm:$0xff] %v7113_v29 }
 0x1ca   : > { %6346 = vset.pattern.permute.xlu1 %v11628_v2 }
 0x1cb   : > { %871 = vperm.xlu1 %6346, %v7012_v45  }
 0x1cc   : > { %3334 = vperm.xlu0 %6386, %v7115_v31  }
 0x1cd   : > { %v3283_v36 = vpop.permute.xlu1 %3282  ;;  %v3069_v37 = vpop.permute.xlu0 %3068 }
 0x1ce   : > { %v3413_v40 = vmul.f32 %v7121_v34, %v3283_v36  ;;  %v3414_v41 = vmul.f32 %v7125_v35, %v3283_v36  ;;  %v3219_v42 = vmul.f32 %v7085_v7, %v3069_v37  ;;  %v3220_v44 = vmul.f32 %v7089_v8, %v3069_v37  ;;  %v3022_v36 = vld [vmem:[#allocation2 + $0x68] sm:$0xff]  ;;  %v7163_v37 = vld [vmem:[#allocation2 + $0xf0] sm:$0xff] }
 0x1cf   : > { %6347 = vset.pattern.permute.xlu1 %v11624_v5  ;;  %12477 = vst [vmem:[#allocation27_spill] sm:$0xff] %v7163_v37 }
 0x1d0   : > { %v7135_v45 = vadd.f32 %v3413_v40, %v3213_v23  ;;  %v7137_v46 = vadd.f32 %v3414_v41, %v3214_v26  ;;  %3103 = vperm.xlu1 %6347, %v3021_v28   ;;  %3346 = vperm.xlu0 %6386, %v7128_v39  }
 0x1d2   : > { %12473 = vst [vmem:[#allocation23_spill] sm:$0xff] %v7135_v45  ;;  %12474 = vst [vmem:[#allocation24_spill] sm:$0xff] %v7137_v46  ;;  %v7142_v49 = vpop.permute.xlu1 %826 }
 0x1d3   : > { %12475 = vst [vmem:[#allocation25_spill] sm:$0xff] %v7142_v49 }
 0x1d4   : > { %6348 = vset.pattern.permute.xlu1 %v11628_v2  ;;  %3358 = vperm.xlu0 %6386, %v7140_v48  }
 0x1d5   : > { %876 = vperm.xlu1 %6348, %v3021_v28  }
 0x1d7   : > { %v7148_v57 = vpop.permute.xlu1 %1055 }
 0x1d8   : > { %12476 = vst [vmem:[#allocation26_spill] sm:$0xff] %v7148_v57  ;;  %3370 = vperm.xlu0 %6386, %v7146_v51  }
 0x1d9   : > { %6349 = vset.pattern.permute.xlu1 %v11626_v4  ;;  %v3084_v0 = vpop.permute.xlu0 %3083 }
 0x1da   : > { %v7155_v59 = vmul.f32 %v7085_v7, %v3084_v0  ;;  %v7158_v23 = vmul.f32 %v7089_v8, %v3084_v0  ;;  %1095 = vperm.xlu1 %6349, %v3021_v28  }
 0x1dc   : > { %v7160_v26 = vpop.permute.xlu1 %3058  ;;  %3382 = vperm.xlu0 %6386, %v7152_v19  }
 0x1de   : > { %6350 = vset.pattern.permute.xlu1 %v11624_v5 }
 0x1df   : > { %3108 = vperm.xlu1 %6350, %v3022_v36  }
 0x1e0   : > { %3394 = vperm.xlu0 %6386, %v7163_v37  }
 0x1e1   : > { %v7167_v40 = vpop.permute.xlu1 %831 }
 0x1e3   : > { %6351 = vset.pattern.permute.xlu1 %v11631_v6 }
 0x1e4   : > { %3326 = vperm.xlu1 %6351, %v3022_v36   ;;  %6388 = vset.pattern.permute.xlu0 %v11628_v2 }
 0x1e5   : > { %821 = vperm.xlu0 %6388, %v6967_v62   ;;  %v3099_v28 = vpop.permute.xlu0 %3098 }
 0x1e6   : > { %v7173_v41 = vmul.f32 %v7085_v7, %v3099_v28  ;;  %v7176_v0 = vmul.f32 %v7089_v8, %v3099_v28  ;;  %v7178_v12 = vpop.permute.xlu1 %3063 }
 0x1e8   : > { %6352 = vset.pattern.permute.xlu1 %v11626_v4 }
 0x1e9   : > { %1099 = vperm.xlu1 %6352, %v3022_v36   ;;  %836 = vperm.xlu0 %6388, %v7009_v43  }
 0x1eb   : > { %v7182_v10 = vpop.permute.xlu1 %3290 }
 0x1ed   : > { %6353 = vset.pattern.permute.xlu1 %v11624_v5  ;;  %851 = vperm.xlu0 %6388, %v7053_v61  }
 0x1ee   : > { %3118 = vperm.xlu1 %6353, %v7115_v31  }
 0x1f0   : > { %v7187_v62 = vpop.permute.xlu1 %1063 }
 0x1f1   : > { %12478 = vst [vmem:[#allocation28_spill] sm:$0xff] %v7187_v62  ;;  %866 = vperm.xlu0 %6388, %v7078_v3   ;;  %v3114_v28 = vpop.permute.xlu0 %3113 }
 0x1f2   : > { %v7191_v11 = vmul.f32 %v7085_v7, %v3114_v28  ;;  %v7194_v63 = vmul.f32 %v7089_v8, %v3114_v28  ;;  %6354 = vset.pattern.permute.xlu1 %v11631_v6 }
 0x1f3   : > { %3330 = vperm.xlu1 %6354, %v7026_v52  }
 0x1f5   : > { %v3295_v43 = vpop.permute.xlu1 %3294  ;;  %881 = vperm.xlu0 %6388, %v3022_v36   ;;  %v3129_v61 = vpop.permute.xlu0 %3128  ;;  %v7212_v36 = vld [vmem:[#allocation2 + $0x80] sm:$0xff] }
 0x1f6   : > { %v3419_v5 = vmul.f32 %v7121_v34, %v3295_v43  ;;  %v3420_v4 = vmul.f32 %v7125_v35, %v3295_v43  ;;  %v7201_v3 = vmul.f32 %v7085_v7, %v3129_v61  ;;  %v7204_v2 = vmul.f32 %v7089_v8, %v3129_v61 }
 0x1f7   : > { %6355 = vset.pattern.permute.xlu1 %v12479_v9 }
 0x1f8   : > { %v7207_v28 = vadd.f32 %v3419_v5, %v3219_v42  ;;  %v7209_v6 = vadd.f32 %v3420_v4, %v3220_v44  ;;  %886 = vperm.xlu1 %6355, %v7026_v52   ;;  %v7222_v5 = vld [vmem:[#allocation2 + $0x98] sm:$0xff] }
 0x1f9   : > { %896 = vperm.xlu0 %6388, %v7212_v36   ;;  %v3144_v18 = vpop.permute.xlu0 %3143 }
 0x1fa   : > { %12480 = vst [vmem:[#allocation29_spill] sm:$0xff] %v7207_v28  ;;  %12481 = vst [vmem:[#allocation30_spill] sm:$0xff] %v7209_v6  ;;  %v7216_v43 = vmul.f32 %v7085_v7, %v3144_v18  ;;  %v7219_v13 = vmul.f32 %v7089_v8, %v3144_v18  ;;  %v842_v61 = vpop.permute.xlu1 %841  ;;  %v7234_v18 = vld [vmem:[#allocation2 + $0xb0] sm:$0xff] }
 0x1fc   : > { %12482 = vst [vmem:[#allocation31_spill] sm:$0xff] %v7216_v43  ;;  %12483 = vst [vmem:[#allocation32_spill] sm:$0xff] %v7219_v13  ;;  %891 = vperm.xlu1 %6355, %v7115_v31  }
 0x1fd   : > { %911 = vperm.xlu0 %6388, %v7222_v5   ;;  %v3159_v4 = vpop.permute.xlu0 %3158 }
 0x1fe   : > { %v7226_v52 = vmul.f32 %v7085_v7, %v3159_v4  ;;  %v7229_v42 = vmul.f32 %v7089_v8, %v3159_v4  ;;  %v7246_v4 = vld [vmem:[#allocation2 + $0xc8] sm:$0xff] }
 0x1ff   : > { %v7231_v44 = vpop.permute.xlu1 %3073 }
 0x200   : > { %12484 = vst [vmem:[#allocation33_spill] sm:$0xff] %v7226_v52  ;;  %12485 = vst [vmem:[#allocation34_spill] sm:$0xff] %v7229_v42  ;;  %6356 = vset.pattern.permute.xlu1 %v12487_v54 }
 0x201   : > { %12486 = vst [vmem:[#allocation35_spill] sm:$0xff] %v7231_v44  ;;  %926 = vperm.xlu0 %6388, %v7234_v18   ;;  %1107 = vperm.xlu1 %6356, %v7115_v31   ;;  %v3174_v32 = vpop.permute.xlu0 %3173 }
 0x202   : > { %v7239_v38 = vmul.f32 %v7085_v7, %v3174_v32  ;;  %v7242_v15 = vmul.f32 %v7089_v8, %v3174_v32  ;;  %v7261_v32 = vrot.slane %v6953_v50, %v6904_v14 }
 0x204   : > { %12488 = vst [vmem:[#allocation36_spill] sm:$0xff] %v7239_v38  ;;  %12489 = vst [vmem:[#allocation37_spill] sm:$0xff] %v7242_v15  ;;  %v7244_v17 = vpop.permute.xlu1 %846  ;;  %v7265_v15 = vrot.slane %v6950_v47, %v6904_v14  ;;  %v7269_v38 = vrot.slane %v6953_v50, %v6892_v1  ;;  %v982_v29 = vmul.f32 %v7261_v32, %v7092_v16 }
 0x205   : > { %12490 = vst [vmem:[#allocation38_spill] sm:$0xff] %v7244_v17  ;;  %941 = vperm.xlu0 %6388, %v7246_v4   ;;  %6357 = vset.pattern.permute.xlu1 %v12491_v24  ;;  %v3189_v30 = vpop.permute.xlu0 %3188 }
 0x206   : > { %v7251_v25 = vmul.f32 %v7085_v7, %v3189_v30  ;;  %v7254_v31 = vmul.f32 %v7089_v8, %v3189_v30  ;;  %3123 = vperm.xlu1 %6357, %v7212_v36   ;;  %v7273_v30 = vrot.slane %v6950_v47, %v6892_v1  ;;  %v983_v14 = vmul.f32 %v7265_v15, %v7092_v16  ;;  %v7286_v47 = vld [vmem:[#allocation2 + $0xf8] sm:$0xff]  ;;  %v7298_v16 = vld [vmem:[%s11615_s3 + $0x8] sm:$0xf] }
 0x207   : > { %12496 = vst [vmem:[#allocation42_spill] sm:$0xff] %v7286_v47  ;;  %12499 = vst [vmem:[#allocation45_spill] sm:$0xff] %v7298_v16  ;;  %v989_v44 = vmul.f32 %v7265_v15, %v7167_v40  ;;  %v993_v42 = vmul.f32 %v7265_v15, %v842_v61 }
 0x208   : > { %12492 = vst [vmem:[#allocation39_spill] sm:$0xff] %v7251_v25  ;;  %12493 = vst [vmem:[#allocation40_spill] sm:$0xff] %v7254_v31  ;;  %v12495_v25 = vmov 3  }
 0x209   : > { %v7275_v31 = vpop.permute.xlu1 %1071  ;;  %956 = vperm.xlu0 %6388, %v7257_v33  }
 0x20a   : > { %12494 = vst [vmem:[#allocation41_spill] sm:$0xff] %v7275_v31  ;;  %6358 = vset.pattern.permute.xlu1 %v12495_v25  ;;  %v1048_v62 = vpop.permute.xlu0 %1047 }
 0x20b   : > { %v1182_v50 = vmul.f32 %v7269_v38, %v1048_v62  ;;  %v1183_v49 = vmul.f32 %v7273_v30, %v1048_v62  ;;  %3338 = vperm.xlu1 %6358, %v7212_v36   ;;  %v988_v62 = vmul.f32 %v7261_v32, %v7167_v40 }
 0x20d   : > { %v7288_v1 = vadd.f32 %v1182_v50, %v982_v29  ;;  %v7290_v57 = vadd.f32 %v1183_v49, %v983_v14  ;;  %971 = vperm.xlu0 %6388, %v7286_v47  }
 0x20e   : > { %v7293_v17 = vpop.permute.xlu1 %3078  ;;  %v1060_v31 = vpop.permute.xlu0 %1059 }
 0x20f   : > { %12497 = vst [vmem:[#allocation43_spill] sm:$0xff] %v7288_v1  ;;  %12498 = vst [vmem:[#allocation44_spill] sm:$0xff] %v7290_v57  ;;  %v1188_v29 = vmul.f32 %v7269_v38, %v1060_v31  ;;  %v1189_v14 = vmul.f32 %v7273_v30, %v1060_v31  ;;  %3342 = vperm.xlu1 %6358, %v7029_v53   ;;  %v992_v1 = vmul.f32 %v7261_v32, %v842_v61 }
 0x211   : > { %v7307_v49 = vadd.f32 %v1188_v29, %v988_v62  ;;  %v7309_v50 = vadd.f32 %v1189_v14, %v989_v44  ;;  %493 = vperm.xlu0 %6388, %v7298_v16  }
 0x212   : > { %v1068_v57 = vpop.permute.xlu0 %1067 }
 0x213   : > { %12500 = vst [vmem:[#allocation46_spill] sm:$0xff] %v7307_v49  ;;  %12501 = vst [vmem:[#allocation47_spill] sm:$0xff] %v7309_v50  ;;  %v1192_v52 = vmul.f32 %v7269_v38, %v1068_v57  ;;  %v1193_v40 = vmul.f32 %v7273_v30, %v1068_v57  ;;  %v7316_v13 = vpop.permute.xlu1 %3302  ;;  %6359 = vset.pattern.permute.xlu1 %v12479_v9 }
 0x214   : > { %901 = vperm.xlu1 %6359, %v7029_v53   ;;  %v3423_v37 = vmul.f32 %v7121_v34, %v7316_v13 }
 0x215   : > { %v7320_v31 = vadd.f32 %v1192_v52, %v992_v1  ;;  %v7322_v44 = vadd.f32 %v1193_v40, %v993_v42  ;;  %6392 = vset.pattern.permute.xlu0 %v12491_v24 }
 0x216   : > { %507 = vperm.xlu0 %6392, %v7298_v16   ;;  %v1080_v62 = vpop.permute.xlu0 %1079 }
 0x217   : > { %12502 = vst [vmem:[#allocation48_spill] sm:$0xff] %v7320_v31  ;;  %12503 = vst [vmem:[#allocation49_spill] sm:$0xff] %v7322_v44  ;;  %v1198_v61 = vmul.f32 %v7269_v38, %v1080_v62  ;;  %v1199_v29 = vmul.f32 %v7273_v30, %v1080_v62 }
 0x218   : > { %v7328_v57 = vpop.permute.xlu1 %1075  ;;  %6360 = vset.pattern.permute.xlu1 %v12487_v54 }
 0x219   : > { %12504 = vst [vmem:[#allocation50_spill] sm:$0xff] %v7328_v57  ;;  %1111 = vperm.xlu1 %6360, %v7212_v36  }
 0x21a   : > { %v1092_v53 = vpop.permute.xlu0 %1091  ;;  %6395 = vset.pattern.permute.xlu0 %v12479_v9 }
 0x21b   : > { %v7334_v1 = vmul.f32 %v7269_v38, %v1092_v53  ;;  %v7337_v52 = vmul.f32 %v7273_v30, %v1092_v53 }
 0x21d   : > { %v3307_v42 = vpop.permute.xlu1 %3306  ;;  %6361 = vset.pattern.permute.xlu1 %v12491_v24 }
 0x21e   : > { %v3425_v14 = vmul.f32 %v7121_v34, %v3307_v42  ;;  %v3426_v40 = vmul.f32 %v7125_v35, %v3307_v42  ;;  %3133 = vperm.xlu1 %6361, %v7128_v39   ;;  %v1104_v62 = vpop.permute.xlu0 %1103 }
 0x21f   : > { %v7344_v36 = vmul.f32 %v7269_v38, %v1104_v62  ;;  %v7347_v57 = vmul.f32 %v7273_v30, %v1104_v62 }
 0x220   : > { %v7350_v44 = vadd.f32 %v3425_v14, %v7155_v59  ;;  %v7353_v53 = vadd.f32 %v3426_v40, %v7158_v23 }
 0x222   : > { %12505 = vst [vmem:[#allocation51_spill] sm:$0xff] %v7350_v44  ;;  %12506 = vst [vmem:[#allocation52_spill] sm:$0xff] %v7353_v53  ;;  %v857_v31 = vpop.permute.xlu1 %856  ;;  %3138 = vperm.xlu1 %6361, %v7222_v5   ;;  %v1116_v50 = vpop.permute.xlu0 %1115 }
 0x223   : > { %v998_v42 = vmul.f32 %v7261_v32, %v857_v31  ;;  %v999_v49 = vmul.f32 %v7265_v15, %v857_v31  ;;  %v7359_v16 = vmul.f32 %v7269_v38, %v1116_v50  ;;  %v7362_v62 = vmul.f32 %v7273_v30, %v1116_v50 }
 0x225   : > { %v7364_v43 = vadd.f32 %v1198_v61, %v998_v42  ;;  %v7366_v59 = vadd.f32 %v1199_v29, %v999_v49  ;;  %v3411_v61 = vmul.f32 %v7121_v34, %v7109_v27  ;;  %v3412_v29 = vmul.f32 %v7125_v35, %v7109_v27 }
 0x226   : > { %6362 = vset.pattern.permute.xlu1 %v12495_v25  ;;  %v1128_v23 = vpop.permute.xlu0 %1127  ;;  %v3217_v27 = vmul.f32 %v7085_v7, %v7178_v12 }
 0x227   : > { %12507 = vst [vmem:[#allocation53_spill] sm:$0xff] %v7364_v43  ;;  %12508 = vst [vmem:[#allocation54_spill] sm:$0xff] %v7366_v59  ;;  %v7370_v14 = vmul.f32 %v7269_v38, %v1128_v23  ;;  %v7373_v40 = vmul.f32 %v7273_v30, %v1128_v23  ;;  %v7375_v31 = vpop.permute.xlu1 %3088  ;;  %3350 = vperm.xlu1 %6362, %v7222_v5   ;;  %v3417_v23 = vmul.f32 %v7121_v34, %v7182_v10 }
 0x228   : > { %12511 = vst [vmem:[#allocation57_spill] sm:$0xff] %v7375_v31  ;;  %v3418_v59 = vmul.f32 %v7125_v35, %v7182_v10  ;;  %v3212_v43 = vmul.f32 %v7089_v8, %v7103_v22 }
 0x229   : > { %12509 = vst [vmem:[#allocation55_spill] sm:$0xff] %v7370_v14  ;;  %12510 = vst [vmem:[#allocation56_spill] sm:$0xff] %v7373_v40 }
 0x22a   : > { %v1140_v47 = vpop.permute.xlu0 %1139  ;;  %v7412_v40 = vadd.f32 %v3412_v29, %v3212_v43  ;;  %v3224_v29 = vmul.f32 %v7089_v8, %v7293_v17 }
 0x22b   : > { %v7379_v50 = vmul.f32 %v7269_v38, %v1140_v47  ;;  %v7382_v49 = vmul.f32 %v7273_v30, %v1140_v47  ;;  %6363 = vset.pattern.permute.xlu1 %v12479_v9  ;;  %v3211_v47 = vmul.f32 %v7085_v7, %v7103_v22  ;;  %v7415_v22 = vadd.f32 %v3417_v23, %v3217_v27 }
 0x22c   : > { %v7389_v42 = vpop.permute.xlu1 %861  ;;  %906 = vperm.xlu1 %6363, %v7128_v39   ;;  %12517 = vst [vmem:[#allocation63_spill] sm:$0xff] %v7412_v40 }
 0x22d   : > { %12512 = vst [vmem:[#allocation58_spill] sm:$0xff] %v7379_v50  ;;  %12513 = vst [vmem:[#allocation59_spill] sm:$0xff] %v7382_v49  ;;  %v7410_v10 = vadd.f32 %v3411_v61, %v3211_v47 }
 0x22e   : > { %12514 = vst [vmem:[#allocation60_spill] sm:$0xff] %v7389_v42  ;;  %v1152_v31 = vpop.permute.xlu0 %1151  ;;  %v3218_v42 = vmul.f32 %v7089_v8, %v7178_v12  ;;  %12518 = vst [vmem:[#allocation64_spill] sm:$0xff] %v7415_v22  ;;  %v3424_v12 = vmul.f32 %v7125_v35, %v7316_v13 }
 0x22f   : > { %v7405_v49 = vmul.f32 %v7269_v38, %v1152_v31  ;;  %v7408_v50 = vmul.f32 %v7273_v30, %v1152_v31  ;;  %12516 = vst [vmem:[#allocation62_spill] sm:$0xff] %v7410_v10  ;;  %v3537_v43 = vmax.f32 %v7410_v10, %v7135_v45  ;;  %v3574_v31 = vmax.f32 %v7412_v40, %v7137_v46 }
 0x230   : > { %6364 = vset.pattern.permute.xlu1 %v12487_v54  ;;  %v7417_v14 = vadd.f32 %v3418_v59, %v3218_v42  ;;  %v3223_v59 = vmul.f32 %v7085_v7, %v7293_v17  ;;  %v7444_v27 = vadd.f32 %v3424_v12, %v3224_v29 }
 0x231   : > { %12515 = vst [vmem:[#allocation61_spill] sm:$0xff] %v7405_v49  ;;  %v7423_v49 = vpop.permute.xlu1 %1083  ;;  %1119 = vperm.xlu1 %6364, %v7128_v39   ;;  %v3538_v39 = vmax.f32 %v7415_v22, %v3537_v43 }
 0x232   : > { %12519 = vst [vmem:[#allocation65_spill] sm:$0xff] %v7417_v14  ;;  %v1164_v61 = vpop.permute.xlu0 %1163  ;;  %v3575_v23 = vmax.f32 %v7417_v14, %v3574_v31  ;;  %v7442_v47 = vadd.f32 %v3423_v37, %v3223_v59  ;;  %12523 = vst [vmem:[#allocation69_spill] sm:$0xff] %v7444_v27 }
 0x233   : > { %v7435_v42 = vmul.f32 %v7269_v38, %v1164_v61  ;;  %v7438_v13 = vmul.f32 %v7273_v30, %v1164_v61  ;;  %v3540_v45 = vmax.f32 %v3538_v39, %v7207_v28 }
 0x234   : > { %12522 = vst [vmem:[#allocation68_spill] sm:$0xff] %v7442_v47  ;;  %v3577_v17 = vmax.f32 %v3575_v23, %v7209_v6 }
 0x235   : > { %12520 = vst [vmem:[#allocation66_spill] sm:$0xff] %v7435_v42  ;;  %12521 = vst [vmem:[#allocation67_spill] sm:$0xff] %v7438_v13  ;;  %1123 = vperm.xlu1 %6364, %v7222_v5   ;;  %v3539_v43 = vmax.f32 %v7442_v47, %v3540_v45 }
 0x236   : > { %v3094_v46 = vpop.permute.xlu1 %3093  ;;  %v3576_v31 = vmax.f32 %v7444_v27, %v3577_v17 }
 0x237   : > { %v3275_v40 = vpop.permute.xlu0 %3274  ;;  %v3541_v12 = vmax.f32 %v3539_v43, %v7350_v44  ;;  %v3229_v45 = vmul.f32 %v7085_v7, %v3094_v46  ;;  %v3230_v39 = vmul.f32 %v7089_v8, %v3094_v46 }
 0x238   : > { %v3409_v10 = vmul.f32 %v7121_v34, %v3275_v40  ;;  %v3410_v61 = vmul.f32 %v7125_v35, %v3275_v40  ;;  %v3578_v59 = vmax.f32 %v3576_v31, %v7353_v53 }
 0x239   : > { %6365 = vset.pattern.permute.xlu1 %v12491_v24 }
 0x23a   : > { %v7455_v37 = vadd.f32 %v3409_v10, %v7095_v20  ;;  %v7458_v5 = vadd.f32 %v3410_v61, %v7098_v21  ;;  %3148 = vperm.xlu1 %6365, %v7140_v48   ;;  %v3215_v21 = vmul.f32 %v7085_v7, %v7160_v26  ;;  %v3216_v10 = vmul.f32 %v7089_v8, %v7160_v26 }
 0x23b   : > { %v3315_v29 = vpop.permute.xlu1 %3314  ;;  %v3287_v40 = vpop.permute.xlu0 %3286 }
 0x23c   : > { %12524 = vst [vmem:[#allocation70_spill] sm:$0xff] %v7455_v37  ;;  %12525 = vst [vmem:[#allocation71_spill] sm:$0xff] %v7458_v5  ;;  %v3429_v23 = vmul.f32 %v7121_v34, %v3315_v29  ;;  %v3430_v20 = vmul.f32 %v7125_v35, %v3315_v29  ;;  %v3415_v17 = vmul.f32 %v7121_v34, %v3287_v40 }
 0x23d   : > { %v3416_v61 = vmul.f32 %v7125_v35, %v3287_v40  ;;  %v3543_v43 = vmax.f32 %v3541_v12, %v7455_v37  ;;  %v3580_v31 = vmax.f32 %v3578_v59, %v7458_v5 }
 0x23e   : > { %v7475_v53 = vadd.f32 %v3429_v23, %v3229_v45  ;;  %v7477_v46 = vadd.f32 %v3430_v20, %v3230_v39  ;;  %6366 = vset.pattern.permute.xlu1 %v12495_v25  ;;  %v7483_v44 = vadd.f32 %v3415_v17, %v3215_v21 }
 0x23f   : > { %3354 = vperm.xlu1 %6366, %v7034_v55   ;;  %v7485_v27 = vadd.f32 %v3416_v61, %v3216_v10  ;;  %v7495_v45 = vpop.permute.xlu0 %3298 }
 0x240   : > { %12526 = vst [vmem:[#allocation72_spill] sm:$0xff] %v7475_v53  ;;  %12527 = vst [vmem:[#allocation73_spill] sm:$0xff] %v7477_v46  ;;  %v3542_v29 = vmax.f32 %v7475_v53, %v3543_v43  ;;  %v3579_v26 = vmax.f32 %v7477_v46, %v3580_v31  ;;  %v7487_v40 = vpop.permute.xlu1 %1087 }
 0x241   : > { %12528 = vst [vmem:[#allocation74_spill] sm:$0xff] %v7483_v44  ;;  %12529 = vst [vmem:[#allocation75_spill] sm:$0xff] %v7485_v27 }
 0x242   : > { %v7490_v12 = vmax.f32 %v3542_v29, %v7483_v44  ;;  %v7493_v59 = vmax.f32 %v3579_v26, %v7485_v27 }
 0x243   : > { %6367 = vset.pattern.permute.xlu1 %v12479_v9  ;;  %v7501_v21 = vpop.permute.xlu0 %3310 }
 0x244   : > { %916 = vperm.xlu1 %6367, %v7034_v55  }
 0x245   : > { %v3319_v39 = vpop.permute.xlu1 %3318 }
 0x246   : > { %v3431_v23 = vmul.f32 %v7121_v34, %v3319_v39  ;;  %v3432_v20 = vmul.f32 %v7125_v35, %v3319_v39 }
 0x248   : > { %v7504_v10 = vadd.f32 %v3431_v23, %v7173_v41  ;;  %v7507_v17 = vadd.f32 %v3432_v20, %v7176_v0  ;;  %921 = vperm.xlu1 %6367, %v7140_v48   ;;  %v7520_v41 = vpop.permute.xlu0 %3322 }
 0x24a   : > { %12530 = vst [vmem:[#allocation76_spill] sm:$0xff] %v7504_v10  ;;  %12531 = vst [vmem:[#allocation77_spill] sm:$0xff] %v7507_v17  ;;  %v872_v61 = vpop.permute.xlu1 %871 }
 0x24b   : > { %v1004_v43 = vmul.f32 %v7261_v32, %v872_v61  ;;  %v1005_v55 = vmul.f32 %v7265_v15, %v872_v61 }
 0x24c   : > { %6368 = vset.pattern.permute.xlu1 %v12487_v54  ;;  %v7526_v26 = vpop.permute.xlu0 %3334 }
 0x24d   : > { %v7514_v31 = vadd.f32 %v7334_v1, %v1004_v43  ;;  %v7517_v29 = vadd.f32 %v7337_v52, %v1005_v55  ;;  %1131 = vperm.xlu1 %6368, %v7140_v48  }
 0x24f   : > { %12532 = vst [vmem:[#allocation78_spill] sm:$0xff] %v7514_v31  ;;  %12533 = vst [vmem:[#allocation79_spill] sm:$0xff] %v7517_v29  ;;  %v7522_v0 = vpop.permute.xlu1 %3103 }
 0x250   : > { %v7534_v52 = vpop.permute.xlu0 %3346 }
 0x251   : > { %6369 = vset.pattern.permute.xlu1 %v12491_v24 }
 0x252   : > { %3153 = vperm.xlu1 %6369, %v7234_v18  }
 0x254   : > { %v7528_v39 = vpop.permute.xlu1 %876  ;;  %v7540_v23 = vpop.permute.xlu0 %3358 }
 0x256   : > { %6370 = vset.pattern.permute.xlu1 %v12495_v25 }
 0x257   : > { %3362 = vperm.xlu1 %6370, %v7234_v18  }
 0x258   : > { %v7547_v61 = vpop.permute.xlu0 %3370 }
 0x259   : > { %v7532_v1 = vpop.permute.xlu1 %1095 }
 0x25b   : > { %3366 = vperm.xlu1 %6370, %v7039_v56  }
 0x25c   : > { %v7553_v55 = vpop.permute.xlu0 %3382 }
 0x25d   : > { %12535 = vst [vmem:[#allocation81_spill] sm:$0xff] %v7553_v55 }
 0x25e   : > { %v7537_v48 = vpop.permute.xlu1 %3108 }
 0x25f   : > { %6371 = vset.pattern.permute.xlu1 %v12479_v9 }
 0x260   : > { %931 = vperm.xlu1 %6371, %v7039_v56   ;;  %v7558_v56 = vpop.permute.xlu0 %3394 }
 0x261   : > { %12536 = vst [vmem:[#allocation82_spill] sm:$0xff] %v7558_v56 }
 0x263   : > { %v7543_v20 = vpop.permute.xlu1 %3326 }
 0x264   : > { %6372 = vset.pattern.permute.xlu1 %v12487_v54  ;;  %v7571_v22 = vpop.permute.xlu0 %821 }
 0x265   : > { %1135 = vperm.xlu1 %6372, %v7234_v18  }
 0x268   : > { %v7549_v43 = vpop.permute.xlu1 %1099 }
 0x269   : > { %12534 = vst [vmem:[#allocation80_spill] sm:$0xff] %v7549_v43  ;;  %6373 = vset.pattern.permute.xlu1 %v12491_v24 }
 0x26a   : > { %3163 = vperm.xlu1 %6373, %v7146_v51  }
 0x26d   : > { %v7555_v46 = vpop.permute.xlu1 %3118 }
 0x26e   : > { %3168 = vperm.xlu1 %6373, %v7246_v4  }
 0x272   : > { %v3331_v53 = vpop.permute.xlu1 %3330  ;;  %6374 = vset.pattern.permute.xlu1 %v12495_v25 }
 0x273   : > { %v3437_v18 = vmul.f32 %v7121_v34, %v3331_v53  ;;  %v3438_v47 = vmul.f32 %v7125_v35, %v3331_v53  ;;  %3374 = vperm.xlu1 %6374, %v7246_v4  }
 0x275   : > { %v7565_v6 = vadd.f32 %v3437_v18, %v7191_v11  ;;  %v7568_v28 = vadd.f32 %v3438_v47, %v7194_v63  ;;  %v7586_v63 = vpop.permute.xlu0 %836 }
 0x276   : > { %12542 = vst [vmem:[#allocation88_spill] sm:$0xff] %v7586_v63 }
 0x277   : > { %12537 = vst [vmem:[#allocation83_spill] sm:$0xff] %v7565_v6  ;;  %12538 = vst [vmem:[#allocation84_spill] sm:$0xff] %v7568_v28  ;;  %v887_v14 = vpop.permute.xlu1 %886  ;;  %6375 = vset.pattern.permute.xlu1 %v12479_v9 }
 0x278   : > { %v1010_v27 = vmul.f32 %v7261_v32, %v887_v14  ;;  %v1011_v44 = vmul.f32 %v7265_v15, %v887_v14  ;;  %936 = vperm.xlu1 %6375, %v7146_v51  }
 0x279   : > { %v7591_v14 = vpop.permute.xlu0 %851 }
 0x27a   : > { %v7577_v53 = vadd.f32 %v7344_v36, %v1010_v27  ;;  %v7580_v11 = vadd.f32 %v7347_v57, %v1011_v44  ;;  %12544 = vst [vmem:[#allocation90_spill] sm:$0xff] %v7591_v14 }
 0x27b   : > { %v7582_v18 = vpop.permute.xlu1 %891 }
 0x27c   : > { %12539 = vst [vmem:[#allocation85_spill] sm:$0xff] %v7577_v53  ;;  %12540 = vst [vmem:[#allocation86_spill] sm:$0xff] %v7580_v11  ;;  %6376 = vset.pattern.permute.xlu1 %v12487_v54 }
 0x27d   : > { %12541 = vst [vmem:[#allocation87_spill] sm:$0xff] %v7582_v18  ;;  %1143 = vperm.xlu1 %6376, %v7146_v51   ;;  %v7597_v27 = vpop.permute.xlu0 %866 }
 0x27e   : > { %12545 = vst [vmem:[#allocation91_spill] sm:$0xff] %v7597_v27  ;;  %v12586_v27 = vld [vmem:[#allocation59_spill] sm:$0xff] }
 0x280   : > { %v7588_v47 = vpop.permute.xlu1 %1107 }
 0x281   : > { %12543 = vst [vmem:[#allocation89_spill] sm:$0xff] %v7588_v47  ;;  %1147 = vperm.xlu1 %6376, %v7246_v4   ;;  %v7610_v13 = vpop.permute.xlu0 %881 }
 0x282   : > { %12548 = vst [vmem:[#allocation94_spill] sm:$0xff] %v7610_v13  ;;  %v12561_v13 = vld [vmem:[#allocation27_spill] sm:$0xff] }
 0x285   : > { %6377 = vset.pattern.permute.xlu1 %v12491_v24  ;;  %v3124_v36 = vpop.permute.xlu1 %3123 }
 0x286   : > { %v3241_v44 = vmul.f32 %v7085_v7, %v3124_v36  ;;  %v3242_v57 = vmul.f32 %v7089_v8, %v3124_v36  ;;  %3178 = vperm.xlu1 %6377, %v7152_v19  }
 0x28a   : > { %6378 = vset.pattern.permute.xlu1 %v12495_v25  ;;  %v3339_v51 = vpop.permute.xlu1 %3338 }
 0x28b   : > { %v3441_v5 = vmul.f32 %v7121_v34, %v3339_v51  ;;  %v3442_v4 = vmul.f32 %v7125_v35, %v3339_v51  ;;  %3378 = vperm.xlu1 %6378, %v7043_v58  }
 0x28d   : > { %v7603_v37 = vadd.f32 %v3441_v5, %v3241_v44  ;;  %v7605_v56 = vadd.f32 %v3442_v4, %v3242_v57 }
 0x28e   : > { %v3343_v11 = vpop.permute.xlu1 %3342 }
 0x28f   : > { %12546 = vst [vmem:[#allocation92_spill] sm:$0xff] %v7603_v37  ;;  %12547 = vst [vmem:[#allocation93_spill] sm:$0xff] %v7605_v56  ;;  %v3443_v36 = vmul.f32 %v7121_v34, %v3343_v11  ;;  %v3444_v53 = vmul.f32 %v7125_v35, %v3343_v11  ;;  %6379 = vset.pattern.permute.xlu1 %v12479_v9  ;;  %v897_v11 = vpop.permute.xlu0 %896 }
 0x290   : > { %946 = vperm.xlu1 %6379, %v7043_v58  }
 0x291   : > { %v7614_v42 = vadd.f32 %v3443_v36, %v7201_v3  ;;  %v7617_v51 = vadd.f32 %v3444_v53, %v7204_v2  ;;  %v1014_v2 = vmul.f32 %v7261_v32, %v897_v11  ;;  %v1015_v3 = vmul.f32 %v7265_v15, %v897_v11 }
 0x293   : > { %12549 = vst [vmem:[#allocation95_spill] sm:$0xff] %v7614_v42  ;;  %12550 = vst [vmem:[#allocation96_spill] sm:$0xff] %v7617_v51  ;;  %v902_v5 = vpop.permute.xlu1 %901 }
 0x294   : > { %v1016_v44 = vmul.f32 %v7261_v32, %v902_v5  ;;  %v1017_v57 = vmul.f32 %v7265_v15, %v902_v5  ;;  %951 = vperm.xlu1 %6379, %v7152_v19  }
 0x296   : > { %v7623_v4 = vadd.f32 %v7359_v16, %v1016_v44  ;;  %v7626_v18 = vadd.f32 %v7362_v62, %v1017_v57  ;;  %v3445_v44 = vmul.f32 %v7121_v34, %v7534_v52  ;;  %v3446_v57 = vmul.f32 %v7125_v35, %v7534_v52 }
 0x298   : > { %12551 = vst [vmem:[#allocation97_spill] sm:$0xff] %v7623_v4  ;;  %12552 = vst [vmem:[#allocation98_spill] sm:$0xff] %v7626_v18  ;;  %6380 = vset.pattern.permute.xlu1 %v12487_v54  ;;  %v1112_v58 = vpop.permute.xlu1 %1111 }
 0x299   : > { %v1214_v53 = vmul.f32 %v7269_v38, %v1112_v58  ;;  %v1215_v36 = vmul.f32 %v7273_v30, %v1112_v58  ;;  %1155 = vperm.xlu1 %6380, %v7152_v19  }
 0x29b   : > { %v7634_v5 = vadd.f32 %v1214_v53, %v1014_v2  ;;  %v7636_v16 = vadd.f32 %v1215_v36, %v1015_v3 }
 0x29d   : > { %12553 = vst [vmem:[#allocation99_spill] sm:$0xff] %v7634_v5  ;;  %12554 = vst [vmem:[#allocation100_spill] sm:$0xff] %v7636_v16  ;;  %6381 = vset.pattern.permute.xlu1 %v12491_v24  ;;  %v3134_v62 = vpop.permute.xlu1 %3133 }
 0x29e   : > { %v3245_v11 = vmul.f32 %v7085_v7, %v3134_v62  ;;  %v3246_v18 = vmul.f32 %v7089_v8, %v3134_v62  ;;  %3183 = vperm.xlu1 %6381, %v7257_v33  }
 0x2a0   : > { %v7646_v19 = vadd.f32 %v3445_v44, %v3245_v11  ;;  %v7648_v58 = vadd.f32 %v3446_v57, %v3246_v18 }
 0x2a1   : > { %v3139_v2 = vpop.permute.xlu1 %3138 }
 0x2a2   : > { %12555 = vst [vmem:[#allocation101_spill] sm:$0xff] %v7646_v19  ;;  %12556 = vst [vmem:[#allocation102_spill] sm:$0xff] %v7648_v58  ;;  %v3247_v3 = vmul.f32 %v7085_v7, %v3139_v2  ;;  %v3248_v53 = vmul.f32 %v7089_v8, %v3139_v2  ;;  %6383 = vset.pattern.permute.xlu1 %v12495_v25 }
 0x2a3   : > { %3386 = vperm.xlu1 %6383, %v7257_v33  }
 0x2a6   : > { %v3351_v52 = vpop.permute.xlu1 %3350 }
 0x2a7   : > { %v3447_v36 = vmul.f32 %v7121_v34, %v3351_v52  ;;  %v3448_v62 = vmul.f32 %v7125_v35, %v3351_v52  ;;  %3390 = vperm.xlu1 %6383, %v7046_v60  }
 0x2a9   : > { %v7657_v44 = vadd.f32 %v3447_v36, %v3247_v3  ;;  %v7659_v18 = vadd.f32 %v3448_v62, %v3248_v53  ;;  %v912_v3 = vpop.permute.xlu0 %911 }
 0x2aa   : > { %v1020_v4 = vmul.f32 %v7261_v32, %v912_v3 }
 0x2ab   : > { %12557 = vst [vmem:[#allocation103_spill] sm:$0xff] %v7657_v44  ;;  %12558 = vst [vmem:[#allocation104_spill] sm:$0xff] %v7659_v18  ;;  %6384 = vset.pattern.permute.xlu1 %v12479_v9  ;;  %v907_v57 = vpop.permute.xlu1 %906 }
 0x2ac   : > { %v1018_v11 = vmul.f32 %v7261_v32, %v907_v57  ;;  %v1019_v2 = vmul.f32 %v7265_v15, %v907_v57  ;;  %961 = vperm.xlu1 %6384, %v7046_v60   ;;  %v1021_v57 = vmul.f32 %v7265_v15, %v912_v3 }
 0x2b0   : > { %6385 = vset.pattern.permute.xlu1 %v12487_v54  ;;  %v1120_v16 = vpop.permute.xlu1 %1119 }
 0x2b1   : > { %v1218_v52 = vmul.f32 %v7269_v38, %v1120_v16  ;;  %v1219_v5 = vmul.f32 %v7273_v30, %v1120_v16  ;;  %1159 = vperm.xlu1 %6385, %v7257_v33  }
 0x2b3   : > { %v7669_v53 = vadd.f32 %v1218_v52, %v1018_v11  ;;  %v7671_v36 = vadd.f32 %v1219_v5, %v1019_v2  ;;  %v3451_v5 = vmul.f32 %v7121_v34, %v7540_v23  ;;  %v3452_v2 = vmul.f32 %v7125_v35, %v7540_v23  ;;  %v12567_v23 = vld [vmem:[#allocation31_spill] sm:$0xff] }
 0x2b4   : > { %v1124_v62 = vpop.permute.xlu1 %1123 }
 0x2b5   : > { %12559 = vst [vmem:[#allocation105_spill] sm:$0xff] %v7669_v53  ;;  %12560 = vst [vmem:[#allocation106_spill] sm:$0xff] %v7671_v36  ;;  %v1220_v60 = vmul.f32 %v7269_v38, %v1124_v62  ;;  %v1221_v47 = vmul.f32 %v7273_v30, %v1124_v62  ;;  %6387 = vset.pattern.permute.xlu1 %v12491_v24  ;;  %v12564_v62 = vld [vmem:[#allocation42_spill] sm:$0xff] }
 0x2b6   : > { %3193 = vperm.xlu1 %6387, %v12561_v13  }
 0x2b7   : > { %v7679_v16 = vadd.f32 %v1220_v60, %v1020_v4  ;;  %v7681_v33 = vadd.f32 %v1221_v47, %v1021_v57 }
 0x2b9   : > { %12562 = vst [vmem:[#allocation27_spill] sm:$0xff] %v7679_v16  ;;  %12563 = vst [vmem:[#allocation107_spill] sm:$0xff] %v7681_v33  ;;  %v3149_v11 = vpop.permute.xlu1 %3148  ;;  %v12569_v33 = vld [vmem:[#allocation32_spill] sm:$0xff]  ;;  %v12571_v16 = vld [vmem:[#allocation55_spill] sm:$0xff] }
 0x2ba   : > { %v3251_v52 = vmul.f32 %v7085_v7, %v3149_v11  ;;  %v3252_v3 = vmul.f32 %v7089_v8, %v3149_v11  ;;  %3198 = vperm.xlu1 %6387, %v12564_v62  }
 0x2bc   : > { %v7690_v24 = vadd.f32 %v3451_v5, %v3251_v52  ;;  %v7692_v13 = vadd.f32 %v3452_v2, %v3252_v3  ;;  %v812_v2 = vld [vmem:[#allocation2 + $0xf0] sm:$0xff] }
 0x2be   : > { %12565 = vst [vmem:[#allocation42_spill] sm:$0xff] %v7690_v24  ;;  %12566 = vst [vmem:[#allocation108_spill] sm:$0xff] %v7692_v13  ;;  %6389 = vset.pattern.permute.xlu1 %v12495_v25  ;;  %v3355_v47 = vpop.permute.xlu1 %3354 }
 0x2bf   : > { %v3449_v4 = vmul.f32 %v7121_v34, %v3355_v47  ;;  %v3450_v57 = vmul.f32 %v7125_v35, %v3355_v47  ;;  %3398 = vperm.xlu1 %6389, %v12564_v62   ;;  %v12573_v47 = vld [vmem:[#allocation56_spill] sm:$0xff] }
 0x2c1   : > { %v7699_v60 = vadd.f32 %v3449_v4, %v12567_v23  ;;  %v7702_v11 = vadd.f32 %v3450_v57, %v12569_v33 }
 0x2c3   : > { %12568 = vst [vmem:[#allocation31_spill] sm:$0xff] %v7699_v60  ;;  %12570 = vst [vmem:[#allocation32_spill] sm:$0xff] %v7702_v11  ;;  %6390 = vset.pattern.permute.xlu1 %v12479_v9  ;;  %v917_v5 = vpop.permute.xlu1 %916 }
 0x2c4   : > { %v1022_v52 = vmul.f32 %v7261_v32, %v917_v5  ;;  %v1023_v3 = vmul.f32 %v7265_v15, %v917_v5  ;;  %966 = vperm.xlu1 %6390, %v812_v2  }
 0x2c6   : > { %v7708_v36 = vadd.f32 %v12571_v16, %v1022_v52  ;;  %v7711_v53 = vadd.f32 %v12573_v47, %v1023_v3  ;;  %v12577_v3 = vld [vmem:[#allocation45_spill] sm:$0xff] }
 0x2c7   : > { %v922_v4 = vpop.permute.xlu1 %921 }
 0x2c8   : > { %12572 = vst [vmem:[#allocation55_spill] sm:$0xff] %v7708_v36  ;;  %12574 = vst [vmem:[#allocation56_spill] sm:$0xff] %v7711_v53  ;;  %v1024_v23 = vmul.f32 %v7261_v32, %v922_v4  ;;  %v1025_v33 = vmul.f32 %v7265_v15, %v922_v4  ;;  %6391 = vset.pattern.permute.xlu1 %v12487_v54 }
 0x2c9   : > { %1167 = vperm.xlu1 %6391, %v812_v2  }
 0x2cc   : > { %v1132_v57 = vpop.permute.xlu1 %1131 }
 0x2cd   : > { %v1224_v43 = vmul.f32 %v7269_v38, %v1132_v57  ;;  %v1225_v5 = vmul.f32 %v7273_v30, %v1132_v57  ;;  %1171 = vperm.xlu1 %6391, %v12564_v62  }
 0x2cf   : > { %v7719_v16 = vadd.f32 %v1224_v43, %v1024_v23  ;;  %v7721_v52 = vadd.f32 %v1225_v5, %v1025_v33  ;;  %v297_v43 = vld [vmem:[%s11616_s4 + $0x8] sm:$0xf] }
 0x2d1   : > { %12575 = vst [vmem:[#allocation109_spill] sm:$0xff] %v7719_v16  ;;  %12576 = vst [vmem:[#allocation110_spill] sm:$0xff] %v7721_v52  ;;  %499 = vperm.xlu1 %6391, %v12577_v3   ;;  %v3154_v47 = vpop.permute.xlu1 %3153 }
 0x2d2   : > { %v3253_v53 = vmul.f32 %v7085_v7, %v3154_v47  ;;  %v3254_v4 = vmul.f32 %v7089_v8, %v3154_v47 }
 0x2d5   : > { %6393 = vset.pattern.permute.xlu1 %v12495_v25  ;;  %v12580_v25 = vld [vmem:[#allocation33_spill] sm:$0xff] }
 0x2d6   : > { %515 = vperm.xlu1 %6393, %v12577_v3   ;;  %v3363_v2 = vpop.permute.xlu1 %3362 }
 0x2d7   : > { %v3453_v57 = vmul.f32 %v7121_v34, %v3363_v2  ;;  %v3454_v62 = vmul.f32 %v7125_v35, %v3363_v2  ;;  %v12582_v2 = vld [vmem:[#allocation34_spill] sm:$0xff] }
 0x2d9   : > { %v7733_v23 = vadd.f32 %v3453_v57, %v3253_v53  ;;  %v7735_v33 = vadd.f32 %v3454_v62, %v3254_v4  ;;  %v927_v57 = vpop.permute.xlu0 %926  ;;  %v12584_v62 = vld [vmem:[#allocation58_spill] sm:$0xff] }
 0x2da   : > { %6394 = vset.pattern.permute.xlu1 %v12479_v9  ;;  %v3367_v5 = vpop.permute.xlu1 %3366 }
 0x2db   : > { %12578 = vst [vmem:[#allocation45_spill] sm:$0xff] %v7733_v23  ;;  %12579 = vst [vmem:[#allocation111_spill] sm:$0xff] %v7735_v33  ;;  %v3455_v47 = vmul.f32 %v7121_v34, %v3367_v5  ;;  %v3456_v3 = vmul.f32 %v7125_v35, %v3367_v5  ;;  %524 = vperm.xlu1 %6394, %v297_v43  }
 0x2dd   : > { %v7741_v52 = vadd.f32 %v3455_v47, %v12580_v25  ;;  %v7744_v16 = vadd.f32 %v3456_v3, %v12582_v2  ;;  %v1026_v25 = vmul.f32 %v7261_v32, %v927_v57  ;;  %v1027_v47 = vmul.f32 %v7265_v15, %v927_v57 }
 0x2df   : > { %12581 = vst [vmem:[#allocation33_spill] sm:$0xff] %v7741_v52  ;;  %12583 = vst [vmem:[#allocation34_spill] sm:$0xff] %v7744_v16  ;;  %v932_v36 = vpop.permute.xlu1 %931  ;;  %6396 = vset.pattern.permute.xlu1 %v12487_v54  ;;  %v12597_v52 = vld [vmem:[#allocation38_spill] sm:$0xff] }
 0x2e0   : > { %v1028_v53 = vmul.f32 %v7261_v32, %v932_v36  ;;  %v1029_v4 = vmul.f32 %v7265_v15, %v932_v36  ;;  %v995_v63 = vmul.f32 %v7265_v15, %v12597_v52 }
 0x2e2   : > { %v7750_v9 = vadd.f32 %v12584_v62, %v1028_v53  ;;  %v7753_v5 = vadd.f32 %v12586_v27, %v1029_v4  ;;  %v3421_v27 = vmul.f32 %v7121_v34, %v7495_v45  ;;  %v3422_v4 = vmul.f32 %v7125_v35, %v7495_v45  ;;  %v12591_v62 = vld [vmem:[#allocation35_spill] sm:$0xff] }
 0x2e3   : > { %v3221_v57 = vmul.f32 %v7085_v7, %v12591_v62 }
 0x2e4   : > { %12585 = vst [vmem:[#allocation58_spill] sm:$0xff] %v7750_v9  ;;  %12587 = vst [vmem:[#allocation59_spill] sm:$0xff] %v7753_v5  ;;  %v1136_v43 = vpop.permute.xlu1 %1135 }
 0x2e5   : > { %v1226_v3 = vmul.f32 %v7269_v38, %v1136_v43  ;;  %v1227_v54 = vmul.f32 %v7273_v30, %v1136_v43  ;;  %v3222_v43 = vmul.f32 %v7089_v8, %v12591_v62  ;;  %v7789_v9 = vadd.f32 %v3421_v27, %v3221_v57 }
 0x2e7   : > { %v7759_v2 = vadd.f32 %v1226_v3, %v1026_v25  ;;  %v7761_v14 = vadd.f32 %v1227_v54, %v1027_v47  ;;  %v3427_v25 = vmul.f32 %v7121_v34, %v7501_v21  ;;  %v3428_v47 = vmul.f32 %v7125_v35, %v7501_v21  ;;  %v12593_v54 = vld [vmem:[#allocation41_spill] sm:$0xff] }
 0x2e8   : > { %v1195_v45 = vmul.f32 %v7273_v30, %v12593_v54  ;;  %12595 = vst [vmem:[#allocation41_spill] sm:$0xff] %v7789_v9  ;;  %v7791_v16 = vadd.f32 %v3422_v4, %v3222_v43  ;;  %v994_v21 = vmul.f32 %v7261_v32, %v12597_v52  ;;  %v3546_v55 = vmax.f32 %v7490_v12, %v7789_v9 }
 0x2e9   : > { %12588 = vst [vmem:[#allocation112_spill] sm:$0xff] %v7759_v2  ;;  %12589 = vst [vmem:[#allocation113_spill] sm:$0xff] %v7761_v14  ;;  %v7763_v36 = vpop.permute.xlu1 %3163  ;;  %v1194_v14 = vmul.f32 %v7269_v38, %v12593_v54  ;;  %v12594_v2 = vld [vmem:[#allocation57_spill] sm:$0xff]  ;;  %v3234_v12 = vmul.f32 %v7089_v8, %v7522_v0 }
 0x2ea   : > { %v3227_v5 = vmul.f32 %v7085_v7, %v12594_v2  ;;  %v3228_v62 = vmul.f32 %v7089_v8, %v12594_v2  ;;  %12596 = vst [vmem:[#allocation57_spill] sm:$0xff] %v7791_v16  ;;  %v12601_v2 = vld [vmem:[#allocation25_spill] sm:$0xff]  ;;  %v7811_v43 = vadd.f32 %v1195_v45, %v995_v63  ;;  %v3233_v45 = vmul.f32 %v7085_v7, %v7522_v0 }
 0x2eb   : > { %v986_v27 = vmul.f32 %v7261_v32, %v12601_v2  ;;  %v987_v4 = vmul.f32 %v7265_v15, %v12601_v2  ;;  %v7809_v57 = vadd.f32 %v1194_v14, %v994_v21 }
 0x2ec   : > { %v7801_v33 = vadd.f32 %v3427_v25, %v3227_v5  ;;  %v7803_v23 = vadd.f32 %v3428_v47, %v3228_v62  ;;  %12603 = vst [vmem:[#allocation115_spill] sm:$0xff] %v7811_v43  ;;  %v3583_v5 = vmax.f32 %v7493_v59, %v7791_v16 }
 0x2ed   : > { %v7765_v53 = vpop.permute.xlu1 %3168  ;;  %12602 = vst [vmem:[#allocation25_spill] sm:$0xff] %v7809_v57 }
 0x2ee   : > { %12590 = vst [vmem:[#allocation114_spill] sm:$0xff] %v7765_v53  ;;  %v12598_v53 = vld [vmem:[#allocation26_spill] sm:$0xff]  ;;  %12599 = vst [vmem:[#allocation38_spill] sm:$0xff] %v7801_v33  ;;  %v3545_v14 = vmax.f32 %v7801_v33, %v3546_v55  ;;  %v3582_v63 = vmax.f32 %v7803_v23, %v3583_v5  ;;  %v3434_v55 = vmul.f32 %v7125_v35, %v7520_v41 }
 0x2ef   : > { %v1187_v54 = vmul.f32 %v7273_v30, %v12598_v53  ;;  %12600 = vst [vmem:[#allocation26_spill] sm:$0xff] %v7803_v23  ;;  %v3436_v5 = vmul.f32 %v7125_v35, %v7543_v20 }
 0x2f0   : > { %v3584_v0 = vmax.f32 %v3582_v63, %v7507_v17  ;;  %v3236_v63 = vmul.f32 %v7089_v8, %v7537_v48 }
 0x2f1   : > { %v7821_v62 = vadd.f32 %v1187_v54, %v987_v4  ;;  %v3433_v54 = vmul.f32 %v7121_v34, %v7520_v41  ;;  %v3547_v4 = vmax.f32 %v3545_v14, %v7504_v10  ;;  %v3235_v14 = vmul.f32 %v7085_v7, %v7537_v48  ;;  %v12611_v10 = vld [vmem:[#allocation44_spill] sm:$0xff] }
 0x2f2   : > { %v7779_v3 = vpop.permute.xlu1 %3374  ;;  %v3440_v48 = vmul.f32 %v7125_v35, %v7526_v26 }
 0x2f3   : > { %12592 = vst [vmem:[#allocation35_spill] sm:$0xff] %v7779_v3  ;;  %v1186_v3 = vmul.f32 %v7269_v38, %v12598_v53  ;;  %12605 = vst [vmem:[#allocation117_spill] sm:$0xff] %v7821_v62  ;;  %v1347_v21 = vmax.f32 %v7811_v43, %v7821_v62  ;;  %v942_v43 = vpop.permute.xlu0 %941  ;;  %v7847_v62 = vadd.f32 %v3434_v55, %v3234_v12 }
 0x2f4   : > { %v1032_v12 = vmul.f32 %v7261_v32, %v942_v43  ;;  %v3439_v55 = vmul.f32 %v7121_v34, %v7526_v26 }
 0x2f5   : > { %v7819_v47 = vadd.f32 %v1186_v3, %v986_v27  ;;  %v1348_v23 = vmax.f32 %v12611_v10, %v1347_v21  ;;  %v3585_v16 = vmax.f32 %v7847_v62, %v3584_v0  ;;  %v1200_v21 = vmul.f32 %v7269_v38, %v7423_v49 }
 0x2f7   : > { %v937_v52 = vpop.permute.xlu1 %936  ;;  %12604 = vst [vmem:[#allocation116_spill] sm:$0xff] %v7819_v47  ;;  %v1310_v59 = vmax.f32 %v7809_v57, %v7819_v47  ;;  %v7845_v57 = vadd.f32 %v3433_v54, %v3233_v45 }
 0x2f8   : > { %v1030_v53 = vmul.f32 %v7261_v32, %v937_v52  ;;  %v1031_v25 = vmul.f32 %v7265_v15, %v937_v52  ;;  %v3435_v52 = vmul.f32 %v7121_v34, %v7543_v20  ;;  %v3240_v20 = vmul.f32 %v7089_v8, %v7555_v46 }
 0x2fc   : > { %v1144_v3 = vpop.permute.xlu1 %1143 }
 0x2fd   : > { %v1230_v2 = vmul.f32 %v7269_v38, %v1144_v3  ;;  %v1231_v27 = vmul.f32 %v7273_v30, %v1144_v3  ;;  %v3239_v3 = vmul.f32 %v7085_v7, %v7555_v46  ;;  %v12610_v46 = vld [vmem:[#allocation43_spill] sm:$0xff] }
 0x2fe   : > { %v1311_v17 = vmax.f32 %v12610_v46, %v1310_v59  ;;  %v12624_v46 = vld [vmem:[#allocation28_spill] sm:$0xff] }
 0x2ff   : > { %v7849_v41 = vadd.f32 %v1230_v2, %v1030_v53  ;;  %v7851_v47 = vadd.f32 %v1231_v27, %v1031_v25  ;;  %v1033_v53 = vmul.f32 %v7265_v15, %v942_v43  ;;  %v7869_v2 = vadd.f32 %v3435_v52, %v3235_v14  ;;  %v12616_v14 = vld [vmem:[#allocation46_spill] sm:$0xff] }
 0x300   : > { %v1148_v45 = vpop.permute.xlu1 %1147  ;;  %v7871_v27 = vadd.f32 %v3436_v5, %v3236_v63  ;;  %v7881_v9 = vadd.f32 %v3439_v55, %v3239_v3  ;;  %v1201_v5 = vmul.f32 %v7273_v30, %v7423_v49  ;;  %v12617_v63 = vld [vmem:[#allocation47_spill] sm:$0xff]  ;;  %v12620_v55 = vld [vmem:[#allocation48_spill] sm:$0xff] }
 0x301   : > { %12606 = vst [vmem:[#allocation118_spill] sm:$0xff] %v7849_v41  ;;  %12607 = vst [vmem:[#allocation119_spill] sm:$0xff] %v7851_v47  ;;  %v1232_v25 = vmul.f32 %v7269_v38, %v1148_v45  ;;  %v1233_v54 = vmul.f32 %v7273_v30, %v1148_v45  ;;  %v3548_v45 = vmax.f32 %v7845_v57, %v3547_v4 }
 0x302   : > { %12608 = vst [vmem:[#allocation120_spill] sm:$0xff] %v7869_v2  ;;  %12609 = vst [vmem:[#allocation121_spill] sm:$0xff] %v7871_v27  ;;  %v7883_v47 = vadd.f32 %v3440_v48, %v3240_v20  ;;  %v3587_v59 = vmax.f32 %v3585_v16, %v7871_v27  ;;  %v1312_v4 = vmax.f32 %v12616_v14, %v1311_v17  ;;  %v12621_v48 = vld [vmem:[#allocation49_spill] sm:$0xff]  ;;  %v12740_v27 = vld [vmem:[#allocation32_spill] sm:$0xff] }
 0x303   : > { %v7875_v33 = vadd.f32 %v1232_v25, %v1032_v12  ;;  %v7877_v43 = vadd.f32 %v1233_v54, %v1033_v53  ;;  %12614 = vst [vmem:[#allocation124_spill] sm:$0xff] %v7881_v9  ;;  %v3550_v52 = vmax.f32 %v3548_v45, %v7869_v2  ;;  %v1349_v0 = vmax.f32 %v12617_v63, %v1348_v23  ;;  %v12618_v12 = vld [vmem:[#allocation22_spill] sm:$0xff]  ;;  %v12619_v25 = vld [vmem:[#allocation60_spill] sm:$0xff]  ;;  %v12739_v2 = vld [vmem:[#allocation31_spill] sm:$0xff] }
 0x304   : > { %12615 = vst [vmem:[#allocation125_spill] sm:$0xff] %v7883_v47  ;;  %v3586_v20 = vmax.f32 %v7883_v47, %v3587_v59  ;;  %v1184_v53 = vmul.f32 %v7269_v38, %v12618_v12  ;;  %v1185_v16 = vmul.f32 %v7273_v30, %v12618_v12  ;;  %v1000_v54 = vmul.f32 %v7261_v32, %v12619_v25  ;;  %v12629_v47 = vld [vmem:[#allocation50_spill] sm:$0xff] }
 0x305   : > { %12612 = vst [vmem:[#allocation122_spill] sm:$0xff] %v7875_v33  ;;  %12613 = vst [vmem:[#allocation123_spill] sm:$0xff] %v7877_v43  ;;  %v7885_v26 = vpop.permute.xlu1 %3178  ;;  %v3549_v3 = vmax.f32 %v7881_v9, %v3550_v52  ;;  %v1001_v49 = vmul.f32 %v7265_v15, %v12619_v25  ;;  %v1314_v17 = vmax.f32 %v1312_v4, %v12620_v55 }
 0x306   : > { %v1351_v23 = vmax.f32 %v1349_v0, %v12621_v48  ;;  %v3588_v52 = vmax.f32 %v3586_v20, %v7568_v28  ;;  %v7909_v63 = vadd.f32 %v1200_v21, %v1000_v54  ;;  %v7917_v25 = vmul.f32 %v7269_v38, %v12624_v46  ;;  %v12625_v21 = vld [vmem:[#allocation53_spill] sm:$0xff]  ;;  %v12742_v28 = vld [vmem:[#allocation108_spill] sm:$0xff] }
 0x307   : > { %v3551_v45 = vmax.f32 %v3549_v3, %v7565_v6  ;;  %v7911_v14 = vadd.f32 %v1201_v5, %v1001_v49  ;;  %v7921_v4 = vmul.f32 %v7273_v30, %v12624_v46  ;;  %v1313_v20 = vmax.f32 %v12625_v21, %v1314_v17  ;;  %v12626_v5 = vld [vmem:[#allocation54_spill] sm:$0xff]  ;;  %v12627_v49 = vld [vmem:[#allocation36_spill] sm:$0xff] }
 0x308   : > { %12622 = vst [vmem:[#allocation22_spill] sm:$0xff] %v7909_v63  ;;  %v3589_v3 = vmax.f32 %v7605_v56, %v3588_v52  ;;  %v1350_v54 = vmax.f32 %v12626_v5, %v1351_v23  ;;  %v7935_v9 = vmul.f32 %v7269_v38, %v12629_v47  ;;  %v7939_v46 = vmul.f32 %v7273_v30, %v12629_v47  ;;  %v12630_v5 = vld [vmem:[#allocation61_spill] sm:$0xff]  ;;  %v12647_v56 = vld [vmem:[#allocation90_spill] sm:$0xff] }
 0x309   : > { %12623 = vst [vmem:[#allocation60_spill] sm:$0xff] %v7911_v14  ;;  %v3552_v0 = vmax.f32 %v7603_v37, %v3551_v45  ;;  %v1315_v23 = vmax.f32 %v1313_v20, %v7909_v63  ;;  %v996_v37 = vmul.f32 %v7261_v32, %v12647_v56  ;;  %v12741_v6 = vld [vmem:[#allocation42_spill] sm:$0xff] }
 0x30a   : > { %v3379_v59 = vpop.permute.xlu1 %3378  ;;  %v3590_v17 = vmax.f32 %v7617_v51, %v3589_v3  ;;  %v1352_v52 = vmax.f32 %v1350_v54, %v7911_v14  ;;  %v1206_v14 = vmul.f32 %v7269_v38, %v7532_v1 }
 0x30b   : > { %v3461_v12 = vmul.f32 %v7121_v34, %v3379_v59  ;;  %v3462_v10 = vmul.f32 %v7125_v35, %v3379_v59  ;;  %v12628_v59 = vld [vmem:[#allocation37_spill] sm:$0xff]  ;;  %v3553_v45 = vmax.f32 %v7614_v42, %v3552_v0  ;;  %v1317_v20 = vmax.f32 %v1315_v23, %v7514_v31 }
 0x30c   : > { %v1354_v54 = vmax.f32 %v1352_v52, %v7517_v29  ;;  %v1006_v23 = vmul.f32 %v7261_v32, %v7528_v39  ;;  %v1007_v52 = vmul.f32 %v7265_v15, %v7528_v39  ;;  %v3458_v39 = vmul.f32 %v7125_v35, %v7547_v61 }
 0x30d   : > { %v7928_v48 = vadd.f32 %v3461_v12, %v12627_v49  ;;  %v7931_v55 = vadd.f32 %v3462_v10, %v12628_v59  ;;  %v7947_v10 = vmul.f32 %v7269_v38, %v7487_v40  ;;  %v7951_v12 = vmul.f32 %v7273_v30, %v7487_v40 }
 0x30e   : > { %v3554_v47 = vmax.f32 %v7646_v19, %v3553_v45  ;;  %v3591_v59 = vmax.f32 %v7648_v58, %v3590_v17  ;;  %v1207_v40 = vmul.f32 %v7273_v30, %v7532_v1  ;;  %v985_v1 = vmul.f32 %v7265_v15, %v7571_v22  ;;  %v12638_v58 = vld [vmem:[#allocation45_spill] sm:$0xff] }
 0x30f   : > { %v947_v49 = vpop.permute.xlu1 %946  ;;  %v3257_v29 = vmul.f32 %v7085_v7, %v7763_v36  ;;  %v7991_v31 = vadd.f32 %v1206_v14, %v1006_v23  ;;  %v12639_v14 = vld [vmem:[#allocation111_spill] sm:$0xff] }
 0x310   : > { %v1034_v0 = vmul.f32 %v7261_v32, %v947_v49  ;;  %v1035_v3 = vmul.f32 %v7265_v15, %v947_v49  ;;  %v3556_v63 = vmax.f32 %v3554_v47, %v7657_v44  ;;  %v3593_v45 = vmax.f32 %v3591_v59, %v7659_v18 }
 0x311   : > { %v984_v49 = vmul.f32 %v7261_v32, %v7571_v22  ;;  %v3258_v22 = vmul.f32 %v7089_v8, %v7763_v36  ;;  %12633 = vst [vmem:[#allocation37_spill] sm:$0xff] %v7991_v31  ;;  %v8003_v44 = vadd.f32 %v1185_v16, %v985_v1  ;;  %v12641_v16 = vld [vmem:[#allocation114_spill] sm:$0xff] }
 0x312   : > { %v7966_v17 = vadd.f32 %v12630_v5, %v1034_v0  ;;  %v7969_v21 = vadd.f32 %v7408_v50, %v1035_v3  ;;  %v3555_v59 = vmax.f32 %v7690_v24, %v3556_v63  ;;  %v3592_v5 = vmax.f32 %v7692_v13, %v3593_v45  ;;  %v12635_v13 = vld [vmem:[#allocation81_spill] sm:$0xff] }
 0x313   : > { %v952_v47 = vpop.permute.xlu1 %951  ;;  %v3457_v3 = vmul.f32 %v7121_v34, %v7547_v61  ;;  %v7993_v63 = vadd.f32 %v1207_v40, %v1007_v52  ;;  %v3463_v24 = vmul.f32 %v7121_v34, %v12635_v13  ;;  %v3464_v61 = vmul.f32 %v7125_v35, %v12635_v13  ;;  %12637 = vst [vmem:[#allocation81_spill] sm:$0xff] %v8003_v44  ;;  %v12640_v40 = vld [vmem:[#allocation35_spill] sm:$0xff] }
 0x314   : > { %12631 = vst [vmem:[#allocation28_spill] sm:$0xff] %v7966_v17  ;;  %12632 = vst [vmem:[#allocation36_spill] sm:$0xff] %v7969_v21  ;;  %v1036_v50 = vmul.f32 %v7261_v32, %v952_v47  ;;  %v1037_v0 = vmul.f32 %v7265_v15, %v952_v47  ;;  %v3557_v45 = vmax.f32 %v3555_v59, %v7699_v60 }
 0x315   : > { %12634 = vst [vmem:[#allocation50_spill] sm:$0xff] %v7993_v63  ;;  %v3594_v47 = vmax.f32 %v3592_v5, %v7702_v11  ;;  %v8001_v18 = vadd.f32 %v1184_v53, %v984_v49  ;;  %v3459_v52 = vmul.f32 %v7121_v34, %v12640_v40  ;;  %v3460_v59 = vmul.f32 %v7125_v35, %v12640_v40 }
 0x316   : > { %v3558_v36 = vmax.f32 %v12638_v58, %v3557_v45  ;;  %v8011_v11 = vadd.f32 %v3457_v3, %v3257_v29  ;;  %v8013_v60 = vadd.f32 %v3458_v39, %v3258_v22  ;;  %v3259_v49 = vmul.f32 %v7085_v7, %v12641_v16  ;;  %v12642_v29 = vld [vmem:[#allocation88_spill] sm:$0xff]  ;;  %v12646_v58 = vld [vmem:[#allocation34_spill] sm:$0xff] }
 0x317   : > { %12636 = vst [vmem:[#allocation61_spill] sm:$0xff] %v8001_v18  ;;  %v3595_v23 = vmax.f32 %v12639_v14, %v3594_v47  ;;  %v3260_v1 = vmul.f32 %v7089_v8, %v12641_v16  ;;  %v3263_v45 = vmul.f32 %v7085_v7, %v7885_v26  ;;  %v3264_v47 = vmul.f32 %v7089_v8, %v7885_v26 }
 0x318   : > { %v1156_v5 = vpop.permute.xlu1 %1155  ;;  %v990_v3 = vmul.f32 %v7261_v32, %v12642_v29  ;;  %v991_v39 = vmul.f32 %v7265_v15, %v12642_v29  ;;  %v8035_v19 = vadd.f32 %v3459_v52, %v3259_v49  ;;  %v1316_v26 = vmax.f32 %v7991_v31, %v1317_v20 }
 0x319   : > { %v1236_v13 = vmul.f32 %v7269_v38, %v1156_v5  ;;  %v1237_v53 = vmul.f32 %v7273_v30, %v1156_v5  ;;  %v12645_v5 = vld [vmem:[#allocation33_spill] sm:$0xff]  ;;  %v3596_v16 = vmax.f32 %v12646_v58, %v3595_v23  ;;  %v8037_v51 = vadd.f32 %v3460_v59, %v3260_v1  ;;  %v12651_v1 = vld [vmem:[#allocation80_spill] sm:$0xff] }
 0x31a   : > { %v3559_v14 = vmax.f32 %v12645_v5, %v3558_v36  ;;  %v1353_v42 = vmax.f32 %v7993_v63, %v1354_v54  ;;  %v8047_v23 = vadd.f32 %v3463_v24, %v3263_v45  ;;  %v8049_v52 = vadd.f32 %v3464_v61, %v3264_v47  ;;  %v12654_v47 = vld [vmem:[#allocation94_spill] sm:$0xff] }
 0x31b   : > { %v8029_v22 = vadd.f32 %v1236_v13, %v1036_v50  ;;  %v8031_v40 = vadd.f32 %v1237_v53, %v1037_v0  ;;  %v997_v50 = vmul.f32 %v7265_v15, %v12647_v56  ;;  %v3597_v36 = vmax.f32 %v8013_v60, %v3596_v16  ;;  %v12650_v56 = vld [vmem:[#allocation91_spill] sm:$0xff] }
 0x31c   : > { %v3560_v13 = vmax.f32 %v8011_v11, %v3559_v14  ;;  %v1318_v59 = vmax.f32 %v1316_v26, %v8001_v18  ;;  %v1355_v20 = vmax.f32 %v1353_v42, %v8003_v44  ;;  %v8054_v54 = vadd.f32 %v7917_v25, %v990_v3 }
 0x31d   : > { %12643 = vst [vmem:[#allocation35_spill] sm:$0xff] %v8029_v22  ;;  %12644 = vst [vmem:[#allocation114_spill] sm:$0xff] %v8031_v40  ;;  %v3184_v0 = vpop.permute.xlu1 %3183  ;;  %v8057_v53 = vadd.f32 %v7921_v4, %v991_v39  ;;  %v1002_v49 = vmul.f32 %v7261_v32, %v12650_v56  ;;  %v1003_v14 = vmul.f32 %v7265_v15, %v12650_v56 }
 0x31e   : > { %12648 = vst [vmem:[#allocation88_spill] sm:$0xff] %v8054_v54  ;;  %v3562_v24 = vmax.f32 %v3560_v13, %v8035_v19  ;;  %v3599_v61 = vmax.f32 %v3597_v36, %v8037_v51  ;;  %v1208_v45 = vmul.f32 %v7269_v38, %v12651_v1  ;;  %v1209_v42 = vmul.f32 %v7273_v30, %v12651_v1 }
 0x31f   : > { %12649 = vst [vmem:[#allocation33_spill] sm:$0xff] %v8057_v53  ;;  %v8070_v25 = vadd.f32 %v7935_v9, %v996_v37  ;;  %v8073_v4 = vadd.f32 %v7939_v46, %v997_v50  ;;  %v1008_v29 = vmul.f32 %v7261_v32, %v12654_v47  ;;  %v1009_v3 = vmul.f32 %v7265_v15, %v12654_v47 }
 0x320   : > { %v3561_v39 = vmax.f32 %v8047_v23, %v3562_v24  ;;  %v3598_v16 = vmax.f32 %v8049_v52, %v3599_v61  ;;  %v3265_v13 = vmul.f32 %v7085_v7, %v3184_v0  ;;  %v3266_v36 = vmul.f32 %v7089_v8, %v3184_v0 }
 0x321   : > { %12652 = vst [vmem:[#allocation34_spill] sm:$0xff] %v8070_v25  ;;  %12653 = vst [vmem:[#allocation90_spill] sm:$0xff] %v8073_v4  ;;  %v1320_v46 = vmax.f32 %v1318_v59, %v8054_v54  ;;  %v1357_v50 = vmax.f32 %v1355_v20, %v8057_v53  ;;  %v8088_v56 = vadd.f32 %v7947_v10, %v1002_v49  ;;  %v12683_v54 = vld [vmem:[#allocation107_spill] sm:$0xff] }
 0x322   : > { %v3387_v26 = vpop.permute.xlu1 %3386  ;;  %v8091_v24 = vadd.f32 %v7951_v12, %v1003_v14  ;;  %v3563_v61 = vmax.f32 %v3561_v39, %v7928_v48  ;;  %v3600_v1 = vmax.f32 %v3598_v16, %v7931_v55  ;;  %v8101_v63 = vadd.f32 %v1208_v45, %v1008_v29  ;;  %v12661_v45 = vld [vmem:[#allocation40_spill] sm:$0xff] }
 0x323   : > { %v3465_v9 = vmul.f32 %v7121_v34, %v3387_v26  ;;  %v3466_v37 = vmul.f32 %v7125_v35, %v3387_v26  ;;  %12655 = vst [vmem:[#allocation91_spill] sm:$0xff] %v8088_v56  ;;  %v1319_v26 = vmax.f32 %v8070_v25, %v1320_v46  ;;  %v1356_v59 = vmax.f32 %v8073_v4, %v1357_v50 }
 0x324   : > { %12656 = vst [vmem:[#allocation80_spill] sm:$0xff] %v8091_v24  ;;  %12658 = vst [vmem:[#allocation126_spill] sm:$0xff] %v8101_v63  ;;  %v8103_v20 = vadd.f32 %v1209_v42, %v1009_v3  ;;  %v12662_v42 = vld [vmem:[#allocation89_spill] sm:$0xff] }
 0x325   : > { %v8095_v47 = vadd.f32 %v3465_v9, %v3265_v13  ;;  %v8097_v0 = vadd.f32 %v3466_v37, %v3266_v36  ;;  %v1321_v16 = vmax.f32 %v1319_v26, %v8088_v56  ;;  %v1358_v13 = vmax.f32 %v1356_v59, %v8091_v24  ;;  %v12660_v36 = vld [vmem:[#allocation39_spill] sm:$0xff]  ;;  %v12671_v24 = vld [vmem:[#allocation86_spill] sm:$0xff] }
 0x326   : > { %12659 = vst [vmem:[#allocation127_spill] sm:$0xff] %v8103_v20  ;;  %v3391_v10 = vpop.permute.xlu1 %3390  ;;  %v1212_v3 = vmul.f32 %v7269_v38, %v12662_v42  ;;  %v1213_v37 = vmul.f32 %v7273_v30, %v12662_v42  ;;  %v12663_v59 = vld [vmem:[#allocation87_spill] sm:$0xff]  ;;  %v12666_v42 = vld [vmem:[#allocation66_spill] sm:$0xff] }
 0x327   : > { %12657 = vst [vmem:[#allocation94_spill] sm:$0xff] %v8097_v0  ;;  %v3564_v12 = vmax.f32 %v8095_v47, %v3563_v61  ;;  %v3601_v49 = vmax.f32 %v8097_v0, %v3600_v1  ;;  %v3467_v14 = vmul.f32 %v7121_v34, %v3391_v10  ;;  %v3468_v39 = vmul.f32 %v7125_v35, %v3391_v10 }
 0x328   : > { %v1322_v46 = vmax.f32 %v8101_v63, %v1321_v16  ;;  %v1359_v50 = vmax.f32 %v8103_v20, %v1358_v13  ;;  %v1012_v10 = vmul.f32 %v7261_v32, %v12663_v59  ;;  %v957_v13 = vpop.permute.xlu0 %956  ;;  %v12670_v63 = vld [vmem:[#allocation85_spill] sm:$0xff] }
 0x329   : > { %v8112_v9 = vadd.f32 %v3467_v14, %v12660_v36  ;;  %v8115_v29 = vadd.f32 %v3468_v39, %v12661_v45  ;;  %v1013_v14 = vmul.f32 %v7265_v15, %v12663_v59  ;;  %v1038_v4 = vmul.f32 %v7261_v32, %v957_v13 }
 0x32a   : > { %v8131_v45 = vadd.f32 %v1212_v3, %v1012_v10  ;;  %v1323_v31 = vmax.f32 %v12670_v63, %v1322_v46  ;;  %v1360_v56 = vmax.f32 %v12671_v24, %v1359_v50  ;;  %v12674_v46 = vld [vmem:[#allocation97_spill] sm:$0xff]  ;;  %v12675_v50 = vld [vmem:[#allocation98_spill] sm:$0xff] }
 0x32b   : > { %v3565_v61 = vmax.f32 %v8112_v9, %v3564_v12  ;;  %v3602_v1 = vmax.f32 %v8115_v29, %v3601_v49  ;;  %v962_v26 = vpop.permute.xlu1 %961  ;;  %v8133_v16 = vadd.f32 %v1213_v37, %v1013_v14  ;;  %v12668_v49 = vld [vmem:[#allocation67_spill] sm:$0xff]  ;;  %v12676_v24 = vld [vmem:[#allocation82_spill] sm:$0xff] }
 0x32c   : > { %v1040_v39 = vmul.f32 %v7261_v32, %v962_v26  ;;  %v1041_v36 = vmul.f32 %v7265_v15, %v962_v26  ;;  %12664 = vst [vmem:[#allocation39_spill] sm:$0xff] %v8131_v45  ;;  %v1039_v26 = vmul.f32 %v7265_v15, %v957_v13  ;;  %v1325_v10 = vmax.f32 %v1323_v31, %v8131_v45  ;;  %v12678_v31 = vld [vmem:[#allocation100_spill] sm:$0xff] }
 0x32d   : > { %12665 = vst [vmem:[#allocation40_spill] sm:$0xff] %v8133_v16  ;;  %v1362_v14 = vmax.f32 %v1360_v56, %v8133_v16  ;;  %v3469_v63 = vmul.f32 %v7121_v34, %v12676_v24  ;;  %v3470_v13 = vmul.f32 %v7125_v35, %v12676_v24  ;;  %v12682_v16 = vld [vmem:[#allocation27_spill] sm:$0xff] }
 0x32e   : > { %v8136_v12 = vadd.f32 %v12666_v42, %v1040_v39  ;;  %v8139_v20 = vadd.f32 %v12668_v49, %v1041_v36  ;;  %v1324_v42 = vmax.f32 %v12674_v46, %v1325_v10 }
 0x32f   : > { %v1361_v49 = vmax.f32 %v12675_v50, %v1362_v14 }
 0x330   : > { %12667 = vst [vmem:[#allocation89_spill] sm:$0xff] %v8136_v12  ;;  %12669 = vst [vmem:[#allocation87_spill] sm:$0xff] %v8139_v20  ;;  %v1160_v59 = vpop.permute.xlu1 %1159 }
 0x331   : > { %v1238_v3 = vmul.f32 %v7269_v38, %v1160_v59  ;;  %v1239_v37 = vmul.f32 %v7273_v30, %v1160_v59  ;;  %v12677_v59 = vld [vmem:[#allocation99_spill] sm:$0xff]  ;;  %v1363_v45 = vmax.f32 %v1361_v49, %v12678_v31 }
 0x332   : > { %v1326_v53 = vmax.f32 %v1324_v42, %v12677_v59  ;;  %v12684_v31 = vld [vmem:[#allocation55_spill] sm:$0xff] }
 0x333   : > { %v8149_v39 = vadd.f32 %v1238_v3, %v1038_v4  ;;  %v8151_v36 = vadd.f32 %v1239_v37, %v1039_v26  ;;  %v12679_v26 = vld [vmem:[#allocation105_spill] sm:$0xff]  ;;  %v12680_v37 = vld [vmem:[#allocation106_spill] sm:$0xff] }
 0x334   : > { %v1327_v3 = vmax.f32 %v12679_v26, %v1326_v53  ;;  %v1364_v10 = vmax.f32 %v12680_v37, %v1363_v45  ;;  %v12686_v53 = vld [vmem:[#allocation109_spill] sm:$0xff]  ;;  %v12687_v45 = vld [vmem:[#allocation110_spill] sm:$0xff] }
 0x335   : > { %12672 = vst [vmem:[#allocation66_spill] sm:$0xff] %v8149_v39  ;;  %12673 = vst [vmem:[#allocation67_spill] sm:$0xff] %v8151_v36  ;;  %v3194_v25 = vpop.permute.xlu1 %3193 }
 0x336   : > { %v3269_v4 = vmul.f32 %v7085_v7, %v3194_v25  ;;  %v3270_v56 = vmul.f32 %v7089_v8, %v3194_v25  ;;  %v1328_v24 = vmax.f32 %v12682_v16, %v1327_v3  ;;  %v1365_v44 = vmax.f32 %v12683_v54, %v1364_v10  ;;  %v12685_v25 = vld [vmem:[#allocation56_spill] sm:$0xff]  ;;  %v12688_v54 = vld [vmem:[#allocation58_spill] sm:$0xff]  ;;  %v12689_v16 = vld [vmem:[#allocation59_spill] sm:$0xff] }
 0x338   : > { %v8165_v14 = vadd.f32 %v3469_v63, %v3269_v4  ;;  %v8167_v50 = vadd.f32 %v3470_v13, %v3270_v56  ;;  %v1329_v59 = vmax.f32 %v12684_v31, %v1328_v24  ;;  %v1366_v18 = vmax.f32 %v12685_v25, %v1365_v44 }
 0x339   : > { %v3199_v46 = vpop.permute.xlu1 %3198 }
 0x33a   : > { %12681 = vst [vmem:[#allocation82_spill] sm:$0xff] %v8165_v14  ;;  %v3566_v42 = vmax.f32 %v8165_v14, %v3565_v61  ;;  %v3603_v49 = vmax.f32 %v8167_v50, %v3602_v1  ;;  %v1331_v26 = vmax.f32 %v1329_v59, %v12686_v53  ;;  %v1368_v63 = vmax.f32 %v1366_v18, %v12687_v45  ;;  %v972_v61 = vpop.permute.xlu0 %971  ;;  %v12690_v59 = vld [vmem:[#allocation112_spill] sm:$0xff]  ;;  %v12691_v45 = vld [vmem:[#allocation113_spill] sm:$0xff] }
 0x33b   : > { %v3271_v13 = vmul.f32 %v7085_v7, %v3199_v46  ;;  %v3272_v56 = vmul.f32 %v7089_v8, %v3199_v46  ;;  %v12692_v46 = vld [vmem:[#allocation119_spill] sm:$0xff] }
 0x33c   : > { %v1330_v1 = vmax.f32 %v12688_v54, %v1331_v26  ;;  %v1367_v24 = vmax.f32 %v12689_v16, %v1368_v63 }
 0x33e   : > { %v3399_v4 = vpop.permute.xlu1 %3398  ;;  %v1332_v18 = vmax.f32 %v1330_v1, %v12690_v59  ;;  %v1369_v53 = vmax.f32 %v1367_v24, %v12691_v45  ;;  %v494_v63 = vpop.permute.xlu0 %493 }
 0x33f   : > { %v3471_v3 = vmul.f32 %v7121_v34, %v3399_v4  ;;  %v3472_v10 = vmul.f32 %v7125_v35, %v3399_v4 }
 0x340   : > { %v1333_v35 = vmax.f32 %v7849_v41, %v1332_v18  ;;  %v1370_v4 = vmax.f32 %v12692_v46, %v1369_v53 }
 0x341   : > { %v8183_v31 = vadd.f32 %v3471_v3, %v3271_v13  ;;  %v8185_v44 = vadd.f32 %v3472_v10, %v3272_v56 }
 0x342   : > { %v1334_v13 = vmax.f32 %v7875_v33, %v1333_v35  ;;  %v1371_v56 = vmax.f32 %v7877_v43, %v1370_v4  ;;  %v12744_v43 = vld [vmem:[#allocation111_spill] sm:$0xff] }
 0x343   : > { %v3567_v7 = vmax.f32 %v8183_v31, %v3566_v42  ;;  %v3604_v8 = vmax.f32 %v8185_v44, %v3603_v49  ;;  %v967_v34 = vpop.permute.xlu1 %966 }
 0x344   : > { %v1335_v1 = vmax.f32 %v7966_v17, %v1334_v13  ;;  %v1372_v42 = vmax.f32 %v7969_v21, %v1371_v56  ;;  %v1042_v35 = vmul.f32 %v7261_v32, %v967_v34  ;;  %v508_v13 = vpop.permute.xlu0 %507 }
 0x345   : > { %v3568_v26 = vrot.slane %v3567_v7, 4  ;;  %v3605_v54 = vrot.slane %v3604_v8, 4 }
 0x346   : > { %v1337_v46 = vmax.f32 %v1335_v1, %v8029_v22  ;;  %v1374_v41 = vmax.f32 %v1372_v42, %v8031_v40  ;;  %v12695_v40 = vld [vmem:[#allocation20_spill] sm:$0xff] }
 0x347   : > { %v3569_v3 = vmax.f32 %v3567_v7, %v3568_v26  ;;  %v3606_v10 = vmax.f32 %v3604_v8, %v3605_v54  ;;  %v1043_v7 = vmul.f32 %v7265_v15, %v967_v34  ;;  %v1044_v54 = vmul.f32 %v7261_v32, %v972_v61  ;;  %v12697_v34 = vld [vmem:[#allocation17_spill] sm:$0xff] }
 0x348   : > { %v1168_v24 = vpop.permute.xlu1 %1167  ;;  %v1045_v8 = vmul.f32 %v7265_v15, %v972_v61  ;;  %v1336_v56 = vmax.f32 %v8136_v12, %v1337_v46  ;;  %v1373_v21 = vmax.f32 %v8139_v20, %v1374_v41  ;;  %v8212_v22 = vmul.f32 %v494_v63, %v12695_v40  ;;  %v12725_v20 = vld [vmem:[#allocation72_spill] sm:$0xff]  ;;  %v12726_v12 = vld [vmem:[#allocation73_spill] sm:$0xff] }
 0x349   : > { %v3570_v49 = vrot.slane %v3569_v3, 2  ;;  %v3607_v16 = vrot.slane %v3606_v10, 2  ;;  %v1242_v18 = vmul.f32 %v7269_v38, %v1168_v24  ;;  %v1243_v53 = vmul.f32 %v7273_v30, %v1168_v24 }
 0x34a   : > { %12696 = vst [vmem:[#allocation20_spill] sm:$0xff] %v8212_v22  ;;  %v8215_v17 = vmul.f32 %v494_v63, %v12697_v34  ;;  %v1375_v61 = vmax.f32 %v1373_v21, %v8151_v36  ;;  %v12715_v34 = vld [vmem:[#allocation29_spill] sm:$0xff]  ;;  %v12727_v36 = vld [vmem:[#allocation76_spill] sm:$0xff] }
 0x34b   : > { %v3571_v4 = vmax.f32 %v3569_v3, %v3570_v49  ;;  %v3608_v26 = vmax.f32 %v3606_v10, %v3607_v16  ;;  %v8207_v24 = vadd.f32 %v1242_v18, %v1042_v35  ;;  %v8209_v1 = vadd.f32 %v1243_v53, %v1043_v7  ;;  %v12699_v3 = vld [vmem:[#allocation18_spill] sm:$0xff]  ;;  %v12701_v49 = vld [vmem:[#allocation16_spill] sm:$0xff] }
 0x34c   : > { %v1172_v42 = vpop.permute.xlu1 %1171  ;;  %12698 = vst [vmem:[#allocation17_spill] sm:$0xff] %v8215_v17  ;;  %v1338_v16 = vmax.f32 %v1336_v56, %v8149_v39  ;;  %v8222_v10 = vmul.f32 %v508_v13, %v12699_v3  ;;  %v8225_v18 = vmul.f32 %v508_v13, %v12701_v49  ;;  %v12706_v13 = vld [vmem:[#allocation71_spill] sm:$0xff]  ;;  %v12713_v3 = vld [vmem:[#allocation64_spill] sm:$0xff]  ;;  %v12720_v49 = vld [vmem:[#allocation69_spill] sm:$0xff] }
 0x34d   : > { %12693 = vst [vmem:[#allocation128_spill] sm:$0xff] %v8207_v24  ;;  %12694 = vst [vmem:[#allocation129_spill] sm:$0xff] %v8209_v1  ;;  %v3572_v32 = vrot.slane %v3571_v4, 1  ;;  %v3609_v15 = vrot.slane %v3608_v26, 1  ;;  %v1244_v46 = vmul.f32 %v7269_v38, %v1172_v42  ;;  %v1245_v41 = vmul.f32 %v7273_v30, %v1172_v42  ;;  %v12705_v30 = vld [vmem:[#allocation70_spill] sm:$0xff]  ;;  %v12708_v42 = vld [vmem:[#allocation63_spill] sm:$0xff] }
 0x34e   : > { %12700 = vst [vmem:[#allocation18_spill] sm:$0xff] %v8222_v10  ;;  %12702 = vst [vmem:[#allocation16_spill] sm:$0xff] %v8225_v18  ;;  %v8232_v53 = vmax.f32 %v8207_v24, %v1338_v16  ;;  %v8235_v35 = vmax.f32 %v8209_v1, %v1375_v61  ;;  %v12717_v16 = vld [vmem:[#allocation41_spill] sm:$0xff]  ;;  %v12721_v56 = vld [vmem:[#allocation51_spill] sm:$0xff] }
 0x34f   : > { %v8227_v40 = vmax.f32 %v3571_v4, %v3572_v32  ;;  %v8229_v63 = vmax.f32 %v3608_v26, %v3609_v15  ;;  %v8237_v21 = vadd.f32 %v1244_v46, %v1044_v54  ;;  %v8239_v38 = vadd.f32 %v1245_v41, %v1045_v8  ;;  %v12707_v4 = vld [vmem:[#allocation62_spill] sm:$0xff]  ;;  %v12709_v32 = vld [vmem:[#allocation23_spill] sm:$0xff]  ;;  %v12710_v54 = vld [vmem:[#allocation24_spill] sm:$0xff] }
 0x350   : > { %v12711_v8 = vld [vmem:[#allocation74_spill] sm:$0xff]  ;;  %v12712_v46 = vld [vmem:[#allocation75_spill] sm:$0xff]  ;;  %v12714_v26 = vld [vmem:[#allocation65_spill] sm:$0xff] }
 0x351   : > { %12703 = vst [vmem:[#allocation130_spill] sm:$0xff] %v8237_v21  ;;  %12704 = vst [vmem:[#allocation131_spill] sm:$0xff] %v8239_v38  ;;  %v12716_v15 = vld [vmem:[#allocation30_spill] sm:$0xff]  ;;  %v12718_v61 = vld [vmem:[#allocation57_spill] sm:$0xff]  ;;  %v12745_v37 = vsub.f32 %v12705_v30, %v8227_v40  ;;  %v12746_v10 = vsub.f32 %v12706_v13, %v8229_v63  ;;  %v12747_v33 = vsub.f32 %v12707_v4, %v8227_v40 }
 0x352   : > { %v12719_v41 = vld [vmem:[#allocation68_spill] sm:$0xff]  ;;  %v12723_v1 = vld [vmem:[#allocation38_spill] sm:$0xff]  ;;  %v12728_v39 = vld [vmem:[#allocation77_spill] sm:$0xff]  ;;  %v8380_v45 = vmax.f32 %v8237_v21, %v8232_v53  ;;  %v12748_v59 = vsub.f32 %v12708_v42, %v8229_v63  ;;  %v12749_v30 = vsub.f32 %v12709_v32, %v8227_v40  ;;  %v12750_v13 = vsub.f32 %v12710_v54, %v8229_v63 }
 0x353   : > { %v12722_v7 = vld [vmem:[#allocation52_spill] sm:$0xff]  ;;  %v12724_v24 = vld [vmem:[#allocation26_spill] sm:$0xff]  ;;  %v12743_v18 = vld [vmem:[#allocation45_spill] sm:$0xff]  ;;  %v3675_v0 = vmul.f32 1.442695, %v12745_v37  ;;  %v8393_v4 = vmax.f32 %v8239_v38, %v8235_v35  ;;  %v12753_v32 = vsub.f32 %v12713_v3, %v8227_v40  ;;  %v12754_v54 = vsub.f32 %v12714_v26, %v8229_v63 }
 0x354   : > { %v12738_v22 = vld [vmem:[#allocation104_spill] sm:$0xff]  ;;  %v3677_v17 = vmul.f32 1.442695, %v12746_v10  ;;  %v3679_v14 = vmul.f32 1.442695, %v12747_v33  ;;  %v12751_v33 = vsub.f32 %v12711_v8, %v8227_v40  ;;  %v12756_v8 = vsub.f32 %v12716_v15, %v8229_v63 }
 0x355   : > { %v3681_v25 = vmul.f32 1.442695, %v12748_v59  ;;  %v3683_v37 = vmul.f32 1.442695, %v12749_v30  ;;  %v3685_v10 = vmul.f32 1.442695, %v12750_v13  ;;  %6408 = vpow2.f32 %v3675_v0 }
 0x356   : > { %v3687_v53 = vmul.f32 1.442695, %v12751_v33  ;;  %v12752_v59 = vsub.f32 %v12712_v46, %v8229_v63  ;;  %v3691_v30 = vmul.f32 1.442695, %v12753_v32  ;;  %6410 = vpow2.f32 %v3677_v17 }
 0x357   : > { %v3693_v13 = vmul.f32 1.442695, %v12754_v54  ;;  %v12755_v0 = vsub.f32 %v12715_v34, %v8227_v40  ;;  %v3697_v33 = vmul.f32 1.442695, %v12756_v8  ;;  %6412 = vpow2.f32 %v3679_v14 }
 0x358   : > { %v3689_v42 = vmul.f32 1.442695, %v12752_v59  ;;  %v12757_v46 = vsub.f32 %v12717_v16, %v8227_v40  ;;  %v12758_v17 = vsub.f32 %v12718_v61, %v8229_v63  ;;  %v12759_v26 = vsub.f32 %v12719_v41, %v8227_v40 }
 0x359   : > { %v3695_v35 = vmul.f32 1.442695, %v12755_v0  ;;  %6414 = vpow2.f32 %v3681_v25  ;;  %v12760_v34 = vsub.f32 %v12720_v49, %v8229_v63  ;;  %v12761_v14 = vsub.f32 %v12721_v56, %v8227_v40 }
 0x35a   : > { %v3699_v59 = vmul.f32 1.442695, %v12757_v46  ;;  %v3701_v3 = vmul.f32 1.442695, %v12758_v17  ;;  %v3703_v32 = vmul.f32 1.442695, %v12759_v26  ;;  %v12762_v16 = vsub.f32 %v12722_v7, %v8229_v63 }
 0x35b   : > { %v3705_v54 = vmul.f32 1.442695, %v12760_v34  ;;  %v3707_v15 = vmul.f32 1.442695, %v12761_v14  ;;  %6416 = vpow2.f32 %v3683_v37  ;;  %v12763_v61 = vsub.f32 %v12723_v1, %v8227_v40  ;;  %v12771_v34 = vld [vmem:[#allocation120_spill] sm:$0xff] }
 0x35c   : > { %v3709_v0 = vmul.f32 1.442695, %v12762_v16  ;;  %v12764_v25 = vsub.f32 %v12724_v24, %v8229_v63  ;;  %v12765_v49 = vsub.f32 %v12725_v20, %v8227_v40  ;;  %6418 = vpow2.f32 %v3685_v10 }
 0x35d   : > { %v8434_v8 = vmul.f32 1.442695, %v12763_v61  ;;  %v12766_v7 = vsub.f32 %v12726_v12, %v8229_v63  ;;  %v12767_v1 = vsub.f32 %v12727_v36, %v8227_v40  ;;  %v12768_v24 = vsub.f32 %v12728_v39, %v8229_v63  ;;  %v12773_v39 = vld [vmem:[#allocation121_spill] sm:$0xff]  ;;  %v12775_v61 = vld [vmem:[#allocation83_spill] sm:$0xff] }
 0x35e   : > { %v8439_v41 = vmul.f32 1.442695, %v12764_v25  ;;  %v8444_v56 = vmul.f32 1.442695, %v12765_v49  ;;  %6420 = vpow2.f32 %v3687_v53  ;;  %v12769_v20 = vsub.f32 %v7845_v57, %v8227_v40  ;;  %v12777_v49 = vld [vmem:[#allocation84_spill] sm:$0xff] }
 0x35f   : > { %v8449_v37 = vmul.f32 1.442695, %v12766_v7  ;;  %v8454_v46 = vmul.f32 1.442695, %v12767_v1  ;;  %v8459_v17 = vmul.f32 1.442695, %v12768_v24  ;;  %v12770_v12 = vsub.f32 %v7847_v62, %v8229_v63  ;;  %v8521_v38 = vpop.eup %6408 }
 0x360   : > { %v8464_v10 = vmul.f32 1.442695, %v12769_v20  ;;  %v12772_v36 = vsub.f32 %v12771_v34, %v8227_v40  ;;  %6422 = vpow2.f32 %v3689_v42  ;;  %v12774_v16 = vsub.f32 %v12773_v39, %v8229_v63  ;;  %v12779_v1 = vld [vmem:[#allocation124_spill] sm:$0xff]  ;;  %v12781_v20 = vld [vmem:[#allocation125_spill] sm:$0xff]  ;;  %12792 = vst [vmem:[#allocation71_spill] sm:$0xff] %v8521_v38 }
 0x361   : > { %v8469_v26 = vmul.f32 1.442695, %v12770_v12  ;;  %v12776_v57 = vsub.f32 %v12775_v61, %v8227_v40  ;;  %v12778_v62 = vsub.f32 %v12777_v49, %v8229_v63  ;;  %6424 = vpow2.f32 %v3691_v30  ;;  %v12785_v61 = vld [vmem:[#allocation93_spill] sm:$0xff]  ;;  %v12787_v49 = vld [vmem:[#allocation95_spill] sm:$0xff] }
 0x362   : > { %v8474_v14 = vmul.f32 1.442695, %v12772_v36  ;;  %v8479_v53 = vmul.f32 1.442695, %v12774_v16  ;;  %v12780_v24 = vsub.f32 %v12779_v1, %v8227_v40  ;;  %v12782_v12 = vsub.f32 %v12781_v20, %v8229_v63  ;;  %v12783_v36 = vld [vmem:[#allocation92_spill] sm:$0xff] }
 0x363   : > { %v8484_v25 = vmul.f32 1.442695, %v12776_v57  ;;  %v8489_v7 = vmul.f32 1.442695, %v12778_v62  ;;  %v12784_v39 = vsub.f32 %v12783_v36, %v8227_v40  ;;  %6426 = vpow2.f32 %v3693_v13  ;;  %v12793_v36 = vld [vmem:[#allocation101_spill] sm:$0xff] }
 0x364   : > { %v8494_v42 = vmul.f32 1.442695, %v12780_v24  ;;  %v8499_v34 = vmul.f32 1.442695, %v12782_v12  ;;  %v12786_v57 = vsub.f32 %v12785_v61, %v8229_v63  ;;  %v12788_v62 = vsub.f32 %v12787_v49, %v8227_v40  ;;  %v12790_v24 = vld [vmem:[#allocation96_spill] sm:$0xff]  ;;  %v12795_v61 = vld [vmem:[#allocation102_spill] sm:$0xff] }
 0x365   : > { %v8504_v16 = vmul.f32 1.442695, %v12784_v39  ;;  %v12791_v20 = vsub.f32 %v12790_v24, %v8229_v63  ;;  %6428 = vpow2.f32 %v3695_v35  ;;  %v12794_v13 = vsub.f32 %v12793_v36, %v8227_v40  ;;  %v12797_v49 = vld [vmem:[#allocation103_spill] sm:$0xff]  ;;  %v8538_v24 = vpop.eup %6410 }
 0x366   : > { %v8509_v30 = vmul.f32 1.442695, %v12786_v57  ;;  %v8514_v1 = vmul.f32 1.442695, %v12788_v62  ;;  %v12796_v57 = vsub.f32 %v12795_v61, %v8229_v63  ;;  %v12798_v62 = vsub.f32 %v12797_v49, %v8227_v40  ;;  %12799 = vst [vmem:[#allocation62_spill] sm:$0xff] %v8538_v24  ;;  %v8555_v49 = vpop.eup %6412 }
 0x367   : > { %v8519_v12 = vmul.f32 1.442695, %v12791_v20  ;;  %v8526_v39 = vmul.f32 1.442695, %v12794_v13  ;;  %6430 = vpow2.f32 %v3697_v33  ;;  %v12800_v35 = vsub.f32 %v12738_v22, %v8229_v63  ;;  %12803 = vst [vmem:[#allocation63_spill] sm:$0xff] %v8555_v49 }
 0x368   : > { %12789 = vst [vmem:[#allocation70_spill] sm:$0xff] %v8514_v1  ;;  %v8531_v21 = vmul.f32 1.442695, %v12796_v57  ;;  %v8536_v1 = vmul.f32 1.442695, %v12798_v62  ;;  %v12801_v36 = vsub.f32 %v12739_v2, %v8227_v40  ;;  %v12802_v61 = vsub.f32 %v12740_v27, %v8229_v63  ;;  %v8572_v27 = vpop.eup %6414 }
 0x369   : > { %v8543_v20 = vmul.f32 1.442695, %v12800_v35  ;;  %6432 = vpow2.f32 %v3699_v59  ;;  %v12804_v33 = vsub.f32 %v12741_v6, %v8227_v40  ;;  %v12805_v22 = vsub.f32 %v12742_v28, %v8229_v63  ;;  %12807 = vst [vmem:[#allocation23_spill] sm:$0xff] %v8572_v27 }
 0x36a   : > { %v8548_v13 = vmul.f32 1.442695, %v12801_v36  ;;  %v8553_v57 = vmul.f32 1.442695, %v12802_v61  ;;  %v12806_v2 = vsub.f32 %v12743_v18, %v8227_v40  ;;  %6434 = vpow2.f32 %v3701_v3  ;;  %v8589_v18 = vpop.eup %6416 }
 0x36b   : > { %v8560_v62 = vmul.f32 1.442695, %v12804_v33  ;;  %v8565_v35 = vmul.f32 1.442695, %v12805_v22  ;;  %v12808_v59 = vsub.f32 %v12744_v43, %v8229_v63  ;;  %v12809_v6 = vsub.f32 %v12645_v5, %v8227_v40  ;;  %12811 = vst [vmem:[#allocation24_spill] sm:$0xff] %v8589_v18 }
 0x36c   : > { %v8570_v36 = vmul.f32 1.442695, %v12806_v2  ;;  %v12810_v28 = vsub.f32 %v12646_v58, %v8229_v63  ;;  %6436 = vpow2.f32 %v3703_v32  ;;  %v12812_v3 = vsub.f32 %v8011_v11, %v8227_v40  ;;  %v8606_v58 = vpop.eup %6418 }
 0x36d   : > { %v8577_v61 = vmul.f32 1.442695, %v12808_v59  ;;  %v8582_v33 = vmul.f32 1.442695, %v12809_v6  ;;  %v12813_v43 = vsub.f32 %v8013_v60, %v8229_v63  ;;  %v12814_v5 = vsub.f32 %v8035_v19, %v8227_v40  ;;  %12815 = vst [vmem:[#allocation74_spill] sm:$0xff] %v8606_v58  ;;  %v500_v19 = vpop.permute.xlu1 %499 }
 0x36e   : > { %v8587_v22 = vmul.f32 1.442695, %v12810_v28  ;;  %v8594_v2 = vmul.f32 1.442695, %v12812_v3  ;;  %6438 = vpow2.f32 %v3705_v54  ;;  %v12816_v32 = vsub.f32 %v8037_v51, %v8229_v63 }
 0x36f   : > { %v8599_v59 = vmul.f32 1.442695, %v12813_v43  ;;  %v8604_v6 = vmul.f32 1.442695, %v12814_v5  ;;  %v12817_v11 = vsub.f32 %v7928_v48, %v8227_v40  ;;  %v12819_v60 = vsub.f32 %v7931_v55, %v8229_v63  ;;  %v8623_v5 = vpop.eup %6420 }
 0x370   : > { %v8611_v28 = vmul.f32 1.442695, %v12816_v32  ;;  %12821 = vst [vmem:[#allocation65_spill] sm:$0xff] %v8623_v5  ;;  %6440 = vpow2.f32 %v3707_v15  ;;  %v12822_v54 = vsub.f32 %v8047_v23, %v8227_v40  ;;  %v12823_v32 = vsub.f32 %v8049_v52, %v8229_v63 }
 0x371   : > { %v8616_v3 = vmul.f32 1.442695, %v12817_v11  ;;  %v8621_v43 = vmul.f32 1.442695, %v12819_v60  ;;  %v12824_v11 = vsub.f32 %v8095_v47, %v8227_v40  ;;  %v8640_v60 = vpop.eup %6422  ;;  %6442 = vpow2.f32 %v3709_v0  ;;  %v12831_v0 = vld [vmem:[#allocation82_spill] sm:$0xff] }
 0x372   : > { %v8628_v51 = vmul.f32 1.442695, %v12822_v54  ;;  %v8633_v48 = vmul.f32 1.442695, %v12823_v32  ;;  %12825 = vst [vmem:[#allocation29_spill] sm:$0xff] %v8640_v60  ;;  %v12828_v23 = vsub.f32 %v8112_v9, %v8227_v40  ;;  %v12829_v52 = vsub.f32 %v8115_v29, %v8229_v63  ;;  %v8657_v47 = vpop.eup %6424 }
 0x373   : > { %12818 = vst [vmem:[#allocation75_spill] sm:$0xff] %v8616_v3  ;;  %12820 = vst [vmem:[#allocation64_spill] sm:$0xff] %v8621_v43  ;;  %v8638_v55 = vmul.f32 1.442695, %v12824_v11  ;;  %v12826_v43 = vld [vmem:[#allocation94_spill] sm:$0xff]  ;;  %6444 = vpow2.f32 %v8434_v8  ;;  %v12832_v11 = vsub.f32 %v12831_v0, %v8227_v40  ;;  %v12838_v8 = vsub.f32 %v8185_v44, %v8229_v63 }
 0x374   : > { %v12827_v15 = vsub.f32 %v12826_v43, %v8229_v63  ;;  %v8650_v54 = vmul.f32 1.442695, %v12828_v23  ;;  %v8655_v32 = vmul.f32 1.442695, %v12829_v52  ;;  %12830 = vst [vmem:[#allocation30_spill] sm:$0xff] %v8657_v47  ;;  %v12835_v23 = vsub.f32 %v8183_v31, %v8227_v40  ;;  %v8675_v52 = vpop.eup %6426 }
 0x375   : > { %v8663_v43 = vmul.f32 1.442695, %v12832_v11  ;;  %12837 = vst [vmem:[#allocation68_spill] sm:$0xff] %v8675_v52  ;;  %6446 = vpow2.f32 %v8439_v41  ;;  %v8681_v0 = vmul.f32 1.442695, %v12838_v8  ;;  %v3803_v11 = vadd.f32 %v8555_v49, %v8521_v38  ;;  %v12841_v41 = vld [vmem:[#allocation14_spill] sm:$0xff] }
 0x376   : > { %v8645_v3 = vmul.f32 1.442695, %v12827_v15  ;;  %v12833_v15 = vsub.f32 %v8167_v50, %v8229_v63  ;;  %v8673_v29 = vmul.f32 1.442695, %v12835_v23  ;;  %v3840_v50 = vadd.f32 %v8572_v27, %v8538_v24  ;;  %v12843_v8 = vld [vmem:[#allocation13_spill] sm:$0xff]  ;;  %v516_v27 = vpop.permute.xlu1 %515 }
 0x377   : > { %12839 = vst [vmem:[#allocation69_spill] sm:$0xff] %v8681_v0  ;;  %6448 = vpow2.f32 %v8444_v56  ;;  %v1341_v31 = vrot.slane %v8380_v45, 4  ;;  %v1378_v40 = vrot.slane %v8393_v4, 4  ;;  %v502_v23 = vmul.f32 %v500_v19, %v12841_v41  ;;  %v12845_v41 = vld [vmem:[#allocation20_spill] sm:$0xff] }
 0x378   : > { %v8668_v9 = vmul.f32 1.442695, %v12833_v15  ;;  %12836 = vst [vmem:[#allocation57_spill] sm:$0xff] %v8673_v29  ;;  %v8687_v15 = vpop.eup %6428  ;;  %6450 = vpow2.f32 %v8449_v37  ;;  %v3804_v44 = vadd.f32 %v8589_v18, %v3803_v11  ;;  %v3841_v63 = vadd.f32 %v8606_v58, %v3840_v50 }
 0x379   : > { %12840 = vst [vmem:[#allocation51_spill] sm:$0xff] %v8687_v15  ;;  %v8693_v29 = vpop.eup %6430  ;;  %v503_v49 = vmul.f32 %v500_v19, %v12843_v8  ;;  %6452 = vpow2.f32 %v8454_v46  ;;  %v1342_v56 = vmax.f32 %v8380_v45, %v1341_v31  ;;  %v1379_v38 = vmax.f32 %v8393_v4, %v1378_v40  ;;  %v12847_v19 = vld [vmem:[#allocation17_spill] sm:$0xff] }
 0x37a   : > { %12834 = vst [vmem:[#allocation41_spill] sm:$0xff] %v8668_v9  ;;  %12842 = vst [vmem:[#allocation52_spill] sm:$0xff] %v8693_v29  ;;  %v8699_v24 = vpop.eup %6432  ;;  %v504_v0 = vadd.f32 %v502_v23, %v12845_v41  ;;  %6454 = vpow2.f32 %v8459_v17  ;;  %v3805_v37 = vadd.f32 %v8623_v5, %v3804_v44  ;;  %v3842_v11 = vadd.f32 %v8640_v60, %v3841_v63  ;;  %v12849_v31 = vld [vmem:[#allocation21_spill] sm:$0xff]  ;;  %v12851_v44 = vld [vmem:[#allocation19_spill] sm:$0xff] }
 0x37b   : > { %12844 = vst [vmem:[#allocation38_spill] sm:$0xff] %v8699_v24  ;;  %v8705_v9 = vpop.eup %6434  ;;  %v505_v50 = vadd.f32 %v503_v49, %v12847_v19  ;;  %6456 = vpow2.f32 %v8464_v10  ;;  %v1343_v46 = vrot.slane %v1342_v56, 2  ;;  %v1380_v45 = vrot.slane %v1379_v38, 2  ;;  %v12853_v19 = vld [vmem:[#allocation18_spill] sm:$0xff]  ;;  %v12930_v60 = vld [vmem:[#allocation112_spill] sm:$0xff] }
 0x37c   : > { %12846 = vst [vmem:[#allocation26_spill] sm:$0xff] %v8705_v9  ;;  %v8711_v8 = vpop.eup %6436  ;;  %v518_v4 = vmul.f32 %v516_v27, %v12849_v31  ;;  %6458 = vpow2.f32 %v8469_v26  ;;  %v3806_v17 = vadd.f32 %v8657_v47, %v3805_v37  ;;  %v3843_v23 = vadd.f32 %v8675_v52, %v3842_v11  ;;  %v525_v31 = vpop.permute.xlu1 %524  ;;  %v12855_v11 = vld [vmem:[#allocation16_spill] sm:$0xff] }
 0x37d   : > { %12848 = vst [vmem:[#allocation72_spill] sm:$0xff] %v8711_v8  ;;  %v8715_v40 = vpop.eup %6438  ;;  %v519_v63 = vmul.f32 %v516_v27, %v12851_v44  ;;  %6460 = vpow2.f32 %v8474_v14  ;;  %v1344_v49 = vmax.f32 %v1342_v56, %v1343_v46  ;;  %v1381_v10 = vmax.f32 %v1379_v38, %v1380_v45 }
 0x37e   : > { %12850 = vst [vmem:[#allocation73_spill] sm:$0xff] %v8715_v40  ;;  %v8721_v41 = vpop.eup %6440  ;;  %v512_v5 = vadd.f32 %v12853_v19, %v504_v0  ;;  %6462 = vpow2.f32 %v8479_v53  ;;  %v3807_v26 = vadd.f32 %v8687_v15, %v3806_v17  ;;  %v3844_v37 = vadd.f32 %v8693_v29, %v3843_v23  ;;  %v12863_v19 = vld [vmem:[#allocation61_spill] sm:$0xff]  ;;  %v12894_v29 = vld [vmem:[#allocation78_spill] sm:$0xff] }
 0x37f   : > { %12852 = vst [vmem:[#allocation76_spill] sm:$0xff] %v8721_v41  ;;  %v8725_v18 = vpop.eup %6442  ;;  %v513_v47 = vadd.f32 %v12855_v11, %v505_v50  ;;  %6464 = vpow2.f32 %v8484_v25  ;;  %v1345_v14 = vrot.slane %v1344_v49, 1  ;;  %v1382_v56 = vrot.slane %v1381_v10, 1  ;;  %v12865_v11 = vld [vmem:[#allocation81_spill] sm:$0xff] }
 0x380   : > { %12854 = vst [vmem:[#allocation77_spill] sm:$0xff] %v8725_v18  ;;  %v8731_v27 = vpop.eup %6444  ;;  %v520_v38 = vadd.f32 %v518_v4, %v512_v5  ;;  %6466 = vpow2.f32 %v8489_v7  ;;  %v3808_v53 = vadd.f32 %v8699_v24, %v3807_v26  ;;  %v3845_v0 = vadd.f32 %v8705_v9, %v3844_v37  ;;  %v12870_v26 = vld [vmem:[#allocation46_spill] sm:$0xff] }
 0x381   : > { %12856 = vst [vmem:[#allocation104_spill] sm:$0xff] %v8731_v27  ;;  %v8734_v46 = vpop.eup %6446  ;;  %v521_v45 = vadd.f32 %v519_v63, %v513_v47  ;;  %6468 = vpow2.f32 %v8494_v42  ;;  %v8742_v50 = vmax.f32 %v1344_v49, %v1345_v14  ;;  %v8744_v23 = vmax.f32 %v1381_v10, %v1382_v56  ;;  %v12861_v42 = vld [vmem:[#allocation43_spill] sm:$0xff]  ;;  %v12862_v49 = vld [vmem:[#allocation44_spill] sm:$0xff]  ;;  %v12867_v56 = vld [vmem:[#allocation70_spill] sm:$0xff] }
 0x382   : > { %12857 = vst [vmem:[#allocation31_spill] sm:$0xff] %v8734_v46  ;;  %v8739_v17 = vpop.eup %6448  ;;  %v8746_v25 = vadd.f32 %v525_v31, %v520_v38  ;;  %6470 = vpow2.f32 %v8499_v34  ;;  %v3809_v7 = vadd.f32 %v8711_v8, %v3808_v53  ;;  %v3846_v4 = vadd.f32 %v8715_v40, %v3845_v0  ;;  %v12868_v38 = vld [vmem:[#allocation116_spill] sm:$0xff]  ;;  %v12869_v0 = vld [vmem:[#allocation117_spill] sm:$0xff]  ;;  %v12882_v24 = vld [vmem:[#allocation34_spill] sm:$0xff] }
 0x383   : > { %12858 = vst [vmem:[#allocation32_spill] sm:$0xff] %v8739_v17  ;;  %v8748_v5 = vpop.eup %6450  ;;  %v8753_v44 = vadd.f32 %v525_v31, %v521_v45  ;;  %6472 = vpow2.f32 %v8504_v16  ;;  %v12872_v16 = vld [vmem:[#allocation47_spill] sm:$0xff]  ;;  %v12874_v45 = vld [vmem:[#allocation88_spill] sm:$0xff]  ;;  %v12888_v9 = vld [vmem:[#allocation22_spill] sm:$0xff] }
 0x384   : > { %12859 = vst [vmem:[#allocation42_spill] sm:$0xff] %v8748_v5  ;;  %v8755_v47 = vpop.eup %6452  ;;  %6474 = vpow2.f32 %v8509_v30  ;;  %v3810_v37 = vadd.f32 %v8721_v41, %v3809_v7  ;;  %v3847_v31 = vadd.f32 %v8725_v18, %v3846_v4  ;;  %v12875_v30 = vld [vmem:[#allocation33_spill] sm:$0xff]  ;;  %v12876_v18 = vld [vmem:[#allocation48_spill] sm:$0xff]  ;;  %v12922_v53 = vld [vmem:[#allocation75_spill] sm:$0xff] }
 0x385   : > { %12860 = vst [vmem:[#allocation108_spill] sm:$0xff] %v8755_v47  ;;  %v8764_v34 = vpop.eup %6454  ;;  %6476 = vpow2.f32 %v12867_v56  ;;  %v12878_v56 = vld [vmem:[#allocation49_spill] sm:$0xff] }
 0x386   : > { %12864 = vst [vmem:[#allocation45_spill] sm:$0xff] %v8764_v34  ;;  %v8771_v14 = vpop.eup %6456  ;;  %6478 = vpow2.f32 %v8519_v12  ;;  %v3811_v7 = vadd.f32 %v8731_v27, %v3810_v37  ;;  %v3848_v4 = vadd.f32 %v8734_v46, %v3847_v31  ;;  %v12880_v41 = vld [vmem:[#allocation25_spill] sm:$0xff]  ;;  %v12881_v12 = vld [vmem:[#allocation115_spill] sm:$0xff] }
 0x387   : > { %12866 = vst [vmem:[#allocation111_spill] sm:$0xff] %v8771_v14  ;;  %v8780_v10 = vpop.eup %6458  ;;  %6480 = vpow2.f32 %v8526_v39  ;;  %v12884_v39 = vld [vmem:[#allocation90_spill] sm:$0xff]  ;;  %v12886_v46 = vld [vmem:[#allocation53_spill] sm:$0xff] }
 0x388   : > { %12871 = vst [vmem:[#allocation120_spill] sm:$0xff] %v8780_v10  ;;  %v8787_v63 = vpop.eup %6460  ;;  %6482 = vpow2.f32 %v8531_v21  ;;  %v3812_v37 = vadd.f32 %v8739_v17, %v3811_v7  ;;  %v3849_v31 = vadd.f32 %v8748_v5, %v3848_v4  ;;  %v12887_v21 = vld [vmem:[#allocation54_spill] sm:$0xff]  ;;  %v12892_v5 = vld [vmem:[#allocation91_spill] sm:$0xff] }
 0x389   : > { %12873 = vst [vmem:[#allocation121_spill] sm:$0xff] %v8787_v63  ;;  %v8796_v8 = vpop.eup %6462  ;;  %6484 = vpow2.f32 %v8536_v1  ;;  %v12890_v1 = vld [vmem:[#allocation60_spill] sm:$0xff] }
 0x38a   : > { %12877 = vst [vmem:[#allocation83_spill] sm:$0xff] %v8796_v8  ;;  %v8803_v27 = vpop.eup %6464  ;;  %6486 = vpow2.f32 %v8543_v20  ;;  %v3813_v7 = vadd.f32 %v8755_v47, %v3812_v37  ;;  %v3850_v4 = vadd.f32 %v8764_v34, %v3849_v31  ;;  %v12893_v20 = vld [vmem:[#allocation80_spill] sm:$0xff]  ;;  %v12898_v34 = vld [vmem:[#allocation37_spill] sm:$0xff] }
 0x38b   : > { %12879 = vst [vmem:[#allocation84_spill] sm:$0xff] %v8803_v27  ;;  %v8812_v40 = vpop.eup %6466  ;;  %6488 = vpow2.f32 %v8548_v13  ;;  %v12896_v13 = vld [vmem:[#allocation79_spill] sm:$0xff] }
 0x38c   : > { %12883 = vst [vmem:[#allocation124_spill] sm:$0xff] %v8812_v40  ;;  %v8819_v17 = vpop.eup %6468  ;;  %6490 = vpow2.f32 %v8553_v57  ;;  %v3814_v37 = vadd.f32 %v8771_v14, %v3813_v7  ;;  %v3851_v31 = vadd.f32 %v8780_v10, %v3850_v4  ;;  %v12904_v10 = vld [vmem:[#allocation85_spill] sm:$0xff] }
 0x38d   : > { %12885 = vst [vmem:[#allocation125_spill] sm:$0xff] %v8819_v17  ;;  %v8828_v15 = vpop.eup %6470  ;;  %6492 = vpow2.f32 %v8560_v62  ;;  %v12902_v62 = vld [vmem:[#allocation127_spill] sm:$0xff] }
 0x38e   : > { %12889 = vst [vmem:[#allocation92_spill] sm:$0xff] %v8828_v15  ;;  %v8835_v47 = vpop.eup %6472  ;;  %6494 = vpow2.f32 %v8565_v35  ;;  %v3815_v7 = vadd.f32 %v8787_v63, %v3814_v37  ;;  %v3852_v4 = vadd.f32 %v8796_v8, %v3851_v31  ;;  %v12910_v8 = vld [vmem:[#allocation99_spill] sm:$0xff] }
 0x38f   : > { %12891 = vst [vmem:[#allocation93_spill] sm:$0xff] %v8835_v47  ;;  %v8844_v52 = vpop.eup %6474  ;;  %6496 = vpow2.f32 %v8570_v36  ;;  %v12908_v36 = vld [vmem:[#allocation40_spill] sm:$0xff] }
 0x390   : > { %12895 = vst [vmem:[#allocation95_spill] sm:$0xff] %v8844_v52  ;;  %v8851_v14 = vpop.eup %6476  ;;  %6498 = vpow2.f32 %v8577_v61  ;;  %v3816_v37 = vadd.f32 %v8803_v27, %v3815_v7  ;;  %v3853_v31 = vadd.f32 %v8812_v40, %v3852_v4 }
 0x391   : > { %12897 = vst [vmem:[#allocation96_spill] sm:$0xff] %v8851_v14  ;;  %v8860_v58 = vpop.eup %6478  ;;  %6500 = vpow2.f32 %v8582_v33  ;;  %v12914_v33 = vld [vmem:[#allocation98_spill] sm:$0xff] }
 0x392   : > { %12901 = vst [vmem:[#allocation101_spill] sm:$0xff] %v8860_v58  ;;  %v8867_v63 = vpop.eup %6480  ;;  %6502 = vpow2.f32 %v8587_v22  ;;  %v3817_v7 = vadd.f32 %v8819_v17, %v3816_v37  ;;  %v3854_v4 = vadd.f32 %v8828_v15, %v3853_v31  ;;  %v12936_v22 = vld [vmem:[#allocation118_spill] sm:$0xff] }
 0x393   : > { %12903 = vst [vmem:[#allocation102_spill] sm:$0xff] %v8867_v63  ;;  %v8876_v57 = vpop.eup %6482  ;;  %6504 = vpow2.f32 %v8594_v2  ;;  %v12920_v2 = vld [vmem:[#allocation107_spill] sm:$0xff] }
 0x394   : > { %12907 = vst [vmem:[#allocation103_spill] sm:$0xff] %v8876_v57  ;;  %v8883_v27 = vpop.eup %6484  ;;  %6506 = vpow2.f32 %v8599_v59  ;;  %v3818_v37 = vadd.f32 %v8835_v47, %v3817_v7  ;;  %v3855_v31 = vadd.f32 %v8844_v52, %v3854_v4  ;;  %v12955_v52 = vld [vmem:[#allocation57_spill] sm:$0xff] }
 0x395   : > { %12909 = vst [vmem:[#allocation94_spill] sm:$0xff] %v8883_v27  ;;  %v8892_v35 = vpop.eup %6486  ;;  %6508 = vpow2.f32 %v8604_v6 }
 0x396   : > { %12913 = vst [vmem:[#allocation82_spill] sm:$0xff] %v8892_v35  ;;  %v8899_v17 = vpop.eup %6488  ;;  %6510 = vpow2.f32 %v8611_v28  ;;  %v3819_v7 = vadd.f32 %v8851_v14, %v3818_v37  ;;  %v3856_v4 = vadd.f32 %v8860_v58, %v3855_v31  ;;  %v12927_v37 = vld [vmem:[#allocation64_spill] sm:$0xff]  ;;  %v12928_v14 = vld [vmem:[#allocation110_spill] sm:$0xff] }
 0x397   : > { %12915 = vst [vmem:[#allocation14_spill] sm:$0xff] %v8899_v17  ;;  %v8908_v61 = vpop.eup %6490  ;;  %6512 = vpow2.f32 %v12922_v53  ;;  %v12934_v53 = vld [vmem:[#allocation59_spill] sm:$0xff] }
 0x398   : > { %12919 = vst [vmem:[#allocation13_spill] sm:$0xff] %v8908_v61  ;;  %v8915_v47 = vpop.eup %6492  ;;  %6514 = vpow2.f32 %v12927_v37  ;;  %v3820_v31 = vadd.f32 %v8867_v63, %v3819_v7  ;;  %v3857_v6 = vadd.f32 %v8876_v57, %v3856_v4  ;;  %v12942_v57 = vld [vmem:[#allocation28_spill] sm:$0xff] }
 0x399   : > { %12921 = vst [vmem:[#allocation20_spill] sm:$0xff] %v8915_v47  ;;  %v8924_v40 = vpop.eup %6494  ;;  %6516 = vpow2.f32 %v8628_v51  ;;  %v12940_v51 = vld [vmem:[#allocation123_spill] sm:$0xff] }
 0x39a   : > { %12926 = vst [vmem:[#allocation17_spill] sm:$0xff] %v8924_v40  ;;  %v8931_v58 = vpop.eup %6496  ;;  %6518 = vpow2.f32 %v8633_v48  ;;  %v3821_v7 = vadd.f32 %v8883_v27, %v3820_v31  ;;  %v3858_v4 = vadd.f32 %v8892_v35, %v3857_v6 }
 0x39b   : > { %12929 = vst [vmem:[#allocation21_spill] sm:$0xff] %v8931_v58  ;;  %v8940_v15 = vpop.eup %6498  ;;  %6520 = vpow2.f32 %v8638_v55 }
 0x39c   : > { %12933 = vst [vmem:[#allocation19_spill] sm:$0xff] %v8940_v15  ;;  %v8947_v63 = vpop.eup %6500  ;;  %6522 = vpow2.f32 %v8645_v3  ;;  %v3822_v6 = vadd.f32 %v8899_v17, %v3821_v7  ;;  %v3859_v31 = vadd.f32 %v8908_v61, %v3858_v4  ;;  %v12956_v61 = vld [vmem:[#allocation128_spill] sm:$0xff]  ;;  %v12963_v3 = vsub.f32 %v12861_v42, %v8742_v50 }
 0x39d   : > { %12935 = vst [vmem:[#allocation18_spill] sm:$0xff] %v8947_v63  ;;  %v8956_v28 = vpop.eup %6502  ;;  %6524 = vpow2.f32 %v8650_v54  ;;  %v12967_v42 = vsub.f32 %v12865_v11, %v8744_v23 }
 0x39e   : > { %12939 = vst [vmem:[#allocation16_spill] sm:$0xff] %v8956_v28  ;;  %v8963_v27 = vpop.eup %6504  ;;  %6526 = vpow2.f32 %v8655_v32  ;;  %v3823_v7 = vadd.f32 %v8915_v47, %v3822_v6  ;;  %v3860_v4 = vadd.f32 %v8924_v40, %v3859_v31  ;;  %v12952_v6 = vld [vmem:[#allocation41_spill] sm:$0xff]  ;;  %v12953_v47 = vld [vmem:[#allocation87_spill] sm:$0xff]  ;;  %v1448_v59 = vmul.f32 1.442695, %v12963_v3 }
 0x39f   : > { %12941 = vst [vmem:[#allocation43_spill] sm:$0xff] %v8963_v27  ;;  %v8972_v37 = vpop.eup %6506  ;;  %6528 = vpow2.f32 %v8663_v43  ;;  %v1454_v3 = vmul.f32 1.442695, %v12967_v42 }
 0x3a0   : > { %12945 = vst [vmem:[#allocation44_spill] sm:$0xff] %v8972_v37  ;;  %v8979_v17 = vpop.eup %6508  ;;  %6530 = vpow2.f32 %v12952_v6  ;;  %v3824_v31 = vadd.f32 %v8931_v58, %v3823_v7  ;;  %v3861_v54 = vadd.f32 %v8940_v15, %v3860_v4  ;;  %v12960_v7 = vld [vmem:[#allocation69_spill] sm:$0xff]  ;;  %v12961_v58 = vld [vmem:[#allocation131_spill] sm:$0xff]  ;;  %v12964_v6 = vsub.f32 %v12862_v49, %v8744_v23 }
 0x3a1   : > { %12947 = vst [vmem:[#allocation61_spill] sm:$0xff] %v8979_v17  ;;  %v8988_v48 = vpop.eup %6510  ;;  %6532 = vpow2.f32 %v12955_v52  ;;  %v12968_v49 = vsub.f32 %v12868_v38, %v8742_v50 }
 0x3a2   : > { %12951 = vst [vmem:[#allocation81_spill] sm:$0xff] %v8988_v48  ;;  %v8995_v40 = vpop.eup %6512  ;;  %6534 = vpow2.f32 %v12960_v7  ;;  %v3825_v4 = vadd.f32 %v8947_v63, %v3824_v31  ;;  %v3862_v43 = vadd.f32 %v8956_v28, %v3861_v54  ;;  %v1450_v35 = vmul.f32 1.442695, %v12964_v6 }
 0x3a3   : > { %12954 = vst [vmem:[#allocation70_spill] sm:$0xff] %v8995_v40  ;;  %v9004_v55 = vpop.eup %6514  ;;  %v12965_v7 = vsub.f32 %v12863_v19, %v8742_v50  ;;  %v634_v54 = vcombine.low %v8746_v25, %v8753_v44  ;;  %v1456_v6 = vmul.f32 1.442695, %v12968_v49  ;;  %6536 = vpow2.f32 %v1448_v59 }
 0x3a4   : > { %12959 = vst [vmem:[#allocation116_spill] sm:$0xff] %v9004_v55  ;;  %v9011_v15 = vpop.eup %6516  ;;  %v3826_v52 = vadd.f32 %v8963_v27, %v3825_v4  ;;  %v3863_v63 = vadd.f32 %v8972_v37, %v3862_v43  ;;  %v12970_v25 = vsub.f32 %v12869_v0, %v8744_v23  ;;  %v12971_v19 = vsub.f32 %v12870_v26, %v8742_v50 }
 0x3a5   : > { %12962 = vst [vmem:[#allocation117_spill] sm:$0xff] %v9011_v15  ;;  %v1452_v32 = vmul.f32 1.442695, %v12965_v7  ;;  %v9024_v31 = vpop.eup %6518  ;;  %v12972_v43 = vsub.f32 %v12872_v16, %v8744_v23  ;;  %636 = vst [vmem:[#allocation3] sm:$0xff] %v634_v54  ;;  %6538 = vpow2.f32 %v1450_v35  ;;  %v12974_v0 = vsub.f32 %v12874_v45, %v8742_v50 }
 0x3a6   : > { %12966 = vst [vmem:[#allocation46_spill] sm:$0xff] %v9024_v31  ;;  %v9034_v28 = vpop.eup %6520  ;;  %v1458_v44 = vmul.f32 1.442695, %v12970_v25  ;;  %v1460_v4 = vmul.f32 1.442695, %v12971_v19  ;;  %v3827_v38 = vadd.f32 %v8979_v17, %v3826_v52  ;;  %v3864_v42 = vadd.f32 %v8988_v48, %v3863_v63 }
 0x3a7   : > { %12969 = vst [vmem:[#allocation47_spill] sm:$0xff] %v9034_v28  ;;  %v1462_v11 = vmul.f32 1.442695, %v12972_v43  ;;  %v9045_v7 = vpop.eup %6522  ;;  %v1464_v59 = vmul.f32 1.442695, %v12974_v0  ;;  %6540 = vpow2.f32 %v1452_v32  ;;  %v12976_v26 = vsub.f32 %v12875_v30, %v8744_v23 }
 0x3a8   : > { %12973 = vst [vmem:[#allocation88_spill] sm:$0xff] %v9045_v7  ;;  %v9052_v49 = vpop.eup %6524  ;;  %v12977_v54 = vsub.f32 %v12876_v18, %v8742_v50  ;;  %v12978_v52 = vsub.f32 %v12878_v56, %v8744_v23  ;;  %v3828_v45 = vadd.f32 %v8995_v40, %v3827_v38  ;;  %v3865_v19 = vadd.f32 %v9004_v55, %v3864_v42 }
 0x3a9   : > { %12975 = vst [vmem:[#allocation33_spill] sm:$0xff] %v9052_v49  ;;  %v1466_v16 = vmul.f32 1.442695, %v12976_v26  ;;  %v9063_v35 = vpop.eup %6526  ;;  %6542 = vpow2.f32 %v1454_v3  ;;  %v12980_v32 = vsub.f32 %v12880_v41, %v8742_v50  ;;  %v12982_v18 = vsub.f32 %v12881_v12, %v8744_v23 }
 0x3aa   : > { %v1468_v25 = vmul.f32 1.442695, %v12977_v54  ;;  %v1470_v63 = vmul.f32 1.442695, %v12978_v52  ;;  %12979 = vst [vmem:[#allocation48_spill] sm:$0xff] %v9063_v35  ;;  %v9070_v43 = vpop.eup %6528  ;;  %6544 = vpow2.f32 %v1456_v6  ;;  %v12983_v56 = vsub.f32 %v12882_v24, %v8742_v50 }
 0x3ab   : > { %v1472_v30 = vmul.f32 1.442695, %v12980_v32  ;;  %12981 = vst [vmem:[#allocation49_spill] sm:$0xff] %v9070_v43  ;;  %v1474_v0 = vmul.f32 1.442695, %v12982_v18  ;;  %v12984_v38 = vsub.f32 %v12884_v39, %v8744_v23  ;;  %v9081_v3 = vpop.eup %6530  ;;  %v3829_v41 = vadd.f32 %v9011_v15, %v3828_v45 }
 0x3ac   : > { %v1476_v26 = vmul.f32 1.442695, %v12983_v56  ;;  %12985 = vst [vmem:[#allocation25_spill] sm:$0xff] %v9081_v3  ;;  %v3866_v54 = vadd.f32 %v9024_v31, %v3865_v19  ;;  %6546 = vpow2.f32 %v1458_v44  ;;  %v12986_v6 = vsub.f32 %v12886_v46, %v8742_v50  ;;  %v9088_v52 = vpop.eup %6532 }
 0x3ad   : > { %v1478_v42 = vmul.f32 1.442695, %v12984_v38  ;;  %12987 = vst [vmem:[#allocation115_spill] sm:$0xff] %v9088_v52  ;;  %6548 = vpow2.f32 %v1460_v4  ;;  %v12988_v24 = vsub.f32 %v12887_v21, %v8744_v23  ;;  %v12989_v39 = vsub.f32 %v12888_v9, %v8742_v50  ;;  %v9099_v44 = vpop.eup %6534 }
 0x3ae   : > { %v1480_v12 = vmul.f32 1.442695, %v12986_v6  ;;  %v12990_v45 = vsub.f32 %v12890_v1, %v8744_v23  ;;  %12991 = vst [vmem:[#allocation34_spill] sm:$0xff] %v9099_v44  ;;  %v3830_v46 = vadd.f32 %v9034_v28, %v3829_v41  ;;  %v3867_v56 = vadd.f32 %v9045_v7, %v3866_v54 }
 0x3af   : > { %v1482_v32 = vmul.f32 1.442695, %v12988_v24  ;;  %v1484_v18 = vmul.f32 1.442695, %v12989_v39  ;;  %6550 = vpow2.f32 %v1462_v11  ;;  %v12992_v4 = vsub.f32 %v12892_v5, %v8742_v50  ;;  %v9128_v24 = vpop.eup %6536 }
 0x3b0   : > { %v1486_v19 = vmul.f32 1.442695, %v12990_v45  ;;  %6552 = vpow2.f32 %v1464_v59  ;;  %v12993_v9 = vsub.f32 %v12893_v20, %v8744_v23  ;;  %v12994_v1 = vsub.f32 %v12894_v29, %v8742_v50  ;;  %v12997_v29 = vld [vmem:[#allocation50_spill] sm:$0xff] }
 0x3b1   : > { %v1488_v21 = vmul.f32 1.442695, %v12992_v4  ;;  %v12995_v41 = vsub.f32 %v12896_v13, %v8744_v23  ;;  %v3831_v11 = vadd.f32 %v9052_v49, %v3830_v46  ;;  %v3868_v5 = vadd.f32 %v9063_v35, %v3867_v56  ;;  %v12999_v13 = vld [vmem:[#allocation126_spill] sm:$0xff] }
 0x3b2   : > { %v9109_v38 = vmul.f32 1.442695, %v12993_v9  ;;  %v9114_v6 = vmul.f32 1.442695, %v12994_v1  ;;  %6554 = vpow2.f32 %v1466_v16  ;;  %v12996_v20 = vsub.f32 %v12898_v34, %v8742_v50  ;;  %v9145_v34 = vpop.eup %6538 }
 0x3b3   : > { %v9119_v54 = vmul.f32 1.442695, %v12995_v41  ;;  %6556 = vpow2.f32 %v1468_v25  ;;  %v12998_v39 = vsub.f32 %v12997_v29, %v8744_v23  ;;  %v13000_v4 = vsub.f32 %v12999_v13, %v8742_v50  ;;  %13002 = vst [vmem:[#allocation90_spill] sm:$0xff] %v9145_v34  ;;  %v13005_v29 = vld [vmem:[#allocation86_spill] sm:$0xff]  ;;  %v13007_v13 = vld [vmem:[#allocation39_spill] sm:$0xff] }
 0x3b4   : > { %v9126_v59 = vmul.f32 1.442695, %v12996_v20  ;;  %v13001_v16 = vsub.f32 %v12902_v62, %v8744_v23  ;;  %v3832_v9 = vadd.f32 %v9070_v43, %v3831_v11  ;;  %v3869_v25 = vadd.f32 %v9081_v3, %v3868_v5  ;;  %v9154_v20 = vpop.eup %6540 }
 0x3b5   : > { %v9133_v45 = vmul.f32 1.442695, %v12998_v39  ;;  %v9138_v46 = vmul.f32 1.442695, %v13000_v4  ;;  %6558 = vpow2.f32 %v1470_v63  ;;  %v13003_v1 = vsub.f32 %v12904_v10, %v8742_v50  ;;  %13004 = vst [vmem:[#allocation53_spill] sm:$0xff] %v9154_v20  ;;  %v9171_v10 = vpop.eup %6542 }
 0x3b6   : > { %v9143_v56 = vmul.f32 1.442695, %v13001_v16  ;;  %6560 = vpow2.f32 %v1472_v30  ;;  %v13006_v62 = vsub.f32 %v13005_v29, %v8744_v23  ;;  %v13008_v4 = vsub.f32 %v13007_v13, %v8742_v50  ;;  %13010 = vst [vmem:[#allocation54_spill] sm:$0xff] %v9171_v10  ;;  %v13012_v13 = vld [vmem:[#allocation100_spill] sm:$0xff] }
 0x3b7   : > { %v9152_v41 = vmul.f32 1.442695, %v13003_v1  ;;  %v13009_v63 = vsub.f32 %v12908_v36, %v8744_v23  ;;  %v3833_v16 = vadd.f32 %v9088_v52, %v3832_v9  ;;  %v3870_v30 = vadd.f32 %v9099_v44, %v3869_v25 }
 0x3b8   : > { %v9159_v39 = vmul.f32 1.442695, %v13006_v62  ;;  %v9164_v11 = vmul.f32 1.442695, %v13008_v4  ;;  %6562 = vpow2.f32 %v1474_v0  ;;  %v13011_v1 = vsub.f32 %v12910_v8, %v8742_v50  ;;  %v9180_v62 = vpop.eup %6544 }
 0x3b9   : > { %v9169_v5 = vmul.f32 1.442695, %v13009_v63  ;;  %6564 = vpow2.f32 %v1476_v26  ;;  %v13013_v36 = vsub.f32 %v13012_v13, %v8744_v23  ;;  %v13014_v63 = vld [vmem:[#allocation97_spill] sm:$0xff]  ;;  %v13016_v0 = vsub.f32 %v12914_v33, %v8744_v23  ;;  %v9197_v8 = vpop.eup %6546  ;;  %v13021_v33 = vld [vmem:[#allocation27_spill] sm:$0xff] }
 0x3ba   : > { %v9178_v29 = vmul.f32 1.442695, %v13011_v1  ;;  %v13015_v43 = vsub.f32 %v13014_v63, %v8742_v50  ;;  %v3834_v1 = vrot.slane %v3833_v16, 4  ;;  %v3871_v52 = vrot.slane %v3870_v30, 4  ;;  %v13017_v26 = vld [vmem:[#allocation105_spill] sm:$0xff]  ;;  %v9204_v44 = vpop.eup %6548 }
 0x3bb   : > { %v9185_v4 = vmul.f32 1.442695, %v13013_v36  ;;  %v9195_v25 = vmul.f32 1.442695, %v13016_v0  ;;  %6566 = vpow2.f32 %v1478_v42  ;;  %v13018_v13 = vsub.f32 %v13017_v26, %v8742_v50  ;;  %v9221_v26 = vpop.eup %6550 }
 0x3bc   : > { %v9190_v9 = vmul.f32 1.442695, %v13015_v43  ;;  %6568 = vpow2.f32 %v1480_v12  ;;  %v13019_v43 = vld [vmem:[#allocation106_spill] sm:$0xff]  ;;  %v13022_v0 = vsub.f32 %v13021_v33, %v8742_v50  ;;  %v13023_v42 = vsub.f32 %v12920_v2, %v8744_v23  ;;  %13024 = vst [vmem:[#allocation22_spill] sm:$0xff] %v9221_v26  ;;  %v13025_v12 = vld [vmem:[#allocation55_spill] sm:$0xff]  ;;  %v9228_v7 = vpop.eup %6552  ;;  %v13027_v33 = vld [vmem:[#allocation56_spill] sm:$0xff] }
 0x3bd   : > { %v9202_v36 = vmul.f32 1.442695, %v13018_v13  ;;  %v13020_v63 = vsub.f32 %v13019_v43, %v8744_v23  ;;  %v3835_v13 = vadd.f32 %v3834_v1, %v3833_v16  ;;  %v3872_v35 = vadd.f32 %v3871_v52, %v3870_v30  ;;  %v13029_v2 = vld [vmem:[#allocation109_spill] sm:$0xff]  ;;  %v9245_v16 = vpop.eup %6554 }
 0x3be   : > { %v9214_v49 = vmul.f32 1.442695, %v13022_v0  ;;  %v9219_v28 = vmul.f32 1.442695, %v13023_v42  ;;  %6570 = vpow2.f32 %v1482_v32  ;;  %v13026_v43 = vsub.f32 %v13025_v12, %v8742_v50 }
 0x3bf   : > { %v9209_v3 = vmul.f32 1.442695, %v13020_v63  ;;  %6572 = vpow2.f32 %v1484_v18  ;;  %v13028_v0 = vsub.f32 %v13027_v33, %v8744_v23  ;;  %v13030_v42 = vsub.f32 %v13029_v2, %v8742_v50  ;;  %v13033_v33 = vld [vmem:[#allocation113_spill] sm:$0xff] }
 0x3c0   : > { %v9226_v63 = vmul.f32 1.442695, %v13026_v43  ;;  %v13031_v52 = vsub.f32 %v12928_v14, %v8744_v23  ;;  %v3836_v30 = vrot.slane %v3835_v13, 2  ;;  %v3873_v1 = vrot.slane %v3872_v35, 2  ;;  %v9252_v43 = vpop.eup %6556  ;;  %v13035_v14 = vld [vmem:[#allocation58_spill] sm:$0xff] }
 0x3c1   : > { %v9233_v15 = vmul.f32 1.442695, %v13028_v0  ;;  %v9238_v40 = vmul.f32 1.442695, %v13030_v42  ;;  %6574 = vpow2.f32 %v1486_v19  ;;  %v13032_v18 = vsub.f32 %v12930_v60, %v8742_v50  ;;  %v9269_v60 = vpop.eup %6558 }
 0x3c2   : > { %v9243_v32 = vmul.f32 1.442695, %v13031_v52  ;;  %6576 = vpow2.f32 %v1488_v21  ;;  %v13034_v0 = vsub.f32 %v13033_v33, %v8744_v23  ;;  %v13036_v42 = vsub.f32 %v13035_v14, %v8742_v50  ;;  %v13039_v14 = vld [vmem:[#allocation119_spill] sm:$0xff] }
 0x3c3   : > { %v9250_v12 = vmul.f32 1.442695, %v13032_v18  ;;  %v13037_v19 = vsub.f32 %v12934_v53, %v8744_v23  ;;  %v3837_v18 = vadd.f32 %v3836_v30, %v3835_v13  ;;  %v3874_v55 = vadd.f32 %v3873_v1, %v3872_v35 }
 0x3c4   : > { %v9257_v2 = vmul.f32 1.442695, %v13034_v0  ;;  %v9262_v52 = vmul.f32 1.442695, %v13036_v42  ;;  %6578 = vpow2.f32 %v9109_v38  ;;  %v13038_v21 = vsub.f32 %v12936_v22, %v8742_v50  ;;  %v9277_v0 = vpop.eup %6560 }
 0x3c5   : > { %v9267_v31 = vmul.f32 1.442695, %v13037_v19  ;;  %6580 = vpow2.f32 %v9114_v6  ;;  %v13040_v53 = vsub.f32 %v13039_v14, %v8744_v23  ;;  %v13041_v19 = vld [vmem:[#allocation122_spill] sm:$0xff]  ;;  %v13043_v38 = vsub.f32 %v12940_v51, %v8744_v23  ;;  %v9295_v30 = vpop.eup %6562 }
 0x3c6   : > { %v9275_v33 = vmul.f32 1.442695, %v13038_v21  ;;  %v13042_v13 = vsub.f32 %v13041_v19, %v8742_v50  ;;  %v3838_v1 = vrot.slane %v3837_v18, 1  ;;  %v3875_v21 = vrot.slane %v3874_v55, 1  ;;  %v13047_v19 = vld [vmem:[#allocation36_spill] sm:$0xff] }
 0x3c7   : > { %v9283_v42 = vmul.f32 1.442695, %v13040_v53  ;;  %v9293_v22 = vmul.f32 1.442695, %v13043_v38  ;;  %6582 = vpow2.f32 %v9119_v54  ;;  %v13044_v6 = vsub.f32 %v12942_v57, %v8742_v50  ;;  %v9303_v53 = vpop.eup %6564  ;;  %v13050_v38 = vld [vmem:[#allocation35_spill] sm:$0xff]  ;;  %v13052_v54 = vld [vmem:[#allocation114_spill] sm:$0xff] }
 0x3c8   : > { %v9288_v35 = vmul.f32 1.442695, %v13042_v13  ;;  %13046 = vst [vmem:[#allocation91_spill] sm:$0xff] %v9303_v53  ;;  %6584 = vpow2.f32 %v9126_v59  ;;  %v13048_v51 = vsub.f32 %v13047_v19, %v8744_v23  ;;  %v13051_v17 = vsub.f32 %v13050_v38, %v8742_v50  ;;  %v13055_v59 = vld [vmem:[#allocation66_spill] sm:$0xff]  ;;  %v3943_v38 = vld [vmem:[#allocation3] sm:$0xcc] }
 0x3c9   : > { %v9301_v14 = vmul.f32 1.442695, %v13044_v6  ;;  %v13053_v48 = vsub.f32 %v13052_v54, %v8744_v23  ;;  %v9321_v6 = vpop.eup %6566  ;;  %v3839_v37 = vadd.f32 %v3838_v1, %v3837_v18  ;;  %6586 = vpow2.f32 %v9133_v45  ;;  %v13057_v54 = vld [vmem:[#allocation67_spill] sm:$0xff]  ;;  %v13060_v18 = vld [vmem:[#allocation89_spill] sm:$0xff] }
 0x3ca   : > { %v9309_v13 = vmul.f32 1.442695, %v13048_v51  ;;  %v9314_v27 = vmul.f32 1.442695, %v13051_v17  ;;  %v13056_v19 = vsub.f32 %v13055_v59, %v8742_v50  ;;  %v9329_v17 = vpop.eup %6568  ;;  %6588 = vpow2.f32 %v9138_v46 }
 0x3cb   : > { %13045 = vst [vmem:[#allocation60_spill] sm:$0xff] %v9301_v14  ;;  %v9319_v57 = vmul.f32 1.442695, %v13053_v48  ;;  %v3876_v14 = vadd.f32 %v3875_v21, %v3874_v55  ;;  %v13058_v48 = vsub.f32 %v13057_v54, %v8744_v23  ;;  %v13061_v55 = vsub.f32 %v13060_v18, %v8742_v50  ;;  %v9347_v59 = vpop.eup %6570  ;;  %v13065_v54 = vld [vmem:[#allocation129_spill] sm:$0xff]  ;;  %v13067_v18 = vld [vmem:[#allocation130_spill] sm:$0xff] }
 0x3cc   : > { %13049 = vst [vmem:[#allocation80_spill] sm:$0xff] %v9309_v13  ;;  %v9327_v51 = vmul.f32 1.442695, %v13056_v19  ;;  %v1716_v13 = vld [vmem:[#allocation3] sm:$0x33]  ;;  %v13063_v1 = vsub.f32 %v12953_v47, %v8744_v23  ;;  %6590 = vrcp.f32 %v3839_v37  ;;  %v13064_v46 = vsub.f32 %v12956_v61, %v8742_v50  ;;  %v9364_v47 = vpop.eup %6572 }
 0x3cd   : > { %13054 = vst [vmem:[#allocation78_spill] sm:$0xff] %v9319_v57  ;;  %v9335_v57 = vmul.f32 1.442695, %v13058_v48  ;;  %v9340_v45 = vmul.f32 1.442695, %v13061_v55  ;;  %v13066_v48 = vsub.f32 %v13065_v54, %v8744_v23  ;;  %v13068_v55 = vsub.f32 %v13067_v18, %v8742_v50  ;;  %v9375_v54 = vpop.eup %6574 }
 0x3ce   : > { %v9345_v21 = vmul.f32 1.442695, %v13063_v1  ;;  %v9352_v19 = vmul.f32 1.442695, %v13064_v46  ;;  %6592 = vrcp.f32 %v3876_v14  ;;  %v13069_v37 = vsub.f32 %v12961_v58, %v8744_v23  ;;  %v9380_v14 = vpop.eup %6576 }
 0x3cf   : > { %13059 = vst [vmem:[#allocation79_spill] sm:$0xff] %v9335_v57  ;;  %13062 = vst [vmem:[#allocation37_spill] sm:$0xff] %v9340_v45  ;;  %v9357_v57 = vmul.f32 1.442695, %v13066_v48  ;;  %v9362_v45 = vmul.f32 1.442695, %v13068_v55  ;;  %v1576_v61 = vadd.f32 %v9154_v20, %v9128_v24  ;;  %v1613_v46 = vadd.f32 %v9171_v10, %v9145_v34 }
 0x3d0   : > { %v9369_v1 = vmul.f32 1.442695, %v13069_v37  ;;  %6594 = vpow2.f32 %v9143_v56  ;;  %v1718_v50 = vcombine.high %v1716_v13, %v1716_v13  ;;  %v9378_v48 = vand.u32 4294901760, %v1716_v13  ;;  %v9385_v37 = vpop.eup %6578 }
 0x3d1   : > { %v3945_v18 = vcombine.high %v3943_v38, %v3943_v38  ;;  %6596 = vpow2.f32 %v9152_v41  ;;  %v1577_v58 = vadd.f32 %v9180_v62, %v1576_v61  ;;  %v1614_v23 = vadd.f32 %v9197_v8, %v1613_v46  ;;  %v9393_v20 = vpop.eup %6580 }
 0x3d2   : > { %13070 = vst [vmem:[#allocation127_spill] sm:$0xff] %v9378_v48  ;;  %v3946_v55 = vrot.slane %v3943_v38, 2  ;;  %6598 = vpow2.f32 %v9159_v39  ;;  %v9388_v10 = vand.u32 4294901760, %v1718_v50  ;;  %v9391_v34 = vsub.f32 %v1716_v13, %v9378_v48  ;;  %v9400_v38 = vpop.eup %6582 }
 0x3d3   : > { %v3947_v56 = vrot.slane %v3945_v18, 2  ;;  %6600 = vpow2.f32 %v9164_v11  ;;  %v1578_v41 = vadd.f32 %v9204_v44, %v1577_v58  ;;  %v1615_v61 = vadd.f32 %v9221_v26, %v1614_v23  ;;  %v9409_v48 = vpop.eup %6584 }
 0x3d4   : > { %13071 = vst [vmem:[#allocation85_spill] sm:$0xff] %v9388_v10  ;;  %13072 = vst [vmem:[#allocation40_spill] sm:$0xff] %v9391_v34  ;;  %v9398_v46 = vand.u32 4294901760, %v3946_v55  ;;  %6602 = vpow2.f32 %v9169_v5  ;;  %v9404_v39 = vsub.f32 %v1718_v50, %v9388_v10  ;;  %v11939_v13 = vand.u32 4294901760, %v9391_v34  ;;  %v9417_v26 = vpop.eup %6586 }
 0x3d5   : > { %v9406_v18 = vand.u32 4294901760, %v3947_v56  ;;  %13076 = vst [vmem:[#allocation75_spill] sm:$0xff] %v9409_v48  ;;  %6604 = vpow2.f32 %v9178_v29  ;;  %v1579_v11 = vadd.f32 %v9228_v7, %v1578_v41  ;;  %v1616_v58 = vadd.f32 %v9245_v16, %v1615_v61  ;;  %v9429_v41 = vpop.eup %6588 }
 0x3d6   : > { %13073 = vst [vmem:[#allocation99_spill] sm:$0xff] %v9398_v46  ;;  %13074 = vst [vmem:[#allocation98_spill] sm:$0xff] %v9404_v39  ;;  %v9415_v23 = vsub.f32 %v3946_v55, %v9398_v46  ;;  %6606 = vpow2.f32 %v9185_v4  ;;  %v11944_v5 = vand.u32 4294901760, %v9404_v39  ;;  %v9427_v29 = vsub.f32 %v9391_v34, %v11939_v13  ;;  %v9435_v46 = vpop.eup %6590 }
 0x3d7   : > { %13075 = vst [vmem:[#allocation107_spill] sm:$0xff] %v9406_v18  ;;  %v9422_v50 = vsub.f32 %v3947_v56, %v9406_v18  ;;  %6608 = vpow2.f32 %v9190_v9  ;;  %v1580_v55 = vadd.f32 %v9252_v43, %v1579_v11  ;;  %v1617_v61 = vadd.f32 %v9269_v60, %v1616_v58  ;;  %v13080_v58 = vld [vmem:[#allocation71_spill] sm:$0xff] }
 0x3d8   : > { %13077 = vst [vmem:[#allocation64_spill] sm:$0xff] %v9415_v23  ;;  %13079 = vst [vmem:[#allocation112_spill] sm:$0xff] %v9427_v29  ;;  %6610 = vpow2.f32 %v9195_v25  ;;  %v1851_v56 = vsub.f32 %v9404_v39, %v11944_v5  ;;  %v9443_v10 = vpop.eup %6592  ;;  %v3878_v4 = vmul.f32 %v9435_v46, %v13080_v58  ;;  %v13081_v39 = vld [vmem:[#allocation62_spill] sm:$0xff]  ;;  %v13083_v58 = vld [vmem:[#allocation23_spill] sm:$0xff] }
 0x3d9   : > { %13078 = vst [vmem:[#allocation110_spill] sm:$0xff] %v9422_v50  ;;  %v11950_v13 = vand.u32 4294901760, %v9422_v50  ;;  %6612 = vpow2.f32 %v9202_v36  ;;  %v1581_v9 = vadd.f32 %v9277_v0, %v1580_v55  ;;  %v1618_v11 = vadd.f32 %v9295_v30, %v1617_v61 }
 0x3da   : > { %v9450_v25 = vpop.eup %6594  ;;  %6614 = vpow2.f32 %v9209_v3  ;;  %v1852_v5 = vand.u32 4294901760, %v1851_v56  ;;  %v3880_v29 = vmul.f32 %v9443_v10, %v13081_v39  ;;  %v3882_v18 = vmul.f32 %v9443_v10, %v13083_v58 }
 0x3db   : > { %v4081_v34 = vsub.f32 %v9422_v50, %v11950_v13  ;;  %v9458_v36 = vpop.eup %6596  ;;  %6616 = vpow2.f32 %v9214_v49  ;;  %v1582_v55 = vadd.f32 %v9303_v53, %v1581_v9  ;;  %v1619_v61 = vadd.f32 %v9321_v6, %v1618_v11  ;;  %v13085_v50 = vld [vmem:[#allocation63_spill] sm:$0xff] }
 0x3dc   : > { %13082 = vst [vmem:[#allocation59_spill] sm:$0xff] %v9458_v36  ;;  %v9465_v3 = vpop.eup %6598  ;;  %6618 = vpow2.f32 %v9219_v28  ;;  %1853 = vmatprep.mubr.f32.mxu0 %v1852_v5  ;;  %v3950_v13 = vand.u32 4294901760, %v3880_v29  ;;  %v3881_v39 = vmul.f32 %v9435_v46, %v13085_v50  ;;  %v3954_v11 = vand.u32 4294901760, %v3882_v18 }
 0x3dd   : > { %13084 = vst [vmem:[#allocation118_spill] sm:$0xff] %v9465_v3  ;;  %v4082_v56 = vand.u32 4294901760, %v4081_v34  ;;  %v9470_v23 = vpop.eup %6600  ;;  %6620 = vpow2.f32 %v9226_v63  ;;  %v1583_v49 = vadd.f32 %v9329_v17, %v1582_v55  ;;  %v1620_v9 = vadd.f32 %v9347_v59, %v1619_v61 }
 0x3de   : > { %13086 = vst [vmem:[#allocation123_spill] sm:$0xff] %v9470_v23  ;;  %v9475_v58 = vpop.eup %6602  ;;  %6622 = vpow2.f32 %v9233_v15  ;;  %v9478_v28 = vsub.f32 %v3880_v29, %v3950_v13  ;;  %v3952_v34 = vand.u32 4294901760, %v3878_v4  ;;  %v3956_v5 = vand.u32 4294901760, %v3881_v39 }
 0x3df   : > { %13087 = vst [vmem:[#allocation28_spill] sm:$0xff] %v9475_v58  ;;  %4083 = vmatprep.mubr.f32.mxu1 %v4082_v56  ;;  %v9480_v53 = vpop.eup %6604  ;;  %6624 = vpow2.f32 %v9238_v40  ;;  %v1584_v63 = vadd.f32 %v9364_v47, %v1583_v49  ;;  %v1621_v50 = vadd.f32 %v9375_v54, %v1620_v9  ;;  %v9485_v55 = vpack.c.bf16 %v3954_v11, %v3950_v13 }
 0x3e0   : > { %13088 = vst [vmem:[#allocation41_spill] sm:$0xff] %v9478_v28  ;;  %v9487_v61 = vpop.eup %6606  ;;  %6626 = vpow2.f32 %v9243_v32  ;;  %v9490_v15 = vsub.f32 %v3882_v18, %v3954_v11  ;;  %v9492_v29 = vpack.c.bf16 %v3956_v5, %v3952_v34  ;;  %v9494_v56 = vsub.f32 %v3878_v4, %v3952_v34  ;;  %v13095_v32 = vld [vmem:[#allocation74_spill] sm:$0xff]  ;;  %v13096_v4 = vld [vmem:[#allocation29_spill] sm:$0xff]  ;;  %v13097_v11 = vld [vmem:[#allocation24_spill] sm:$0xff] }
 0x3e1   : > { %13089 = vst [vmem:[#allocation87_spill] sm:$0xff] %v9485_v55  ;;  %v9496_v28 = vpop.eup %6608  ;;  %6628 = vpow2.f32 %v9250_v12  ;;  %v1585_v40 = vadd.f32 %v9380_v14, %v1584_v63  ;;  %v1622_v49 = vadd.f32 %v9385_v37, %v1621_v50  ;;  %5848 = vmatprep.subr.bf16.mxu1 %v9485_v55  ;;  %v9502_v13 = vsub.f32 %v3881_v39, %v3956_v5 }
 0x3e2   : > { %13090 = vst [vmem:[#allocation57_spill] sm:$0xff] %v9490_v15  ;;  %13091 = vst [vmem:[#allocation128_spill] sm:$0xff] %v9492_v29  ;;  %v9504_v9 = vpop.eup %6610  ;;  %6630 = vpow2.f32 %v9257_v2  ;;  %5850 = vmatpush1.bf16.msra.mxu1 %v9492_v29  ;;  %v3884_v18 = vmul.f32 %v9443_v10, %v13095_v32  ;;  %v3886_v12 = vmul.f32 %v9443_v10, %v13096_v4  ;;  %v13099_v2 = vld [vmem:[#allocation65_spill] sm:$0xff] }
 0x3e3   : > { %13092 = vst [vmem:[#allocation69_spill] sm:$0xff] %v9494_v56  ;;  %13093 = vst [vmem:[#allocation131_spill] sm:$0xff] %v9496_v28  ;;  %v3883_v34 = vmul.f32 %v9435_v46, %v13097_v11  ;;  %v9514_v63 = vpop.eup %6612  ;;  %6632 = vpow2.f32 %v9262_v52  ;;  %v1586_v39 = vadd.f32 %v9393_v20, %v1585_v40  ;;  %v1623_v5 = vadd.f32 %v9400_v38, %v1622_v49 }
 0x3e4   : > { %13094 = vst [vmem:[#allocation50_spill] sm:$0xff] %v9502_v13  ;;  %13098 = vst [vmem:[#allocation126_spill] sm:$0xff] %v9514_v63  ;;  %v3885_v50 = vmul.f32 %v9435_v46, %v13099_v2  ;;  %v9521_v29 = vpop.eup %6614  ;;  %6634 = vpow2.f32 %v9267_v31  ;;  %v3958_v32 = vand.u32 4294901760, %v3884_v18  ;;  %v3962_v4 = vand.u32 4294901760, %v3886_v12 }
 0x3e5   : > { %13100 = vst [vmem:[#allocation86_spill] sm:$0xff] %v9521_v29  ;;  %v3960_v55 = vand.u32 4294901760, %v3883_v34  ;;  %v9524_v13 = vpop.eup %6616  ;;  %6636 = vpow2.f32 %v9275_v33  ;;  %v1587_v52 = vadd.f32 %v9409_v48, %v1586_v39  ;;  %v1624_v40 = vadd.f32 %v9417_v26, %v1623_v5 }
 0x3e6   : > { %13101 = vst [vmem:[#allocation39_spill] sm:$0xff] %v9524_v13  ;;  %v3964_v11 = vand.u32 4294901760, %v3885_v50  ;;  %v9529_v49 = vpop.eup %6618  ;;  %6638 = vpow2.f32 %v9283_v42  ;;  %v9532_v2 = vpack.c.bf16 %v3962_v4, %v3958_v32  ;;  %v9534_v56 = vsub.f32 %v3884_v18, %v3958_v32 }
 0x3e7   : > { %13102 = vst [vmem:[#allocation100_spill] sm:$0xff] %v9529_v49  ;;  %v9536_v31 = vsub.f32 %v3886_v12, %v3962_v4  ;;  %v9538_v15 = vpop.eup %6620  ;;  %6640 = vpow2.f32 %v9288_v35  ;;  %v1588_v33 = vadd.f32 %v9429_v41, %v1587_v52  ;;  %v1625_v39 = vadd.f32 %v9450_v25, %v1624_v40  ;;  %v13111_v12 = vld [vmem:[#allocation68_spill] sm:$0xff] }
 0x3e8   : > { %13103 = vst [vmem:[#allocation97_spill] sm:$0xff] %v9532_v2  ;;  %13104 = vst [vmem:[#allocation105_spill] sm:$0xff] %v9534_v56  ;;  %v9543_v5 = vpack.c.bf16 %v3964_v11, %v3960_v55  ;;  %v9545_v48 = vpop.eup %6622  ;;  %6642 = vpow2.f32 %v9293_v22  ;;  %5852 = vmatprep.subr.bf16.mxu1 %v9532_v2  ;;  %v9549_v42 = vsub.f32 %v3883_v34, %v3960_v55  ;;  %v13113_v4 = vld [vmem:[#allocation60_spill] sm:$0xff] }
 0x3e9   : > { %13105 = vst [vmem:[#allocation106_spill] sm:$0xff] %v9536_v31  ;;  %13106 = vst [vmem:[#allocation27_spill] sm:$0xff] %v9538_v15  ;;  %v9551_v18 = vsub.f32 %v3885_v50, %v3964_v11  ;;  %v3888_v32 = vmul.f32 %v9443_v10, %v13111_v12  ;;  %v9555_v35 = vpop.eup %6624  ;;  %6644 = vpow2.f32 %v13113_v4  ;;  %v1589_v52 = vadd.f32 %v9458_v36, %v1588_v33  ;;  %v13114_v22 = vld [vmem:[#allocation52_spill] sm:$0xff]  ;;  %v13117_v11 = vld [vmem:[#allocation30_spill] sm:$0xff] }
 0x3ea   : > { %13107 = vst [vmem:[#allocation55_spill] sm:$0xff] %v9543_v5  ;;  %13108 = vst [vmem:[#allocation56_spill] sm:$0xff] %v9545_v48  ;;  %v1626_v40 = vadd.f32 %v9465_v3, %v1625_v39  ;;  %5854 = vmatpush1.bf16.msra.mxu1 %v9543_v5  ;;  %v3890_v2 = vmul.f32 %v9443_v10, %v13114_v22  ;;  %v9563_v55 = vpop.eup %6626  ;;  %v13116_v34 = vld [vmem:[#allocation80_spill] sm:$0xff]  ;;  %v3887_v12 = vmul.f32 %v9435_v46, %v13117_v11  ;;  %v13121_v31 = vld [vmem:[#allocation78_spill] sm:$0xff] }
 0x3eb   : > { %13109 = vst [vmem:[#allocation109_spill] sm:$0xff] %v9549_v42  ;;  %13110 = vst [vmem:[#allocation113_spill] sm:$0xff] %v9551_v18  ;;  %6646 = vpow2.f32 %v13116_v34  ;;  %v3966_v50 = vand.u32 4294901760, %v3888_v32  ;;  %v13118_v18 = vld [vmem:[#allocation51_spill] sm:$0xff]  ;;  %v9570_v42 = vpop.eup %6628  ;;  %v1590_v33 = vadd.f32 %v9470_v23, %v1589_v52  ;;  %v13129_v3 = vld [vmem:[#allocation37_spill] sm:$0xff] }
 0x3ec   : > { %13112 = vst [vmem:[#allocation58_spill] sm:$0xff] %v9555_v35  ;;  %13115 = vst [vmem:[#allocation119_spill] sm:$0xff] %v9563_v55  ;;  %v3889_v4 = vmul.f32 %v9435_v46, %v13118_v18  ;;  %6648 = vpow2.f32 %v9314_v27  ;;  %v1627_v39 = vadd.f32 %v9475_v58, %v1626_v40  ;;  %v3970_v22 = vand.u32 4294901760, %v3890_v2  ;;  %v9575_v5 = vpop.eup %6630  ;;  %v13124_v23 = vld [vmem:[#allocation79_spill] sm:$0xff] }
 0x3ed   : > { %13119 = vst [vmem:[#allocation122_spill] sm:$0xff] %v9570_v42  ;;  %13120 = vst [vmem:[#allocation36_spill] sm:$0xff] %v9575_v5  ;;  %6650 = vpow2.f32 %v13121_v31  ;;  %v9578_v34 = vsub.f32 %v3888_v32, %v3966_v50  ;;  %v3968_v56 = vand.u32 4294901760, %v3887_v12  ;;  %v9580_v36 = vpop.eup %6632  ;;  %v1591_v18 = vadd.f32 %v9480_v53, %v1590_v33 }
 0x3ee   : > { %v3972_v11 = vand.u32 4294901760, %v3889_v4  ;;  %6652 = vpow2.f32 %v9327_v51  ;;  %v1628_v27 = vadd.f32 %v9487_v61, %v1627_v39  ;;  %v9585_v52 = vpack.c.bf16 %v3970_v22, %v3966_v50  ;;  %v9587_v40 = vpop.eup %6634 }
 0x3ef   : > { %13122 = vst [vmem:[#allocation35_spill] sm:$0xff] %v9578_v34  ;;  %6654 = vpow2.f32 %v13124_v23  ;;  %v9590_v58 = vsub.f32 %v3890_v2, %v3970_v22  ;;  %v9594_v32 = vsub.f32 %v3887_v12, %v3968_v56  ;;  %v9596_v34 = vpop.eup %6636  ;;  %v1592_v51 = vadd.f32 %v9496_v28, %v1591_v18  ;;  %v13131_v23 = vld [vmem:[#allocation26_spill] sm:$0xff]  ;;  %v13132_v2 = vld [vmem:[#allocation73_spill] sm:$0xff] }
 0x3f0   : > { %13123 = vst [vmem:[#allocation114_spill] sm:$0xff] %v9585_v52  ;;  %v9592_v31 = vpack.c.bf16 %v3972_v11, %v3968_v56  ;;  %13128 = vst [vmem:[#allocation129_spill] sm:$0xff] %v9596_v34  ;;  %6656 = vpow2.f32 %v13129_v3  ;;  %v1629_v33 = vadd.f32 %v9504_v9, %v1628_v27  ;;  %5856 = vmatprep.subr.bf16.mxu1 %v9585_v52  ;;  %v9604_v39 = vpop.eup %6638  ;;  %v13133_v12 = vld [vmem:[#allocation38_spill] sm:$0xff] }
 0x3f1   : > { %13125 = vst [vmem:[#allocation66_spill] sm:$0xff] %v9590_v58  ;;  %13127 = vst [vmem:[#allocation89_spill] sm:$0xff] %v9594_v32  ;;  %v9602_v50 = vsub.f32 %v3889_v4, %v3972_v11  ;;  %6658 = vpow2.f32 %v9345_v21  ;;  %v3892_v56 = vmul.f32 %v9443_v10, %v13131_v23  ;;  %v3894_v3 = vmul.f32 %v9443_v10, %v13132_v2  ;;  %v9614_v18 = vpop.eup %6640  ;;  %v13135_v21 = vld [vmem:[#allocation72_spill] sm:$0xff] }
 0x3f2   : > { %13126 = vst [vmem:[#allocation67_spill] sm:$0xff] %v9592_v31  ;;  %5858 = vmatpush1.bf16.msra.mxu1 %v9592_v31  ;;  %v3891_v22 = vmul.f32 %v9435_v46, %v13133_v12  ;;  %13134 = vst [vmem:[#allocation71_spill] sm:$0xff] %v9614_v18  ;;  %6660 = vpow2.f32 %v9352_v19  ;;  %v1593_v4 = vadd.f32 %v9514_v63, %v1592_v51  ;;  %v9621_v31 = vpop.eup %6642 }
 0x3f3   : > { %13130 = vst [vmem:[#allocation130_spill] sm:$0xff] %v9602_v50  ;;  %v1630_v11 = vadd.f32 %v9521_v29, %v1629_v33  ;;  %v3893_v27 = vmul.f32 %v9435_v46, %v13135_v21  ;;  %6662 = vpow2.f32 %v9357_v57  ;;  %v3974_v23 = vand.u32 4294901760, %v3892_v56  ;;  %v9624_v50 = vpop.eup %6644 }
 0x3f4   : > { %v3978_v2 = vand.u32 4294901760, %v3894_v3  ;;  %v3976_v52 = vand.u32 4294901760, %v3891_v22  ;;  %6664 = vpow2.f32 %v9362_v45  ;;  %v1594_v19 = vadd.f32 %v9524_v13, %v1593_v4 }
 0x3f5   : > { %v1631_v51 = vadd.f32 %v9529_v49, %v1630_v11  ;;  %v3980_v12 = vand.u32 4294901760, %v3893_v27  ;;  %v9629_v33 = vpop.eup %6646  ;;  %6666 = vpow2.f32 %v9369_v1  ;;  %v9634_v32 = vsub.f32 %v3892_v56, %v3974_v23  ;;  %v13143_v56 = vld [vmem:[#allocation77_spill] sm:$0xff] }
 0x3f6   : > { %v9632_v21 = vpack.c.bf16 %v3978_v2, %v3974_v23  ;;  %v9636_v57 = vsub.f32 %v3894_v3, %v3978_v2  ;;  %v9638_v58 = vpop.eup %6648  ;;  %v1595_v63 = vadd.f32 %v9538_v15, %v1594_v19  ;;  %v9644_v11 = vsub.f32 %v3891_v22, %v3976_v52  ;;  %v13144_v23 = vld [vmem:[#allocation31_spill] sm:$0xff] }
 0x3f7   : > { %13137 = vst [vmem:[#allocation23_spill] sm:$0xff] %v9634_v32  ;;  %13139 = vst [vmem:[#allocation74_spill] sm:$0xff] %v9638_v58  ;;  %v1632_v45 = vadd.f32 %v9545_v48, %v1631_v51  ;;  %v9642_v4 = vpack.c.bf16 %v3980_v12, %v3976_v52  ;;  %v9646_v13 = vpop.eup %6650  ;;  %v9649_v1 = vsub.f32 %v3893_v27, %v3980_v12  ;;  %v13147_v12 = vld [vmem:[#allocation42_spill] sm:$0xff] }
 0x3f8   : > { %13136 = vst [vmem:[#allocation62_spill] sm:$0xff] %v9632_v21  ;;  %13138 = vst [vmem:[#allocation63_spill] sm:$0xff] %v9636_v57  ;;  %5860 = vmatprep.subr.bf16.mxu1 %v9632_v21  ;;  %v3896_v3 = vmul.f32 %v9443_v10, %v13143_v56  ;;  %v3898_v2 = vmul.f32 %v9443_v10, %v13144_v23  ;;  %v13145_v57 = vld [vmem:[#allocation76_spill] sm:$0xff]  ;;  %v9657_v51 = vpop.eup %6652  ;;  %v1596_v52 = vadd.f32 %v9555_v35, %v1595_v63 }
 0x3f9   : > { %13140 = vst [vmem:[#allocation29_spill] sm:$0xff] %v9642_v4  ;;  %13141 = vst [vmem:[#allocation24_spill] sm:$0xff] %v9644_v11  ;;  %v3895_v19 = vmul.f32 %v9435_v46, %v13145_v57  ;;  %v1633_v22 = vadd.f32 %v9563_v55, %v1632_v45  ;;  %5862 = vmatpush1.bf16.msra.mxu1 %v9642_v4  ;;  %v13146_v21 = vld [vmem:[#allocation104_spill] sm:$0xff]  ;;  %v3900_v56 = vmul.f32 %v9443_v10, %v13147_v12  ;;  %v13148_v57 = vld [vmem:[#allocation45_spill] sm:$0xff] }
 0x3fa   : > { %13142 = vst [vmem:[#allocation65_spill] sm:$0xff] %v9649_v1  ;;  %v3897_v27 = vmul.f32 %v9435_v46, %v13146_v21  ;;  %v9666_v1 = vpop.eup %6654  ;;  %v3982_v23 = vand.u32 4294901760, %v3896_v3  ;;  %v3986_v11 = vand.u32 4294901760, %v3898_v2  ;;  %v3902_v15 = vmul.f32 %v9443_v10, %v13148_v57 }
 0x3fb   : > { %v3984_v32 = vand.u32 4294901760, %v3895_v19  ;;  %v9670_v48 = vpop.eup %6656  ;;  %v1597_v63 = vadd.f32 %v9570_v42, %v1596_v52  ;;  %v1634_v45 = vadd.f32 %v9575_v5, %v1633_v22  ;;  %v3990_v35 = vand.u32 4294901760, %v3900_v56 }
 0x3fc   : > { %13149 = vst [vmem:[#allocation68_spill] sm:$0xff] %v9670_v48  ;;  %v3988_v4 = vand.u32 4294901760, %v3897_v27  ;;  %v9674_v21 = vpop.eup %6658  ;;  %v9676_v55 = vpack.c.bf16 %v3986_v11, %v3982_v23  ;;  %v9678_v12 = vsub.f32 %v3896_v3, %v3982_v23  ;;  %v9680_v49 = vsub.f32 %v3898_v2, %v3986_v11  ;;  %v13159_v11 = vld [vmem:[#allocation32_spill] sm:$0xff] }
 0x3fd   : > { %v9682_v29 = vsub.f32 %v3895_v19, %v3984_v32  ;;  %v9684_v28 = vpop.eup %6660  ;;  %v1598_v57 = vadd.f32 %v9580_v36, %v1597_v63  ;;  %v1635_v52 = vadd.f32 %v9587_v40, %v1634_v45  ;;  %v3994_v3 = vand.u32 4294901760, %v3902_v15  ;;  %v13160_v19 = vld [vmem:[#allocation108_spill] sm:$0xff] }
 0x3fe   : > { %13150 = vst [vmem:[#allocation60_spill] sm:$0xff] %v9676_v55  ;;  %13151 = vst [vmem:[#allocation52_spill] sm:$0xff] %v9678_v12  ;;  %v9688_v42 = vpack.c.bf16 %v3988_v4, %v3984_v32  ;;  %v9690_v22 = vsub.f32 %v3897_v27, %v3988_v4  ;;  %v9692_v5 = vpop.eup %6662  ;;  %5864 = vmatprep.subr.bf16.mxu1 %v9676_v55  ;;  %v9695_v23 = vsub.f32 %v3900_v56, %v3990_v35  ;;  %v13162_v27 = vld [vmem:[#allocation120_spill] sm:$0xff]  ;;  %v13163_v55 = vld [vmem:[#allocation83_spill] sm:$0xff] }
 0x3ff   : > { %13152 = vst [vmem:[#allocation80_spill] sm:$0xff] %v9680_v49  ;;  %13153 = vst [vmem:[#allocation30_spill] sm:$0xff] %v9682_v29  ;;  %v3899_v2 = vmul.f32 %v9435_v46, %v13159_v11  ;;  %v3901_v29 = vmul.f32 %v9435_v46, %v13160_v19  ;;  %v9701_v63 = vpop.eup %6664  ;;  %v1599_v32 = vadd.f32 %v9596_v34, %v1598_v57 }
 0x400   : > { %13154 = vst [vmem:[#allocation51_spill] sm:$0xff] %v9684_v28  ;;  %13155 = vst [vmem:[#allocation78_spill] sm:$0xff] %v9688_v42  ;;  %v1636_v4 = vadd.f32 %v9604_v39, %v1635_v52  ;;  %5866 = vmatpush1.bf16.msra.mxu1 %v9688_v42  ;;  %v3904_v45 = vmul.f32 %v9443_v10, %v13162_v27  ;;  %v3906_v56 = vmul.f32 %v9443_v10, %v13163_v55 }
 0x401   : > { %13156 = vst [vmem:[#allocation79_spill] sm:$0xff] %v9690_v22  ;;  %13157 = vst [vmem:[#allocation37_spill] sm:$0xff] %v9692_v5  ;;  %v9712_v11 = vpack.c.bf16 %v3994_v3, %v3990_v35  ;;  %v9714_v22 = vsub.f32 %v3902_v15, %v3994_v3  ;;  %v3992_v19 = vand.u32 4294901760, %v3899_v2  ;;  %v3996_v49 = vand.u32 4294901760, %v3901_v29  ;;  %v13170_v35 = vld [vmem:[#allocation111_spill] sm:$0xff] }
 0x402   : > { %13158 = vst [vmem:[#allocation26_spill] sm:$0xff] %v9695_v23  ;;  %13161 = vst [vmem:[#allocation73_spill] sm:$0xff] %v9701_v63  ;;  %v9710_v23 = vpop.eup %6666  ;;  %v1600_v57 = vadd.f32 %v9614_v18, %v1599_v32  ;;  %v1637_v52 = vadd.f32 %v9621_v31, %v1636_v4  ;;  %v3998_v12 = vand.u32 4294901760, %v3904_v45  ;;  %v4002_v42 = vand.u32 4294901760, %v3906_v56  ;;  %v13174_v18 = vld [vmem:[#allocation121_spill] sm:$0xff] }
 0x403   : > { %13164 = vst [vmem:[#allocation38_spill] sm:$0xff] %v9710_v23  ;;  %13165 = vst [vmem:[#allocation72_spill] sm:$0xff] %v9712_v11  ;;  %5868 = vmatprep.subr.bf16.mxu1 %v9712_v11  ;;  %v9719_v27 = vpack.c.bf16 %v3996_v49, %v3992_v19  ;;  %v9721_v34 = vsub.f32 %v3899_v2, %v3992_v19  ;;  %v9723_v55 = vsub.f32 %v3901_v29, %v3996_v49  ;;  %v13175_v49 = vld [vmem:[#allocation124_spill] sm:$0xff] }
 0x404   : > { %13166 = vst [vmem:[#allocation77_spill] sm:$0xff] %v9714_v22  ;;  %v3903_v15 = vmul.f32 %v9435_v46, %v13170_v35  ;;  %v1601_v3 = vadd.f32 %v9624_v50, %v1600_v57  ;;  %v1638_v22 = vadd.f32 %v9629_v33, %v1637_v52  ;;  %v9729_v32 = vpack.c.bf16 %v4002_v42, %v3998_v12  ;;  %v13176_v52 = vld [vmem:[#allocation92_spill] sm:$0xff] }
 0x405   : > { %13167 = vst [vmem:[#allocation31_spill] sm:$0xff] %v9719_v27  ;;  %13168 = vst [vmem:[#allocation76_spill] sm:$0xff] %v9721_v34  ;;  %v9731_v4 = vsub.f32 %v3904_v45, %v3998_v12  ;;  %5870 = vmatpush1.bf16.msra.mxu1 %v9719_v27  ;;  %v9734_v11 = vsub.f32 %v3906_v56, %v4002_v42  ;;  %v3905_v2 = vmul.f32 %v9435_v46, %v13174_v18  ;;  %v13177_v45 = vld [vmem:[#allocation84_spill] sm:$0xff] }
 0x406   : > { %13169 = vst [vmem:[#allocation104_spill] sm:$0xff] %v9723_v55  ;;  %13171 = vst [vmem:[#allocation42_spill] sm:$0xff] %v9729_v32  ;;  %v4000_v29 = vand.u32 4294901760, %v3903_v15  ;;  %v3908_v19 = vmul.f32 %v9443_v10, %v13175_v49  ;;  %v1602_v35 = vadd.f32 %v9638_v58, %v1601_v3  ;;  %v1639_v57 = vadd.f32 %v9646_v13, %v1638_v22 }
 0x407   : > { %13172 = vst [vmem:[#allocation45_spill] sm:$0xff] %v9731_v4  ;;  %13173 = vst [vmem:[#allocation32_spill] sm:$0xff] %v9734_v11  ;;  %5872 = vmatprep.subr.bf16.mxu1 %v9729_v32  ;;  %v3910_v12 = vmul.f32 %v9443_v10, %v13176_v52  ;;  %v3907_v42 = vmul.f32 %v9435_v46, %v13177_v45  ;;  %v4004_v56 = vand.u32 4294901760, %v3905_v2  ;;  %v13179_v11 = vld [vmem:[#allocation125_spill] sm:$0xff] }
 0x408   : > { %v9747_v27 = vsub.f32 %v3903_v15, %v4000_v29  ;;  %v4006_v18 = vand.u32 4294901760, %v3908_v19  ;;  %v3909_v4 = vmul.f32 %v9435_v46, %v13179_v11  ;;  %v1603_v49 = vadd.f32 %v9657_v51, %v1602_v35 }
 0x409   : > { %v1640_v3 = vadd.f32 %v9666_v1, %v1639_v57  ;;  %v4010_v22 = vand.u32 4294901760, %v3910_v12  ;;  %v4008_v55 = vand.u32 4294901760, %v3907_v42  ;;  %v9753_v32 = vpack.c.bf16 %v4004_v56, %v4000_v29 }
 0x40a   : > { %13178 = vst [vmem:[#allocation108_spill] sm:$0xff] %v9747_v27  ;;  %v9755_v34 = vsub.f32 %v3905_v2, %v4004_v56  ;;  %v9757_v52 = vsub.f32 %v3908_v19, %v4006_v18  ;;  %v4012_v45 = vand.u32 4294901760, %v3909_v4  ;;  %v1604_v15 = vadd.f32 %v9670_v48, %v1603_v49  ;;  %v13188_v2 = vld [vmem:[#allocation95_spill] sm:$0xff] }
 0x40b   : > { %13180 = vst [vmem:[#allocation120_spill] sm:$0xff] %v9753_v32  ;;  %v1641_v27 = vadd.f32 %v9674_v21, %v1640_v3  ;;  %v9761_v58 = vpack.c.bf16 %v4010_v22, %v4006_v18  ;;  %v9763_v11 = vsub.f32 %v3910_v12, %v4010_v22  ;;  %5874 = vmatpush1.bf16.msra.mxu1 %v9753_v32  ;;  %v13189_v18 = vld [vmem:[#allocation101_spill] sm:$0xff] }
 0x40c   : > { %13181 = vst [vmem:[#allocation83_spill] sm:$0xff] %v9755_v34  ;;  %13182 = vst [vmem:[#allocation111_spill] sm:$0xff] %v9757_v52  ;;  %v9766_v35 = vpack.c.bf16 %v4012_v45, %v4008_v55  ;;  %v9768_v57 = vsub.f32 %v3907_v42, %v4008_v55  ;;  %v9770_v29 = vsub.f32 %v3909_v4, %v4012_v45  ;;  %v13190_v3 = vld [vmem:[#allocation93_spill] sm:$0xff]  ;;  %v13191_v55 = vld [vmem:[#allocation96_spill] sm:$0xff] }
 0x40d   : > { %13183 = vst [vmem:[#allocation121_spill] sm:$0xff] %v9761_v58  ;;  %13184 = vst [vmem:[#allocation124_spill] sm:$0xff] %v9763_v11  ;;  %v3912_v19 = vmul.f32 %v9443_v10, %v13188_v2  ;;  %v1605_v56 = vadd.f32 %v9684_v28, %v1604_v15  ;;  %v1642_v49 = vadd.f32 %v9692_v5, %v1641_v27  ;;  %5876 = vmatprep.subr.bf16.mxu1 %v9761_v58  ;;  %v13192_v42 = vld [vmem:[#allocation103_spill] sm:$0xff]  ;;  %v13193_v2 = vld [vmem:[#allocation82_spill] sm:$0xff] }
 0x40e   : > { %13185 = vst [vmem:[#allocation92_spill] sm:$0xff] %v9766_v35  ;;  %13186 = vst [vmem:[#allocation84_spill] sm:$0xff] %v9768_v57  ;;  %v3914_v12 = vmul.f32 %v9443_v10, %v13189_v18  ;;  %v3911_v22 = vmul.f32 %v9435_v46, %v13190_v3  ;;  %v3913_v4 = vmul.f32 %v9435_v46, %v13191_v55 }
 0x40f   : > { %13187 = vst [vmem:[#allocation125_spill] sm:$0xff] %v9770_v29  ;;  %v4014_v32 = vand.u32 4294901760, %v3912_v19  ;;  %v3916_v45 = vmul.f32 %v9443_v10, %v13192_v42  ;;  %v3918_v15 = vmul.f32 %v9443_v10, %v13193_v2  ;;  %v1606_v27 = vadd.f32 %v9701_v63, %v1605_v56  ;;  %5878 = vmatpush1.bf16.msra.mxu1 %v9766_v35 }
 0x410   : > { %v1643_v58 = vadd.f32 %v9710_v23, %v1642_v49  ;;  %v4018_v29 = vand.u32 4294901760, %v3914_v12  ;;  %v4016_v57 = vand.u32 4294901760, %v3911_v22  ;;  %v4020_v3 = vand.u32 4294901760, %v3913_v4 }
 0x411   : > { %v9790_v18 = vsub.f32 %v3912_v19, %v4014_v32  ;;  %v4022_v11 = vand.u32 4294901760, %v3916_v45  ;;  %v4026_v52 = vand.u32 4294901760, %v3918_v15  ;;  %v1607_v55 = vrot.slane %v1606_v27, 4 }
 0x412   : > { %v1644_v34 = vrot.slane %v1643_v58, 4  ;;  %v9792_v28 = vpack.c.bf16 %v4018_v29, %v4014_v32  ;;  %v9794_v42 = vsub.f32 %v3914_v12, %v4018_v29  ;;  %v9796_v2 = vpack.c.bf16 %v4020_v3, %v4016_v57  ;;  %v13203_v32 = vld [vmem:[#allocation102_spill] sm:$0xff] }
 0x413   : > { %13194 = vst [vmem:[#allocation95_spill] sm:$0xff] %v9790_v18  ;;  %v9798_v56 = vsub.f32 %v3911_v22, %v4016_v57  ;;  %v9800_v49 = vsub.f32 %v3913_v4, %v4020_v3  ;;  %v9802_v63 = vpack.c.bf16 %v4026_v52, %v4022_v11  ;;  %v1608_v35 = vadd.f32 %v1607_v55, %v1606_v27  ;;  %v13204_v12 = vld [vmem:[#allocation94_spill] sm:$0xff]  ;;  %v13205_v22 = vld [vmem:[#allocation13_spill] sm:$0xff] }
 0x414   : > { %13195 = vst [vmem:[#allocation101_spill] sm:$0xff] %v9792_v28  ;;  %13196 = vst [vmem:[#allocation93_spill] sm:$0xff] %v9794_v42  ;;  %v1645_v19 = vadd.f32 %v1644_v34, %v1643_v58  ;;  %5880 = vmatprep.subr.bf16.mxu1 %v9792_v28  ;;  %v9805_v18 = vsub.f32 %v3916_v45, %v4022_v11  ;;  %v9807_v23 = vsub.f32 %v3918_v15, %v4026_v52  ;;  %v13206_v3 = vld [vmem:[#allocation17_spill] sm:$0xff]  ;;  %v13207_v52 = vld [vmem:[#allocation14_spill] sm:$0xff] }
 0x415   : > { %13197 = vst [vmem:[#allocation96_spill] sm:$0xff] %v9796_v2  ;;  %13198 = vst [vmem:[#allocation103_spill] sm:$0xff] %v9798_v56  ;;  %5882 = vmatpush1.bf16.msra.mxu1 %v9796_v2  ;;  %v3915_v29 = vmul.f32 %v9435_v46, %v13203_v32  ;;  %v3917_v57 = vmul.f32 %v9435_v46, %v13204_v12  ;;  %v3920_v4 = vmul.f32 %v9443_v10, %v13205_v22  ;;  %v13208_v45 = vld [vmem:[#allocation20_spill] sm:$0xff] }
 0x416   : > { %13199 = vst [vmem:[#allocation82_spill] sm:$0xff] %v9800_v49  ;;  %13200 = vst [vmem:[#allocation132_spill] sm:$0xff] %v9802_v63  ;;  %v3922_v58 = vmul.f32 %v9443_v10, %v13206_v3  ;;  %v1609_v34 = vrot.slane %v1608_v35, 2  ;;  %v1646_v27 = vrot.slane %v1645_v19, 2  ;;  %5884 = vmatprep.subr.bf16.mxu1 %v9802_v63  ;;  %v3919_v11 = vmul.f32 %v9435_v46, %v13207_v52 }
 0x417   : > { %13201 = vst [vmem:[#allocation133_spill] sm:$0xff] %v9805_v18  ;;  %13202 = vst [vmem:[#allocation134_spill] sm:$0xff] %v9807_v23  ;;  %v3921_v15 = vmul.f32 %v9435_v46, %v13208_v45  ;;  %v4024_v55 = vand.u32 4294901760, %v3915_v29  ;;  %v4028_v32 = vand.u32 4294901760, %v3917_v57  ;;  %v4030_v2 = vand.u32 4294901760, %v3920_v4 }
 0x418   : > { %v4034_v12 = vand.u32 4294901760, %v3922_v58  ;;  %v1610_v28 = vadd.f32 %v1609_v34, %v1608_v35  ;;  %v1647_v23 = vadd.f32 %v1646_v27, %v1645_v19  ;;  %v4032_v22 = vand.u32 4294901760, %v3919_v11 }
 0x419   : > { %v4036_v18 = vand.u32 4294901760, %v3921_v15  ;;  %v9823_v49 = vpack.c.bf16 %v4028_v32, %v4024_v55  ;;  %v9825_v3 = vsub.f32 %v3915_v29, %v4024_v55  ;;  %v9827_v56 = vsub.f32 %v3917_v57, %v4028_v32  ;;  %v13218_v29 = vld [vmem:[#allocation19_spill] sm:$0xff]  ;;  %v13219_v32 = vld [vmem:[#allocation16_spill] sm:$0xff] }
 0x41a   : > { %v9829_v63 = vpack.c.bf16 %v4034_v12, %v4030_v2  ;;  %v1611_v52 = vrot.slane %v1610_v28, 1  ;;  %v1648_v42 = vrot.slane %v1647_v23, 1  ;;  %v9831_v5 = vsub.f32 %v3920_v4, %v4030_v2  ;;  %v13220_v4 = vld [vmem:[#allocation21_spill] sm:$0xff] }
 0x41b   : > { %13209 = vst [vmem:[#allocation102_spill] sm:$0xff] %v9823_v49  ;;  %13210 = vst [vmem:[#allocation94_spill] sm:$0xff] %v9825_v3  ;;  %v9833_v45 = vsub.f32 %v3922_v58, %v4034_v12  ;;  %5886 = vmatpush1.bf16.msra.mxu1 %v9823_v49  ;;  %v9836_v35 = vpack.c.bf16 %v4036_v18, %v4032_v22  ;;  %v9838_v19 = vsub.f32 %v3919_v11, %v4032_v22  ;;  %v13221_v49 = vld [vmem:[#allocation18_spill] sm:$0xff]  ;;  %v13222_v22 = vld [vmem:[#allocation44_spill] sm:$0xff] }
 0x41c   : > { %13211 = vst [vmem:[#allocation13_spill] sm:$0xff] %v9827_v56  ;;  %13212 = vst [vmem:[#allocation17_spill] sm:$0xff] %v9829_v63  ;;  %v9840_v34 = vsub.f32 %v3921_v15, %v4036_v18  ;;  %v3924_v57 = vmul.f32 %v9443_v10, %v13218_v29  ;;  %v1612_v27 = vadd.f32 %v1611_v52, %v1610_v28  ;;  %5888 = vmatprep.subr.bf16.mxu1 %v9829_v63  ;;  %v13223_v15 = vld [vmem:[#allocation81_spill] sm:$0xff] }
 0x41d   : > { %13213 = vst [vmem:[#allocation14_spill] sm:$0xff] %v9831_v5  ;;  %13214 = vst [vmem:[#allocation20_spill] sm:$0xff] %v9833_v45  ;;  %v1649_v55 = vadd.f32 %v1648_v42, %v1647_v23  ;;  %v3926_v2 = vmul.f32 %v9443_v10, %v13219_v32  ;;  %v3923_v58 = vmul.f32 %v9435_v46, %v13220_v4  ;;  %v13224_v42 = vld [vmem:[#allocation43_spill] sm:$0xff] }
 0x41e   : > { %13215 = vst [vmem:[#allocation135_spill] sm:$0xff] %v9836_v35  ;;  %13216 = vst [vmem:[#allocation136_spill] sm:$0xff] %v9838_v19  ;;  %v4038_v12 = vand.u32 4294901760, %v3924_v57  ;;  %v3925_v11 = vmul.f32 %v9435_v46, %v13221_v49  ;;  %v3928_v18 = vmul.f32 %v9443_v10, %v13222_v22  ;;  %v3930_v29 = vmul.f32 %v9443_v10, %v13223_v15 }
 0x41f   : > { %13217 = vst [vmem:[#allocation137_spill] sm:$0xff] %v9840_v34  ;;  %6668 = vrcp.f32 %v1612_v27  ;;  %v4042_v28 = vand.u32 4294901760, %v3926_v2  ;;  %v4040_v23 = vand.u32 4294901760, %v3923_v58  ;;  %v3927_v52 = vmul.f32 %v9435_v46, %v13224_v42  ;;  %5890 = vmatpush1.bf16.msra.mxu1 %v9836_v35 }
 0x420   : > { %6670 = vrcp.f32 %v1649_v55  ;;  %v9858_v32 = vsub.f32 %v3924_v57, %v4038_v12  ;;  %v4044_v4 = vand.u32 4294901760, %v3925_v11  ;;  %v4046_v63 = vand.u32 4294901760, %v3928_v18  ;;  %v13232_v55 = vld [vmem:[#allocation61_spill] sm:$0xff] }
 0x421   : > { %v9860_v49 = vpack.c.bf16 %v4042_v28, %v4038_v12  ;;  %v9862_v34 = vsub.f32 %v3926_v2, %v4042_v28  ;;  %v9864_v22 = vsub.f32 %v3923_v58, %v4040_v23  ;;  %v4050_v15 = vand.u32 4294901760, %v3930_v29  ;;  %v13235_v28 = vld [vmem:[#allocation116_spill] sm:$0xff] }
 0x422   : > { %13225 = vst [vmem:[#allocation19_spill] sm:$0xff] %v9858_v32  ;;  %v9866_v27 = vpack.c.bf16 %v4044_v4, %v4040_v23  ;;  %v9868_v19 = vsub.f32 %v3925_v11, %v4044_v4  ;;  %v9870_v45 = vsub.f32 %v3928_v18, %v4046_v63  ;;  %v3929_v42 = vmul.f32 %v9435_v46, %v13232_v55  ;;  %v13236_v11 = vld [vmem:[#allocation46_spill] sm:$0xff]  ;;  %v13238_v55 = vld [vmem:[#allocation117_spill] sm:$0xff] }
 0x423   : > { %13226 = vst [vmem:[#allocation16_spill] sm:$0xff] %v9860_v49  ;;  %13227 = vst [vmem:[#allocation21_spill] sm:$0xff] %v9862_v34  ;;  %5892 = vmatprep.subr.bf16.mxu1 %v9860_v49  ;;  %v9875_v57 = vpack.c.bf16 %v4050_v15, %v4046_v63  ;;  %v9877_v12 = vsub.f32 %v3930_v29, %v4050_v15  ;;  %v4048_v2 = vand.u32 4294901760, %v3927_v52  ;;  %v13237_v4 = vld [vmem:[#allocation70_spill] sm:$0xff]  ;;  %v13240_v15 = vld [vmem:[#allocation88_spill] sm:$0xff] }
 0x424   : > { %13228 = vst [vmem:[#allocation18_spill] sm:$0xff] %v9864_v22  ;;  %13229 = vst [vmem:[#allocation44_spill] sm:$0xff] %v9866_v27  ;;  %v3932_v58 = vmul.f32 %v9443_v10, %v13235_v28  ;;  %5894 = vmatpush1.bf16.msra.mxu1 %v9866_v27  ;;  %v4052_v23 = vand.u32 4294901760, %v3929_v42  ;;  %v3934_v18 = vmul.f32 %v9443_v10, %v13236_v11 }
 0x425   : > { %13230 = vst [vmem:[#allocation81_spill] sm:$0xff] %v9868_v19  ;;  %13231 = vst [vmem:[#allocation43_spill] sm:$0xff] %v9870_v45  ;;  %v3931_v35 = vmul.f32 %v9435_v46, %v13237_v4  ;;  %v3933_v49 = vmul.f32 %v9435_v46, %v13238_v55  ;;  %5896 = vmatprep.subr.bf16.mxu1 %v9875_v57  ;;  %v9889_v63 = vsub.f32 %v3927_v52, %v4048_v2 }
 0x426   : > { %13233 = vst [vmem:[#allocation61_spill] sm:$0xff] %v9875_v57  ;;  %13234 = vst [vmem:[#allocation138_spill] sm:$0xff] %v9877_v12  ;;  %v4054_v29 = vand.u32 4294901760, %v3932_v58  ;;  %v3936_v28 = vmul.f32 %v9443_v10, %v13240_v15  ;;  %v13241_v12 = vld [vmem:[#allocation48_spill] sm:$0xff]  ;;  %v9897_v45 = vpack.c.bf16 %v4052_v23, %v4048_v2  ;;  %v9899_v11 = vsub.f32 %v3929_v42, %v4052_v23  ;;  %v13248_v2 = vld [vmem:[#allocation47_spill] sm:$0xff] }
 0x427   : > { %13239 = vst [vmem:[#allocation116_spill] sm:$0xff] %v9889_v63  ;;  %v9895_v27 = vmul.f32 %v9443_v10, %v13241_v12  ;;  %v4058_v4 = vand.u32 4294901760, %v3934_v18  ;;  %v4056_v19 = vand.u32 4294901760, %v3931_v35  ;;  %v4060_v55 = vand.u32 4294901760, %v3933_v49 }
 0x428   : > { %13242 = vst [vmem:[#allocation46_spill] sm:$0xff] %v9897_v45  ;;  %13243 = vst [vmem:[#allocation70_spill] sm:$0xff] %v9899_v11  ;;  %v9901_v22 = vsub.f32 %v3932_v58, %v4054_v29  ;;  %v4062_v57 = vand.u32 4294901760, %v3936_v28  ;;  %5898 = vmatpush1.bf16.msra.mxu1 %v9897_v45  ;;  %v9913_v42 = vmul.f32 %v9435_v46, %v13248_v2  ;;  %v13256_v45 = vld [vmem:[#allocation22_spill] sm:$0xff] }
 0x429   : > { %v12077_v52 = vand.u32 4294901760, %v9895_v27  ;;  %v9905_v63 = vpack.c.bf16 %v4058_v4, %v4054_v29  ;;  %v9907_v15 = vsub.f32 %v3934_v18, %v4058_v4  ;;  %v9909_v12 = vsub.f32 %v3931_v35, %v4056_v19  ;;  %v9915_v23 = vpop.eup %6668  ;;  %v13253_v4 = vld [vmem:[#allocation53_spill] sm:$0xff] }
 0x42a   : > { %13244 = vst [vmem:[#allocation117_spill] sm:$0xff] %v9901_v22  ;;  %v9917_v58 = vpack.c.bf16 %v4060_v55, %v4056_v19  ;;  %v9919_v22 = vsub.f32 %v3933_v49, %v4060_v55  ;;  %v9925_v29 = vsub.f32 %v3936_v28, %v4062_v57  ;;  %v9927_v18 = vpop.eup %6670  ;;  %v1651_v35 = vmul.f32 %v9915_v23, %v9128_v24  ;;  %v13254_v55 = vld [vmem:[#allocation90_spill] sm:$0xff] }
 0x42b   : > { %13245 = vst [vmem:[#allocation88_spill] sm:$0xff] %v9905_v63  ;;  %13246 = vst [vmem:[#allocation48_spill] sm:$0xff] %v9907_v15  ;;  %v9923_v11 = vpack.c.bf16 %v12077_v52, %v4062_v57  ;;  %v1654_v2 = vmul.f32 %v9915_v23, %v13253_v4  ;;  %v1656_v19 = vmul.f32 %v9915_v23, %v9180_v62  ;;  %5900 = vmatprep.subr.bf16.mxu1 %v9905_v63  ;;  %v13255_v28 = vld [vmem:[#allocation54_spill] sm:$0xff] }
 0x42c   : > { %13247 = vst [vmem:[#allocation139_spill] sm:$0xff] %v9909_v12  ;;  %13249 = vst [vmem:[#allocation47_spill] sm:$0xff] %v9917_v58  ;;  %v1658_v49 = vmul.f32 %v9915_v23, %v9204_v44  ;;  %v1653_v57 = vmul.f32 %v9927_v18, %v13254_v55  ;;  %v1655_v52 = vmul.f32 %v9927_v18, %v13255_v28  ;;  %5902 = vmatpush1.bf16.msra.mxu1 %v9917_v58 }
 0x42d   : > { %13250 = vst [vmem:[#allocation140_spill] sm:$0xff] %v9919_v22  ;;  %13251 = vst [vmem:[#allocation141_spill] sm:$0xff] %v9923_v11  ;;  %v1657_v24 = vmul.f32 %v9927_v18, %v9197_v8  ;;  %v1659_v4 = vmul.f32 %v9927_v18, %v13256_v45  ;;  %v1726_v22 = vand.u32 4294901760, %v1654_v2  ;;  %v1730_v62 = vand.u32 4294901760, %v1656_v19  ;;  %5904 = vmatprep.subr.bf16.mxu1 %v9923_v11 }
 0x42e   : > { %13252 = vst [vmem:[#allocation142_spill] sm:$0xff] %v9925_v29  ;;  %v1722_v29 = vand.u32 4294901760, %v1651_v35  ;;  %v1734_v12 = vand.u32 4294901760, %v1658_v49  ;;  %v1720_v44 = vand.u32 4294901760, %v1653_v57  ;;  %v1724_v63 = vand.u32 4294901760, %v1655_v52 }
 0x42f   : > { %v1728_v15 = vand.u32 4294901760, %v1657_v24  ;;  %v1732_v34 = vand.u32 4294901760, %v1659_v4  ;;  %v9952_v8 = vsub.f32 %v1654_v2, %v1726_v22  ;;  %v9968_v11 = vsub.f32 %v1656_v19, %v1730_v62 }
 0x430   : > { %v9948_v55 = vpack.c.bf16 %v1726_v22, %v1722_v29  ;;  %v9950_v28 = vsub.f32 %v1651_v35, %v1722_v29  ;;  %v9954_v32 = vpack.c.bf16 %v1734_v12, %v1730_v62  ;;  %v9956_v45 = vpack.c.bf16 %v1724_v63, %v1720_v44 }
 0x431   : > { %13259 = vst [vmem:[#allocation54_spill] sm:$0xff] %v9952_v8  ;;  %v9958_v5 = vsub.f32 %v1653_v57, %v1720_v44  ;;  %v9960_v56 = vsub.f32 %v1655_v52, %v1724_v63  ;;  %v9962_v58 = vpack.c.bf16 %v1732_v34, %v1728_v15  ;;  %v9964_v3 = vsub.f32 %v1657_v24, %v1728_v15 }
 0x432   : > { %13257 = vst [vmem:[#allocation53_spill] sm:$0xff] %v9948_v55  ;;  %13258 = vst [vmem:[#allocation90_spill] sm:$0xff] %v9950_v28  ;;  %v9966_v48 = vsub.f32 %v1659_v4, %v1732_v34  ;;  %v9970_v29 = vsub.f32 %v1658_v49, %v1734_v12  ;;  %5464 = vmatprep.subr.bf16.mxu0 %v9956_v45  ;;  %v1661_v22 = vmul.f32 %v9927_v18, %v9245_v16  ;;  %v13269_v12 = vld [vmem:[#allocation91_spill] sm:$0xff] }
 0x433   : > { %13260 = vst [vmem:[#allocation22_spill] sm:$0xff] %v9954_v32  ;;  %13261 = vst [vmem:[#allocation143_spill] sm:$0xff] %v9956_v45  ;;  %v1663_v35 = vmul.f32 %v9927_v18, %v9269_v60  ;;  %v1660_v63 = vmul.f32 %v9915_v23, %v9228_v7  ;;  %v1662_v52 = vmul.f32 %v9915_v23, %v9252_v43  ;;  %5466 = vmatpush1.bf16.msra.mxu0 %v9948_v55 }
 0x434   : > { %13262 = vst [vmem:[#allocation144_spill] sm:$0xff] %v9958_v5  ;;  %13263 = vst [vmem:[#allocation145_spill] sm:$0xff] %v9960_v56  ;;  %v1665_v34 = vmul.f32 %v9927_v18, %v9295_v30  ;;  %v1667_v15 = vmul.f32 %v9927_v18, %v9321_v6  ;;  %v1664_v16 = vmul.f32 %v9915_v23, %v9277_v0  ;;  %5468 = vmatprep.subr.bf16.mxu0 %v9962_v58 }
 0x435   : > { %13264 = vst [vmem:[#allocation146_spill] sm:$0xff] %v9962_v58  ;;  %13265 = vst [vmem:[#allocation147_spill] sm:$0xff] %v9964_v3  ;;  %v1666_v60 = vmul.f32 %v9915_v23, %v13269_v12  ;;  %v1736_v7 = vand.u32 4294901760, %v1661_v22  ;;  %v1740_v2 = vand.u32 4294901760, %v1663_v35  ;;  %v1738_v19 = vand.u32 4294901760, %v1660_v63 }
 0x436   : > { %13266 = vst [vmem:[#allocation148_spill] sm:$0xff] %v9966_v48  ;;  %13267 = vst [vmem:[#allocation149_spill] sm:$0xff] %v9968_v11  ;;  %v1742_v43 = vand.u32 4294901760, %v1662_v52  ;;  %v1744_v49 = vand.u32 4294901760, %v1665_v34  ;;  %v1748_v57 = vand.u32 4294901760, %v1667_v15  ;;  %v1746_v24 = vand.u32 4294901760, %v1664_v16 }
 0x437   : > { %13268 = vst [vmem:[#allocation150_spill] sm:$0xff] %v9970_v29  ;;  %v1750_v4 = vand.u32 4294901760, %v1666_v60  ;;  %v9991_v30 = vpack.c.bf16 %v1740_v2, %v1736_v7  ;;  %v9993_v62 = vsub.f32 %v1661_v22, %v1736_v7  ;;  %v9995_v6 = vsub.f32 %v1663_v35, %v1740_v2  ;;  %5470 = vmatpush1.bf16.msra.mxu0 %v9954_v32 }
 0x438   : > { %v9997_v0 = vpack.c.bf16 %v1742_v43, %v1738_v19  ;;  %v10000_v44 = vsub.f32 %v1660_v63, %v1738_v19  ;;  %v10002_v12 = vsub.f32 %v1662_v52, %v1742_v43  ;;  %v10004_v58 = vpack.c.bf16 %v1748_v57, %v1744_v49 }
 0x439   : > { %13270 = vst [vmem:[#allocation91_spill] sm:$0xff] %v9991_v30  ;;  %13271 = vst [vmem:[#allocation151_spill] sm:$0xff] %v9993_v62  ;;  %v10006_v55 = vsub.f32 %v1665_v34, %v1744_v49  ;;  %5472 = vmatprep.subr.bf16.mxu0 %v9991_v30  ;;  %v10009_v45 = vsub.f32 %v1667_v15, %v1748_v57  ;;  %v10011_v22 = vpack.c.bf16 %v1750_v4, %v1746_v24 }
 0x43a   : > { %13272 = vst [vmem:[#allocation152_spill] sm:$0xff] %v9995_v6  ;;  %13273 = vst [vmem:[#allocation153_spill] sm:$0xff] %v9997_v0  ;;  %v10013_v35 = vsub.f32 %v1664_v16, %v1746_v24  ;;  %v10015_v7 = vsub.f32 %v1666_v60, %v1750_v4  ;;  %v1669_v63 = vmul.f32 %v9927_v18, %v9347_v59 }
 0x43b   : > { %13274 = vst [vmem:[#allocation154_spill] sm:$0xff] %v10000_v44  ;;  %13275 = vst [vmem:[#allocation155_spill] sm:$0xff] %v10002_v12  ;;  %v1671_v52 = vmul.f32 %v9927_v18, %v9375_v54  ;;  %v1668_v34 = vmul.f32 %v9915_v23, %v9329_v17  ;;  %v1670_v2 = vmul.f32 %v9915_v23, %v9364_v47  ;;  %5474 = vmatpush1.bf16.msra.mxu0 %v9997_v0 }
 0x43c   : > { %13276 = vst [vmem:[#allocation156_spill] sm:$0xff] %v10004_v58  ;;  %13277 = vst [vmem:[#allocation157_spill] sm:$0xff] %v10006_v55  ;;  %v1673_v15 = vmul.f32 %v9927_v18, %v9385_v37  ;;  %v1675_v16 = vmul.f32 %v9927_v18, %v9400_v38  ;;  %v1672_v60 = vmul.f32 %v9915_v23, %v9380_v14  ;;  %v1752_v54 = vand.u32 4294901760, %v1669_v63 }
 0x43d   : > { %13278 = vst [vmem:[#allocation158_spill] sm:$0xff] %v10009_v45  ;;  %13279 = vst [vmem:[#allocation159_spill] sm:$0xff] %v10011_v22  ;;  %v1674_v59 = vmul.f32 %v9915_v23, %v9393_v20  ;;  %v1756_v19 = vand.u32 4294901760, %v1671_v52  ;;  %v1754_v17 = vand.u32 4294901760, %v1668_v34  ;;  %v1758_v43 = vand.u32 4294901760, %v1670_v2  ;;  %5476 = vmatprep.subr.bf16.mxu0 %v10004_v58 }
 0x43e   : > { %13280 = vst [vmem:[#allocation160_spill] sm:$0xff] %v10013_v35  ;;  %13281 = vst [vmem:[#allocation161_spill] sm:$0xff] %v10015_v7  ;;  %v1760_v47 = vand.u32 4294901760, %v1673_v15  ;;  %v1764_v49 = vand.u32 4294901760, %v1675_v16  ;;  %v1762_v37 = vand.u32 4294901760, %v1672_v60  ;;  %v10037_v38 = vsub.f32 %v1669_v63, %v1752_v54 }
 0x43f   : > { %v1766_v57 = vand.u32 4294901760, %v1674_v59  ;;  %v10035_v24 = vpack.c.bf16 %v1756_v19, %v1752_v54  ;;  %v10039_v14 = vsub.f32 %v1671_v52, %v1756_v19  ;;  %v10041_v4 = vpack.c.bf16 %v1758_v43, %v1754_v17  ;;  %5478 = vmatpush1.bf16.msra.mxu0 %v10011_v22  ;;  %v13295_v19 = vld [vmem:[#allocation118_spill] sm:$0xff] }
 0x440   : > { %13283 = vst [vmem:[#allocation163_spill] sm:$0xff] %v10037_v38  ;;  %v10043_v20 = vsub.f32 %v1668_v34, %v1754_v17  ;;  %v10045_v0 = vsub.f32 %v1670_v2, %v1758_v43  ;;  %v10047_v30 = vpack.c.bf16 %v1764_v49, %v1760_v47  ;;  %v10049_v32 = vsub.f32 %v1673_v15, %v1760_v47  ;;  %v13294_v15 = vld [vmem:[#allocation75_spill] sm:$0xff]  ;;  %v13296_v17 = vld [vmem:[#allocation28_spill] sm:$0xff] }
 0x441   : > { %13282 = vst [vmem:[#allocation162_spill] sm:$0xff] %v10035_v24  ;;  %13284 = vst [vmem:[#allocation164_spill] sm:$0xff] %v10039_v14  ;;  %v10052_v58 = vsub.f32 %v1675_v16, %v1764_v49  ;;  %v10054_v7 = vpack.c.bf16 %v1766_v57, %v1762_v37  ;;  %v10056_v63 = vsub.f32 %v1672_v60, %v1762_v37  ;;  %5480 = vmatprep.subr.bf16.mxu0 %v10035_v24  ;;  %v13297_v43 = vld [vmem:[#allocation59_spill] sm:$0xff] }
 0x442   : > { %13285 = vst [vmem:[#allocation165_spill] sm:$0xff] %v10041_v4  ;;  %13286 = vst [vmem:[#allocation166_spill] sm:$0xff] %v10043_v20  ;;  %v10058_v52 = vsub.f32 %v1674_v59, %v1766_v57  ;;  %v1677_v34 = vmul.f32 %v9927_v18, %v9417_v26  ;;  %v1679_v2 = vmul.f32 %v9927_v18, %v9450_v25  ;;  %v13298_v49 = vld [vmem:[#allocation123_spill] sm:$0xff] }
 0x443   : > { %13287 = vst [vmem:[#allocation167_spill] sm:$0xff] %v10045_v0  ;;  %13288 = vst [vmem:[#allocation168_spill] sm:$0xff] %v10047_v30  ;;  %v1676_v54 = vmul.f32 %v9915_v23, %v13294_v15  ;;  %v1678_v16 = vmul.f32 %v9915_v23, %v9429_v41  ;;  %v1681_v60 = vmul.f32 %v9927_v18, %v13295_v19  ;;  %5482 = vmatpush1.bf16.msra.mxu0 %v10041_v4 }
 0x444   : > { %13289 = vst [vmem:[#allocation169_spill] sm:$0xff] %v10049_v32  ;;  %13290 = vst [vmem:[#allocation170_spill] sm:$0xff] %v10052_v58  ;;  %v1683_v59 = vmul.f32 %v9927_v18, %v13296_v17  ;;  %v1680_v47 = vmul.f32 %v9915_v23, %v13297_v43  ;;  %v1682_v26 = vmul.f32 %v9915_v23, %v13298_v49  ;;  %v1768_v37 = vand.u32 4294901760, %v1677_v34 }
 0x445   : > { %13291 = vst [vmem:[#allocation171_spill] sm:$0xff] %v10054_v7  ;;  %13292 = vst [vmem:[#allocation172_spill] sm:$0xff] %v10056_v63  ;;  %v1772_v25 = vand.u32 4294901760, %v1679_v2  ;;  %v1770_v57 = vand.u32 4294901760, %v1676_v54  ;;  %v1774_v24 = vand.u32 4294901760, %v1678_v16  ;;  %v1776_v15 = vand.u32 4294901760, %v1681_v60  ;;  %5484 = vmatprep.subr.bf16.mxu0 %v10047_v30 }
 0x446   : > { %13293 = vst [vmem:[#allocation173_spill] sm:$0xff] %v10058_v52  ;;  %v1780_v41 = vand.u32 4294901760, %v1683_v59  ;;  %v1778_v22 = vand.u32 4294901760, %v1680_v47  ;;  %v1782_v52 = vand.u32 4294901760, %v1682_v26  ;;  %v10081_v17 = vsub.f32 %v1677_v34, %v1768_v37 }
 0x447   : > { %v10079_v19 = vpack.c.bf16 %v1772_v25, %v1768_v37  ;;  %v10083_v43 = vsub.f32 %v1679_v2, %v1772_v25  ;;  %v10085_v63 = vpack.c.bf16 %v1774_v24, %v1770_v57  ;;  %v10087_v49 = vsub.f32 %v1676_v54, %v1770_v57  ;;  %5486 = vmatpush1.bf16.msra.mxu0 %v10054_v7  ;;  %v13315_v37 = vld [vmem:[#allocation39_spill] sm:$0xff] }
 0x448   : > { %13300 = vst [vmem:[#allocation118_spill] sm:$0xff] %v10081_v17  ;;  %v10089_v58 = vsub.f32 %v1678_v16, %v1774_v24  ;;  %v10091_v32 = vpack.c.bf16 %v1780_v41, %v1776_v15  ;;  %v10093_v4 = vsub.f32 %v1681_v60, %v1776_v15  ;;  %v10095_v0 = vsub.f32 %v1683_v59, %v1780_v41  ;;  %v13311_v16 = vld [vmem:[#allocation131_spill] sm:$0xff]  ;;  %v13313_v59 = vld [vmem:[#allocation100_spill] sm:$0xff] }
 0x449   : > { %13299 = vst [vmem:[#allocation75_spill] sm:$0xff] %v10079_v19  ;;  %13301 = vst [vmem:[#allocation28_spill] sm:$0xff] %v10083_v43  ;;  %v10097_v20 = vpack.c.bf16 %v1782_v52, %v1778_v22  ;;  %v10099_v30 = vsub.f32 %v1680_v47, %v1778_v22  ;;  %v10101_v34 = vsub.f32 %v1682_v26, %v1782_v52  ;;  %5488 = vmatprep.subr.bf16.mxu0 %v10079_v19  ;;  %v13312_v22 = vld [vmem:[#allocation86_spill] sm:$0xff] }
 0x44a   : > { %13302 = vst [vmem:[#allocation59_spill] sm:$0xff] %v10085_v63  ;;  %13303 = vst [vmem:[#allocation123_spill] sm:$0xff] %v10087_v49  ;;  %v1685_v2 = vmul.f32 %v9927_v18, %v9487_v61  ;;  %v1687_v24 = vmul.f32 %v9927_v18, %v9504_v9  ;;  %v1684_v54 = vmul.f32 %v9915_v23, %v9480_v53  ;;  %v13314_v26 = vld [vmem:[#allocation126_spill] sm:$0xff] }
 0x44b   : > { %13304 = vst [vmem:[#allocation174_spill] sm:$0xff] %v10089_v58  ;;  %13305 = vst [vmem:[#allocation175_spill] sm:$0xff] %v10091_v32  ;;  %v1686_v60 = vmul.f32 %v9915_v23, %v13311_v16  ;;  %v1689_v52 = vmul.f32 %v9927_v18, %v13312_v22  ;;  %v1691_v47 = vmul.f32 %v9927_v18, %v13313_v59  ;;  %5490 = vmatpush1.bf16.msra.mxu0 %v10085_v63 }
 0x44c   : > { %13306 = vst [vmem:[#allocation176_spill] sm:$0xff] %v10093_v4  ;;  %13307 = vst [vmem:[#allocation177_spill] sm:$0xff] %v10095_v0  ;;  %v1688_v61 = vmul.f32 %v9915_v23, %v13314_v26  ;;  %v1690_v9 = vmul.f32 %v9915_v23, %v13315_v37  ;;  %v1784_v25 = vand.u32 4294901760, %v1685_v2  ;;  %v1788_v57 = vand.u32 4294901760, %v1687_v24  ;;  %5492 = vmatprep.subr.bf16.mxu0 %v10091_v32  ;;  %v13329_v32 = vld [vmem:[#allocation119_spill] sm:$0xff] }
 0x44d   : > { %13308 = vst [vmem:[#allocation178_spill] sm:$0xff] %v10097_v20  ;;  %13309 = vst [vmem:[#allocation179_spill] sm:$0xff] %v10099_v30  ;;  %v1786_v53 = vand.u32 4294901760, %v1684_v54  ;;  %v1790_v15 = vand.u32 4294901760, %v1686_v60  ;;  %v1792_v41 = vand.u32 4294901760, %v1689_v52  ;;  %v1796_v16 = vand.u32 4294901760, %v1691_v47 }
 0x44e   : > { %13310 = vst [vmem:[#allocation180_spill] sm:$0xff] %v10101_v34  ;;  %v1794_v7 = vand.u32 4294901760, %v1688_v61  ;;  %v1798_v19 = vand.u32 4294901760, %v1690_v9  ;;  %v10122_v22 = vpack.c.bf16 %v1788_v57, %v1784_v25  ;;  %v10124_v34 = vsub.f32 %v1685_v2, %v1784_v25  ;;  %v13328_v25 = vld [vmem:[#allocation56_spill] sm:$0xff] }
 0x44f   : > { %v10126_v59 = vsub.f32 %v1687_v24, %v1788_v57  ;;  %v10128_v26 = vpack.c.bf16 %v1790_v15, %v1786_v53  ;;  %v10131_v37 = vsub.f32 %v1684_v54, %v1786_v53  ;;  %v10133_v30 = vsub.f32 %v1686_v60, %v1790_v15  ;;  %5494 = vmatpush1.bf16.msra.mxu0 %v10097_v20 }
 0x450   : > { %13316 = vst [vmem:[#allocation131_spill] sm:$0xff] %v10122_v22  ;;  %13317 = vst [vmem:[#allocation86_spill] sm:$0xff] %v10124_v34  ;;  %v10135_v0 = vpack.c.bf16 %v1796_v16, %v1792_v41  ;;  %v10137_v4 = vsub.f32 %v1689_v52, %v1792_v41  ;;  %v10139_v58 = vsub.f32 %v1691_v47, %v1796_v16  ;;  %v13330_v60 = vand.u32 4294901760, %v9895_v27  ;;  %v13332_v52 = vld [vmem:[#allocation27_spill] sm:$0xff] }
 0x451   : > { %13318 = vst [vmem:[#allocation100_spill] sm:$0xff] %v10126_v59  ;;  %13319 = vst [vmem:[#allocation126_spill] sm:$0xff] %v10128_v26  ;;  %v10141_v63 = vpack.c.bf16 %v1798_v19, %v1794_v7  ;;  %v10143_v2 = vsub.f32 %v1688_v61, %v1794_v7  ;;  %v10145_v24 = vsub.f32 %v1690_v9, %v1798_v19  ;;  %v13333_v7 = vld [vmem:[#allocation58_spill] sm:$0xff]  ;;  %v13334_v61 = vld [vmem:[#allocation36_spill] sm:$0xff]  ;;  %5496 = vmatprep.subr.bf16.mxu0 %v10122_v22 }
 0x452   : > { %13320 = vst [vmem:[#allocation39_spill] sm:$0xff] %v10131_v37  ;;  %13321 = vst [vmem:[#allocation181_spill] sm:$0xff] %v10133_v30  ;;  %v1693_v57 = vmul.f32 %v9927_v18, %v13328_v25  ;;  %v1695_v54 = vmul.f32 %v9927_v18, %v13329_v32  ;;  %v10154_v53 = vsub.f32 %v9895_v27, %v13330_v60  ;;  %v13335_v32 = vld [vmem:[#allocation33_spill] sm:$0xff]  ;;  %v4064_v60 = vand.u32 4294901760, %v9913_v42 }
 0x453   : > { %13322 = vst [vmem:[#allocation182_spill] sm:$0xff] %v10135_v0  ;;  %13323 = vst [vmem:[#allocation183_spill] sm:$0xff] %v10137_v4  ;;  %v1692_v47 = vmul.f32 %v9915_v23, %v13332_v52  ;;  %v1694_v19 = vmul.f32 %v9915_v23, %v13333_v7  ;;  %v1697_v9 = vmul.f32 %v9927_v18, %v13334_v61  ;;  %5498 = vmatpush1.bf16.msra.mxu0 %v10128_v26 }
 0x454   : > { %13324 = vst [vmem:[#allocation184_spill] sm:$0xff] %v10139_v58  ;;  %13325 = vst [vmem:[#allocation185_spill] sm:$0xff] %v10141_v63  ;;  %v1699_v15 = vmul.f32 %v9927_v18, %v9587_v40  ;;  %v3937_v41 = vmul.f32 %v9435_v46, %v13335_v32  ;;  %v1800_v27 = vand.u32 4294901760, %v1693_v57  ;;  %v1804_v16 = vand.u32 4294901760, %v1695_v54  ;;  %5500 = vmatprep.subr.bf16.mxu0 %v10135_v0 }
 0x455   : > { %13326 = vst [vmem:[#allocation186_spill] sm:$0xff] %v10143_v2  ;;  %13327 = vst [vmem:[#allocation187_spill] sm:$0xff] %v10145_v24  ;;  %v1802_v25 = vand.u32 4294901760, %v1692_v47  ;;  %v1806_v52 = vand.u32 4294901760, %v1694_v19  ;;  %v1808_v20 = vand.u32 4294901760, %v1697_v9 }
 0x456   : > { %13331 = vst [vmem:[#allocation56_spill] sm:$0xff] %v10154_v53  ;;  %v1812_v53 = vand.u32 4294901760, %v1699_v15  ;;  %v4068_v7 = vand.u32 4294901760, %v3937_v41  ;;  %v10169_v24 = vpack.c.bf16 %v1804_v16, %v1800_v27  ;;  %v10171_v61 = vsub.f32 %v1693_v57, %v1800_v27  ;;  %v13345_v27 = vld [vmem:[#allocation25_spill] sm:$0xff] }
 0x457   : > { %v10173_v2 = vsub.f32 %v1695_v54, %v1804_v16  ;;  %v10175_v40 = vsub.f32 %v1692_v47, %v1802_v25  ;;  %v10178_v32 = vpack.c.bf16 %v1806_v52, %v1802_v25  ;;  %v10180_v22 = vsub.f32 %v1694_v19, %v1806_v52  ;;  %v13346_v19 = vld [vmem:[#allocation34_spill] sm:$0xff]  ;;  %5502 = vmatpush1.bf16.msra.mxu0 %v10141_v63 }
 0x458   : > { %13336 = vst [vmem:[#allocation119_spill] sm:$0xff] %v10169_v24  ;;  %13337 = vst [vmem:[#allocation27_spill] sm:$0xff] %v10171_v61  ;;  %v10182_v58 = vpack.c.bf16 %v1812_v53, %v1808_v20  ;;  %v10184_v4 = vsub.f32 %v1697_v9, %v1808_v20  ;;  %v10187_v30 = vsub.f32 %v1699_v15, %v1812_v53  ;;  %v13347_v52 = vld [vmem:[#allocation122_spill] sm:$0xff]  ;;  %v13348_v15 = vld [vmem:[#allocation49_spill] sm:$0xff]  ;;  %5504 = vmatprep.subr.bf16.mxu0 %v10169_v24 }
 0x459   : > { %13338 = vst [vmem:[#allocation58_spill] sm:$0xff] %v10178_v32  ;;  %13339 = vst [vmem:[#allocation36_spill] sm:$0xff] %v10180_v22  ;;  %v10189_v57 = vpack.c.bf16 %v4068_v7, %v4064_v60  ;;  %v10192_v54 = vsub.f32 %v9913_v42, %v4064_v60  ;;  %v10194_v47 = vsub.f32 %v3937_v41, %v4068_v7  ;;  %v13349_v60 = vld [vmem:[#allocation115_spill] sm:$0xff] }
 0x45a   : > { %13340 = vst [vmem:[#allocation33_spill] sm:$0xff] %v10182_v58  ;;  %13341 = vst [vmem:[#allocation188_spill] sm:$0xff] %v10184_v4  ;;  %v3940_v16 = vmul.f32 %v9443_v10, %v13345_v27  ;;  %v3942_v25 = vmul.f32 %v9443_v10, %v13346_v19  ;;  %v1696_v20 = vmul.f32 %v9915_v23, %v13347_v52 }
 0x45b   : > { %13342 = vst [vmem:[#allocation189_spill] sm:$0xff] %v10189_v57  ;;  %13343 = vst [vmem:[#allocation190_spill] sm:$0xff] %v10192_v54  ;;  %v1698_v53 = vmul.f32 %v9915_v23, %v9580_v36  ;;  %5906 = vmatpush1.bf16.msra.mxu1 %v10189_v57  ;;  %v1701_v42 = vmul.f32 %v9927_v18, %v9604_v39  ;;  %v1703_v9 = vmul.f32 %v9927_v18, %v9621_v31 }
 0x45c   : > { %13344 = vst [vmem:[#allocation191_spill] sm:$0xff] %v10194_v47  ;;  %v3939_v41 = vmul.f32 %v9435_v46, %v13348_v15  ;;  %v3941_v10 = vmul.f32 %v9435_v46, %v13349_v60  ;;  %v4070_v7 = vand.u32 4294901760, %v3940_v16  ;;  %v4074_v27 = vand.u32 4294901760, %v3942_v25  ;;  %5506 = vmatpush1.bf16.msra.mxu0 %v10178_v32 }
 0x45d   : > { %v1810_v19 = vand.u32 4294901760, %v1696_v20  ;;  %v1814_v36 = vand.u32 4294901760, %v1698_v53  ;;  %v1816_v52 = vand.u32 4294901760, %v1701_v42  ;;  %v1820_v57 = vand.u32 4294901760, %v1703_v9  ;;  %5508 = vmatprep.subr.bf16.mxu0 %v10182_v58  ;;  %v13366_v58 = vld [vmem:[#allocation69_spill] sm:$0xff] }
 0x45e   : > { %v4072_v39 = vand.u32 4294901760, %v3939_v41  ;;  %v4076_v0 = vand.u32 4294901760, %v3941_v10  ;;  %v10215_v26 = vpack.c.bf16 %v4074_v27, %v4070_v7  ;;  %v10217_v31 = vsub.f32 %v3940_v16, %v4070_v7  ;;  %v13359_v7 = vld [vmem:[#allocation41_spill] sm:$0xff] }
 0x45f   : > { %v10219_v15 = vsub.f32 %v3942_v25, %v4074_v27  ;;  %v10221_v47 = vpack.c.bf16 %v1814_v36, %v1810_v19  ;;  %v10223_v46 = vsub.f32 %v1696_v20, %v1810_v19  ;;  %v10225_v60 = vsub.f32 %v1698_v53, %v1814_v36  ;;  %v13361_v53 = vld [vmem:[#allocation57_spill] sm:$0xff] }
 0x460   : > { %13350 = vst [vmem:[#allocation25_spill] sm:$0xff] %v10215_v26  ;;  %v10227_v63 = vpack.c.bf16 %v1820_v57, %v1816_v52  ;;  %v10229_v54 = vsub.f32 %v1701_v42, %v1816_v52  ;;  %5908 = vmatprep.subr.bf16.mxu1 %v10215_v26  ;;  %v10233_v24 = vsub.f32 %v1703_v9, %v1820_v57  ;;  %v12168_v27 = vand.u32 4294901760, %v13359_v7  ;;  %v13362_v42 = vld [vmem:[#allocation129_spill] sm:$0xff]  ;;  %v13363_v52 = vld [vmem:[#allocation71_spill] sm:$0xff] }
 0x461   : > { %13351 = vst [vmem:[#allocation34_spill] sm:$0xff] %v10221_v47  ;;  %13352 = vst [vmem:[#allocation122_spill] sm:$0xff] %v10223_v46  ;;  %v10235_v16 = vpack.c.bf16 %v4076_v0, %v4072_v39  ;;  %v10237_v25 = vsub.f32 %v3939_v41, %v4072_v39  ;;  %v10241_v20 = vsub.f32 %v3941_v10, %v4076_v0  ;;  %v12173_v19 = vand.u32 4294901760, %v13361_v53  ;;  %v13364_v41 = vld [vmem:[#allocation64_spill] sm:$0xff] }
 0x462   : > { %13353 = vst [vmem:[#allocation49_spill] sm:$0xff] %v10225_v60  ;;  %13354 = vst [vmem:[#allocation115_spill] sm:$0xff] %v10227_v63  ;;  %v1700_v36 = vmul.f32 %v9915_v23, %v13362_v42  ;;  %v1702_v26 = vmul.f32 %v9915_v23, %v13363_v52  ;;  %v4098_v57 = vsub.f32 %v13359_v7, %v12168_v27  ;;  %v13365_v10 = vand.u32 4294901760, %v13364_v41 }
 0x463   : > { %13355 = vst [vmem:[#allocation192_spill] sm:$0xff] %v10229_v54  ;;  %13356 = vst [vmem:[#allocation193_spill] sm:$0xff] %v10233_v24  ;;  %5910 = vmatpush1.bf16.msra.mxu1 %v10235_v16  ;;  %v1705_v9 = vmul.f32 %v9927_v18, %v9629_v33  ;;  %v1707_v0 = vmul.f32 %v9927_v18, %v9646_v13  ;;  %v4110_v42 = vsub.f32 %v13361_v53, %v12173_v19  ;;  %v13374_v24 = vld [vmem:[#allocation107_spill] sm:$0xff] }
 0x464   : > { %13357 = vst [vmem:[#allocation194_spill] sm:$0xff] %v10235_v16  ;;  %13358 = vst [vmem:[#allocation195_spill] sm:$0xff] %v10237_v25  ;;  %v4087_v39 = vsub.f32 %v13364_v41, %v13365_v10  ;;  %v1818_v52 = vand.u32 4294901760, %v1700_v36  ;;  %v1822_v16 = vand.u32 4294901760, %v1702_v26  ;;  %5510 = vmatpush1.bf16.msra.mxu0 %v10221_v47  ;;  %v4099_v27 = vand.u32 4294901760, %v4098_v57 }
 0x465   : > { %13360 = vst [vmem:[#allocation196_spill] sm:$0xff] %v10241_v20  ;;  %v1824_v7 = vand.u32 4294901760, %v1705_v9  ;;  %v1828_v33 = vand.u32 4294901760, %v1707_v0  ;;  %5512 = vmatprep.subr.bf16.mxu0 %v10227_v63  ;;  %v4111_v13 = vand.u32 4294901760, %v4110_v42  ;;  %v13372_v57 = vand.u32 4294901760, %v13366_v58  ;;  %v13373_v63 = vld [vmem:[#allocation50_spill] sm:$0xff] }
 0x466   : > { %v4088_v20 = vand.u32 4294901760, %v4087_v39  ;;  %v10265_v25 = vpack.c.bf16 %v1822_v16, %v1818_v52  ;;  %v10267_v10 = vsub.f32 %v1700_v36, %v1818_v52  ;;  %v10269_v41 = vsub.f32 %v1702_v26, %v1822_v16  ;;  %v13375_v36 = vld [vmem:[#allocation105_spill] sm:$0xff]  ;;  %v13376_v26 = vld [vmem:[#allocation106_spill] sm:$0xff] }
 0x467   : > { %v10271_v19 = vpack.c.bf16 %v1828_v33, %v1824_v7  ;;  %v10273_v53 = vsub.f32 %v1705_v9, %v1824_v7  ;;  %v10275_v32 = vsub.f32 %v1707_v0, %v1828_v33  ;;  %v4104_v39 = vsub.f32 %v13366_v58, %v13372_v57  ;;  %v13378_v57 = vld [vmem:[#allocation109_spill] sm:$0xff] }
 0x468   : > { %13367 = vst [vmem:[#allocation129_spill] sm:$0xff] %v10265_v25  ;;  %13368 = vst [vmem:[#allocation71_spill] sm:$0xff] %v10269_v41  ;;  %4089 = vmatmul.mubr.f32.vlgmr.msra.gmra.mrb[0].mxu1 %v4088_v20  ;;  %v5911_v47 = vpack.c.bf16 %v4111_v13, %v4099_v27  ;;  %v12185_v42 = vand.u32 4294901760, %v13373_v63  ;;  %v12186_v52 = vand.u32 4294901760, %v13375_v36  ;;  %v12188_v16 = vand.u32 4294901760, %v13376_v26  ;;  %5514 = vmatpush1.bf16.msra.mxu0 %v10265_v25  ;;  %v13377_v20 = vld [vmem:[#allocation74_spill] sm:$0xff] }
 0x469   : > { %13369 = vst [vmem:[#allocation197_spill] sm:$0xff] %v10271_v19  ;;  %13370 = vst [vmem:[#allocation198_spill] sm:$0xff] %v10273_v53  ;;  %4480 = vmatprep.mubr.f32.mxu1 %v13374_v24  ;;  %v4105_v7 = vand.u32 4294901760, %v4104_v39  ;;  %v1704_v9 = vmul.f32 %v9915_v23, %v9624_v50  ;;  %v1706_v0 = vmul.f32 %v9915_v23, %v13377_v20  ;;  %5516 = vmatprep.subr.bf16.mxu0 %v10271_v19 }
 0x46a   : > { %13371 = vst [vmem:[#allocation199_spill] sm:$0xff] %v10275_v32  ;;  %v1709_v27 = vmul.f32 %v9927_v18, %v9666_v1  ;;  %5912 = vmatprep.subr.bf16.mxu1 %v5911_v47  ;;  %v4116_v33 = vsub.f32 %v13373_v63, %v12185_v42  ;;  %v4122_v13 = vsub.f32 %v13375_v36, %v12186_v52  ;;  %v12193_v39 = vand.u32 4294901760, %v13378_v57 }
 0x46b   : > { %v4134_v50 = vsub.f32 %v13376_v26, %v12188_v16  ;;  %v1826_v20 = vand.u32 4294901760, %v1704_v9  ;;  %v1830_v24 = vand.u32 4294901760, %v1706_v0  ;;  %v1711_v1 = vmul.f32 %v9927_v18, %v9674_v21 }
 0x46c   : > { %v1832_v47 = vand.u32 4294901760, %v1709_v27  ;;  %v4117_v19 = vand.u32 4294901760, %v4116_v33  ;;  %v4123_v25 = vand.u32 4294901760, %v4122_v13  ;;  %v4128_v42 = vsub.f32 %v13378_v57, %v12193_v39  ;;  %v13385_v57 = vld [vmem:[#allocation35_spill] sm:$0xff] }
 0x46d   : > { %v4135_v58 = vand.u32 4294901760, %v4134_v50  ;;  %v10307_v52 = vpack.c.bf16 %v1830_v24, %v1826_v20  ;;  %v10309_v36 = vsub.f32 %v1704_v9, %v1826_v20  ;;  %v10311_v16 = vsub.f32 %v1706_v0, %v1830_v24  ;;  %v13384_v50 = vld [vmem:[#allocation113_spill] sm:$0xff]  ;;  %v13386_v9 = vld [vmem:[#allocation66_spill] sm:$0xff] }
 0x46e   : > { %v1836_v26 = vand.u32 4294901760, %v1711_v1  ;;  %v5913_v63 = vpack.c.bf16 %v4117_v19, %v4105_v7  ;;  %v10313_v53 = vsub.f32 %v1709_v27, %v1832_v47  ;;  %v4129_v21 = vand.u32 4294901760, %v4128_v42  ;;  %v13388_v42 = vld [vmem:[#allocation37_spill] sm:$0xff]  ;;  %v13389_v0 = vld [vmem:[#allocation38_spill] sm:$0xff] }
 0x46f   : > { %13379 = vst [vmem:[#allocation74_spill] sm:$0xff] %v10307_v52  ;;  %13380 = vst [vmem:[#allocation200_spill] sm:$0xff] %v10311_v16  ;;  %v5915_v32 = vpack.c.bf16 %v4135_v58, %v4123_v25  ;;  %5518 = vmatpush1.bf16.msra.mxu0 %v10307_v52  ;;  %v12200_v39 = vand.u32 4294901760, %v13384_v50  ;;  %v12201_v41 = vand.u32 4294901760, %v13385_v57  ;;  %v12205_v24 = vand.u32 4294901760, %v13386_v9  ;;  %v13387_v58 = vld [vmem:[#allocation68_spill] sm:$0xff] }
 0x470   : > { %13381 = vst [vmem:[#allocation201_spill] sm:$0xff] %v10313_v53  ;;  %v10316_v33 = vpack.c.bf16 %v1836_v26, %v1832_v47  ;;  %v10318_v13 = vsub.f32 %v1711_v1, %v1836_v26  ;;  %5914 = vmatpush1.bf16.msra.mxu1 %v5913_v63  ;;  %v1708_v19 = vmul.f32 %v9915_v23, %v9657_v51  ;;  %v13390_v27 = vld [vmem:[#allocation89_spill] sm:$0xff]  ;;  %v13395_v53 = vld [vmem:[#allocation130_spill] sm:$0xff] }
 0x471   : > { %v1710_v25 = vmul.f32 %v9915_v23, %v13387_v58  ;;  %v1713_v7 = vmul.f32 %v9927_v18, %v13388_v42  ;;  %5916 = vmatprep.subr.bf16.mxu1 %v5915_v32  ;;  %v4140_v26 = vsub.f32 %v13384_v50, %v12200_v39  ;;  %v4146_v63 = vsub.f32 %v13385_v57, %v12201_v41 }
 0x472   : > { %13382 = vst [vmem:[#allocation202_spill] sm:$0xff] %v10316_v33  ;;  %13383 = vst [vmem:[#allocation203_spill] sm:$0xff] %v10318_v13  ;;  %5520 = vmatprep.subr.bf16.mxu0 %v10316_v33  ;;  %v1715_v51 = vmul.f32 %v9927_v18, %v13389_v0  ;;  %v12208_v20 = vand.u32 4294901760, %v13390_v27  ;;  %v4158_v1 = vsub.f32 %v13386_v9, %v12205_v24  ;;  %v1834_v32 = vand.u32 4294901760, %v1708_v19 }
 0x473   : > { %v1838_v47 = vand.u32 4294901760, %v1710_v25  ;;  %v1840_v58 = vand.u32 4294901760, %v1713_v7  ;;  %v4141_v42 = vand.u32 4294901760, %v4140_v26  ;;  %v4147_v33 = vand.u32 4294901760, %v4146_v63 }
 0x474   : > { %v1844_v52 = vand.u32 4294901760, %v1715_v51  ;;  %v4152_v39 = vsub.f32 %v13390_v27, %v12208_v20  ;;  %v4159_v41 = vand.u32 4294901760, %v4158_v1  ;;  %v10347_v18 = vsub.f32 %v1708_v19, %v1834_v32  ;;  %v13396_v1 = vld [vmem:[#allocation23_spill] sm:$0xff] }
 0x475   : > { %v10345_v57 = vpack.c.bf16 %v1838_v47, %v1834_v32  ;;  %v10349_v0 = vsub.f32 %v1710_v25, %v1838_v47  ;;  %v5917_v50 = vpack.c.bf16 %v4141_v42, %v4129_v21  ;;  %v10353_v24 = vsub.f32 %v1713_v7, %v1840_v58  ;;  %v13397_v19 = vld [vmem:[#allocation63_spill] sm:$0xff]  ;;  %v13399_v7 = vld [vmem:[#allocation73_spill] sm:$0xff] }
 0x476   : > { %v10351_v13 = vpack.c.bf16 %v1844_v52, %v1840_v58  ;;  %v10355_v9 = vsub.f32 %v1715_v51, %v1844_v52  ;;  %v5919_v26 = vpack.c.bf16 %v4159_v41, %v4147_v33  ;;  %v4153_v63 = vand.u32 4294901760, %v4152_v39  ;;  %v13398_v21 = vld [vmem:[#allocation51_spill] sm:$0xff]  ;;  %v13400_v51 = vld [vmem:[#allocation24_spill] sm:$0xff] }
 0x477   : > { %13391 = vst [vmem:[#allocation68_spill] sm:$0xff] %v10345_v57  ;;  %13393 = vst [vmem:[#allocation38_spill] sm:$0xff] %v10353_v24  ;;  %5522 = vmatpush1.bf16.msra.mxu0 %v10345_v57  ;;  %v12211_v20 = vand.u32 4294901760, %v13395_v53  ;;  %v12210_v27 = vand.u32 4294901760, %v13396_v1  ;;  %5918 = vmatpush1.bf16.msra.mxu1 %v5917_v50  ;;  %v12216_v25 = vand.u32 4294901760, %v13397_v19  ;;  %v1712_v32 = vmul.f32 %v9915_v23, %v13398_v21  ;;  %v13405_v24 = vld [vmem:[#allocation80_spill] sm:$0xff] }
 0x478   : > { %13392 = vst [vmem:[#allocation37_spill] sm:$0xff] %v10351_v13  ;;  %13394 = vst [vmem:[#allocation204_spill] sm:$0xff] %v10355_v9  ;;  %5524 = vmatprep.subr.bf16.mxu0 %v10351_v13  ;;  %v1714_v52 = vmul.f32 %v9915_v23, %v13399_v7  ;;  %v12220_v41 = vand.u32 4294901760, %v9958_v5  ;;  %5920 = vmatprep.subr.bf16.mxu1 %v5919_v26  ;;  %v12223_v50 = vand.u32 4294901760, %v9960_v56  ;;  %v12228_v47 = vand.u32 4294901760, %v13400_v51 }
 0x479   : > { %v4164_v39 = vsub.f32 %v13395_v53, %v12211_v20  ;;  %v4170_v33 = vsub.f32 %v13396_v1, %v12210_v27  ;;  %v4182_v58 = vsub.f32 %v13397_v19, %v12216_v25  ;;  %v1842_v23 = vand.u32 4294901760, %v1712_v32 }
 0x47a   : > { %v1846_v42 = vand.u32 4294901760, %v1714_v52  ;;  %v1868_v26 = vsub.f32 %v9958_v5, %v12220_v41  ;;  %v1880_v27 = vsub.f32 %v9960_v56, %v12223_v50  ;;  %v4176_v20 = vsub.f32 %v13400_v51, %v12228_v47  ;;  %v13403_v5 = vld [vmem:[#allocation65_spill] sm:$0xff]  ;;  %v13404_v56 = vld [vmem:[#allocation52_spill] sm:$0xff] }
 0x47b   : > { %v4165_v21 = vand.u32 4294901760, %v4164_v39  ;;  %v4171_v7 = vand.u32 4294901760, %v4170_v33  ;;  %v4183_v13 = vand.u32 4294901760, %v4182_v58  ;;  %v10389_v25 = vsub.f32 %v1712_v32, %v1842_v23 }
 0x47c   : > { %v10387_v57 = vpack.c.bf16 %v1846_v42, %v1842_v23  ;;  %v10391_v19 = vsub.f32 %v1714_v52, %v1846_v42  ;;  %v1869_v53 = vand.u32 4294901760, %v1868_v26  ;;  %v1881_v41 = vand.u32 4294901760, %v1880_v27 }
 0x47d   : > { %13402 = vst [vmem:[#allocation73_spill] sm:$0xff] %v10389_v25  ;;  %v5921_v1 = vpack.c.bf16 %v4165_v21, %v4153_v63  ;;  %v4177_v39 = vand.u32 4294901760, %v4176_v20  ;;  %v5923_v33 = vpack.c.bf16 %v4183_v13, %v4171_v7  ;;  %v12232_v50 = vand.u32 4294901760, %v13403_v5  ;;  %v13408_v21 = vld [vmem:[#allocation30_spill] sm:$0xff] }
 0x47e   : > { %13401 = vst [vmem:[#allocation51_spill] sm:$0xff] %v10387_v57  ;;  %5526 = vmatpush1.bf16.msra.mxu0 %v10387_v57  ;;  %v12230_v9 = vand.u32 4294901760, %v13404_v56  ;;  %v12229_v47 = vand.u32 4294901760, %v13405_v24  ;;  %v5527_v58 = vpack.c.bf16 %v1881_v41, %v1869_v53  ;;  %v12231_v32 = vand.u32 4294901760, %v9950_v28 }
 0x47f   : > { %5922 = vmatpush1.bf16.msra.mxu1 %v5921_v1  ;;  %v12233_v52 = vand.u32 4294901760, %v9952_v8  ;;  %v12236_v63 = vand.u32 4294901760, %v9964_v3  ;;  %v4188_v13 = vsub.f32 %v13403_v5, %v12232_v50  ;;  %v12245_v53 = vand.u32 4294901760, %v9966_v48  ;;  %v13406_v1 = vld [vmem:[#allocation112_spill] sm:$0xff] }
 0x480   : > { %5924 = vmatprep.subr.bf16.mxu1 %v5923_v33  ;;  %v4194_v27 = vsub.f32 %v13404_v56, %v12230_v9  ;;  %v4206_v20 = vsub.f32 %v13405_v24, %v12229_v47  ;;  %5528 = vmatprep.subr.bf16.mxu0 %v5527_v58  ;;  %v13407_v41 = vand.u32 4294901760, %v13406_v1  ;;  %v1874_v23 = vsub.f32 %v9950_v28, %v12231_v32  ;;  %v13409_v9 = vld [vmem:[#allocation85_spill] sm:$0xff]  ;;  %v13411_v28 = vld [vmem:[#allocation26_spill] sm:$0xff] }
 0x481   : > { %v1886_v42 = vsub.f32 %v9952_v8, %v12233_v52  ;;  %v1892_v26 = vsub.f32 %v9964_v3, %v12236_v63  ;;  %v12251_v7 = vand.u32 4294901760, %v13408_v21  ;;  %v4189_v33 = vand.u32 4294901760, %v4188_v13  ;;  %v13410_v8 = vld [vmem:[#allocation79_spill] sm:$0xff]  ;;  %v13412_v24 = vld [vmem:[#allocation77_spill] sm:$0xff] }
 0x482   : > { %1859 = vmatmul.mubr.f32.vlgmr.msra.gmra.mrb[0].mxu0 %v13407_v41  ;;  %v4195_v47 = vand.u32 4294901760, %v4194_v27  ;;  %v4207_v58 = vand.u32 4294901760, %v4206_v20  ;;  %v1904_v1 = vsub.f32 %v9966_v48, %v12245_v53  ;;  %v1875_v41 = vand.u32 4294901760, %v1874_v23 }
 0x483   : > { %2250 = vmatprep.mubr.f32.mxu0 %v13409_v9  ;;  %v1887_v32 = vand.u32 4294901760, %v1886_v42  ;;  %v1893_v50 = vand.u32 4294901760, %v1892_v26  ;;  %v4200_v52 = vsub.f32 %v13408_v21, %v12251_v7  ;;  %v5925_v57 = vpack.c.bf16 %v4189_v33, %v4177_v39  ;;  %v13413_v26 = vld [vmem:[#allocation76_spill] sm:$0xff] }
 0x484   : > { %v5927_v63 = vpack.c.bf16 %v4207_v58, %v4195_v47  ;;  %v1905_v3 = vand.u32 4294901760, %v1904_v1  ;;  %v12250_v13 = vand.u32 4294901760, %v13410_v8  ;;  %v12249_v9 = vand.u32 4294901760, %v13411_v28 }
 0x485   : > { %v5529_v27 = vpack.c.bf16 %v1887_v32, %v1875_v41  ;;  %v4201_v20 = vand.u32 4294901760, %v4200_v52  ;;  %v12246_v56 = vand.u32 4294901760, %v13412_v24  ;;  %5926 = vmatpush1.bf16.msra.mxu1 %v5925_v57  ;;  %v12247_v42 = vand.u32 4294901760, %v9968_v11 }
 0x486   : > { %v5531_v53 = vpack.c.bf16 %v1905_v3, %v1893_v50  ;;  %v4212_v23 = vsub.f32 %v13410_v8, %v12250_v13  ;;  %v12248_v39 = vand.u32 4294901760, %v9970_v29  ;;  %5928 = vmatprep.subr.bf16.mxu1 %v5927_v63  ;;  %v4218_v47 = vsub.f32 %v13411_v28, %v12249_v9 }
 0x487   : > { %5530 = vmatpush1.bf16.msra.mxu0 %v5529_v27  ;;  %v4230_v32 = vsub.f32 %v13412_v24, %v12246_v56  ;;  %v12254_v3 = vand.u32 4294901760, %v9993_v62  ;;  %v12266_v57 = vand.u32 4294901760, %v9995_v6  ;;  %v1898_v52 = vsub.f32 %v9968_v11, %v12247_v42  ;;  %v13416_v11 = vld [vmem:[#allocation32_spill] sm:$0xff] }
 0x488   : > { %5532 = vmatprep.subr.bf16.mxu0 %v5531_v53  ;;  %v4213_v50 = vand.u32 4294901760, %v4212_v23  ;;  %v1910_v63 = vsub.f32 %v9970_v29, %v12248_v39  ;;  %v12265_v33 = vand.u32 4294901760, %v13413_v26  ;;  %v4219_v58 = vand.u32 4294901760, %v4218_v47  ;;  %v13414_v47 = vld [vmem:[#allocation104_spill] sm:$0xff] }
 0x489   : > { %v4231_v1 = vand.u32 4294901760, %v4230_v32  ;;  %v1916_v41 = vsub.f32 %v9993_v62, %v12254_v3  ;;  %v1928_v53 = vsub.f32 %v9995_v6, %v12266_v57  ;;  %v1899_v23 = vand.u32 4294901760, %v1898_v52  ;;  %v13415_v3 = vld [vmem:[#allocation45_spill] sm:$0xff] }
 0x48a   : > { %v5929_v27 = vpack.c.bf16 %v4213_v50, %v4201_v20  ;;  %v1911_v56 = vand.u32 4294901760, %v1910_v63  ;;  %v4224_v42 = vsub.f32 %v13413_v26, %v12265_v33  ;;  %v12264_v32 = vand.u32 4294901760, %v13414_v47 }
 0x48b   : > { %v5931_v39 = vpack.c.bf16 %v4231_v1, %v4219_v58  ;;  %v1917_v9 = vand.u32 4294901760, %v1916_v41  ;;  %v1929_v13 = vand.u32 4294901760, %v1928_v53  ;;  %v12261_v62 = vand.u32 4294901760, %v13415_v3  ;;  %v13417_v1 = vld [vmem:[#allocation108_spill] sm:$0xff] }
 0x48c   : > { %5930 = vmatpush1.bf16.msra.mxu1 %v5929_v27  ;;  %v5533_v7 = vpack.c.bf16 %v1911_v56, %v1899_v23  ;;  %v4225_v29 = vand.u32 4294901760, %v4224_v42  ;;  %v12260_v24 = vand.u32 4294901760, %v13416_v11  ;;  %v4236_v50 = vsub.f32 %v13414_v47, %v12264_v32 }
 0x48d   : > { %5932 = vmatprep.subr.bf16.mxu1 %v5931_v39  ;;  %v5535_v20 = vpack.c.bf16 %v1929_v13, %v1917_v9  ;;  %v12262_v52 = vand.u32 4294901760, %v10000_v44  ;;  %v12263_v63 = vand.u32 4294901760, %v10002_v12  ;;  %v4242_v56 = vsub.f32 %v13415_v3, %v12261_v62 }
 0x48e   : > { %5534 = vmatpush1.bf16.msra.mxu0 %v5533_v7  ;;  %v4254_v42 = vsub.f32 %v13416_v11, %v12260_v24  ;;  %v12269_v39 = vand.u32 4294901760, %v10006_v55  ;;  %v12281_v9 = vand.u32 4294901760, %v10009_v45  ;;  %v4237_v13 = vand.u32 4294901760, %v4236_v50 }
 0x48f   : > { %5536 = vmatprep.subr.bf16.mxu0 %v5535_v20  ;;  %v1922_v58 = vsub.f32 %v10000_v44, %v12262_v52  ;;  %v1934_v7 = vsub.f32 %v10002_v12, %v12263_v63  ;;  %v12280_v41 = vand.u32 4294901760, %v13417_v1  ;;  %v4243_v53 = vand.u32 4294901760, %v4242_v56  ;;  %v13418_v56 = vld [vmem:[#allocation83_spill] sm:$0xff]  ;;  %v13420_v44 = vld [vmem:[#allocation124_spill] sm:$0xff] }
 0x490   : > { %v4255_v27 = vand.u32 4294901760, %v4254_v42  ;;  %v1940_v23 = vsub.f32 %v10006_v55, %v12269_v39  ;;  %v1952_v20 = vsub.f32 %v10009_v45, %v12281_v9  ;;  %v5933_v50 = vpack.c.bf16 %v4237_v13, %v4225_v29  ;;  %v13419_v39 = vld [vmem:[#allocation111_spill] sm:$0xff] }
 0x491   : > { %v1923_v24 = vand.u32 4294901760, %v1922_v58  ;;  %v1935_v62 = vand.u32 4294901760, %v1934_v7  ;;  %v4248_v52 = vsub.f32 %v13417_v1, %v12280_v41  ;;  %v12277_v42 = vand.u32 4294901760, %v13418_v56  ;;  %v13421_v7 = vld [vmem:[#allocation161_spill] sm:$0xff] }
 0x492   : > { %v5935_v63 = vpack.c.bf16 %v4255_v27, %v4243_v53  ;;  %v1941_v32 = vand.u32 4294901760, %v1940_v23  ;;  %v1953_v33 = vand.u32 4294901760, %v1952_v20  ;;  %5934 = vmatpush1.bf16.msra.mxu1 %v5933_v50  ;;  %v12276_v55 = vand.u32 4294901760, %v13419_v39  ;;  %v13422_v27 = vld [vmem:[#allocation84_spill] sm:$0xff] }
 0x493   : > { %v5537_v57 = vpack.c.bf16 %v1935_v62, %v1923_v24  ;;  %v4249_v12 = vand.u32 4294901760, %v4248_v52  ;;  %v12275_v11 = vand.u32 4294901760, %v13420_v44  ;;  %v4260_v13 = vsub.f32 %v13418_v56, %v12277_v42  ;;  %v13446_v56 = vld [vmem:[#allocation21_spill] sm:$0xff] }
 0x494   : > { %5936 = vmatprep.subr.bf16.mxu1 %v5935_v63  ;;  %v5539_v29 = vpack.c.bf16 %v1953_v33, %v1941_v32  ;;  %v12278_v58 = vand.u32 4294901760, %v10013_v35  ;;  %v12279_v53 = vand.u32 4294901760, %v13421_v7  ;;  %v4266_v62 = vsub.f32 %v13419_v39, %v12276_v55 }
 0x495   : > { %5538 = vmatpush1.bf16.msra.mxu0 %v5537_v57  ;;  %v4278_v24 = vsub.f32 %v13420_v44, %v12275_v11  ;;  %v12285_v52 = vand.u32 4294901760, %v10037_v38  ;;  %v12294_v33 = vand.u32 4294901760, %v10039_v14  ;;  %v4261_v32 = vand.u32 4294901760, %v4260_v13  ;;  %v13425_v44 = vld [vmem:[#allocation93_spill] sm:$0xff] }
 0x496   : > { %5540 = vmatprep.subr.bf16.mxu0 %v5539_v29  ;;  %v1946_v63 = vsub.f32 %v10013_v35, %v12278_v58  ;;  %v1958_v57 = vsub.f32 %v13421_v7, %v12279_v53  ;;  %v12292_v23 = vand.u32 4294901760, %v13422_v27  ;;  %v4267_v20 = vand.u32 4294901760, %v4266_v62  ;;  %v13423_v62 = vld [vmem:[#allocation125_spill] sm:$0xff] }
 0x497   : > { %v4279_v50 = vand.u32 4294901760, %v4278_v24  ;;  %v1964_v11 = vsub.f32 %v10037_v38, %v12285_v52  ;;  %v1976_v29 = vsub.f32 %v10039_v14, %v12294_v33  ;;  %v5937_v13 = vpack.c.bf16 %v4261_v32, %v4249_v12  ;;  %v13424_v52 = vld [vmem:[#allocation95_spill] sm:$0xff] }
 0x498   : > { %v1947_v55 = vand.u32 4294901760, %v1946_v63  ;;  %v1959_v42 = vand.u32 4294901760, %v1958_v57  ;;  %v4272_v58 = vsub.f32 %v13422_v27, %v12292_v23  ;;  %v12291_v24 = vand.u32 4294901760, %v13423_v62  ;;  %v13426_v63 = vld [vmem:[#allocation166_spill] sm:$0xff] }
 0x499   : > { %v5939_v53 = vpack.c.bf16 %v4279_v50, %v4267_v20  ;;  %v1965_v41 = vand.u32 4294901760, %v1964_v11  ;;  %v1977_v9 = vand.u32 4294901760, %v1976_v29  ;;  %5938 = vmatpush1.bf16.msra.mxu1 %v5937_v13  ;;  %v12290_v38 = vand.u32 4294901760, %v13424_v52  ;;  %v13427_v20 = vld [vmem:[#allocation167_spill] sm:$0xff]  ;;  %v13433_v27 = vld [vmem:[#allocation134_spill] sm:$0xff] }
 0x49a   : > { %v5541_v7 = vpack.c.bf16 %v1959_v42, %v1947_v55  ;;  %v4273_v35 = vand.u32 4294901760, %v4272_v58  ;;  %v12293_v39 = vand.u32 4294901760, %v13425_v44  ;;  %v4284_v32 = vsub.f32 %v13423_v62, %v12291_v24  ;;  %v13428_v58 = vld [vmem:[#allocation169_spill] sm:$0xff]  ;;  %v13430_v13 = vld [vmem:[#allocation103_spill] sm:$0xff] }
 0x49b   : > { %5940 = vmatprep.subr.bf16.mxu1 %v5939_v53  ;;  %v5543_v12 = vpack.c.bf16 %v1977_v9, %v1965_v41  ;;  %v12296_v57 = vand.u32 4294901760, %v13426_v63  ;;  %v12297_v11 = vand.u32 4294901760, %v13427_v20  ;;  %v4290_v55 = vsub.f32 %v13424_v52, %v12290_v38  ;;  %v13429_v9 = vld [vmem:[#allocation170_spill] sm:$0xff] }
 0x49c   : > { %5542 = vmatpush1.bf16.msra.mxu0 %v5541_v7  ;;  %v4302_v42 = vsub.f32 %v13425_v44, %v12293_v39  ;;  %v12302_v53 = vand.u32 4294901760, %v13428_v58  ;;  %v12313_v41 = vand.u32 4294901760, %v13429_v9  ;;  %v4285_v50 = vand.u32 4294901760, %v4284_v32 }
 0x49d   : > { %5544 = vmatprep.subr.bf16.mxu0 %v5543_v12  ;;  %v1970_v29 = vsub.f32 %v13426_v63, %v12296_v57  ;;  %v1982_v7 = vsub.f32 %v13427_v20, %v12297_v11  ;;  %v12310_v38 = vand.u32 4294901760, %v13430_v13  ;;  %v4291_v24 = vand.u32 4294901760, %v4290_v55  ;;  %v13431_v55 = vld [vmem:[#allocation82_spill] sm:$0xff] }
 0x49e   : > { %v4303_v23 = vand.u32 4294901760, %v4302_v42  ;;  %v1988_v39 = vsub.f32 %v13428_v58, %v12302_v53  ;;  %v2000_v12 = vsub.f32 %v13429_v9, %v12313_v41  ;;  %v5941_v32 = vpack.c.bf16 %v4285_v50, %v4273_v35  ;;  %v13432_v53 = vld [vmem:[#allocation133_spill] sm:$0xff] }
 0x49f   : > { %v1971_v33 = vand.u32 4294901760, %v1970_v29  ;;  %v1983_v44 = vand.u32 4294901760, %v1982_v7  ;;  %v4296_v57 = vsub.f32 %v13430_v13, %v12310_v38  ;;  %v12309_v42 = vand.u32 4294901760, %v13431_v55  ;;  %v13434_v29 = vld [vmem:[#allocation172_spill] sm:$0xff] }
 0x4a0   : > { %v5943_v11 = vpack.c.bf16 %v4303_v23, %v4291_v24  ;;  %v1989_v20 = vand.u32 4294901760, %v1988_v39  ;;  %v2001_v63 = vand.u32 4294901760, %v2000_v12  ;;  %5942 = vmatpush1.bf16.msra.mxu1 %v5941_v32  ;;  %v12307_v58 = vand.u32 4294901760, %v13432_v53  ;;  %v13435_v23 = vld [vmem:[#allocation173_spill] sm:$0xff] }
 0x4a1   : > { %v5545_v52 = vpack.c.bf16 %v1983_v44, %v1971_v33  ;;  %v4297_v62 = vand.u32 4294901760, %v4296_v57  ;;  %v12308_v14 = vand.u32 4294901760, %v13433_v27  ;;  %v4308_v50 = vsub.f32 %v13431_v55, %v12309_v42 }
 0x4a2   : > { %5944 = vmatprep.subr.bf16.mxu1 %v5943_v11  ;;  %v5547_v35 = vpack.c.bf16 %v2001_v63, %v1989_v20  ;;  %v12311_v7 = vand.u32 4294901760, %v13434_v29  ;;  %v12312_v39 = vand.u32 4294901760, %v13435_v23  ;;  %v4314_v44 = vsub.f32 %v13432_v53, %v12307_v58  ;;  %v13436_v11 = vld [vmem:[#allocation94_spill] sm:$0xff]  ;;  %v13439_v53 = vld [vmem:[#allocation20_spill] sm:$0xff] }
 0x4a3   : > { %5546 = vmatpush1.bf16.msra.mxu0 %v5545_v52  ;;  %v4326_v33 = vsub.f32 %v13433_v27, %v12308_v14  ;;  %v12317_v24 = vand.u32 4294901760, %v10081_v17  ;;  %v12326_v63 = vand.u32 4294901760, %v10083_v43  ;;  %v4309_v57 = vand.u32 4294901760, %v4308_v50 }
 0x4a4   : > { %5548 = vmatprep.subr.bf16.mxu0 %v5547_v35  ;;  %v1994_v20 = vsub.f32 %v13434_v29, %v12311_v7  ;;  %v2006_v52 = vsub.f32 %v13435_v23, %v12312_v39  ;;  %v12325_v12 = vand.u32 4294901760, %v13436_v11  ;;  %v4315_v32 = vand.u32 4294901760, %v4314_v44  ;;  %v13437_v44 = vld [vmem:[#allocation13_spill] sm:$0xff] }
 0x4a5   : > { %v4327_v58 = vand.u32 4294901760, %v4326_v33  ;;  %v2012_v14 = vsub.f32 %v10081_v17, %v12317_v24  ;;  %v2024_v35 = vsub.f32 %v10083_v43, %v12326_v63  ;;  %v5945_v50 = vpack.c.bf16 %v4309_v57, %v4297_v62  ;;  %v13438_v24 = vld [vmem:[#allocation14_spill] sm:$0xff] }
 0x4a6   : > { %v1995_v42 = vand.u32 4294901760, %v1994_v20  ;;  %v2007_v38 = vand.u32 4294901760, %v2006_v52  ;;  %v4320_v7 = vsub.f32 %v13436_v11, %v12325_v12  ;;  %v12323_v33 = vand.u32 4294901760, %v13437_v44 }
 0x4a7   : > { %v5947_v39 = vpack.c.bf16 %v4327_v58, %v4315_v32  ;;  %v2013_v41 = vand.u32 4294901760, %v2012_v14  ;;  %v2025_v23 = vand.u32 4294901760, %v2024_v35  ;;  %5946 = vmatpush1.bf16.msra.mxu1 %v5945_v50  ;;  %v12322_v17 = vand.u32 4294901760, %v13438_v24  ;;  %v13440_v58 = vld [vmem:[#allocation174_spill] sm:$0xff]  ;;  %v13443_v35 = vld [vmem:[#allocation136_spill] sm:$0xff] }
 0x4a8   : > { %v5549_v29 = vpack.c.bf16 %v2007_v38, %v1995_v42  ;;  %v4321_v27 = vand.u32 4294901760, %v4320_v7  ;;  %v12324_v55 = vand.u32 4294901760, %v13439_v53  ;;  %v4332_v57 = vsub.f32 %v13437_v44, %v12323_v33  ;;  %v13441_v7 = vld [vmem:[#allocation176_spill] sm:$0xff] }
 0x4a9   : > { %5948 = vmatprep.subr.bf16.mxu1 %v5947_v39  ;;  %v5551_v62 = vpack.c.bf16 %v2025_v23, %v2013_v41  ;;  %v12327_v20 = vand.u32 4294901760, %v10087_v49  ;;  %v12328_v14 = vand.u32 4294901760, %v13440_v58  ;;  %v4338_v38 = vsub.f32 %v13438_v24, %v12322_v17  ;;  %v13442_v41 = vld [vmem:[#allocation177_spill] sm:$0xff] }
 0x4aa   : > { %5550 = vmatpush1.bf16.msra.mxu0 %v5549_v29  ;;  %v4350_v42 = vsub.f32 %v13439_v53, %v12324_v55  ;;  %v12334_v39 = vand.u32 4294901760, %v13441_v7  ;;  %v12344_v23 = vand.u32 4294901760, %v13442_v41  ;;  %v4333_v52 = vand.u32 4294901760, %v4332_v57 }
 0x4ab   : > { %5552 = vmatprep.subr.bf16.mxu0 %v5551_v62  ;;  %v2018_v32 = vsub.f32 %v10087_v49, %v12327_v20  ;;  %v2030_v29 = vsub.f32 %v13440_v58, %v12328_v14  ;;  %v12341_v50 = vand.u32 4294901760, %v13443_v35  ;;  %v4339_v17 = vand.u32 4294901760, %v4338_v38  ;;  %v13444_v38 = vld [vmem:[#allocation137_spill] sm:$0xff]  ;;  %v13567_v49 = vld [vmem:[#allocation28_spill] sm:$0xff] }
 0x4ac   : > { %v4351_v33 = vand.u32 4294901760, %v4350_v42  ;;  %v2036_v55 = vsub.f32 %v13441_v7, %v12334_v39  ;;  %v2048_v62 = vsub.f32 %v13442_v41, %v12344_v23  ;;  %v5949_v57 = vpack.c.bf16 %v4333_v52, %v4321_v27  ;;  %v13445_v39 = vld [vmem:[#allocation19_spill] sm:$0xff]  ;;  %v13564_v41 = vld [vmem:[#allocation172_spill] sm:$0xff] }
 0x4ad   : > { %v2019_v12 = vand.u32 4294901760, %v2018_v32  ;;  %v2031_v63 = vand.u32 4294901760, %v2030_v29  ;;  %v4344_v20 = vsub.f32 %v13443_v35, %v12341_v50  ;;  %v12340_v42 = vand.u32 4294901760, %v13444_v38  ;;  %v13447_v32 = vld [vmem:[#allocation179_spill] sm:$0xff] }
 0x4ae   : > { %v5951_v14 = vpack.c.bf16 %v4351_v33, %v4339_v17  ;;  %v2037_v44 = vand.u32 4294901760, %v2036_v55  ;;  %v2049_v11 = vand.u32 4294901760, %v2048_v62  ;;  %5950 = vmatpush1.bf16.msra.mxu1 %v5949_v57  ;;  %v12338_v9 = vand.u32 4294901760, %v13445_v39  ;;  %v13448_v17 = vld [vmem:[#allocation180_spill] sm:$0xff] }
 0x4af   : > { %v5553_v43 = vpack.c.bf16 %v2031_v63, %v2019_v12  ;;  %v4345_v13 = vand.u32 4294901760, %v4344_v20  ;;  %v12339_v1 = vand.u32 4294901760, %v13446_v56  ;;  %v4356_v52 = vsub.f32 %v13444_v38, %v12340_v42  ;;  %v13551_v38 = vld [vmem:[#allocation164_spill] sm:$0xff] }
 0x4b0   : > { %5952 = vmatprep.subr.bf16.mxu1 %v5951_v14  ;;  %v5555_v27 = vpack.c.bf16 %v2049_v11, %v2037_v44  ;;  %v12342_v29 = vand.u32 4294901760, %v13447_v32  ;;  %v12343_v55 = vand.u32 4294901760, %v13448_v17  ;;  %v4362_v63 = vsub.f32 %v13445_v39, %v12338_v9  ;;  %v13449_v14 = vld [vmem:[#allocation18_spill] sm:$0xff]  ;;  %v13545_v39 = vld [vmem:[#allocation83_spill] sm:$0xff] }
 0x4b1   : > { %5554 = vmatpush1.bf16.msra.mxu0 %v5553_v43  ;;  %v4374_v12 = vsub.f32 %v13446_v56, %v12339_v1  ;;  %v12349_v33 = vand.u32 4294901760, %v10124_v34  ;;  %v12358_v11 = vand.u32 4294901760, %v10126_v59  ;;  %v4357_v44 = vand.u32 4294901760, %v4356_v52 }
 0x4b2   : > { %5556 = vmatprep.subr.bf16.mxu0 %v5555_v27  ;;  %v2042_v20 = vsub.f32 %v13447_v32, %v12342_v29  ;;  %v2054_v43 = vsub.f32 %v13448_v17, %v12343_v55  ;;  %v12357_v62 = vand.u32 4294901760, %v13449_v14  ;;  %v4363_v57 = vand.u32 4294901760, %v4362_v63  ;;  %v13450_v63 = vld [vmem:[#allocation81_spill] sm:$0xff]  ;;  %v13452_v32 = vld [vmem:[#allocation138_spill] sm:$0xff] }
 0x4b3   : > { %v4375_v9 = vand.u32 4294901760, %v4374_v12  ;;  %v2060_v1 = vsub.f32 %v10124_v34, %v12349_v33  ;;  %v2072_v27 = vsub.f32 %v10126_v59, %v12358_v11  ;;  %v5953_v52 = vpack.c.bf16 %v4357_v44, %v4345_v13  ;;  %v13451_v33 = vld [vmem:[#allocation43_spill] sm:$0xff] }
 0x4b4   : > { %v2043_v42 = vand.u32 4294901760, %v2042_v20  ;;  %v2055_v50 = vand.u32 4294901760, %v2054_v43  ;;  %v4368_v29 = vsub.f32 %v13449_v14, %v12357_v62  ;;  %v12355_v12 = vand.u32 4294901760, %v13450_v63  ;;  %v13541_v59 = vld [vmem:[#allocation155_spill] sm:$0xff] }
 0x4b5   : > { %v5955_v55 = vpack.c.bf16 %v4375_v9, %v4363_v57  ;;  %v2061_v23 = vand.u32 4294901760, %v2060_v1  ;;  %v2073_v45 = vand.u32 4294901760, %v2072_v27  ;;  %5954 = vmatpush1.bf16.msra.mxu1 %v5953_v52  ;;  %v12354_v34 = vand.u32 4294901760, %v13451_v33  ;;  %v13453_v9 = vld [vmem:[#allocation181_spill] sm:$0xff]  ;;  %v13456_v27 = vld [vmem:[#allocation116_spill] sm:$0xff] }
 0x4b6   : > { %v5557_v3 = vpack.c.bf16 %v2055_v50, %v2043_v42  ;;  %v4369_v17 = vand.u32 4294901760, %v4368_v29  ;;  %v12356_v56 = vand.u32 4294901760, %v13452_v32  ;;  %v4380_v44 = vsub.f32 %v13450_v63, %v12355_v12  ;;  %v13454_v29 = vld [vmem:[#allocation183_spill] sm:$0xff]  ;;  %v13459_v63 = vld [vmem:[#allocation48_spill] sm:$0xff] }
 0x4b7   : > { %5956 = vmatprep.subr.bf16.mxu1 %v5955_v55  ;;  %v5559_v13 = vpack.c.bf16 %v2073_v45, %v2061_v23  ;;  %v12359_v20 = vand.u32 4294901760, %v10131_v37  ;;  %v12360_v1 = vand.u32 4294901760, %v13453_v9  ;;  %v4386_v50 = vsub.f32 %v13451_v33, %v12354_v34  ;;  %v13455_v45 = vld [vmem:[#allocation184_spill] sm:$0xff] }
 0x4b8   : > { %5558 = vmatpush1.bf16.msra.mxu0 %v5557_v3  ;;  %v4398_v42 = vsub.f32 %v13452_v32, %v12356_v56  ;;  %v12366_v55 = vand.u32 4294901760, %v13454_v29  ;;  %v12370_v23 = vand.u32 4294901760, %v13455_v45  ;;  %v4381_v43 = vand.u32 4294901760, %v4380_v44 }
 0x4b9   : > { %5560 = vmatprep.subr.bf16.mxu0 %v5559_v13  ;;  %v2066_v57 = vsub.f32 %v10131_v37, %v12359_v20  ;;  %v2078_v3 = vsub.f32 %v13453_v9, %v12360_v1  ;;  %v12376_v52 = vand.u32 4294901760, %v13456_v27  ;;  %v4387_v34 = vand.u32 4294901760, %v4386_v50  ;;  %v13457_v50 = vld [vmem:[#allocation70_spill] sm:$0xff] }
 0x4ba   : > { %v4399_v12 = vand.u32 4294901760, %v4398_v42  ;;  %v2084_v56 = vsub.f32 %v13454_v29, %v12366_v55  ;;  %v2096_v13 = vsub.f32 %v13455_v45, %v12370_v23  ;;  %v5957_v44 = vpack.c.bf16 %v4381_v43, %v4369_v17  ;;  %v13458_v55 = vld [vmem:[#allocation117_spill] sm:$0xff] }
 0x4bb   : > { %v2067_v62 = vand.u32 4294901760, %v2066_v57  ;;  %v2079_v11 = vand.u32 4294901760, %v2078_v3  ;;  %v4392_v20 = vsub.f32 %v13456_v27, %v12376_v52  ;;  %v12373_v42 = vand.u32 4294901760, %v13457_v50  ;;  %v13460_v57 = vld [vmem:[#allocation186_spill] sm:$0xff] }
 0x4bc   : > { %v5959_v1 = vpack.c.bf16 %v4399_v12, %v4387_v34  ;;  %v2085_v9 = vand.u32 4294901760, %v2084_v56  ;;  %v2097_v37 = vand.u32 4294901760, %v2096_v13  ;;  %5958 = vmatpush1.bf16.msra.mxu1 %v5957_v44  ;;  %v12372_v29 = vand.u32 4294901760, %v13458_v55  ;;  %v13461_v34 = vld [vmem:[#allocation187_spill] sm:$0xff] }
 0x4bd   : > { %v5561_v32 = vpack.c.bf16 %v2079_v11, %v2067_v62  ;;  %v4393_v33 = vand.u32 4294901760, %v4392_v20  ;;  %v12371_v14 = vand.u32 4294901760, %v13459_v63  ;;  %v4404_v43 = vsub.f32 %v13457_v50, %v12373_v42 }
 0x4be   : > { %5960 = vmatprep.subr.bf16.mxu1 %v5959_v1  ;;  %v5563_v17 = vpack.c.bf16 %v2097_v37, %v2085_v9  ;;  %v12374_v3 = vand.u32 4294901760, %v13460_v57  ;;  %v12375_v56 = vand.u32 4294901760, %v13461_v34  ;;  %v4410_v11 = vsub.f32 %v13458_v55, %v12372_v29  ;;  %v13462_v1 = vld [vmem:[#allocation139_spill] sm:$0xff]  ;;  %v13465_v55 = vld [vmem:[#allocation56_spill] sm:$0xff] }
 0x4bf   : > { %5562 = vmatpush1.bf16.msra.mxu0 %v5561_v32  ;;  %v4422_v62 = vsub.f32 %v13459_v63, %v12371_v14  ;;  %v12380_v12 = vand.u32 4294901760, %v10171_v61  ;;  %v12391_v37 = vand.u32 4294901760, %v10173_v2  ;;  %v4405_v20 = vand.u32 4294901760, %v4404_v43 }
 0x4c0   : > { %5564 = vmatprep.subr.bf16.mxu0 %v5563_v17  ;;  %v2090_v9 = vsub.f32 %v13460_v57, %v12374_v3  ;;  %v2102_v32 = vsub.f32 %v13461_v34, %v12375_v56  ;;  %v12390_v13 = vand.u32 4294901760, %v13462_v1  ;;  %v4411_v44 = vand.u32 4294901760, %v4410_v11  ;;  %v13463_v11 = vld [vmem:[#allocation140_spill] sm:$0xff] }
 0x4c1   : > { %v4423_v23 = vand.u32 4294901760, %v4422_v62  ;;  %v2108_v14 = vsub.f32 %v10171_v61, %v12380_v12  ;;  %v2120_v17 = vsub.f32 %v10173_v2, %v12391_v37  ;;  %v5961_v43 = vpack.c.bf16 %v4405_v20, %v4393_v33  ;;  %v13464_v12 = vld [vmem:[#allocation142_spill] sm:$0xff] }
 0x4c2   : > { %v2091_v29 = vand.u32 4294901760, %v2090_v9  ;;  %v2103_v42 = vand.u32 4294901760, %v2102_v32  ;;  %v4416_v3 = vsub.f32 %v13462_v1, %v12390_v13  ;;  %v12389_v62 = vand.u32 4294901760, %v13463_v11 }
 0x4c3   : > { %v5963_v56 = vpack.c.bf16 %v4423_v23, %v4411_v44  ;;  %v2109_v52 = vand.u32 4294901760, %v2108_v14  ;;  %v2121_v34 = vand.u32 4294901760, %v2120_v17  ;;  %5962 = vmatpush1.bf16.msra.mxu1 %v5961_v43  ;;  %v12386_v61 = vand.u32 4294901760, %v13464_v12 }
 0x4c4   : > { %v5565_v57 = vpack.c.bf16 %v2103_v42, %v2091_v29  ;;  %v4417_v63 = vand.u32 4294901760, %v4416_v3  ;;  %v12385_v50 = vand.u32 4294901760, %v13465_v55  ;;  %v4428_v20 = vsub.f32 %v13463_v11, %v12389_v62 }
 0x4c5   : > { %5964 = vmatprep.subr.bf16.mxu1 %v5963_v56  ;;  %v5567_v33 = vpack.c.bf16 %v2121_v34, %v2109_v52  ;;  %v12387_v9 = vand.u32 4294901760, %v10175_v40  ;;  %v12388_v14 = vand.u32 4294901760, %v10180_v22  ;;  %v4434_v29 = vsub.f32 %v13464_v12, %v12386_v61  ;;  %v13466_v56 = vld [vmem:[#allocation190_spill] sm:$0xff] }
 0x4c6   : > { %5566 = vmatpush1.bf16.msra.mxu0 %v5565_v57  ;;  %v4446_v23 = vsub.f32 %v13465_v55, %v12385_v50  ;;  %v12394_v42 = vand.u32 4294901760, %v10184_v4  ;;  %v12403_v52 = vand.u32 4294901760, %v10187_v30  ;;  %v4429_v3 = vand.u32 4294901760, %v4428_v20 }
 0x4c7   : > { %5568 = vmatprep.subr.bf16.mxu0 %v5567_v33  ;;  %v2114_v34 = vsub.f32 %v10175_v40, %v12387_v9  ;;  %v2126_v57 = vsub.f32 %v10180_v22, %v12388_v14  ;;  %v12402_v32 = vand.u32 4294901760, %v13466_v56  ;;  %v4435_v44 = vand.u32 4294901760, %v4434_v29  ;;  %v13467_v29 = vld [vmem:[#allocation191_spill] sm:$0xff] }
 0x4c8   : > { %v4447_v17 = vand.u32 4294901760, %v4446_v23  ;;  %v2132_v43 = vsub.f32 %v10184_v4, %v12394_v42  ;;  %v2144_v33 = vsub.f32 %v10187_v30, %v12403_v52  ;;  %v5965_v20 = vpack.c.bf16 %v4429_v3, %v4417_v63 }
 0x4c9   : > { %v2115_v50 = vand.u32 4294901760, %v2114_v34  ;;  %v2127_v61 = vand.u32 4294901760, %v2126_v57  ;;  %v4440_v9 = vsub.f32 %v13466_v56, %v12402_v32  ;;  %v12399_v23 = vand.u32 4294901760, %v13467_v29 }
 0x4ca   : > { %v5967_v14 = vpack.c.bf16 %v4447_v17, %v4435_v44  ;;  %v2133_v62 = vand.u32 4294901760, %v2132_v43  ;;  %v2145_v13 = vand.u32 4294901760, %v2144_v33  ;;  %5966 = vmatpush1.bf16.msra.mxu1 %v5965_v20  ;;  %v12398_v42 = vand.u32 4294901760, %v10217_v31  ;;  %v13469_v17 = vld [vmem:[#allocation195_spill] sm:$0xff] }
 0x4cb   : > { %v5569_v37 = vpack.c.bf16 %v2127_v61, %v2115_v50  ;;  %v4441_v22 = vand.u32 4294901760, %v4440_v9  ;;  %v12397_v4 = vand.u32 4294901760, %v10219_v15  ;;  %v4452_v3 = vsub.f32 %v13467_v29, %v12399_v23 }
 0x4cc   : > { %5968 = vmatprep.subr.bf16.mxu1 %v5967_v14  ;;  %v5571_v63 = vpack.c.bf16 %v2145_v13, %v2133_v62  ;;  %v12400_v34 = vand.u32 4294901760, %v10223_v46  ;;  %v12401_v57 = vand.u32 4294901760, %v10225_v60  ;;  %v4458_v61 = vsub.f32 %v10217_v31, %v12398_v42  ;;  %v13468_v13 = vld [vmem:[#allocation193_spill] sm:$0xff] }
 0x4cd   : > { %5570 = vmatpush1.bf16.msra.mxu0 %v5569_v37  ;;  %v4470_v50 = vsub.f32 %v10219_v15, %v12397_v4  ;;  %v12408_v9 = vand.u32 4294901760, %v10229_v54  ;;  %v12414_v62 = vand.u32 4294901760, %v13468_v13  ;;  %v4453_v14 = vand.u32 4294901760, %v4452_v3 }
 0x4ce   : > { %5572 = vmatprep.subr.bf16.mxu0 %v5571_v63  ;;  %v2138_v44 = vsub.f32 %v10223_v46, %v12400_v34  ;;  %v2150_v37 = vsub.f32 %v10225_v60, %v12401_v57  ;;  %v12411_v43 = vand.u32 4294901760, %v13469_v17  ;;  %v4459_v33 = vand.u32 4294901760, %v4458_v61  ;;  %v13470_v61 = vld [vmem:[#allocation196_spill] sm:$0xff] }
 0x4cf   : > { %v4471_v20 = vand.u32 4294901760, %v4470_v50  ;;  %v2156_v4 = vsub.f32 %v10229_v54, %v12408_v9  ;;  %v2168_v63 = vsub.f32 %v13468_v13, %v12414_v62  ;;  %v5969_v3 = vpack.c.bf16 %v4453_v14, %v4441_v22  ;;  %v13471_v14 = vld [vmem:[#allocation71_spill] sm:$0xff] }
 0x4d0   : > { %v2139_v42 = vand.u32 4294901760, %v2138_v44  ;;  %v2151_v23 = vand.u32 4294901760, %v2150_v37  ;;  %v4464_v34 = vsub.f32 %v13469_v17, %v12411_v43  ;;  %v12413_v50 = vand.u32 4294901760, %v13470_v61  ;;  %v13472_v37 = vld [vmem:[#allocation198_spill] sm:$0xff] }
 0x4d1   : > { %v5971_v57 = vpack.c.bf16 %v4471_v20, %v4459_v33  ;;  %v2157_v32 = vand.u32 4294901760, %v2156_v4  ;;  %v2169_v52 = vand.u32 4294901760, %v2168_v63  ;;  %5970 = vmatpush1.bf16.msra.mxu1 %v5969_v3  ;;  %v12412_v9 = vand.u32 4294901760, %v10267_v10  ;;  %v13473_v4 = vld [vmem:[#allocation41_spill] sm:$0xff] }
 0x4d2   : > { %v5573_v60 = vpack.c.bf16 %v2151_v23, %v2139_v42  ;;  %v4465_v46 = vand.u32 4294901760, %v4464_v34  ;;  %v4476_v22 = vsub.f32 %v13470_v61, %v12413_v50  ;;  %v12415_v44 = vand.u32 4294901760, %v13471_v14  ;;  %v13474_v33 = vld [vmem:[#allocation57_spill] sm:$0xff]  ;;  %v13475_v23 = vld [vmem:[#allocation199_spill] sm:$0xff] }
 0x4d3   : > { %5972 = vmatprep.subr.bf16.mxu1 %v5971_v57  ;;  %v5575_v54 = vpack.c.bf16 %v2169_v52, %v2157_v32  ;;  %v12417_v43 = vand.u32 4294901760, %v13472_v37  ;;  %v5975_v20 = vpack.c.bf16 %v13474_v33, %v13473_v4  ;;  %v2162_v42 = vsub.f32 %v10267_v10, %v12412_v9  ;;  %v13476_v50 = vld [vmem:[#allocation201_spill] sm:$0xff] }
 0x4d4   : > { %5574 = vmatpush1.bf16.msra.mxu0 %v5573_v60  ;;  %v12416_v34 = vand.u32 4294901760, %v13475_v23  ;;  %v4477_v52 = vand.u32 4294901760, %v4476_v22  ;;  %v2174_v32 = vsub.f32 %v13471_v14, %v12415_v44  ;;  %v12421_v60 = vand.u32 4294901760, %v10309_v36 }
 0x4d5   : > { %5576 = vmatprep.subr.bf16.mxu0 %v5575_v54  ;;  %v2180_v57 = vsub.f32 %v13472_v37, %v12417_v43  ;;  %v2163_v63 = vand.u32 4294901760, %v2162_v42  ;;  %v12422_v9 = vand.u32 4294901760, %v10311_v16  ;;  %v12425_v54 = vand.u32 4294901760, %v13476_v50  ;;  %v13477_v43 = vld [vmem:[#allocation203_spill] sm:$0xff] }
 0x4d6   : > { %v2192_v3 = vsub.f32 %v13475_v23, %v12416_v34  ;;  %v5973_v22 = vpack.c.bf16 %v4477_v52, %v4465_v46  ;;  %v2175_v62 = vand.u32 4294901760, %v2174_v32  ;;  %v2186_v44 = vsub.f32 %v10309_v36, %v12421_v60  ;;  %v13478_v46 = vld [vmem:[#allocation69_spill] sm:$0xff]  ;;  %v13479_v52 = vld [vmem:[#allocation50_spill] sm:$0xff] }
 0x4d7   : > { %v2181_v33 = vand.u32 4294901760, %v2180_v57  ;;  %v2198_v42 = vsub.f32 %v10311_v16, %v12422_v9  ;;  %v2204_v34 = vsub.f32 %v13476_v50, %v12425_v54  ;;  %v12427_v23 = vand.u32 4294901760, %v13477_v43  ;;  %v13480_v50 = vld [vmem:[#allocation38_spill] sm:$0xff] }
 0x4d8   : > { %v2193_v4 = vand.u32 4294901760, %v2192_v3  ;;  %5974 = vmatpush1.bf16.msra.mxu1 %v5973_v22  ;;  %v5577_v37 = vpack.c.bf16 %v2175_v62, %v2163_v63  ;;  %v5977_v32 = vpack.c.bf16 %v13479_v52, %v13478_v46  ;;  %v2187_v57 = vand.u32 4294901760, %v2186_v44  ;;  %v13481_v62 = vld [vmem:[#allocation204_spill] sm:$0xff]  ;;  %v13482_v52 = vld [vmem:[#allocation99_spill] sm:$0xff]  ;;  %v13483_v44 = vld [vmem:[#allocation105_spill] sm:$0xff] }
 0x4d9   : > { %5976 = vmatprep.subr.bf16.mxu1 %v5975_v20  ;;  %v2199_v60 = vand.u32 4294901760, %v2198_v42  ;;  %v2205_v3 = vand.u32 4294901760, %v2204_v34  ;;  %v2216_v9 = vsub.f32 %v13477_v43, %v12427_v23  ;;  %v12428_v16 = vand.u32 4294901760, %v10347_v18  ;;  %v13485_v42 = vld [vmem:[#allocation110_spill] sm:$0xff] }
 0x4da   : > { %v5579_v14 = vpack.c.bf16 %v2193_v4, %v2181_v33  ;;  %5578 = vmatpush1.bf16.msra.mxu0 %v5577_v37  ;;  %v12429_v54 = vand.u32 4294901760, %v10349_v0  ;;  %v12430_v22 = vand.u32 4294901760, %v13480_v50  ;;  %v13484_v4 = vld [vmem:[#allocation106_spill] sm:$0xff]  ;;  %v12432_v63 = vand.u32 4294901760, %v10389_v25 }
 0x4db   : > { %4482 = vmatmul.mubr.f32.vlgmr.msra.gmra.mrb[0].mxu1 %v13482_v52  ;;  %v5979_v33 = vpack.c.bf16 %v13484_v4, %v13483_v44  ;;  %v5581_v20 = vpack.c.bf16 %v2199_v60, %v2187_v57  ;;  %v2217_v34 = vand.u32 4294901760, %v2216_v9  ;;  %v2210_v37 = vsub.f32 %v10347_v18, %v12428_v16  ;;  %v13486_v9 = vld [vmem:[#allocation109_spill] sm:$0xff] }
 0x4dc   : > { %5580 = vmatprep.subr.bf16.mxu0 %v5579_v14  ;;  %5978 = vmatpush1.bf16.msra.mxu1 %v5977_v32  ;;  %v2222_v23 = vsub.f32 %v10349_v0, %v12429_v54  ;;  %v2228_v14 = vsub.f32 %v13480_v50, %v12430_v22  ;;  %v13487_v32 = vld [vmem:[#allocation113_spill] sm:$0xff]  ;;  %v13488_v52 = vand.u32 4294901760, %v13481_v62  ;;  %v12436_v16 = vand.u32 4294901760, %v10391_v19 }
 0x4dd   : > { %4682 = vmatprep.mubr.f32.mxu1 %v13485_v42  ;;  %5980 = vmatprep.subr.bf16.mxu1 %v5979_v33  ;;  %v5583_v60 = vpack.c.bf16 %v2217_v34, %v2205_v3  ;;  %v5981_v57 = vpack.c.bf16 %v13487_v32, %v13486_v9  ;;  %v2211_v44 = vand.u32 4294901760, %v2210_v37  ;;  %v2234_v22 = vsub.f32 %v10389_v25, %v12432_v63  ;;  %v13489_v33 = vld [vmem:[#allocation35_spill] sm:$0xff]  ;;  %v13490_v3 = vld [vmem:[#allocation66_spill] sm:$0xff]  ;;  %v13491_v37 = vld [vmem:[#allocation89_spill] sm:$0xff] }
 0x4de   : > { %v2240_v4 = vsub.f32 %v13481_v62, %v13488_v52  ;;  %5582 = vmatpush1.bf16.msra.mxu0 %v5581_v20  ;;  %v2223_v54 = vand.u32 4294901760, %v2222_v23  ;;  %v2229_v46 = vand.u32 4294901760, %v2228_v14  ;;  %v5983_v34 = vpack.c.bf16 %v13490_v3, %v13489_v33  ;;  %v13492_v14 = vld [vmem:[#allocation130_spill] sm:$0xff]  ;;  %v13494_v63 = vld [vmem:[#allocation63_spill] sm:$0xff]  ;;  %v13496_v33 = vld [vmem:[#allocation145_spill] sm:$0xff] }
 0x4df   : > { %5584 = vmatprep.subr.bf16.mxu0 %v5583_v60  ;;  %v2246_v32 = vsub.f32 %v10391_v19, %v12436_v16  ;;  %v2235_v9 = vand.u32 4294901760, %v2234_v22  ;;  %v5985_v62 = vpack.c.bf16 %v13492_v14, %v13491_v37  ;;  %v13493_v60 = vld [vmem:[#allocation23_spill] sm:$0xff]  ;;  %v13497_v22 = vld [vmem:[#allocation52_spill] sm:$0xff]  ;;  %v13504_v16 = vld [vmem:[#allocation150_spill] sm:$0xff] }
 0x4e0   : > { %v2241_v42 = vand.u32 4294901760, %v2240_v4  ;;  %5982 = vmatpush1.bf16.msra.mxu1 %v5981_v57  ;;  %v5585_v52 = vpack.c.bf16 %v2223_v54, %v2211_v44  ;;  %v5987_v25 = vpack.c.bf16 %v13494_v63, %v13493_v60  ;;  %v13495_v4 = vld [vmem:[#allocation144_spill] sm:$0xff]  ;;  %v5989_v54 = vpack.c.bf16 %v13403_v5, %v13400_v51  ;;  %v13527_v14 = vld [vmem:[#allocation122_spill] sm:$0xff]  ;;  %v13537_v37 = vld [vmem:[#allocation45_spill] sm:$0xff] }
 0x4e1   : > { %5984 = vmatprep.subr.bf16.mxu1 %v5983_v34  ;;  %v2247_v23 = vand.u32 4294901760, %v2246_v32  ;;  %v5591_v50 = vpack.c.bf16 %v13496_v33, %v13495_v4  ;;  %v13500_v32 = vld [vmem:[#allocation54_spill] sm:$0xff]  ;;  %v13501_v34 = vld [vmem:[#allocation147_spill] sm:$0xff]  ;;  %v13520_v4 = vld [vmem:[#allocation117_spill] sm:$0xff] }
 0x4e2   : > { %v5587_v20 = vpack.c.bf16 %v2241_v42, %v2229_v46  ;;  %5586 = vmatpush1.bf16.msra.mxu0 %v5585_v52  ;;  %v13498_v46 = vld [vmem:[#allocation80_spill] sm:$0xff]  ;;  %v13499_v42 = vld [vmem:[#allocation90_spill] sm:$0xff]  ;;  %v5595_v52 = vpack.c.bf16 %v9966_v48, %v13501_v34 }
 0x4e3   : > { %v5589_v3 = vpack.c.bf16 %v2247_v23, %v2235_v9  ;;  %v5991_v44 = vpack.c.bf16 %v13498_v46, %v13497_v22  ;;  %v5593_v57 = vpack.c.bf16 %v13500_v32, %v13499_v42  ;;  %v5993_v9 = vpack.c.bf16 %v13410_v8, %v13408_v21  ;;  %v13503_v23 = vld [vmem:[#allocation149_spill] sm:$0xff]  ;;  %v13512_v8 = vld [vmem:[#allocation127_spill] sm:$0xff]  ;;  %v13521_v21 = vld [vmem:[#allocation48_spill] sm:$0xff] }
 0x4e4   : > { %5588 = vmatprep.subr.bf16.mxu0 %v5587_v20  ;;  %5986 = vmatpush1.bf16.msra.mxu1 %v5985_v62  ;;  %v13502_v62 = vld [vmem:[#allocation77_spill] sm:$0xff]  ;;  %v5597_v5 = vpack.c.bf16 %v13504_v16, %v13503_v23  ;;  %v5997_v46 = vpack.c.bf16 %v13414_v47, %v13413_v26  ;;  %v13518_v47 = vld [vmem:[#allocation98_spill] sm:$0xff]  ;;  %v13524_v32 = vld [vmem:[#allocation27_spill] sm:$0xff] }
 0x4e5   : > { %5988 = vmatprep.subr.bf16.mxu1 %v5987_v25  ;;  %v5995_v20 = vpack.c.bf16 %v13502_v62, %v13411_v28  ;;  %v13505_v25 = vld [vmem:[#allocation151_spill] sm:$0xff]  ;;  %v13519_v26 = vld [vmem:[#allocation70_spill] sm:$0xff]  ;;  %v13526_v33 = vld [vmem:[#allocation188_spill] sm:$0xff] }
 0x4e6   : > { %5590 = vmatpush1.bf16.msra.mxu0 %v5589_v3  ;;  %v5599_v51 = vpack.c.bf16 %v9995_v6, %v13505_v25  ;;  %v13525_v6 = vld [vmem:[#allocation36_spill] sm:$0xff]  ;;  %v13531_v63 = vld [vmem:[#allocation198_spill] sm:$0xff]  ;;  %v13532_v62 = vld [vmem:[#allocation199_spill] sm:$0xff] }
 0x4e7   : > { %5592 = vmatprep.subr.bf16.mxu0 %v5591_v50  ;;  %v13529_v42 = vld [vmem:[#allocation192_spill] sm:$0xff]  ;;  %v13534_v3 = vld [vmem:[#allocation201_spill] sm:$0xff]  ;;  %v13543_v22 = vld [vmem:[#allocation158_spill] sm:$0xff] }
 0x4e8   : > { %5990 = vmatpush1.bf16.msra.mxu1 %v5989_v54  ;;  %v13533_v60 = vld [vmem:[#allocation200_spill] sm:$0xff]  ;;  %v13539_v50 = vld [vmem:[#allocation73_spill] sm:$0xff] }
 0x4e9   : > { %2252 = vmatmul.mubr.f32.vlgmr.msra.gmra.mrb[0].mxu0 %v13512_v8  ;;  %5992 = vmatprep.subr.bf16.mxu1 %v5991_v44  ;;  %v13522_v8 = vld [vmem:[#allocation186_spill] sm:$0xff]  ;;  %v13523_v44 = vld [vmem:[#allocation187_spill] sm:$0xff]  ;;  %v13536_v34 = vld [vmem:[#allocation204_spill] sm:$0xff] }
 0x4ea   : > { %5594 = vmatpush1.bf16.msra.mxu0 %v5593_v57  ;;  %2452 = vmatprep.mubr.f32.mxu0 %v13518_v47  ;;  %v13528_v47 = vld [vmem:[#allocation49_spill] sm:$0xff]  ;;  %v13535_v57 = vld [vmem:[#allocation38_spill] sm:$0xff]  ;;  %v13538_v28 = vld [vmem:[#allocation32_spill] sm:$0xff] }
 0x4eb   : > { %5596 = vmatprep.subr.bf16.mxu0 %v5595_v52  ;;  %v5999_v45 = vpack.c.bf16 %v13538_v28, %v13537_v37  ;;  %v13542_v25 = vld [vmem:[#allocation157_spill] sm:$0xff]  ;;  %v13547_v48 = vld [vmem:[#allocation124_spill] sm:$0xff] }
 0x4ec   : > { %5994 = vmatpush1.bf16.msra.mxu1 %v5993_v9  ;;  %v13530_v9 = vld [vmem:[#allocation71_spill] sm:$0xff]  ;;  %v5603_v23 = vpack.c.bf16 %v13543_v22, %v13542_v25  ;;  %v13548_v28 = vld [vmem:[#allocation160_spill] sm:$0xff]  ;;  %v13549_v37 = vld [vmem:[#allocation161_spill] sm:$0xff] }
 0x4ed   : > { %5996 = vmatprep.subr.bf16.mxu1 %v5995_v20  ;;  %v13544_v20 = vld [vmem:[#allocation108_spill] sm:$0xff]  ;;  %v5605_v54 = vpack.c.bf16 %v13549_v37, %v13548_v28  ;;  %v13555_v25 = vld [vmem:[#allocation93_spill] sm:$0xff]  ;;  %v13561_v37 = vld [vmem:[#allocation82_spill] sm:$0xff] }
 0x4ee   : > { %5598 = vmatpush1.bf16.msra.mxu0 %v5597_v5  ;;  %v13540_v5 = vld [vmem:[#allocation154_spill] sm:$0xff]  ;;  %v6001_v16 = vpack.c.bf16 %v13545_v39, %v13544_v20  ;;  %v13557_v20 = vld [vmem:[#allocation167_spill] sm:$0xff] }
 0x4ef   : > { %5600 = vmatprep.subr.bf16.mxu0 %v5599_v51  ;;  %v5601_v52 = vpack.c.bf16 %v13541_v59, %v13540_v5  ;;  %v13546_v51 = vld [vmem:[#allocation111_spill] sm:$0xff]  ;;  %v13553_v5 = vld [vmem:[#allocation125_spill] sm:$0xff] }
 0x4f0   : > { %5998 = vmatpush1.bf16.msra.mxu1 %v5997_v46  ;;  %v6003_v35 = vpack.c.bf16 %v13547_v48, %v13546_v51  ;;  %v13550_v46 = vld [vmem:[#allocation163_spill] sm:$0xff]  ;;  %v13559_v51 = vld [vmem:[#allocation170_spill] sm:$0xff] }
 0x4f1   : > { %6000 = vmatprep.subr.bf16.mxu1 %v5999_v45  ;;  %v5607_v59 = vpack.c.bf16 %v13551_v38, %v13550_v46  ;;  %v13552_v45 = vld [vmem:[#allocation84_spill] sm:$0xff]  ;;  %v13562_v38 = vld [vmem:[#allocation133_spill] sm:$0xff] }
 0x4f2   : > { %5602 = vmatpush1.bf16.msra.mxu0 %v5601_v52  ;;  %v6005_v22 = vpack.c.bf16 %v13553_v5, %v13552_v45  ;;  %v13554_v52 = vld [vmem:[#allocation95_spill] sm:$0xff]  ;;  %v13565_v5 = vld [vmem:[#allocation173_spill] sm:$0xff]  ;;  %v13566_v45 = vld [vmem:[#allocation118_spill] sm:$0xff] }
 0x4f3   : > { %5604 = vmatprep.subr.bf16.mxu0 %v5603_v23  ;;  %v6007_v39 = vpack.c.bf16 %v13555_v25, %v13554_v52  ;;  %v13556_v23 = vld [vmem:[#allocation166_spill] sm:$0xff]  ;;  %v5615_v25 = vpack.c.bf16 %v13567_v49, %v13566_v45  ;;  %v13569_v52 = vld [vmem:[#allocation13_spill] sm:$0xff]  ;;  %v13577_v49 = vand.u32 4294901760, %v13523_v44 }
 0x4f4   : > { %6002 = vmatpush1.bf16.msra.mxu1 %v6001_v16  ;;  %v5609_v48 = vpack.c.bf16 %v13557_v20, %v13556_v23  ;;  %v13558_v16 = vld [vmem:[#allocation169_spill] sm:$0xff]  ;;  %v13570_v23 = vand.u32 4294901760, %v13456_v27 }
 0x4f5   : > { %6004 = vmatprep.subr.bf16.mxu1 %v6003_v35  ;;  %v5611_v7 = vpack.c.bf16 %v13559_v51, %v13558_v16  ;;  %v13560_v35 = vld [vmem:[#allocation103_spill] sm:$0xff] }
 0x4f6   : > { %5606 = vmatpush1.bf16.msra.mxu0 %v5605_v54  ;;  %v6009_v28 = vpack.c.bf16 %v13561_v37, %v13560_v35  ;;  %v13563_v54 = vld [vmem:[#allocation134_spill] sm:$0xff]  ;;  %v13573_v37 = vand.u32 4294901760, %v13520_v4 }
 0x4f7   : > { %5608 = vmatprep.subr.bf16.mxu0 %v5607_v59  ;;  %v6011_v46 = vpack.c.bf16 %v13563_v54, %v13562_v38  ;;  %v5613_v59 = vpack.c.bf16 %v13565_v5, %v13564_v41  ;;  %v13574_v54 = vand.u32 4294901760, %v13521_v21  ;;  %v13576_v5 = vand.u32 4294901760, %v13522_v8 }
 0x4f8   : > { %6006 = vmatpush1.bf16.msra.mxu1 %v6005_v22  ;;  %v13568_v22 = vld [vmem:[#allocation94_spill] sm:$0xff] }
 0x4f9   : > { %6008 = vmatprep.subr.bf16.mxu1 %v6007_v39  ;;  %v6013_v20 = vpack.c.bf16 %v13569_v52, %v13568_v22  ;;  %v13571_v39 = vand.u32 4294901760, %v13519_v26  ;;  %v10983_v38 = vpack.c.bf16 %v13574_v54, %v13573_v37  ;;  %v13579_v52 = vand.u32 4294901760, %v13524_v32 }
 0x4fa   : > { %5610 = vmatpush1.bf16.msra.mxu0 %v5609_v48  ;;  %v10989_v48 = vpack.c.bf16 %v13577_v49, %v13576_v5  ;;  %v13580_v22 = vand.u32 4294901760, %v10173_v2  ;;  %v13585_v37 = vand.u32 4294901760, %v13464_v12  ;;  %v13586_v54 = vand.u32 4294901760, %v13465_v55 }
 0x4fb   : > { %v10977_v51 = vpack.c.bf16 %v13571_v39, %v13570_v23  ;;  %13575 = vst [vmem:[#allocation14_spill] sm:$0xff] %v10983_v38  ;;  %5612 = vmatprep.subr.bf16.mxu0 %v5611_v7  ;;  %v13582_v23 = vand.u32 4294901760, %v13462_v1  ;;  %v13583_v39 = vand.u32 4294901760, %v13463_v11  ;;  %v13588_v49 = vand.u32 4294901760, %v10175_v40 }
 0x4fc   : > { %13578 = vst [vmem:[#allocation20_spill] sm:$0xff] %v10989_v48  ;;  %v10995_v45 = vpack.c.bf16 %v13580_v22, %v13579_v52  ;;  %v11007_v38 = vpack.c.bf16 %v13586_v54, %v13585_v37  ;;  %v13589_v7 = vand.u32 4294901760, %v13525_v6  ;;  %6010 = vmatpush1.bf16.msra.mxu1 %v6009_v28  ;;  %v13591_v52 = vand.u32 4294901760, %v13526_v33  ;;  %v13649_v48 = vld [vmem:[#allocation18_spill] sm:$0xff] }
 0x4fd   : > { %13572 = vst [vmem:[#allocation112_spill] sm:$0xff] %v10977_v51  ;;  %v11001_v51 = vpack.c.bf16 %v13583_v39, %v13582_v23  ;;  %v13592_v22 = vand.u32 4294901760, %v10187_v30  ;;  %v13594_v23 = vand.u32 4294901760, %v13466_v56  ;;  %v13595_v39 = vand.u32 4294901760, %v13467_v29  ;;  %6012 = vmatprep.subr.bf16.mxu1 %v6011_v46 }
 0x4fe   : > { %13581 = vst [vmem:[#allocation174_spill] sm:$0xff] %v10995_v45  ;;  %13587 = vst [vmem:[#allocation139_spill] sm:$0xff] %v11007_v38  ;;  %v11013_v5 = vpack.c.bf16 %v13589_v7, %v13588_v49  ;;  %v13597_v37 = vand.u32 4294901760, %v10217_v31  ;;  %v13598_v54 = vand.u32 4294901760, %v10219_v15  ;;  %v13600_v28 = vand.u32 4294901760, %v13527_v14  ;;  %5614 = vmatpush1.bf16.msra.mxu0 %v5613_v59 }
 0x4ff   : > { %13584 = vst [vmem:[#allocation116_spill] sm:$0xff] %v11001_v51  ;;  %v11019_v45 = vpack.c.bf16 %v13592_v22, %v13591_v52  ;;  %v11025_v51 = vpack.c.bf16 %v13595_v39, %v13594_v23  ;;  %v13601_v49 = vand.u32 4294901760, %v13528_v47  ;;  %v13603_v52 = vand.u32 4294901760, %v13529_v42  ;;  %5616 = vmatprep.subr.bf16.mxu0 %v5615_v25  ;;  %v13636_v25 = vld [vmem:[#allocation137_spill] sm:$0xff] }
 0x500   : > { %13590 = vst [vmem:[#allocation140_spill] sm:$0xff] %v11013_v5  ;;  %v11031_v38 = vpack.c.bf16 %v13598_v54, %v13597_v37  ;;  %v13604_v22 = vand.u32 4294901760, %v13468_v13  ;;  %v13606_v23 = vand.u32 4294901760, %v13469_v17  ;;  %v13607_v39 = vand.u32 4294901760, %v13470_v61  ;;  %6014 = vmatpush1.bf16.msra.mxu1 %v6013_v20  ;;  %v13642_v20 = vld [vmem:[#allocation180_spill] sm:$0xff] }
 0x501   : > { %13593 = vst [vmem:[#allocation142_spill] sm:$0xff] %v11019_v45  ;;  %13596 = vst [vmem:[#allocation56_spill] sm:$0xff] %v11025_v51  ;;  %v11037_v7 = vpack.c.bf16 %v13601_v49, %v13600_v28  ;;  %v13609_v37 = vand.u32 4294901760, %v10267_v10  ;;  %v13610_v54 = vand.u32 4294901760, %v13530_v9  ;;  %v13612_v46 = vand.u32 4294901760, %v13531_v63 }
 0x502   : > { %13599 = vst [vmem:[#allocation190_spill] sm:$0xff] %v11031_v38  ;;  %v11043_v45 = vpack.c.bf16 %v13604_v22, %v13603_v52  ;;  %v11049_v51 = vpack.c.bf16 %v13607_v39, %v13606_v23  ;;  %v13613_v28 = vand.u32 4294901760, %v13532_v62  ;;  %v13615_v52 = vand.u32 4294901760, %v10309_v36 }
 0x503   : > { %13602 = vst [vmem:[#allocation191_spill] sm:$0xff] %v11037_v7  ;;  %v11055_v38 = vpack.c.bf16 %v13610_v54, %v13609_v37  ;;  %v13616_v22 = vand.u32 4294901760, %v13533_v60  ;;  %v13618_v23 = vand.u32 4294901760, %v13534_v3  ;;  %v13619_v39 = vand.u32 4294901760, %v13477_v43  ;;  %v13646_v7 = vld [vmem:[#allocation86_spill] sm:$0xff] }
 0x504   : > { %13605 = vst [vmem:[#allocation193_spill] sm:$0xff] %v11043_v45  ;;  %13608 = vst [vmem:[#allocation195_spill] sm:$0xff] %v11049_v51  ;;  %v11061_v49 = vpack.c.bf16 %v13613_v28, %v13612_v46  ;;  %v13621_v37 = vand.u32 4294901760, %v10347_v18  ;;  %v13622_v54 = vand.u32 4294901760, %v10349_v0  ;;  %v13624_v59 = vand.u32 4294901760, %v13535_v57 }
 0x505   : > { %13611 = vst [vmem:[#allocation196_spill] sm:$0xff] %v11055_v38  ;;  %v11067_v45 = vpack.c.bf16 %v13616_v22, %v13615_v52  ;;  %v11073_v51 = vpack.c.bf16 %v13619_v39, %v13618_v23  ;;  %v13625_v46 = vand.u32 4294901760, %v13536_v34  ;;  %v13627_v52 = vand.u32 4294901760, %v13539_v50  ;;  %v13631_v39 = vld [vmem:[#allocation123_spill] sm:$0xff] }
 0x506   : > { %13614 = vst [vmem:[#allocation203_spill] sm:$0xff] %v11061_v49  ;;  %v11079_v38 = vpack.c.bf16 %v13622_v54, %v13621_v37  ;;  %v13628_v22 = vand.u32 4294901760, %v10391_v19  ;;  %v13630_v23 = vpack.c.bf16 %v13439_v53, %v13438_v24  ;;  %v13632_v37 = vpack.c.bf16 %v13440_v58, %v13631_v39  ;;  %v13633_v54 = vld [vmem:[#allocation177_spill] sm:$0xff] }
 0x507   : > { %13617 = vst [vmem:[#allocation70_spill] sm:$0xff] %v11067_v45  ;;  %13620 = vst [vmem:[#allocation117_spill] sm:$0xff] %v11073_v51  ;;  %v11085_v28 = vpack.c.bf16 %v13625_v46, %v13624_v59  ;;  %v13637_v46 = vld [vmem:[#allocation136_spill] sm:$0xff]  ;;  %v13639_v51 = vld [vmem:[#allocation21_spill] sm:$0xff] }
 0x508   : > { %13623 = vst [vmem:[#allocation48_spill] sm:$0xff] %v11079_v38  ;;  %v11091_v45 = vpack.c.bf16 %v13628_v22, %v13627_v52  ;;  %6016 = vmatprep.subr.bf16.mxu1 %v13630_v23  ;;  %5618 = vmatpush1.bf16.msra.mxu0 %v13632_v37  ;;  %v13634_v38 = vld [vmem:[#allocation176_spill] sm:$0xff]  ;;  %v13640_v52 = vld [vmem:[#allocation19_spill] sm:$0xff]  ;;  %v13648_v37 = vld [vmem:[#allocation81_spill] sm:$0xff] }
 0x509   : > { %13626 = vst [vmem:[#allocation186_spill] sm:$0xff] %v11085_v28  ;;  %v13635_v59 = vpack.c.bf16 %v13633_v54, %v13634_v38  ;;  %v13638_v28 = vpack.c.bf16 %v13636_v25, %v13637_v46  ;;  %v13641_v22 = vpack.c.bf16 %v13639_v51, %v13640_v52  ;;  %v13645_v23 = vld [vmem:[#allocation100_spill] sm:$0xff]  ;;  %v13650_v54 = vpack.c.bf16 %v13648_v37, %v13649_v48  ;;  %v13652_v38 = vld [vmem:[#allocation43_spill] sm:$0xff] }
 0x50a   : > { %13629 = vst [vmem:[#allocation187_spill] sm:$0xff] %v11091_v45  ;;  %v13643_v45 = vld [vmem:[#allocation179_spill] sm:$0xff]  ;;  %v13647_v5 = vpack.c.bf16 %v13645_v23, %v13646_v7 }
 0x50b   : > { %5620 = vmatprep.subr.bf16.mxu0 %v13635_v59  ;;  %6018 = vmatpush1.bf16.msra.mxu1 %v13638_v28  ;;  %v13644_v49 = vpack.c.bf16 %v13642_v20, %v13643_v45  ;;  %v13651_v59 = vld [vmem:[#allocation138_spill] sm:$0xff]  ;;  %v13654_v28 = vld [vmem:[#allocation181_spill] sm:$0xff]  ;;  %v13655_v46 = vld [vmem:[#allocation39_spill] sm:$0xff] }
 0x50c   : > { %6020 = vmatprep.subr.bf16.mxu1 %v13641_v22  ;;  %v13653_v25 = vpack.c.bf16 %v13651_v59, %v13652_v38  ;;  %v13656_v51 = vpack.c.bf16 %v13654_v28, %v13655_v46  ;;  %v13657_v22 = vld [vmem:[#allocation184_spill] sm:$0xff]  ;;  %v13658_v52 = vld [vmem:[#allocation183_spill] sm:$0xff] }
 0x50d   : > { %5622 = vmatpush1.bf16.msra.mxu0 %v13644_v49  ;;  %v13659_v20 = vpack.c.bf16 %v13657_v22, %v13658_v52  ;;  %v13660_v49 = vpack.c.bf16 %v13519_v26, %v13456_v27  ;;  %v13665_v26 = vpack.c.bf16 %v13465_v55, %v13464_v12  ;;  %v13669_v27 = vpack.c.bf16 %v10219_v15, %v10217_v31  ;;  %v13676_v15 = vld [vmem:[#allocation64_spill] sm:$0xff] }
 0x50e   : > { %5624 = vmatprep.subr.bf16.mxu0 %v13647_v5  ;;  %v13661_v5 = vpack.c.bf16 %v13521_v21, %v13520_v4  ;;  %v13666_v21 = vpack.c.bf16 %v13525_v6, %v10175_v40  ;;  %v13670_v55 = vpack.c.bf16 %v13528_v47, %v13527_v14  ;;  %v13671_v6 = vpack.c.bf16 %v13468_v13, %v13529_v42  ;;  %v13673_v40 = vld [vmem:[#allocation87_spill] sm:$0xff]  ;;  %v13677_v47 = vld [vmem:[#allocation128_spill] sm:$0xff]  ;;  %v13695_v42 = vld [vmem:[#allocation98_spill] sm:$0xff] }
 0x50f   : > { %6022 = vmatpush1.bf16.msra.mxu1 %v13650_v54  ;;  %v13662_v54 = vpack.c.bf16 %v13523_v44, %v13522_v8  ;;  %v13667_v8 = vpack.c.bf16 %v10187_v30, %v13526_v33  ;;  %v13672_v30 = vpack.c.bf16 %v13470_v61, %v13469_v17  ;;  %v13674_v12 = vpack.c.bf16 %v13530_v9, %v10267_v10  ;;  %v13683_v13 = vld [vmem:[#allocation55_spill] sm:$0xff]  ;;  %v13684_v17 = vld [vmem:[#allocation114_spill] sm:$0xff]  ;;  %v13692_v4 = vld [vmem:[#allocation40_spill] sm:$0xff] }
 0x510   : > { %6024 = vmatprep.subr.bf16.mxu1 %v13653_v25  ;;  %v13663_v25 = vpack.c.bf16 %v10173_v2, %v13524_v32  ;;  %v13668_v2 = vpack.c.bf16 %v13467_v29, %v13466_v56  ;;  %v13675_v31 = vpack.c.bf16 %v13532_v62, %v13531_v63  ;;  %v13680_v56 = vld [vmem:[#allocation97_spill] sm:$0xff]  ;;  %v13681_v29 = vpack.c.bf16 %v13533_v60, %v10309_v36  ;;  %v13687_v33 = vld [vmem:[#allocation67_spill] sm:$0xff]  ;;  %v13688_v36 = vld [vmem:[#allocation62_spill] sm:$0xff] }
 0x511   : > { %5626 = vmatpush1.bf16.msra.mxu0 %v13656_v51  ;;  %v13664_v51 = vpack.c.bf16 %v13463_v11, %v13462_v1  ;;  %v13678_v1 = vld [vmem:[#allocation110_spill] sm:$0xff]  ;;  %v13682_v10 = vpack.c.bf16 %v13477_v43, %v13534_v3  ;;  %v13685_v61 = vpack.c.bf16 %v10349_v0, %v10347_v18  ;;  %v13686_v63 = vpack.c.bf16 %v13536_v34, %v13535_v57  ;;  %v13690_v14 = vld [vmem:[#allocation143_spill] sm:$0xff]  ;;  %v13691_v60 = vld [vmem:[#allocation29_spill] sm:$0xff] }
 0x512   : > { %5628 = vmatprep.subr.bf16.mxu0 %v13659_v20  ;;  %v13679_v11 = vand.u32 4294901760, %v13678_v1  ;;  %v13689_v43 = vpack.c.bf16 %v10391_v19, %v13539_v50  ;;  %v13693_v18 = vld [vmem:[#allocation60_spill] sm:$0xff]  ;;  %v13694_v0 = vld [vmem:[#allocation53_spill] sm:$0xff]  ;;  %v13696_v32 = vand.u32 4294901760, %v13695_v42  ;;  %v13697_v34 = vld [vmem:[#allocation146_spill] sm:$0xff] }
 0x513   : > { %6026 = vmatpush1.bf16.msra.mxu1 %v13660_v49  ;;  %v13698_v62 = vld [vmem:[#allocation78_spill] sm:$0xff]  ;;  %v13699_v3 = vld [vmem:[#allocation72_spill] sm:$0xff]  ;;  %v13701_v50 = vld [vmem:[#allocation91_spill] sm:$0xff] }
 0x514   : > { %6028 = vmatprep.subr.bf16.mxu1 %v13661_v5  ;;  %v13700_v19 = vld [vmem:[#allocation22_spill] sm:$0xff]  ;;  %v13702_v44 = vld [vmem:[#allocation31_spill] sm:$0xff]  ;;  %v13704_v9 = vld [vmem:[#allocation153_spill] sm:$0xff] }
 0x515   : > { %5630 = vmatpush1.bf16.msra.mxu0 %v13662_v54  ;;  %v13703_v57 = vld [vmem:[#allocation42_spill] sm:$0xff]  ;;  %v13705_v20 = vld [vmem:[#allocation156_spill] sm:$0xff]  ;;  %v13707_v5 = vld [vmem:[#allocation121_spill] sm:$0xff] }
 0x516   : > { %5632 = vmatprep.subr.bf16.mxu0 %v13663_v25  ;;  %v13706_v49 = vld [vmem:[#allocation120_spill] sm:$0xff]  ;;  %v13708_v54 = vld [vmem:[#allocation159_spill] sm:$0xff]  ;;  %v13709_v25 = vld [vmem:[#allocation162_spill] sm:$0xff] }
 0x517   : > { %6030 = vmatpush1.bf16.msra.mxu1 %v13664_v51  ;;  %v13710_v51 = vld [vmem:[#allocation92_spill] sm:$0xff]  ;;  %v13721_v1 = vld [vmem:[#allocation175_spill] sm:$0xff]  ;;  %v13728_v42 = vld [vmem:[#allocation126_spill] sm:$0xff] }
 0x518   : > { %6032 = vmatprep.subr.bf16.mxu1 %v13665_v26  ;;  %v13711_v26 = vld [vmem:[#allocation101_spill] sm:$0xff] }
 0x519   : > { %5634 = vmatpush1.bf16.msra.mxu0 %v13666_v21  ;;  %v13712_v21 = vld [vmem:[#allocation165_spill] sm:$0xff] }
 0x51a   : > { %5636 = vmatprep.subr.bf16.mxu0 %v13667_v8  ;;  %v13713_v8 = vld [vmem:[#allocation168_spill] sm:$0xff] }
 0x51b   : > { %6034 = vmatpush1.bf16.msra.mxu1 %v13668_v2  ;;  %v13714_v2 = vld [vmem:[#allocation96_spill] sm:$0xff] }
 0x51c   : > { %6036 = vmatprep.subr.bf16.mxu1 %v13669_v27  ;;  %v13715_v27 = vld [vmem:[#allocation132_spill] sm:$0xff] }
 0x51d   : > { %5638 = vmatpush1.bf16.msra.mxu0 %v13670_v55  ;;  %v13716_v55 = vld [vmem:[#allocation171_spill] sm:$0xff] }
 0x51e   : > { %5640 = vmatprep.subr.bf16.mxu0 %v13671_v6  ;;  %v13717_v6 = vld [vmem:[#allocation75_spill] sm:$0xff] }
 0x51f   : > { %6038 = vmatpush1.bf16.msra.mxu1 %v13672_v30  ;;  %v13718_v30 = vld [vmem:[#allocation102_spill] sm:$0xff] }
 0x520   : > { %6040 = vmatprep.subr.bf16.mxu1 %v13673_v40 }
 0x521   : > { %5642 = vmatpush1.bf16.msra.mxu0 %v13674_v12  ;;  %v13719_v12 = vld [vmem:[#allocation17_spill] sm:$0xff] }
 0x522   : > { %5644 = vmatprep.subr.bf16.mxu0 %v13675_v31  ;;  %4685 = vmatmul.mubr.f32.vlgmr.msra.gmra.mrb[0].mxu1 %v13676_v15  ;;  %v13720_v31 = vld [vmem:[#allocation59_spill] sm:$0xff] }
 0x523   : > { %6042 = vmatpush1.bf16.msra.mxu1 %v13677_v47  ;;  %4822 = vmatprep.mubr.f32.mxu1 %v13679_v11  ;;  %v13722_v11 = vld [vmem:[#allocation135_spill] sm:$0xff] }
 0x524   : > { %6044 = vmatprep.subr.bf16.mxu1 %v13680_v56 }
 0x525   : > { %5646 = vmatpush1.bf16.msra.mxu0 %v13681_v29  ;;  %v13723_v29 = vld [vmem:[#allocation16_spill] sm:$0xff] }
 0x526   : > { %5648 = vmatprep.subr.bf16.mxu0 %v13682_v10  ;;  %v13724_v10 = vld [vmem:[#allocation178_spill] sm:$0xff] }
 0x527   : > { %6046 = vmatpush1.bf16.msra.mxu1 %v13683_v13 }
 0x528   : > { %6048 = vmatprep.subr.bf16.mxu1 %v13684_v17 }
 0x529   : > { %5650 = vmatpush1.bf16.msra.mxu0 %v13685_v61  ;;  %v13725_v61 = vld [vmem:[#allocation131_spill] sm:$0xff] }
 0x52a   : > { %5652 = vmatprep.subr.bf16.mxu0 %v13686_v63  ;;  %v13726_v63 = vld [vmem:[#allocation44_spill] sm:$0xff] }
 0x52b   : > { %6050 = vmatpush1.bf16.msra.mxu1 %v13687_v33 }
 0x52c   : > { %6052 = vmatprep.subr.bf16.mxu1 %v13688_v36 }
 0x52d   : > { %5654 = vmatpush1.bf16.msra.mxu0 %v13689_v43  ;;  %v13727_v43 = vld [vmem:[#allocation61_spill] sm:$0xff] }
 0x52e   : > { %5656 = vmatprep.subr.bf16.mxu0 %v13690_v14 }
 0x52f   : > { %6054 = vmatpush1.bf16.msra.mxu1 %v13691_v60 }
 0x530   : > { %2455 = vmatmul.mubr.f32.vlgmr.msra.gmra.mrb[0].mxu0 %v13692_v4  ;;  %6056 = vmatprep.subr.bf16.mxu1 %v13693_v18 }
 0x531   : > { %5658 = vmatpush1.bf16.msra.mxu0 %v13694_v0  ;;  %2592 = vmatprep.mubr.f32.mxu0 %v13696_v32  ;;  %v13729_v32 = vld [vmem:[#allocation182_spill] sm:$0xff] }
 0x532   : > { %5660 = vmatprep.subr.bf16.mxu0 %v13697_v34 }
 0x533   : > { %6058 = vmatpush1.bf16.msra.mxu1 %v13698_v62 }
 0x534   : > { %6060 = vmatprep.subr.bf16.mxu1 %v13699_v3 }
 0x535   : > { %5662 = vmatpush1.bf16.msra.mxu0 %v13700_v19 }
 0x536   : > { %5664 = vmatprep.subr.bf16.mxu0 %v13701_v50 }
 0x537   : > { %6062 = vmatpush1.bf16.msra.mxu1 %v13702_v44 }
 0x538   : > { %6064 = vmatprep.subr.bf16.mxu1 %v13703_v57 }
 0x539   : > { %5666 = vmatpush1.bf16.msra.mxu0 %v13704_v9 }
 0x53a   : > { %5668 = vmatprep.subr.bf16.mxu0 %v13705_v20 }
 0x53b   : > { %6066 = vmatpush1.bf16.msra.mxu1 %v13706_v49 }
 0x53c   : > { %6068 = vmatprep.subr.bf16.mxu1 %v13707_v5 }
 0x53d   : > { %5670 = vmatpush1.bf16.msra.mxu0 %v13708_v54 }
 0x53e   : > { %5672 = vmatprep.subr.bf16.mxu0 %v13709_v25 }
 0x53f   : > { %6070 = vmatpush1.bf16.msra.mxu1 %v13710_v51 }
 0x540   : > { %6072 = vmatprep.subr.bf16.mxu1 %v13711_v26  ;;  %v13790_v26 = vld [vmem:[#allocation80_spill] sm:$0xff] }
 0x541   : > { %5674 = vmatpush1.bf16.msra.mxu0 %v13712_v21 }
 0x542   : > { %5676 = vmatprep.subr.bf16.mxu0 %v13713_v8 }
 0x543   : > { %6074 = vmatpush1.bf16.msra.mxu1 %v13714_v2  ;;  %v13756_v2 = vld [vmem:[#allocation106_spill] sm:$0xff] }
 0x544   : > { %6076 = vmatprep.subr.bf16.mxu1 %v13715_v27 }
 0x545   : > { %5678 = vmatpush1.bf16.msra.mxu0 %v13716_v55  ;;  %v13750_v55 = vld [vmem:[#allocation50_spill] sm:$0xff] }
 0x546   : > { %5680 = vmatprep.subr.bf16.mxu0 %v13717_v6 }
 0x547   : > { %6078 = vmatpush1.bf16.msra.mxu1 %v13718_v30  ;;  %v13744_v30 = vld [vmem:[#allocation57_spill] sm:$0xff] }
 0x548   : > { %6080 = vmatprep.subr.bf16.mxu1 %v13719_v12  ;;  %v13730_v12 = vld [vmem:[#allocation46_spill] sm:$0xff] }
 0x549   : > { %5682 = vmatpush1.bf16.msra.mxu0 %v13720_v31  ;;  %v13731_v31 = vld [vmem:[#allocation88_spill] sm:$0xff] }
 0x54a   : > { %5684 = vmatprep.subr.bf16.mxu0 %v13721_v1  ;;  %v13732_v1 = vld [vmem:[#allocation185_spill] sm:$0xff] }
 0x54b   : > { %6082 = vmatpush1.bf16.msra.mxu1 %v13722_v11  ;;  %v13733_v11 = vld [vmem:[#allocation119_spill] sm:$0xff] }
 0x54c   : > { %6084 = vmatprep.subr.bf16.mxu1 %v13723_v29  ;;  %v13734_v29 = vld [vmem:[#allocation47_spill] sm:$0xff] }
 0x54d   : > { %5686 = vmatpush1.bf16.msra.mxu0 %v13724_v10  ;;  %v13735_v10 = vld [vmem:[#allocation141_spill] sm:$0xff] }
 0x54e   : > { %5688 = vmatprep.subr.bf16.mxu0 %v13725_v61  ;;  %v13736_v61 = vld [vmem:[#allocation58_spill] sm:$0xff] }
 0x54f   : > { %6086 = vmatpush1.bf16.msra.mxu1 %v13726_v63  ;;  %v13737_v63 = vld [vmem:[#allocation33_spill] sm:$0xff] }
 0x550   : > { %6088 = vmatprep.subr.bf16.mxu1 %v13727_v43  ;;  %v13738_v43 = vld [vmem:[#allocation189_spill] sm:$0xff] }
 0x551   : > { %5690 = vmatpush1.bf16.msra.mxu0 %v13728_v42  ;;  %v13739_v42 = vld [vmem:[#allocation25_spill] sm:$0xff] }
 0x552   : > { %5692 = vmatprep.subr.bf16.mxu0 %v13729_v32  ;;  %v13740_v32 = vld [vmem:[#allocation34_spill] sm:$0xff] }
 0x553   : > { %6090 = vmatpush1.bf16.msra.mxu1 %v13730_v12  ;;  %v13741_v12 = vld [vmem:[#allocation115_spill] sm:$0xff] }
 0x554   : > { %6092 = vmatprep.subr.bf16.mxu1 %v13731_v31  ;;  %v13742_v31 = vld [vmem:[#allocation41_spill] sm:$0xff] }
 0x555   : > { %5694 = vmatpush1.bf16.msra.mxu0 %v13732_v1  ;;  %v13743_v1 = vand.u32 4294901760, %v13742_v31 }
 0x556   : > { %5696 = vmatprep.subr.bf16.mxu0 %v13733_v11  ;;  %v13745_v11 = vand.u32 4294901760, %v13744_v30  ;;  %v13757_v30 = vand.u32 4294901760, %v13756_v2  ;;  %v13769_v2 = vld [vmem:[#allocation68_spill] sm:$0xff] }
 0x557   : > { %6094 = vmatpush1.bf16.msra.mxu1 %v13734_v29  ;;  %v13746_v29 = vld [vmem:[#allocation194_spill] sm:$0xff] }
 0x558   : > { %6096 = vmatprep.subr.bf16.mxu1 %v13735_v10  ;;  %v6103_v6 = vpack.c.bf16 %v13745_v11, %v13743_v1  ;;  %v13747_v10 = vld [vmem:[#allocation129_spill] sm:$0xff]  ;;  %v13758_v11 = vld [vmem:[#allocation107_spill] sm:$0xff] }
 0x559   : > { %5698 = vmatpush1.bf16.msra.mxu0 %v13736_v61  ;;  %v13748_v61 = vld [vmem:[#allocation69_spill] sm:$0xff] }
 0x55a   : > { %5700 = vmatprep.subr.bf16.mxu0 %v13737_v63  ;;  %v13749_v63 = vand.u32 4294901760, %v13748_v61  ;;  %v13760_v61 = vld [vmem:[#allocation109_spill] sm:$0xff] }
 0x55b   : > { %6098 = vmatpush1.bf16.msra.mxu1 %v13738_v43  ;;  %v13751_v43 = vand.u32 4294901760, %v13750_v55  ;;  %v13762_v55 = vld [vmem:[#allocation113_spill] sm:$0xff] }
 0x55c   : > { %6100 = vmatprep.subr.bf16.mxu1 %v13739_v42  ;;  %v13752_v42 = vld [vmem:[#allocation197_spill] sm:$0xff] }
 0x55d   : > { %5702 = vmatpush1.bf16.msra.mxu0 %v13740_v32  ;;  %v6105_v27 = vpack.c.bf16 %v13751_v43, %v13749_v63  ;;  %v13753_v32 = vand.u32 4294901760, %v13676_v15  ;;  %v13763_v63 = vand.u32 4294901760, %v13762_v55  ;;  %v13765_v15 = vld [vmem:[#allocation35_spill] sm:$0xff] }
 0x55e   : > { %5704 = vmatprep.subr.bf16.mxu0 %v13741_v12  ;;  %v13754_v12 = vld [vmem:[#allocation105_spill] sm:$0xff]  ;;  %v13775_v55 = vld [vmem:[#allocation23_spill] sm:$0xff] }
 0x55f   : > { %6102 = vmatpush1.bf16.msra.mxu1 %v13746_v29  ;;  %v13755_v31 = vand.u32 4294901760, %v13754_v12  ;;  %v13767_v29 = vld [vmem:[#allocation66_spill] sm:$0xff] }
 0x560   : > { %6104 = vmatprep.subr.bf16.mxu1 %v6103_v6  ;;  %v13759_v6 = vld [vmem:[#allocation74_spill] sm:$0xff]  ;;  %v13768_v12 = vand.u32 4294901760, %v13767_v29  ;;  %v13779_v29 = vld [vmem:[#allocation144_spill] sm:$0xff] }
 0x561   : > { %5706 = vmatpush1.bf16.msra.mxu0 %v13747_v10  ;;  %v6107_v1 = vpack.c.bf16 %v13757_v30, %v13755_v31  ;;  %v13761_v10 = vand.u32 4294901760, %v13760_v61  ;;  %v13772_v30 = vld [vmem:[#allocation130_spill] sm:$0xff]  ;;  %v13774_v61 = vld [vmem:[#allocation37_spill] sm:$0xff] }
 0x562   : > { %5708 = vmatprep.subr.bf16.mxu0 %v13752_v42  ;;  %4826 = vmatmul.mubr.f32.vlgmr.msra.gmra.mrb[0].mxu1 %v13753_v32  ;;  %v13764_v42 = vld [vmem:[#allocation202_spill] sm:$0xff]  ;;  %v13766_v32 = vand.u32 4294901760, %v13765_v15  ;;  %v13780_v15 = vand.u32 4294901760, %v13779_v29 }
 0x563   : > { %6106 = vmatpush1.bf16.msra.mxu1 %v6105_v27  ;;  %5089 = vmatprep.mubr.f32.mxu1 %v13758_v11  ;;  %v6109_v43 = vpack.c.bf16 %v13763_v63, %v13761_v10  ;;  %v13770_v27 = vld [vmem:[#allocation89_spill] sm:$0xff]  ;;  %v13776_v10 = vand.u32 4294901760, %v13775_v55  ;;  %v13777_v63 = vld [vmem:[#allocation63_spill] sm:$0xff] }
 0x564   : > { %6108 = vmatprep.subr.bf16.mxu1 %v6107_v1  ;;  %v6111_v8 = vpack.c.bf16 %v13768_v12, %v13766_v32  ;;  %v13771_v31 = vand.u32 4294901760, %v13770_v27  ;;  %v13773_v1 = vand.u32 4294901760, %v13772_v30  ;;  %v13783_v12 = vld [vmem:[#allocation51_spill] sm:$0xff]  ;;  %v13784_v27 = vld [vmem:[#allocation24_spill] sm:$0xff]  ;;  %v13786_v30 = vld [vmem:[#allocation65_spill] sm:$0xff] }
 0x565   : > { %5710 = vmatpush1.bf16.msra.mxu0 %v13759_v6 }
 0x566   : > { %5712 = vmatprep.subr.bf16.mxu0 %v13764_v42  ;;  %v6113_v6 = vpack.c.bf16 %v13773_v1, %v13771_v31  ;;  %v13778_v42 = vand.u32 4294901760, %v13777_v63  ;;  %v13787_v31 = vand.u32 4294901760, %v13786_v30  ;;  %v13791_v63 = vand.u32 4294901760, %v13790_v26  ;;  %v13799_v30 = vld [vmem:[#allocation148_spill] sm:$0xff] }
 0x567   : > { %6110 = vmatpush1.bf16.msra.mxu1 %v6109_v43  ;;  %v13781_v43 = vld [vmem:[#allocation145_spill] sm:$0xff]  ;;  %v5240_v26 = vld [vmem:[%s11617_s5] sm:$0xf] }
 0x568   : > { %6112 = vmatprep.subr.bf16.mxu1 %v6111_v8  ;;  %v6115_v21 = vpack.c.bf16 %v13778_v42, %v13776_v10  ;;  %v13782_v8 = vand.u32 4294901760, %v13781_v43  ;;  %v13794_v10 = vld [vmem:[#allocation54_spill] sm:$0xff]  ;;  %5245 = vperm.xlu0 %6395, %v5240_v26  }
 0x569   : > { %5714 = vmatpush1.bf16.msra.mxu0 %v13769_v2  ;;  %v13785_v2 = vand.u32 4294901760, %v13784_v27  ;;  %v13795_v29 = vand.u32 4294901760, %v13794_v10  ;;  %5270 = vperm.xlu1 %6396, %v5240_v26  }
 0x56a   : > { %5716 = vmatprep.subr.bf16.mxu0 %v13774_v61  ;;  %v5719_v32 = vpack.c.bf16 %v13782_v8, %v13780_v15  ;;  %v13788_v61 = vld [vmem:[#allocation52_spill] sm:$0xff]  ;;  %v13796_v15 = vand.u32 4294901760, %v13692_v4  ;;  %v13797_v8 = vld [vmem:[#allocation147_spill] sm:$0xff]  ;;  %v13806_v4 = vld [vmem:[#allocation26_spill] sm:$0xff] }
 0x56b   : > { %6114 = vmatpush1.bf16.msra.mxu1 %v6113_v6  ;;  %v6117_v1 = vpack.c.bf16 %v13787_v31, %v13785_v2  ;;  %v13789_v55 = vand.u32 4294901760, %v13788_v61  ;;  %v13798_v27 = vand.u32 4294901760, %v13797_v8  ;;  %v13800_v2 = vand.u32 4294901760, %v13799_v30  ;;  %v13801_v61 = vld [vmem:[#allocation85_spill] sm:$0xff]  ;;  %v13802_v31 = vld [vmem:[#allocation30_spill] sm:$0xff] }
 0x56c   : > { %6116 = vmatprep.subr.bf16.mxu1 %v6115_v21  ;;  %v13792_v21 = vld [vmem:[#allocation90_spill] sm:$0xff] }
 0x56d   : > { %5718 = vmatpush1.bf16.msra.mxu0 %v13783_v12  ;;  %v6119_v42 = vpack.c.bf16 %v13791_v63, %v13789_v55  ;;  %v13793_v6 = vand.u32 4294901760, %v13792_v21  ;;  %v13804_v55 = vld [vmem:[#allocation79_spill] sm:$0xff]  ;;  %v13816_v12 = vld [vmem:[#allocation152_spill] sm:$0xff] }
 0x56e   : > { %5720 = vmatprep.subr.bf16.mxu0 %v5719_v32  ;;  %v5723_v32 = vpack.c.bf16 %v13800_v2, %v13798_v27  ;;  %v13805_v63 = vand.u32 4294901760, %v13804_v55  ;;  %v13812_v27 = vld [vmem:[#allocation150_spill] sm:$0xff]  ;;  %v13814_v2 = vld [vmem:[#allocation151_spill] sm:$0xff]  ;;  %v13817_v55 = vand.u32 4294901760, %v13816_v12 }
 0x56f   : > { %6118 = vmatpush1.bf16.msra.mxu1 %v6117_v1  ;;  %v5721_v43 = vpack.c.bf16 %v13795_v29, %v13793_v6  ;;  %v13803_v1 = vand.u32 4294901760, %v13802_v31  ;;  %v13808_v6 = vld [vmem:[#allocation77_spill] sm:$0xff]  ;;  %v13813_v30 = vand.u32 4294901760, %v13812_v27  ;;  %v13815_v31 = vand.u32 4294901760, %v13814_v2  ;;  %v13829_v2 = vld [vmem:[#allocation155_spill] sm:$0xff] }
 0x570   : > { %2596 = vmatmul.mubr.f32.vlgmr.msra.gmra.mrb[0].mxu0 %v13796_v15  ;;  %6120 = vmatprep.subr.bf16.mxu1 %v6119_v42  ;;  %v13807_v42 = vand.u32 4294901760, %v13806_v4  ;;  %v13809_v10 = vand.u32 4294901760, %v13808_v6  ;;  %v13810_v15 = vld [vmem:[#allocation149_spill] sm:$0xff]  ;;  %v13820_v4 = vld [vmem:[#allocation104_spill] sm:$0xff]  ;;  %v13830_v12 = vand.u32 4294901760, %v13829_v2 }
 0x571   : > { %5722 = vmatpush1.bf16.msra.mxu0 %v5721_v43  ;;  %2859 = vmatprep.mubr.f32.mxu0 %v13801_v61  ;;  %v6121_v21 = vpack.c.bf16 %v13805_v63, %v13803_v1  ;;  %v13811_v8 = vand.u32 4294901760, %v13810_v15  ;;  %v5727_v1 = vpack.c.bf16 %v13817_v55, %v13815_v31  ;;  %v13821_v6 = vand.u32 4294901760, %v13820_v4  ;;  %v13824_v15 = vld [vmem:[#allocation32_spill] sm:$0xff]  ;;  %v13832_v55 = vld [vmem:[#allocation157_spill] sm:$0xff] }
 0x572   : > { %5724 = vmatprep.subr.bf16.mxu0 %v5723_v32  ;;  %v6123_v29 = vpack.c.bf16 %v13809_v10, %v13807_v42  ;;  %v13818_v32 = vld [vmem:[#allocation76_spill] sm:$0xff]  ;;  %v13825_v51 = vand.u32 4294901760, %v13824_v15  ;;  %v13840_v15 = vld [vmem:[#allocation111_spill] sm:$0xff] }
 0x573   : > { %6122 = vmatpush1.bf16.msra.mxu1 %v6121_v21  ;;  %v5725_v43 = vpack.c.bf16 %v13813_v30, %v13811_v8  ;;  %v13819_v63 = vand.u32 4294901760, %v13818_v32  ;;  %v13822_v21 = vld [vmem:[#allocation45_spill] sm:$0xff]  ;;  %v13826_v8 = vmov 3   ;;  %v13833_v32 = vand.u32 4294901760, %v13832_v55 }
 0x574   : > { %6124 = vmatprep.subr.bf16.mxu1 %v6123_v29  ;;  %v13823_v10 = vand.u32 4294901760, %v13822_v21  ;;  %6398 = vset.pattern.permute.xlu0 %v13826_v8  ;;  %v13827_v29 = vld [vmem:[#allocation154_spill] sm:$0xff]  ;;  %v13838_v21 = vld [vmem:[#allocation83_spill] sm:$0xff]  ;;  %v13841_v8 = vand.u32 4294901760, %v13840_v15 }
 0x575   : > { %5726 = vmatpush1.bf16.msra.mxu0 %v5725_v43  ;;  %v6125_v42 = vpack.c.bf16 %v13821_v6, %v13819_v63  ;;  %v13828_v30 = vand.u32 4294901760, %v13827_v29  ;;  %v13831_v43 = vmov 2   ;;  %v13834_v63 = vld [vmem:[#allocation158_spill] sm:$0xff]  ;;  %5322 = vperm.xlu0 %6398, %v5240_v26   ;;  %v13836_v6 = vld [vmem:[#allocation108_spill] sm:$0xff] }
 0x576   : > { %5728 = vmatprep.subr.bf16.mxu0 %v5727_v1  ;;  %v6127_v27 = vpack.c.bf16 %v13825_v51, %v13823_v10  ;;  %6397 = vset.pattern.permute.xlu1 %v13831_v43  ;;  %v13835_v1 = vand.u32 4294901760, %v13834_v63  ;;  %v13837_v51 = vand.u32 4294901760, %v13836_v6  ;;  %v13839_v10 = vand.u32 4294901760, %v13838_v21  ;;  %v13842_v29 = vld [vmem:[#allocation124_spill] sm:$0xff]  ;;  %v13846_v43 = vld [vmem:[#allocation161_spill] sm:$0xff]  ;;  %v13848_v63 = vld [vmem:[#allocation163_spill] sm:$0xff] }
 0x577   : > { %6126 = vmatpush1.bf16.msra.mxu1 %v6125_v42  ;;  %v5729_v31 = vpack.c.bf16 %v13830_v12, %v13828_v30  ;;  %5296 = vperm.xlu1 %6397, %v5240_v26   ;;  %v13843_v30 = vand.u32 4294901760, %v13842_v29  ;;  %v13847_v55 = vand.u32 4294901760, %v13846_v43  ;;  %v13850_v26 = vld [vmem:[#allocation164_spill] sm:$0xff]  ;;  %v13857_v29 = vld [vmem:[#allocation95_spill] sm:$0xff]  ;;  %v13861_v43 = vld [vmem:[#allocation166_spill] sm:$0xff] }
 0x578   : > { %6128 = vmatprep.subr.bf16.mxu1 %v6127_v27  ;;  %v5731_v4 = vpack.c.bf16 %v13835_v1, %v13833_v32  ;;  %v6129_v42 = vpack.c.bf16 %v13839_v10, %v13837_v51  ;;  %v13844_v27 = vld [vmem:[#allocation160_spill] sm:$0xff]  ;;  %v13849_v1 = vand.u32 4294901760, %v13848_v63  ;;  %v13852_v51 = vmov 0   ;;  %v13863_v63 = vld [vmem:[#allocation167_spill] sm:$0xff] }
 0x579   : > { %5730 = vmatpush1.bf16.msra.mxu0 %v5729_v31  ;;  %v6131_v2 = vpack.c.bf16 %v13843_v30, %v13841_v8  ;;  %v13845_v12 = vand.u32 4294901760, %v13844_v27  ;;  %v5241_v31 = vld [vmem:[%s11618_s6] sm:$0xf]  ;;  %6400 = vset.pattern.permute.xlu0 %v13852_v51  ;;  %v13858_v30 = vand.u32 4294901760, %v13857_v29  ;;  %v13859_v27 = vld [vmem:[#allocation93_spill] sm:$0xff]  ;;  %v13873_v29 = vld [vmem:[#allocation134_spill] sm:$0xff] }
 0x57a   : > { %5732 = vmatprep.subr.bf16.mxu0 %v5731_v4  ;;  %v13851_v4 = vand.u32 4294901760, %v13850_v26  ;;  %v13853_v21 = vld [vmem:[#allocation84_spill] sm:$0xff]  ;;  %v13865_v26 = vand.u32 4294901760, %v13558_v16 }
 0x57b   : > { %6130 = vmatpush1.bf16.msra.mxu1 %v6129_v42  ;;  %v5733_v32 = vpack.c.bf16 %v13847_v55, %v13845_v12  ;;  %v13854_v10 = vand.u32 4294901760, %v13853_v21  ;;  %v13855_v42 = vld [vmem:[#allocation125_spill] sm:$0xff]  ;;  %6399 = vset.pattern.permute.xlu1 %v13852_v51  ;;  %v13862_v55 = vand.u32 4294901760, %v13861_v43  ;;  %v13869_v51 = vld [vmem:[#allocation82_spill] sm:$0xff] }
 0x57c   : > { %6132 = vmatprep.subr.bf16.mxu1 %v6131_v2  ;;  %v5735_v6 = vpack.c.bf16 %v13851_v4, %v13849_v1  ;;  %v13856_v15 = vand.u32 4294901760, %v13855_v42  ;;  %v13860_v2 = vand.u32 4294901760, %v13859_v27  ;;  %5349 = vperm.xlu1 %6399, %v5241_v31   ;;  %v13864_v1 = vand.u32 4294901760, %v13863_v63  ;;  %v13866_v4 = vld [vmem:[#allocation170_spill] sm:$0xff]  ;;  %v13871_v31 = vld [vmem:[#allocation133_spill] sm:$0xff] }
 0x57d   : > { %5734 = vmatpush1.bf16.msra.mxu0 %v5733_v32  ;;  %v13867_v21 = vand.u32 4294901760, %v13866_v4  ;;  %v13870_v42 = vand.u32 4294901760, %v13869_v51  ;;  %v13886_v51 = vand.u32 4294901760, %v13438_v24 }
 0x57e   : > { %v6133_v8 = vpack.c.bf16 %v13856_v15, %v13854_v10  ;;  %5736 = vmatprep.subr.bf16.mxu0 %v5735_v6  ;;  %v6135_v12 = vpack.c.bf16 %v13860_v2, %v13858_v30  ;;  %v5737_v32 = vpack.c.bf16 %v13864_v1, %v13862_v55  ;;  %v13868_v6 = vand.u32 4294901760, %v13560_v35  ;;  %v13878_v55 = vld [vmem:[#allocation118_spill] sm:$0xff]  ;;  %v13880_v1 = vld [vmem:[#allocation28_spill] sm:$0xff] }
 0x57f   : > { %v5739_v10 = vpack.c.bf16 %v13867_v21, %v13865_v26  ;;  %v13874_v30 = vand.u32 4294901760, %v13873_v29  ;;  %v13875_v2 = vand.u32 4294901760, %v13564_v41  ;;  %v13879_v63 = vand.u32 4294901760, %v13878_v55  ;;  %v13882_v26 = vld [vmem:[#allocation94_spill] sm:$0xff]  ;;  %v13884_v21 = vld [vmem:[#allocation13_spill] sm:$0xff]  ;;  %v13890_v29 = vld [vmem:[#allocation176_spill] sm:$0xff] }
 0x580   : > { %6134 = vmatpush1.bf16.msra.mxu1 %v6133_v8  ;;  %v6137_v15 = vpack.c.bf16 %v13870_v42, %v13868_v6  ;;  %v13872_v8 = vand.u32 4294901760, %v13871_v31  ;;  %v13881_v35 = vand.u32 4294901760, %v13880_v1  ;;  %v13883_v4 = vand.u32 4294901760, %v13882_v26  ;;  %v13896_v55 = vld [vmem:[#allocation137_spill] sm:$0xff]  ;;  %v13903_v26 = vld [vmem:[#allocation180_spill] sm:$0xff] }
 0x581   : > { %6136 = vmatprep.subr.bf16.mxu1 %v6135_v12  ;;  %5738 = vmatpush1.bf16.msra.mxu0 %v5737_v32  ;;  %v13876_v12 = vld [vmem:[#allocation173_spill] sm:$0xff]  ;;  %v13887_v41 = vand.u32 4294901760, %v13439_v53  ;;  %v13889_v31 = vand.u32 4294901760, %v13440_v58  ;;  %v13897_v24 = vand.u32 4294901760, %v13896_v55  ;;  %v13898_v53 = vld [vmem:[#allocation19_spill] sm:$0xff]  ;;  %v13902_v58 = vand.u32 4294901760, %v13643_v45 }
 0x582   : > { %5740 = vmatprep.subr.bf16.mxu0 %v5739_v10  ;;  %v6139_v27 = vpack.c.bf16 %v13874_v30, %v13872_v8  ;;  %v13877_v16 = vand.u32 4294901760, %v13876_v12  ;;  %v5743_v32 = vpack.c.bf16 %v13881_v35, %v13879_v63  ;;  %v13885_v10 = vand.u32 4294901760, %v13884_v21  ;;  %v13900_v35 = vld [vmem:[#allocation21_spill] sm:$0xff] }
 0x583   : > { %v6143_v42 = vpack.c.bf16 %v13887_v41, %v13886_v51  ;;  %v13891_v30 = vand.u32 4294901760, %v13890_v29  ;;  %v13899_v1 = vand.u32 4294901760, %v13898_v53  ;;  %v13907_v41 = vand.u32 4294901760, %v13649_v48  ;;  %v13926_v55 = vld [vmem:[#allocation193_spill] sm:$0xff]  ;;  %v13929_v53 = vld [vmem:[#allocation203_spill] sm:$0xff] }
 0x584   : > { %6138 = vmatpush1.bf16.msra.mxu1 %v6137_v15  ;;  %v5741_v43 = vpack.c.bf16 %v13877_v16, %v13875_v2  ;;  %v6141_v6 = vpack.c.bf16 %v13885_v10, %v13883_v4  ;;  %v13888_v15 = vand.u32 4294901760, %v13631_v39  ;;  %v13894_v16 = vld [vmem:[#allocation136_spill] sm:$0xff]  ;;  %v13901_v39 = vand.u32 4294901760, %v13900_v35  ;;  %v13931_v35 = vld [vmem:[#allocation70_spill] sm:$0xff] }
 0x585   : > { %6140 = vmatprep.subr.bf16.mxu1 %v6139_v27  ;;  %v13892_v27 = vld [vmem:[#allocation177_spill] sm:$0xff]  ;;  %v13904_v4 = vand.u32 4294901760, %v13903_v26  ;;  %v13905_v10 = vand.u32 4294901760, %v13646_v7  ;;  %v13910_v45 = vand.u32 4294901760, %v13651_v59  ;;  %v13911_v29 = vand.u32 4294901760, %v13655_v46  ;;  %v13917_v59 = vld [vmem:[#allocation20_spill] sm:$0xff] }
 0x586   : > { %5742 = vmatpush1.bf16.msra.mxu0 %v5741_v43  ;;  %v5745_v8 = vpack.c.bf16 %v13889_v31, %v13888_v15  ;;  %v13893_v2 = vand.u32 4294901760, %v13892_v27  ;;  %v13895_v43 = vand.u32 4294901760, %v13894_v16  ;;  %v13909_v31 = vand.u32 4294901760, %v13652_v38  ;;  %v13916_v38 = vld [vmem:[#allocation14_spill] sm:$0xff]  ;;  %v13919_v46 = vld [vmem:[#allocation116_spill] sm:$0xff]  ;;  %v13961_v26 = vld [vmem:[#allocation47_spill] sm:$0xff] }
 0x587   : > { %5744 = vmatprep.subr.bf16.mxu0 %v5743_v32  ;;  %v6147_v32 = vpack.c.bf16 %v13901_v39, %v13899_v1  ;;  %v5749_v21 = vpack.c.bf16 %v13904_v4, %v13902_v58  ;;  %v13912_v7 = vand.u32 4294901760, %v13654_v28  ;;  %v13914_v48 = vand.u32 4294901760, %v13657_v22  ;;  %v13920_v28 = vld [vmem:[#allocation139_spill] sm:$0xff]  ;;  %v13923_v22 = vld [vmem:[#allocation56_spill] sm:$0xff]  ;;  %v13924_v16 = vld [vmem:[#allocation190_spill] sm:$0xff] }
 0x588   : > { %6142 = vmatpush1.bf16.msra.mxu1 %v6141_v6  ;;  %v5747_v12 = vpack.c.bf16 %v13893_v2, %v13891_v30  ;;  %v6145_v63 = vpack.c.bf16 %v13897_v24, %v13895_v43  ;;  %v13906_v6 = vand.u32 4294901760, %v13645_v23  ;;  %v13913_v23 = vand.u32 4294901760, %v13658_v52  ;;  %v13918_v2 = vld [vmem:[#allocation174_spill] sm:$0xff]  ;;  %v13925_v43 = vld [vmem:[#allocation191_spill] sm:$0xff]  ;;  %v13932_v39 = vld [vmem:[#allocation117_spill] sm:$0xff] }
 0x589   : > { %6144 = vmatprep.subr.bf16.mxu1 %v6143_v42  ;;  %v13908_v42 = vand.u32 4294901760, %v13648_v37  ;;  %v5753_v30 = vpack.c.bf16 %v13912_v7, %v13911_v29  ;;  %v13915_v37 = vld [vmem:[#allocation112_spill] sm:$0xff]  ;;  %v13922_v52 = vld [vmem:[#allocation142_spill] sm:$0xff]  ;;  %v13927_v24 = vld [vmem:[#allocation195_spill] sm:$0xff] }
 0x58a   : > { %5746 = vmatpush1.bf16.msra.mxu0 %v5745_v8  ;;  %v5751_v51 = vpack.c.bf16 %v13906_v6, %v13905_v10  ;;  %v6151_v8 = vpack.c.bf16 %v13910_v45, %v13909_v31  ;;  %v5755_v27 = vpack.c.bf16 %v13914_v48, %v13913_v23  ;;  %v13930_v1 = vld [vmem:[#allocation99_spill] sm:$0xff]  ;;  %v13962_v4 = vld [vmem:[#allocation141_spill] sm:$0xff]  ;;  %v13973_v29 = vld [vmem:[#allocation202_spill] sm:$0xff] }
 0x58b   : > { %5748 = vmatprep.subr.bf16.mxu0 %v5747_v12  ;;  %v6149_v15 = vpack.c.bf16 %v13908_v42, %v13907_v41  ;;  %v13921_v12 = vld [vmem:[#allocation140_spill] sm:$0xff]  ;;  %v13960_v58 = vld [vmem:[#allocation119_spill] sm:$0xff]  ;;  %v13964_v10 = vld [vmem:[#allocation33_spill] sm:$0xff] }
 0x58c   : > { %6146 = vmatpush1.bf16.msra.mxu1 %v6145_v63  ;;  %v13928_v63 = vld [vmem:[#allocation196_spill] sm:$0xff]  ;;  %v13965_v6 = vld [vmem:[#allocation189_spill] sm:$0xff]  ;;  %v13967_v41 = vld [vmem:[#allocation34_spill] sm:$0xff] }
 0x58d   : > { %6148 = vmatprep.subr.bf16.mxu1 %v6147_v32  ;;  %v13934_v32 = vld [vmem:[#allocation186_spill] sm:$0xff]  ;;  %v13968_v42 = vld [vmem:[#allocation115_spill] sm:$0xff]  ;;  %v13970_v31 = vld [vmem:[#allocation129_spill] sm:$0xff] }
 0x58e   : > { %5750 = vmatpush1.bf16.msra.mxu0 %v5749_v21  ;;  %v13963_v21 = vld [vmem:[#allocation58_spill] sm:$0xff]  ;;  %v13971_v45 = vld [vmem:[#allocation197_spill] sm:$0xff]  ;;  %v13974_v7 = vld [vmem:[#allocation68_spill] sm:$0xff] }
 0x58f   : > { %5752 = vmatprep.subr.bf16.mxu0 %v5751_v51  ;;  %v13966_v51 = vld [vmem:[#allocation25_spill] sm:$0xff]  ;;  %v13976_v23 = vld [vmem:[#allocation51_spill] sm:$0xff] }
 0x590   : > { %6150 = vmatpush1.bf16.msra.mxu1 %v6149_v15  ;;  %v13969_v15 = vld [vmem:[#allocation194_spill] sm:$0xff] }
 0x591   : > { %6152 = vmatprep.subr.bf16.mxu1 %v6151_v8  ;;  %v13972_v8 = vld [vmem:[#allocation74_spill] sm:$0xff] }
 0x592   : > { %5754 = vmatpush1.bf16.msra.mxu0 %v5753_v30  ;;  %v13975_v30 = vld [vmem:[#allocation37_spill] sm:$0xff] }
 0x593   : > { %5756 = vmatprep.subr.bf16.mxu0 %v5755_v27 }
 0x594   : > { %6154 = vmatpush1.bf16.msra.mxu1 %v13915_v37 }
 0x595   : > { %6156 = vmatprep.subr.bf16.mxu1 %v13916_v38 }
 0x596   : > { %5758 = vmatpush1.bf16.msra.mxu0 %v13917_v59 }
 0x597   : > { %5760 = vmatprep.subr.bf16.mxu0 %v13918_v2 }
 0x598   : > { %6158 = vmatpush1.bf16.msra.mxu1 %v13919_v46 }
 0x599   : > { %6160 = vmatprep.subr.bf16.mxu1 %v13920_v28 }
 0x59a   : > { %5762 = vmatpush1.bf16.msra.mxu0 %v13921_v12 }
 0x59b   : > { %5764 = vmatprep.subr.bf16.mxu0 %v13922_v52 }
 0x59c   : > { %6162 = vmatpush1.bf16.msra.mxu1 %v13923_v22  ;;  %v13977_v22 = vld [vmem:[#allocation10_spill] sm:$0xff] }
 0x59d   : > { %6164 = vmatprep.subr.bf16.mxu1 %v13924_v16 }
 0x59e   : > { %5766 = vmatpush1.bf16.msra.mxu0 %v13925_v43  ;;  %v13978_v43 = vld [vmem:[#allocation9_spill] sm:$0xff] }
 0x59f   : > { %5768 = vmatprep.subr.bf16.mxu0 %v13926_v55  ;;  %v13979_v55 = vsub.s32 5, %v13978_v43 }
 0x5a0   : > { %6166 = vmatpush1.bf16.msra.mxu1 %v13927_v24 }
 0x5a1   : > { %6168 = vmatprep.subr.bf16.mxu1 %v13673_v40  ;;  %v13933_v40 = vld [vmem:[#allocation48_spill] sm:$0xff] }
 0x5a2   : > { %5770 = vmatpush1.bf16.msra.mxu0 %v13928_v63  ;;  %v13980_v63 = vld [vmem:[#allocation12_spill] sm:$0xff] }
 0x5a3   : > { %5772 = vmatprep.subr.bf16.mxu0 %v13929_v53  ;;  %5091 = vmatmul.mubr.f32.vlgmr.msra.gmra.mrb[0].mxu1 %v13930_v1 }
 0x5a4   : > { %6170 = vmatpush1.bf16.msra.mxu1 %v13677_v47  ;;  %5226 = vmatprep.mubr.f32.mxu1 %v13758_v11  ;;  %v13935_v47 = vld [vmem:[#allocation187_spill] sm:$0xff]  ;;  %v13958_v11 = vld [vmem:[#allocation88_spill] sm:$0xff] }
 0x5a5   : > { %6172 = vmatprep.subr.bf16.mxu1 %v13680_v56  ;;  %v13936_v56 = vld [vmem:[#allocation127_spill] sm:$0xff] }
 0x5a6   : > { %5774 = vmatpush1.bf16.msra.mxu0 %v13931_v35 }
 0x5a7   : > { %5776 = vmatprep.subr.bf16.mxu0 %v13932_v39  ;;  %v13982_v39 = vld [vmem:[#allocation11_spill] sm:$0xff] }
 0x5a8   : > { %6174 = vmatpush1.bf16.msra.mxu1 %v13683_v13  ;;  %v13937_v13 = vld [vmem:[#allocation92_spill] sm:$0xff] }
 0x5a9   : > { %6176 = vmatprep.subr.bf16.mxu1 %v13684_v17  ;;  %v13938_v17 = vld [vmem:[#allocation101_spill] sm:$0xff] }
 0x5aa   : > { %5778 = vmatpush1.bf16.msra.mxu0 %v13933_v40 }
 0x5ab   : > { %5780 = vmatprep.subr.bf16.mxu0 %v13934_v32  ;;  %v13983_v32 = vsub.s32 6, %v13978_v43 }
 0x5ac   : > { %6178 = vmatpush1.bf16.msra.mxu1 %v13687_v33  ;;  %v13939_v33 = vld [vmem:[#allocation165_spill] sm:$0xff] }
 0x5ad   : > { %6180 = vmatprep.subr.bf16.mxu1 %v13688_v36  ;;  %v13940_v36 = vld [vmem:[#allocation168_spill] sm:$0xff] }
 0x5ae   : > { %5782 = vmatpush1.bf16.msra.mxu0 %v13935_v47 }
 0x5af   : > { %5784 = vmatprep.subr.bf16.mxu0 %v13690_v14  ;;  %v13941_v14 = vld [vmem:[#allocation96_spill] sm:$0xff] }
 0x5b0   : > { %6182 = vmatpush1.bf16.msra.mxu1 %v13691_v60  ;;  %v13942_v60 = vld [vmem:[#allocation132_spill] sm:$0xff] }
 0x5b1   : > { %2861 = vmatmul.mubr.f32.vlgmr.msra.gmra.mrb[0].mxu0 %v13936_v56  ;;  %6184 = vmatprep.subr.bf16.mxu1 %v13693_v18  ;;  %v13943_v18 = vld [vmem:[#allocation171_spill] sm:$0xff] }
 0x5b2   : > { %5786 = vmatpush1.bf16.msra.mxu0 %v13694_v0  ;;  %2996 = vmatprep.mubr.f32.mxu0 %v13801_v61  ;;  %v13944_v0 = vld [vmem:[#allocation75_spill] sm:$0xff]  ;;  %v13959_v61 = vld [vmem:[#allocation185_spill] sm:$0xff] }
 0x5b3   : > { %5788 = vmatprep.subr.bf16.mxu0 %v13697_v34  ;;  %v13945_v34 = vld [vmem:[#allocation102_spill] sm:$0xff] }
 0x5b4   : > { %6186 = vmatpush1.bf16.msra.mxu1 %v13698_v62  ;;  %v13946_v62 = vld [vmem:[#allocation17_spill] sm:$0xff] }
 0x5b5   : > { %6188 = vmatprep.subr.bf16.mxu1 %v13699_v3  ;;  %v13947_v3 = vld [vmem:[#allocation59_spill] sm:$0xff] }
 0x5b6   : > { %5790 = vmatpush1.bf16.msra.mxu0 %v13700_v19  ;;  %v13948_v19 = vld [vmem:[#allocation175_spill] sm:$0xff] }
 0x5b7   : > { %5792 = vmatprep.subr.bf16.mxu0 %v13701_v50  ;;  %v13949_v50 = vld [vmem:[#allocation135_spill] sm:$0xff] }
 0x5b8   : > { %6190 = vmatpush1.bf16.msra.mxu1 %v13702_v44  ;;  %v13950_v44 = vld [vmem:[#allocation16_spill] sm:$0xff] }
 0x5b9   : > { %6192 = vmatprep.subr.bf16.mxu1 %v13703_v57  ;;  %v13951_v57 = vld [vmem:[#allocation178_spill] sm:$0xff] }
 0x5ba   : > { %5794 = vmatpush1.bf16.msra.mxu0 %v13704_v9  ;;  %v13952_v9 = vld [vmem:[#allocation131_spill] sm:$0xff] }
 0x5bb   : > { %5796 = vmatprep.subr.bf16.mxu0 %v13705_v20  ;;  %v13953_v20 = vld [vmem:[#allocation44_spill] sm:$0xff] }
 0x5bc   : > { %6194 = vmatpush1.bf16.msra.mxu1 %v13706_v49  ;;  %v13954_v49 = vld [vmem:[#allocation61_spill] sm:$0xff] }
 0x5bd   : > { %6196 = vmatprep.subr.bf16.mxu1 %v13707_v5  ;;  %v13955_v5 = vld [vmem:[#allocation126_spill] sm:$0xff] }
 0x5be   : > { %5798 = vmatpush1.bf16.msra.mxu0 %v13708_v54  ;;  %v13956_v54 = vld [vmem:[#allocation182_spill] sm:$0xff] }
 0x5bf   : > { %5800 = vmatprep.subr.bf16.mxu0 %v13709_v25  ;;  %v13957_v25 = vld [vmem:[#allocation46_spill] sm:$0xff] }
 0x5c0   : > { %6198 = vmatpush1.bf16.msra.mxu1 %v13937_v13 }
 0x5c1   : > { %6200 = vmatprep.subr.bf16.mxu1 %v13938_v17  ;;  %v13985_v17 = vsub.s32 7, %v13978_v43 }
 0x5c2   : > { %5802 = vmatpush1.bf16.msra.mxu0 %v13939_v33 }
 0x5c3   : > { %5804 = vmatprep.subr.bf16.mxu0 %v13940_v36 }
 0x5c4   : > { %6202 = vmatpush1.bf16.msra.mxu1 %v13941_v14 }
 0x5c5   : > { %6204 = vmatprep.subr.bf16.mxu1 %v13942_v60 }
 0x5c6   : > { %5806 = vmatpush1.bf16.msra.mxu0 %v13943_v18 }
 0x5c7   : > { %5808 = vmatprep.subr.bf16.mxu0 %v13944_v0 }
 0x5c8   : > { %6206 = vmatpush1.bf16.msra.mxu1 %v13945_v34 }
 0x5c9   : > { %6208 = vmatprep.subr.bf16.mxu1 %v13946_v62 }
 0x5ca   : > { %5810 = vmatpush1.bf16.msra.mxu0 %v13947_v3 }
 0x5cb   : > { %5812 = vmatprep.subr.bf16.mxu0 %v13948_v19 }
 0x5cc   : > { %6210 = vmatpush1.bf16.msra.mxu1 %v13949_v50 }
 0x5cd   : > { %6212 = vmatprep.subr.bf16.mxu1 %v13950_v44 }
 0x5ce   : > { %5814 = vmatpush1.bf16.msra.mxu0 %v13951_v57 }
 0x5cf   : > { %5816 = vmatprep.subr.bf16.mxu0 %v13952_v9 }
 0x5d0   : > { %6214 = vmatpush1.bf16.msra.mxu1 %v13953_v20 }
 0x5d1   : > { %6216 = vmatprep.subr.bf16.mxu1 %v13954_v49 }
 0x5d2   : > { %5818 = vmatpush1.bf16.msra.mxu0 %v13955_v5 }
 0x5d3   : > { %5820 = vmatprep.subr.bf16.mxu0 %v13956_v54 }
 0x5d4   : > { %6218 = vmatpush1.bf16.msra.mxu1 %v13957_v25 }
 0x5d5   : > { %6220 = vmatprep.subr.bf16.mxu1 %v13958_v11 }
 0x5d6   : > { %5822 = vmatpush1.bf16.msra.mxu0 %v13959_v61 }
 0x5d7   : > { %5824 = vmatprep.subr.bf16.mxu0 %v13960_v58 }
 0x5d8   : > { %6222 = vmatpush1.bf16.msra.mxu1 %v13961_v26 }
 0x5d9   : > { %6224 = vmatprep.subr.bf16.mxu1 %v13962_v4 }
 0x5da   : > { %5826 = vmatpush1.bf16.msra.mxu0 %v13963_v21 }
 0x5db   : > { %5828 = vmatprep.subr.bf16.mxu0 %v13964_v10 }
 0x5dc   : > { %6226 = vmatpush1.bf16.msra.mxu1 %v13965_v6 }
 0x5dd   : > { %6228 = vmatprep.subr.bf16.mxu1 %v13966_v51 }
 0x5de   : > { %5830 = vmatpush1.bf16.msra.mxu0 %v13967_v41  ;;  %v6672_v41 = vld [vmem:[%s6877_s12] sm:$0xff]  ;;  %s6758_s12 = smov [#allocation5]  }
 0x5df   : > { %5832 = vmatprep.subr.bf16.mxu0 %v13968_v42  ;;  %s6677_s20 = sshll.u32 %s6758_s12, 4  ;;  %s6678_s20 = int_to_ptr.vmem [resolvable:$false] %s6677_s20 }
 0x5e0   : > { %6230 = vmatpush1.bf16.msra.mxu1 %v13969_v15  ;;  %v13986_v15 = vld [vmem:[#allocation8_spill] sm:$0xff]  ;;  %s6679_s21 = scalar_lea.vmem %s6678_s20, 256  ;;  %p6680_p1 = scmp.lt.s32.totalorder %s11567_s15, %s6678_s20 }
 0x5e1   : > { %p6681_p2 = scmp.lt.s32.totalorder %s6679_s21, %s6673_s27 }
 0x5e2   : > { %5834 = vmatpush1.bf16.msra.mxu0 %v13970_v31 }
 0x5e3   : > { %5836 = vmatprep.subr.bf16.mxu0 %v13971_v45  ;;  %5228 = vmatmul.mubr.f32.vlgmr.msra.gmra.mrb[0].mxu1 %v13930_v1  ;;  %v13981_v1 = vsub.s32 4, %v13978_v43  ;;  %p6682_p3 = por %p6681_p2, %p6680_p1 }
 0x5e5   : > { %p6683_p5 = pnand %p6682_p3, %p6676_p0 }
 0x5e6   : > { %5838 = vmatpush1.bf16.msra.mxu0 %v13972_v8 }
 0x5e7   : > { %5840 = vmatprep.subr.bf16.mxu0 %v13973_v29  ;;  %v5246_v52 = vpop.permute.xlu0 %5245 }
 0x5e8   : > { %v5271_v28 = vpop.permute.xlu1 %5270 }
 0x5ea   : > { %5842 = vmatpush1.bf16.msra.mxu0 %v13974_v7 }
 0x5eb   : > { %5844 = vmatprep.subr.bf16.mxu0 %v13975_v30 }
 0x5ee   : > { %5846 = vmatpush1.bf16.msra.mxu0 %v13976_v23 }
 0x5f1   : > { %2998 = vmatmul.mubr.f32.vlgmr.msra.gmra.mrb[0].mxu0 %v13936_v56  ;;  %v13984_v56 = vld [vmem:[#allocation15_spill] sm:$0xff] }
 0x5f4   : > { %v5323_v20 = vpop.permute.xlu0 %5322 }
 0x5f6   : > { %v5297_v0 = vpop.permute.xlu1 %5296 }
 0x5fb   : > { %v5350_v4 = vpop.permute.xlu1 %5349 }
 0x6b6   : > { %v5229_v48 = vpop.f32.mrb[0].mxu1 }
 0x6b7   : > { %v5231_v27 = vpop.f32.mrb[1].mxu1 }
 0x6b8   : > { %v5236_v37 = vcombine.low %v5229_v48, %v5231_v27 }
 0x6ba   : > { %v5237_v38 = vrot.slane %v5236_v37, 6 }
 0x6bc   : > { %5239 = vst [vmem:[#allocation4] sm:$0xcc] %v5237_v38 }
 0x6c4   : > { %v2999_v59 = vpop.f32.mrb[0].mxu0 }
 0x6c5   : > { %v3001_v2 = vpop.f32.mrb[1].mxu0 }
 0x6c6   : > { %v3006_v46 = vcombine.low %v2999_v59, %v3001_v2 }
 0x6c8   : > { %3008 = vst [vmem:[#allocation4] sm:$0x33] %v3006_v46 }
 0x6cf   : > { %v5242_v12 = vld [vmem:[#allocation4] sm:$0xff] }
 0x6d0   : > { %v5276_v16 = vrot.slane %v5242_v12, %v13977_v22  ;;  %v5280_v24 = vrot.slane %v5242_v12, %v13979_v55  ;;  %v5252_v53 = vrot.slane %v5242_v12, %v13980_v63  ;;  %v5256_v35 = vrot.slane %v5242_v12, %v13981_v1 }
 0x6d1   : > { %v5302_v40 = vrot.slane %v5242_v12, %v13982_v39  ;;  %v5306_v47 = vrot.slane %v5242_v12, %v13983_v32  ;;  %v5328_v13 = vrot.slane %v5242_v12, %v13984_v56  ;;  %v5332_v33 = vrot.slane %v5242_v12, %v13985_v17 }
 0x6d2   : > { %v5286_v36 = vrot.slane %v5276_v16, %v13977_v22  ;;  %v5290_v14 = vrot.slane %v5280_v24, %v13977_v22  ;;  %v5262_v60 = vrot.slane %v5252_v53, %v13980_v63  ;;  %v5266_v18 = vrot.slane %v5256_v35, %v13980_v63 }
 0x6d3   : > { %v5312_v34 = vrot.slane %v5302_v40, %v13982_v39  ;;  %v5316_v62 = vrot.slane %v5306_v47, %v13982_v39  ;;  %v5338_v3 = vrot.slane %v5328_v13, %v13984_v56  ;;  %v5342_v19 = vrot.slane %v5332_v33, %v13984_v56 }
 0x6d4   : > { %v5291_v50 = vmul.f32 %v5286_v36, %v5271_v28  ;;  %v5292_v44 = vmul.f32 %v5290_v14, %v5271_v28  ;;  %v5267_v57 = vmul.f32 %v5262_v60, %v5246_v52  ;;  %v5268_v9 = vmul.f32 %v5266_v18, %v5246_v52 }
 0x6d5   : > { %v5317_v54 = vmul.f32 %v5312_v34, %v5297_v0  ;;  %v5318_v25 = vmul.f32 %v5316_v62, %v5297_v0  ;;  %v5343_v58 = vmul.f32 %v5338_v3, %v5323_v20  ;;  %v5344_v26 = vmul.f32 %v5342_v19, %v5323_v20 }
 0x6d6   : > { %v5293_v49 = vadd.f32 %v5291_v50, %v5267_v57  ;;  %v5294_v5 = vadd.f32 %v5292_v44, %v5268_v9 }
 0x6d8   : > { %v5319_v11 = vadd.f32 %v5317_v54, %v5293_v49  ;;  %v5320_v61 = vadd.f32 %v5318_v25, %v5294_v5 }
 0x6da   : > { %v5345_v21 = vadd.f32 %v5343_v58, %v5319_v11  ;;  %v5346_v10 = vadd.f32 %v5344_v26, %v5320_v61 }
 0x6dc   : > { %v5352_v6 = vadd.f32 %v5350_v4, %v5345_v21  ;;  %v5353_v51 = vadd.f32 %v5350_v4, %v5346_v10 }
 0x6de   : > { %v5354_v42 = vadd.f32 %v6672_v41, %v5352_v6  ;;  %v5355_v31 = vadd.f32 %v5353_v51, %v13986_v15 }
 0x6e0   : > { %v5358_v45 = vcombine.low %v5354_v42, %v5355_v31 }
 0x6e2   : > { %5360 = vst [vmem:[%s285_s10] sm:$0xff] %v5358_v45 }
 0x6e3   : > { %6686 = shalt.err (!%p6683_p5)
}
 0x6e4   : > { %s6687_s22 = scalar_lea.hbm %s11565_s18, 128  ;;  %s6691_s8 = scalar_lea.hbm %s11619_s7, 256 }
 0x6e5   : > { %p6688_p6 = scmp.ne.s32.totalorder %s11565_s18, %s6687_s22  ;;  %p6692_p10 = scmp.lt.u32.totalorder %s11565_s18, %s11619_s7 }
 0x6e6   : > { %p6693_p11 = scmp.lt.u32.totalorder %s6691_s8, %s6687_s22  ;;  %p6695_p13 = scmp.lt.u32.totalorder %s6687_s22, %s11565_s18 }
 0x6e7   : > { %p6689_p7 = pnand %p6688_p6, %p6839_p4 }
 0x6e8   : > { %p6694_p12 = por %p6693_p11, %p6692_p10 }
 0x6e9   : > { %p6690_p9 = pneg %p6689_p7 }
 0x6ea   : > { %p6696_p0 = por %p6695_p13, %p6694_p12 }
 0x6ec   : > { %p6697_p1 = pnand %p6696_p0, %p6690_p9 }
 0x6ee   : > { %6700 = shalt.err (!%p6697_p1)
}
 0x6ef   : > { %6251 = dma.vmem_to_hbm [thread:$0]  (%p6839_p4), %s11567_s15, 128, %s11565_s18, %s5362_s19  }
 0x6f0 PF: > { %p6257_p2 = scmp.ge.s32.totalorder %s6751_s29, 2  ;;  %s5390_s17 = sand.u32 1, %s6731_s24  }
 0x6f1   : > { %s5391_s27 = scalar_lea.sflag [#allocation6], %s5390_s17 }
 0x6f2   : > { %p6254_p3 = pnand %p6257_p2, %p6846_p8 }
 0x6f4   : > { %6726 = dma.done.wait (!%p6254_p3), %s5391_s27, 128  }
 0x6f5   : > { %6728 = vsyncadd (!%p6254_p3), %s5391_s27, 4294967168  ;;  %s20_s29 = sadd.s32 1, %s6751_s29   ;;  %s13987_s24 = smov %s6735_s25 }
 0x6f6   : > { %p17_p5 = scmp.ge.s32.totalorder %s20_s29, 4   ;;  %s13988_s25 = smov %s6739_s26 }
 0x6f7   : > { %s13989_s26 = smov %s6852_s14  ;;  %s13990_s27 = smov %s6747_s28 }
 0x6f8   : > { %s13991_s28 = smov %s13993_s9  ;;  %19 = sbr.rel (!%p17_p5) target bundleno = 4 (0x4), region = 83 }
 0x6ff   :  { %5396 = vsyncpa [#allocation6], 1 }
 0x700   :  { %5398 = vsyncpa [#allocation6 + $0x1], 1 }

</bundles_post_ra>
